<compile_context>
chip_gen: v7x
topology: tpu7x:2x2x1
jax: 0.10.0
libtpu: 0.0.40
codegen_flags: <defaults>
</compile_context>

<pallas_src>
import jax
import jax.numpy as jnp
from jax import lax
from jax.experimental import pallas as pl
from jax.experimental.pallas import tpu as pltpu

EPS = 1e-5

# MXU operand dtype. jnp.bfloat16 ~doubles MXU throughput and halves VMEM/vreg
# footprint on v6e/v7x; kept float32 here because at these shapes the kernel is
# dispatch/HBM-bound (MXU time is negligible) and f32 keeps the kernel tight
# against the float32 reference checked in __main__.
MXU_DTYPE = jnp.float32

# lecun-variant architecture constants (match the PyTorch module)
K1, C1 = 21, 6      # conv1: Conv1d(1, 6, kernel=21, stride=21)
K2, C2 = 11, 16     # conv2: Conv1d(6, 16, kernel=11, stride=11)
K3, C3 = 11, 256    # conv3: Conv1d(16, 256, kernel=11, stride=11)
D1, D2 = 120, 84    # dense1 / dense2 widths


# --------------------------------------------------------------------------
# fused forward (one pallas_call)
# --------------------------------------------------------------------------
def _cnn_forward(x, p):
    N, _, L = x.shape
    L1 = (L - K1) // K1 + 1            # conv1 output length
    assert L1 % 2 == 0, "pipeline assumes an even conv1 output length"
    H1 = L1 // 2                       # even/odd half length
    P1 = H1 + 1                        # maxpool(k=2,s=2,pad=1) output length
    L2 = (P1 - K2) // K2 + 1           # conv2 output length
    assert L2 % 2 == 0, "pipeline assumes an even conv2 output length"
    H2 = L2 // 2
    P2 = H2 + 1                        # second pool output length
    assert P2 == K3, "lecun variant needs conv3 spatial length 1 (pick L accordingly)"
    nb = p["Wd3"].shape[1]

    # ---- input prep (pure layout work, single XLA op chain on the raw input):
    #      block im2col for the stride==kernel conv1 + even/odd output split,
    #      transposed so the long batch*spatial axis is the lane dimension. ----
    xr = x[:, 0, : L1 * K1].reshape(N, L1, K1)                     # (N, L1, 21)
    xe = jnp.transpose(xr[:, 0::2, :], (2, 0, 1)).reshape(K1, N * H1)
    xo = jnp.transpose(xr[:, 1::2, :], (2, 0, 1)).reshape(K1, N * H1)

    def kernel(xte_ref, xto_ref, w1_ref, b1_ref, g1_ref, be1_ref,
               w2_ref, b2_ref, g2_ref, be2_ref,
               w3_ref, b3_ref, g3_ref, be3_ref,
               wd1_ref, bd1_ref, wd2_ref, bd2_ref, wd3_ref, bd3_ref,
               o_ref, pool1_scr, pool2_scr, p3_scr):
        f32 = jnp.float32

        # ===== conv1 (even / odd output positions) + one-pass BN1 =====
        # layout: channels (6) on sublanes, batch*spatial (N*H1) on lanes.
        w1 = w1_ref[...]
        y1e = jnp.dot(w1, xte_ref[...].astype(MXU_DTYPE),
                      preferred_element_type=f32) + b1_ref[...]
        y1o = jnp.dot(w1, xto_ref[...].astype(MXU_DTYPE),
                      preferred_element_type=f32) + b1_ref[...]
        cnt1 = float(N * L1)
        s1 = jnp.sum(y1e, axis=1, keepdims=True) + jnp.sum(y1o, axis=1, keepdims=True)
        ss1 = (jnp.sum(y1e * y1e, axis=1, keepdims=True)
               + jnp.sum(y1o * y1o, axis=1, keepdims=True))
        mean1 = s1 / cnt1
        var1 = ss1 / cnt1 - mean1 * mean1
        scale1 = lax.rsqrt(var1 + EPS) * g1_ref[...]
        shift1 = be1_ref[...] - mean1 * scale1
        y1e = y1e * scale1 + shift1
        y1o = y1o * scale1 + shift1

        # ===== iota-built permutation for conv2 im2col =====
        # S[j, k*L2 + t] = 1  iff  j == K2*t + k  (stride-K2 lane deinterleave)
        jf = lax.broadcasted_iota(jnp.int32, (P1, K2 * L2), 0).astype(f32)
        cf = lax.broadcasted_iota(jnp.int32, (P1, K2 * L2), 1).astype(f32)
        tf = jnp.floor((jf + 0.5) * (1.0 / K2))      # j // K2 (exact for j < 2^23)
        kf = jf - K2 * tf                            # j %  K2
        S = jnp.where((cf == kf * L2 + tf) & (tf < L2), 1.0, 0.0).astype(f32)

        # ===== per sample: maxpool(2,2,pad=1) + ReLU + conv2 =====
        w2 = w2_ref[...]
        b2 = b2_ref[...]
        y2_list = []
        for n in range(N):
            ev = y1e[:, n * H1:(n + 1) * H1]         # conv1 outputs at even t
            od = y1o[:, n * H1:(n + 1) * H1]         # conv1 outputs at odd  t
            # pool: out[0]=ev[0]; out[j]=max(od[j-1], ev[j]); out[P1-1]=od[H1-1]
            pool1_scr[:, 0:1] = ev[:, 0:1]
            pool1_scr[:, 1:H1] = jnp.maximum(od[:, 0:H1 - 1], ev[:, 1:H1])
            pool1_scr[:, H1:P1] = od[:, H1 - 1:H1]
            z1 = jnp.maximum(pool1_scr[...], 0.0)    # ReLU, (6, P1)
            # stride-K2 deinterleave on the (idle) MXU, then conv2 as K2 small
            # (16,6)x(6,L2) matmuls accumulated in f32.
            zp = jnp.dot(z1, S, preferred_element_type=f32)       # (6, K2*L2)
            acc = b2
            for k in range(K2):
                acc = acc + jnp.dot(
                    w2[:, C1 * k:C1 * (k + 1)],
                    zp[:, L2 * k:L2 * (k + 1)].astype(MXU_DTYPE),
                    preferred_element_type=f32)
            y2_list.append(acc)                      # (16, L2)

        # ===== one-pass BN2 over batch and spatial =====
        cnt2 = float(N * L2)
        s2 = jnp.sum(y2_list[0], axis=1, keepdims=True)
        ss2 = jnp.sum(y2_list[0] * y2_list[0], axis=1, keepdims=True)
        for y2 in y2_list[1:]:
            s2 = s2 + jnp.sum(y2, axis=1, keepdims=True)
            ss2 = ss2 + jnp.sum(y2 * y2, axis=1, keepdims=True)
        mean2 = s2 / cnt2
        var2 = ss2 / cnt2 - mean2 * mean2
        scale2 = lax.rsqrt(var2 + EPS) * g2_ref[...]
        shift2 = be2_ref[...] - mean2 * scale2

        # ===== per sample: maxpool(2,2,pad=1) + ReLU + conv3 patch assembly =====
        for n in range(N):
            v = y2_list[n] * scale2 + shift2         # BN2-normalized, (16, L2)
            pool2_scr[:, 0:1] = v[:, 0:1]
            for j in range(1, H2):
                pool2_scr[:, j:j + 1] = jnp.maximum(v[:, 2 * j - 1:2 * j],
                                                    v[:, 2 * j:2 * j + 1])
            pool2_scr[:, H2:P2] = v[:, L2 - 1:L2]
            z2 = jnp.maximum(pool2_scr[...], 0.0)    # ReLU, (16, P2=K3)
            # conv3 patch row for this sample, lanes ordered ci*K3 + k
            for ci in range(C2):
                p3_scr[n:n + 1, K3 * ci:K3 * (ci + 1)] = z2[ci:ci + 1, :]

        # ===== conv3 (single output position) + BN3 + ReLU, all samples =====
        y3 = jnp.dot(p3_scr[...].astype(MXU_DTYPE), w3_ref[...],
                     preferred_element_type=f32) + b3_ref[...]     # (N, 256)
        mean3 = jnp.sum(y3, axis=0, keepdims=True) / float(N)
        var3 = jnp.sum(y3 * y3, axis=0, keepdims=True) / float(N) - mean3 * mean3
        y3 = jnp.maximum((y3 - mean3) * lax.rsqrt(var3 + EPS) * g3_ref[...]
                         + be3_ref[...], 0.0)

        # ===== dense head + softmax =====
        h = jnp.dot(y3.astype(MXU_DTYPE), wd1_ref[...],
                    preferred_element_type=f32) + bd1_ref[...]
        h = jnp.maximum(h, 0.0)
        h = jnp.dot(h.astype(MXU_DTYPE), wd2_ref[...],
                    preferred_element_type=f32) + bd2_ref[...]
        logits = jnp.dot(h.astype(MXU_DTYPE), wd3_ref[...],
                         preferred_element_type=f32) + bd3_ref[...]
        m = jnp.max(logits, axis=1, keepdims=True)
        ex = jnp.exp(logits - m)
        denom = jnp.sum(ex, axis=1, keepdims=True)
        # EUP reciprocal instead of a vector divide (approx=False keeps the
        # softmax normalization exact; approx=True would also be fine here).
        o_ref[...] = ex * pl.reciprocal(denom, approx=False)

    vmem_spec = lambda: pl.BlockSpec(memory_space=pltpu.MemorySpace.VMEM)
    out = pl.pallas_call(
        kernel,
        out_shape=jax.ShapeDtypeStruct((N, nb), jnp.float32),
        in_specs=[vmem_spec() for _ in range(20)],
        out_specs=vmem_spec(),
        scratch_shapes=[
            pltpu.VMEM((C1, P1), jnp.float32),       # pool1 assembly
            pltpu.VMEM((C2, P2), jnp.float32),       # pool2 assembly
            pltpu.VMEM((N, C2 * K3), jnp.float32),   # conv3 im2col patches
        ],
        compiler_params=pltpu.CompilerParams(vmem_limit_bytes=32 * 1024 * 1024),
    )(xe, xo,
      p["W1"], p["b1"], p["g1"], p["be1"],
      p["W2"], p["b2"], p["g2"], p["be2"],
      p["W3"], p["b3"], p["g3"], p["be3"],
      p["Wd1"], p["bd1"], p["Wd2"], p["bd2"], p["Wd3"], p["bd3"])
    return out


cnn_forward = jax.jit(_cnn_forward)


# --------------------------------------------------------------------------
# parameters (PyTorch layout) + packing into the kernel layout
# --------------------------------------------------------------------------
def make_params(key, nb_classes):
    def w_init(k, shape, fan_in):            # kaiming_uniform-style
        bound = (6.0 / fan_in) ** 0.5
        return jax.random.uniform(k, shape, jnp.float32, -bound, bound)

    def b_init(k, shape, fan_in):            # PyTorch conv default bias init
        bound = 1.0 / fan_in ** 0.5
        return jax.random.uniform(k, shape, jnp.float32, -bound, bound)

    ks = jax.random.split(key, 12)
    return {
        "W1": w_init(ks[0], (C1, 1, K1), K1), "b1": b_init(ks[1], (C1,), K1),
        "g1": jnp.ones((C1,), jnp.float32), "be1": jnp.zeros((C1,), jnp.float32),
        "W2": w_init(ks[2], (C2, C1, K2), C1 * K2), "b2": b_init(ks[3], (C2,), C1 * K2),
        "g2": jnp.ones((C2,), jnp.float32), "be2": jnp.zeros((C2,), jnp.float32),
        "W3": w_init(ks[4], (C3, C2, K3), C2 * K3), "b3": b_init(ks[5], (C3,), C2 * K3),
        "g3": jnp.ones((C3,), jnp.float32), "be3": jnp.zeros((C3,), jnp.float32),
        "Wd1": w_init(ks[6], (D1, C3), C3), "bd1": jnp.zeros((D1,), jnp.float32),
        "Wd2": w_init(ks[7], (D2, D1), D1), "bd2": jnp.zeros((D2,), jnp.float32),
        "Wd3": w_init(ks[8], (nb_classes, D2), D2),
        "bd3": jnp.zeros((nb_classes,), jnp.float32),
    }


def pack_params(tp):
    """Rearrange PyTorch-layout params into the layouts the fused kernel uses."""
    f32 = jnp.float32
    return {
        "W1": tp["W1"].reshape(C1, K1).astype(MXU_DTYPE),
        "b1": tp["b1"].reshape(C1, 1).astype(f32),
        "g1": tp["g1"].reshape(C1, 1).astype(f32),
        "be1": tp["be1"].reshape(C1, 1).astype(f32),
        # conv2 weight flattened tap-major: column k*C1 + ci  <->  W2[:, ci, k]
        "W2": jnp.transpose(tp["W2"], (0, 2, 1)).reshape(C2, K2 * C1).astype(MXU_DTYPE),
        "b2": tp["b2"].reshape(C2, 1).astype(f32),
        "g2": tp["g2"].reshape(C2, 1).astype(f32),
        "be2": tp["be2"].reshape(C2, 1).astype(f32),
        # conv3 weight as (Cin*K, Cout): row ci*K3 + k  <->  W3[o, ci, k]
        "W3": tp["W3"].reshape(C3, C2 * K3).T.astype(MXU_DTYPE),
        "b3": tp["b3"].reshape(1, C3).astype(f32),
        "g3": tp["g3"].reshape(1, C3).astype(f32),
        "be3": tp["be3"].reshape(1, C3).astype(f32),
        "Wd1": tp["Wd1"].T.astype(MXU_DTYPE), "bd1": tp["bd1"].reshape(1, D1).astype(f32),
        "Wd2": tp["Wd2"].T.astype(MXU_DTYPE), "bd2": tp["bd2"].reshape(1, D2).astype(f32),
        "Wd3": tp["Wd3"].T.astype(MXU_DTYPE), "bd3": tp["bd3"].reshape(1, -1).astype(f32),
    }


# --------------------------------------------------------------------------
# pure-JAX reference (mirrors the PyTorch forward) for the in-script check
# --------------------------------------------------------------------------
def _bn_train(y, gamma, beta):
    axes = (0, 2) if y.ndim == 3 else (0,)
    m = jnp.mean(y, axis=axes, keepdims=True)
    v = jnp.mean((y - m) ** 2, axis=axes, keepdims=True)
    g = gamma.reshape((1, -1) + (1,) * (y.ndim - 2))
    b = beta.reshape((1, -1) + (1,) * (y.ndim - 2))
    return (y - m) * lax.rsqrt(v + EPS) * g + b


def _maxpool_relu(y):
    yp = jnp.pad(y, ((0, 0), (0, 0), (1, 1)), constant_values=-jnp.inf)
    return jnp.maximum(jnp.maximum(yp[:, :, 0::2], yp[:, :, 1::2]), 0.0)


def cnn_reference(x, tp):
    hi = lax.Precision.HIGHEST
    N, _, L = x.shape
    L1 = (L - K1) // K1 + 1
    xr = x[:, 0, : L1 * K1].reshape(N, L1, K1)
    y = jnp.einsum("ntk,ck->nct", xr, tp["W1"][:, 0, :], precision=hi) + tp["b1"][None, :, None]
    y = _maxpool_relu(_bn_train(y, tp["g1"], tp["be1"]))
    L2 = (y.shape[2] - K2) // K2 + 1
    zr = y[:, :, : L2 * K2].reshape(N, C1, L2, K2)
    y = jnp.einsum("nctk,ock->not", zr, tp["W2"], precision=hi) + tp["b2"][None, :, None]
    y = _maxpool_relu(_bn_train(y, tp["g2"], tp["be2"]))
    y = jnp.einsum("nck,ock->no", y, tp["W3"], precision=hi) + tp["b3"][None, :]
    y = jnp.maximum(_bn_train(y, tp["g3"], tp["be3"]), 0.0)
    h = jnp.maximum(y @ tp["Wd1"].T + tp["bd1"][None, :], 0.0)
    h = h @ tp["Wd2"].T + tp["bd2"][None, :]
    logits = h @ tp["Wd3"].T + tp["bd3"][None, :]
    return jax.nn.softmax(logits, axis=1)


# --------------------------------------------------------------------------
if __name__ == "__main__":
    nb_classes = 5
    N = 4
    # Smallest L for which the lecun pipeline reaches spatial length 1 before
    # the squeeze (conv3 needs 11 positions after the second pool).
    L = 9198

    key = jax.random.PRNGKey(0)
    kx, kp = jax.random.split(key)
    x = jax.random.normal(kx, (N, 1, L), jnp.float32)
    torch_params = make_params(kp, nb_classes)
    kernel_params = pack_params(torch_params)

    out = cnn_forward(x, kernel_params)
    out = jax.block_until_ready(out)

    assert out.shape == (N, nb_classes)
    assert bool(jnp.all(jnp.isfinite(out)))
    assert bool(jnp.allclose(jnp.sum(out, axis=1), 1.0, atol=1e-4))

    ref = jax.jit(cnn_reference)(x, torch_params)
    ref = jax.block_until_ready(ref)
    assert bool(jnp.allclose(out, ref, atol=2e-2)), \
        f"kernel/reference mismatch, max|diff|={float(jnp.max(jnp.abs(out - ref)))}"

    print("KERNEL_OK")
</pallas_src>

<mosaic_0001>
module attributes {stable_mosaic.version = 11 : i64} {
  func.func @kernel(%arg0: memref<21x876xf32, #tpu.memory_space<vmem>>, %arg1: memref<21x876xf32, #tpu.memory_space<vmem>>, %arg2: memref<6x21xf32, #tpu.memory_space<vmem>>, %arg3: memref<6x1xf32, #tpu.memory_space<vmem>>, %arg4: memref<6x1xf32, #tpu.memory_space<vmem>>, %arg5: memref<6x1xf32, #tpu.memory_space<vmem>>, %arg6: memref<16x66xf32, #tpu.memory_space<vmem>>, %arg7: memref<16x1xf32, #tpu.memory_space<vmem>>, %arg8: memref<16x1xf32, #tpu.memory_space<vmem>>, %arg9: memref<16x1xf32, #tpu.memory_space<vmem>>, %arg10: memref<176x256xf32, #tpu.memory_space<vmem>>, %arg11: memref<1x256xf32, #tpu.memory_space<vmem>>, %arg12: memref<1x256xf32, #tpu.memory_space<vmem>>, %arg13: memref<1x256xf32, #tpu.memory_space<vmem>>, %arg14: memref<256x120xf32, #tpu.memory_space<vmem>>, %arg15: memref<1x120xf32, #tpu.memory_space<vmem>>, %arg16: memref<120x84xf32, #tpu.memory_space<vmem>>, %arg17: memref<1x84xf32, #tpu.memory_space<vmem>>, %arg18: memref<84x5xf32, #tpu.memory_space<vmem>>, %arg19: memref<1x5xf32, #tpu.memory_space<vmem>>, %arg20: memref<4x5xf32, #tpu.memory_space<vmem>>, %arg21: memref<6x220xf32, #tpu.memory_space<vmem>>, %arg22: memref<16x11xf32, #tpu.memory_space<vmem>>, %arg23: memref<4x176xf32, #tpu.memory_space<vmem>>) attributes {dimension_semantics = [], scalar_prefetch = 0 : i64, scratch_operands = 3 : i64, tpu.core_type = #tpu.core_type<tc>} {
    %c0 = arith.constant 0 : index
    %c0_0 = arith.constant 0 : index
    %0 = vector.load %arg2[%c0, %c0_0] : memref<6x21xf32, #tpu.memory_space<vmem>>, vector<6x21xf32>
    %c0_1 = arith.constant 0 : index
    %c0_2 = arith.constant 0 : index
    %1 = vector.load %arg0[%c0_1, %c0_2] : memref<21x876xf32, #tpu.memory_space<vmem>>, vector<21x876xf32>
    %cst = arith.constant dense<0.000000e+00> : vector<6x876xf32>
    %2 = tpu.matmul %0, %1, %cst {dimension_numbers = #tpu.dot_dimension_numbers<[1], [0], [0], [1], [0, 0, 1, 1], [], []>} : vector<6x21xf32>, vector<21x876xf32>, vector<6x876xf32> -> vector<6x876xf32>
    %c0_3 = arith.constant 0 : index
    %c0_4 = arith.constant 0 : index
    %3 = vector.load %arg3[%c0_3, %c0_4] : memref<6x1xf32, #tpu.memory_space<vmem>>, vector<6x1xf32>
    %4 = vector.broadcast %3 : vector<6x1xf32> to vector<6x876xf32>
    %5 = arith.addf %2, %4 : vector<6x876xf32>
    %c0_5 = arith.constant 0 : index
    %c0_6 = arith.constant 0 : index
    %6 = vector.load %arg1[%c0_5, %c0_6] : memref<21x876xf32, #tpu.memory_space<vmem>>, vector<21x876xf32>
    %cst_7 = arith.constant dense<0.000000e+00> : vector<6x876xf32>
    %7 = tpu.matmul %0, %6, %cst_7 {dimension_numbers = #tpu.dot_dimension_numbers<[1], [0], [0], [1], [0, 0, 1, 1], [], []>} : vector<6x21xf32>, vector<21x876xf32>, vector<6x876xf32> -> vector<6x876xf32>
    %c0_8 = arith.constant 0 : index
    %c0_9 = arith.constant 0 : index
    %8 = vector.load %arg3[%c0_8, %c0_9] : memref<6x1xf32, #tpu.memory_space<vmem>>, vector<6x1xf32>
    %9 = vector.broadcast %8 : vector<6x1xf32> to vector<6x876xf32>
    %10 = arith.addf %7, %9 : vector<6x876xf32>
    %cst_10 = arith.constant dense<0.000000e+00> : vector<6xf32>
    %11 = vector.multi_reduction <add>, %5, %cst_10 [1] : vector<6x876xf32> to vector<6xf32>
    %12 = vector.shape_cast %11 : vector<6xf32> to vector<6x1xf32>
    %cst_11 = arith.constant dense<0.000000e+00> : vector<6xf32>
    %13 = vector.multi_reduction <add>, %10, %cst_11 [1] : vector<6x876xf32> to vector<6xf32>
    %14 = vector.shape_cast %13 : vector<6xf32> to vector<6x1xf32>
    %15 = arith.addf %12, %14 : vector<6x1xf32>
    %16 = arith.mulf %5, %5 : vector<6x876xf32>
    %cst_12 = arith.constant dense<0.000000e+00> : vector<6xf32>
    %17 = vector.multi_reduction <add>, %16, %cst_12 [1] : vector<6x876xf32> to vector<6xf32>
    %18 = vector.shape_cast %17 : vector<6xf32> to vector<6x1xf32>
    %19 = arith.mulf %10, %10 : vector<6x876xf32>
    %cst_13 = arith.constant dense<0.000000e+00> : vector<6xf32>
    %20 = vector.multi_reduction <add>, %19, %cst_13 [1] : vector<6x876xf32> to vector<6xf32>
    %21 = vector.shape_cast %20 : vector<6xf32> to vector<6x1xf32>
    %22 = arith.addf %18, %21 : vector<6x1xf32>
    %cst_14 = arith.constant 1.752000e+03 : f32
    %23 = vector.broadcast %cst_14 : f32 to vector<6x1xf32>
    %24 = arith.divf %15, %23 : vector<6x1xf32>
    %cst_15 = arith.constant 1.752000e+03 : f32
    %25 = vector.broadcast %cst_15 : f32 to vector<6x1xf32>
    %26 = arith.divf %22, %25 : vector<6x1xf32>
    %27 = arith.mulf %24, %24 : vector<6x1xf32>
    %28 = arith.subf %26, %27 : vector<6x1xf32>
    %cst_16 = arith.constant 9.99999974E-6 : f32
    %29 = vector.broadcast %cst_16 : f32 to vector<6x1xf32>
    %30 = arith.addf %28, %29 : vector<6x1xf32>
    %31 = math.rsqrt %30 : vector<6x1xf32>
    %c0_17 = arith.constant 0 : index
    %c0_18 = arith.constant 0 : index
    %32 = vector.load %arg4[%c0_17, %c0_18] : memref<6x1xf32, #tpu.memory_space<vmem>>, vector<6x1xf32>
    %33 = arith.mulf %31, %32 : vector<6x1xf32>
    %c0_19 = arith.constant 0 : index
    %c0_20 = arith.constant 0 : index
    %34 = vector.load %arg5[%c0_19, %c0_20] : memref<6x1xf32, #tpu.memory_space<vmem>>, vector<6x1xf32>
    %35 = arith.mulf %24, %33 : vector<6x1xf32>
    %36 = arith.subf %34, %35 : vector<6x1xf32>
    %37 = vector.broadcast %33 : vector<6x1xf32> to vector<6x876xf32>
    %38 = arith.mulf %5, %37 : vector<6x876xf32>
    %39 = vector.broadcast %36 : vector<6x1xf32> to vector<6x876xf32>
    %40 = arith.addf %38, %39 : vector<6x876xf32>
    %41 = vector.broadcast %33 : vector<6x1xf32> to vector<6x876xf32>
    %42 = arith.mulf %10, %41 : vector<6x876xf32>
    %43 = vector.broadcast %36 : vector<6x1xf32> to vector<6x876xf32>
    %44 = arith.addf %42, %43 : vector<6x876xf32>
    %45 = tpu.iota {dimensions = array<i32: 0>} : vector<220x220xi32>
    %46 = arith.sitofp %45 : vector<220x220xi32> to vector<220x220xf32>
    %47 = tpu.iota {dimensions = array<i32: 1>} : vector<220x220xi32>
    %48 = arith.sitofp %47 : vector<220x220xi32> to vector<220x220xf32>
    %cst_21 = arith.constant 5.000000e-01 : f32
    %49 = vector.broadcast %cst_21 : f32 to vector<220x220xf32>
    %50 = arith.addf %46, %49 : vector<220x220xf32>
    %cst_22 = arith.constant 0.0909090936 : f32
    %51 = vector.broadcast %cst_22 : f32 to vector<220x220xf32>
    %52 = arith.mulf %50, %51 : vector<220x220xf32>
    %53 = math.floor %52 : vector<220x220xf32>
    %cst_23 = arith.constant 1.100000e+01 : f32
    %54 = vector.broadcast %cst_23 : f32 to vector<220x220xf32>
    %55 = arith.mulf %54, %53 : vector<220x220xf32>
    %56 = arith.subf %46, %55 : vector<220x220xf32>
    %cst_24 = arith.constant 2.000000e+01 : f32
    %57 = vector.broadcast %cst_24 : f32 to vector<220x220xf32>
    %58 = arith.mulf %56, %57 : vector<220x220xf32>
    %59 = arith.addf %58, %53 : vector<220x220xf32>
    %60 = arith.cmpf oeq, %48, %59 : vector<220x220xf32>
    %cst_25 = arith.constant 2.000000e+01 : f32
    %61 = vector.broadcast %cst_25 : f32 to vector<220x220xf32>
    %62 = arith.cmpf olt, %53, %61 : vector<220x220xf32>
    %63 = arith.andi %60, %62 : vector<220x220xi1>
    %cst_26 = arith.constant 1.000000e+00 : f32
    %cst_27 = arith.constant 0.000000e+00 : f32
    %64 = vector.broadcast %cst_26 : f32 to vector<220x220xf32>
    %65 = vector.broadcast %cst_27 : f32 to vector<220x220xf32>
    %66 = arith.select %63, %64, %65 : vector<220x220xi1>, vector<220x220xf32>
    %c0_28 = arith.constant 0 : index
    %c0_29 = arith.constant 0 : index
    %67 = vector.load %arg6[%c0_28, %c0_29] : memref<16x66xf32, #tpu.memory_space<vmem>>, vector<16x66xf32>
    %c0_30 = arith.constant 0 : index
    %c0_31 = arith.constant 0 : index
    %68 = vector.load %arg7[%c0_30, %c0_31] : memref<16x1xf32, #tpu.memory_space<vmem>>, vector<16x1xf32>
    %69 = vector.extract_strided_slice %40 {offsets = [0, 0], sizes = [6, 219], strides = [1, 1]} : vector<6x876xf32> to vector<6x219xf32>
    %70 = vector.extract_strided_slice %44 {offsets = [0, 0], sizes = [6, 219], strides = [1, 1]} : vector<6x876xf32> to vector<6x219xf32>
    %71 = vector.extract_strided_slice %69 {offsets = [0, 0], sizes = [6, 1], strides = [1, 1]} : vector<6x219xf32> to vector<6x1xf32>
    %c0_32 = arith.constant 0 : index
    %c0_33 = arith.constant 0 : index
    %72 = vector.load %arg21[%c0_32, %c0_33] : memref<6x220xf32, #tpu.memory_space<vmem>>, vector<6x1xf32>
    tpu.vector_store %arg21[%c0_32, %c0_33], %71 {strides = array<i32>} : memref<6x220xf32, #tpu.memory_space<vmem>>, vector<6x1xf32>,
    %73 = vector.extract_strided_slice %70 {offsets = [0, 0], sizes = [6, 218], strides = [1, 1]} : vector<6x219xf32> to vector<6x218xf32>
    %74 = vector.extract_strided_slice %69 {offsets = [0, 1], sizes = [6, 218], strides = [1, 1]} : vector<6x219xf32> to vector<6x218xf32>
    %75 = arith.maximumf %73, %74 : vector<6x218xf32>
    %c0_34 = arith.constant 0 : index
    %c1 = arith.constant 1 : index
    %76 = vector.load %arg21[%c0_34, %c1] : memref<6x220xf32, #tpu.memory_space<vmem>>, vector<6x218xf32>
    tpu.vector_store %arg21[%c0_34, %c1], %75 {strides = array<i32>} : memref<6x220xf32, #tpu.memory_space<vmem>>, vector<6x218xf32>,
    %77 = vector.extract_strided_slice %70 {offsets = [0, 218], sizes = [6, 1], strides = [1, 1]} : vector<6x219xf32> to vector<6x1xf32>
    %c0_35 = arith.constant 0 : index
    %c219 = arith.constant 219 : index
    %78 = vector.load %arg21[%c0_35, %c219] : memref<6x220xf32, #tpu.memory_space<vmem>>, vector<6x1xf32>
    tpu.vector_store %arg21[%c0_35, %c219], %77 {strides = array<i32>} : memref<6x220xf32, #tpu.memory_space<vmem>>, vector<6x1xf32>,
    %c0_36 = arith.constant 0 : index
    %c0_37 = arith.constant 0 : index
    %79 = vector.load %arg21[%c0_36, %c0_37] : memref<6x220xf32, #tpu.memory_space<vmem>>, vector<6x220xf32>
    %cst_38 = arith.constant 0.000000e+00 : f32
    %80 = vector.broadcast %cst_38 : f32 to vector<6x220xf32>
    %81 = arith.maximumf %79, %80 : vector<6x220xf32>
    %cst_39 = arith.constant dense<0.000000e+00> : vector<6x220xf32>
    %82 = tpu.matmul %81, %66, %cst_39 {dimension_numbers = #tpu.dot_dimension_numbers<[1], [0], [0], [1], [0, 0, 1, 1], [], []>} : vector<6x220xf32>, vector<220x220xf32>, vector<6x220xf32> -> vector<6x220xf32>
    %83 = vector.extract_strided_slice %67 {offsets = [0, 0], sizes = [16, 6], strides = [1, 1]} : vector<16x66xf32> to vector<16x6xf32>
    %84 = vector.extract_strided_slice %82 {offsets = [0, 0], sizes = [6, 20], strides = [1, 1]} : vector<6x220xf32> to vector<6x20xf32>
    %cst_40 = arith.constant dense<0.000000e+00> : vector<16x20xf32>
    %85 = tpu.matmul %83, %84, %cst_40 {dimension_numbers = #tpu.dot_dimension_numbers<[1], [0], [0], [1], [0, 0, 1, 1], [], []>} : vector<16x6xf32>, vector<6x20xf32>, vector<16x20xf32> -> vector<16x20xf32>
    %86 = vector.broadcast %68 : vector<16x1xf32> to vector<16x20xf32>
    %87 = arith.addf %86, %85 : vector<16x20xf32>
    %88 = vector.extract_strided_slice %67 {offsets = [0, 6], sizes = [16, 6], strides = [1, 1]} : vector<16x66xf32> to vector<16x6xf32>
    %89 = vector.extract_strided_slice %82 {offsets = [0, 20], sizes = [6, 20], strides = [1, 1]} : vector<6x220xf32> to vector<6x20xf32>
    %cst_41 = arith.constant dense<0.000000e+00> : vector<16x20xf32>
    %90 = tpu.matmul %88, %89, %cst_41 {dimension_numbers = #tpu.dot_dimension_numbers<[1], [0], [0], [1], [0, 0, 1, 1], [], []>} : vector<16x6xf32>, vector<6x20xf32>, vector<16x20xf32> -> vector<16x20xf32>
    %91 = arith.addf %87, %90 : vector<16x20xf32>
    %92 = vector.extract_strided_slice %67 {offsets = [0, 12], sizes = [16, 6], strides = [1, 1]} : vector<16x66xf32> to vector<16x6xf32>
    %93 = vector.extract_strided_slice %82 {offsets = [0, 40], sizes = [6, 20], strides = [1, 1]} : vector<6x220xf32> to vector<6x20xf32>
    %cst_42 = arith.constant dense<0.000000e+00> : vector<16x20xf32>
    %94 = tpu.matmul %92, %93, %cst_42 {dimension_numbers = #tpu.dot_dimension_numbers<[1], [0], [0], [1], [0, 0, 1, 1], [], []>} : vector<16x6xf32>, vector<6x20xf32>, vector<16x20xf32> -> vector<16x20xf32>
    %95 = arith.addf %91, %94 : vector<16x20xf32>
    %96 = vector.extract_strided_slice %67 {offsets = [0, 18], sizes = [16, 6], strides = [1, 1]} : vector<16x66xf32> to vector<16x6xf32>
    %97 = vector.extract_strided_slice %82 {offsets = [0, 60], sizes = [6, 20], strides = [1, 1]} : vector<6x220xf32> to vector<6x20xf32>
    %cst_43 = arith.constant dense<0.000000e+00> : vector<16x20xf32>
    %98 = tpu.matmul %96, %97, %cst_43 {dimension_numbers = #tpu.dot_dimension_numbers<[1], [0], [0], [1], [0, 0, 1, 1], [], []>} : vector<16x6xf32>, vector<6x20xf32>, vector<16x20xf32> -> vector<16x20xf32>
    %99 = arith.addf %95, %98 : vector<16x20xf32>
    %100 = vector.extract_strided_slice %67 {offsets = [0, 24], sizes = [16, 6], strides = [1, 1]} : vector<16x66xf32> to vector<16x6xf32>
    %101 = vector.extract_strided_slice %82 {offsets = [0, 80], sizes = [6, 20], strides = [1, 1]} : vector<6x220xf32> to vector<6x20xf32>
    %cst_44 = arith.constant dense<0.000000e+00> : vector<16x20xf32>
    %102 = tpu.matmul %100, %101, %cst_44 {dimension_numbers = #tpu.dot_dimension_numbers<[1], [0], [0], [1], [0, 0, 1, 1], [], []>} : vector<16x6xf32>, vector<6x20xf32>, vector<16x20xf32> -> vector<16x20xf32>
    %103 = arith.addf %99, %102 : vector<16x20xf32>
    %104 = vector.extract_strided_slice %67 {offsets = [0, 30], sizes = [16, 6], strides = [1, 1]} : vector<16x66xf32> to vector<16x6xf32>
    %105 = vector.extract_strided_slice %82 {offsets = [0, 100], sizes = [6, 20], strides = [1, 1]} : vector<6x220xf32> to vector<6x20xf32>
    %cst_45 = arith.constant dense<0.000000e+00> : vector<16x20xf32>
    %106 = tpu.matmul %104, %105, %cst_45 {dimension_numbers = #tpu.dot_dimension_numbers<[1], [0], [0], [1], [0, 0, 1, 1], [], []>} : vector<16x6xf32>, vector<6x20xf32>, vector<16x20xf32> -> vector<16x20xf32>
    %107 = arith.addf %103, %106 : vector<16x20xf32>
    %108 = vector.extract_strided_slice %67 {offsets = [0, 36], sizes = [16, 6], strides = [1, 1]} : vector<16x66xf32> to vector<16x6xf32>
    %109 = vector.extract_strided_slice %82 {offsets = [0, 120], sizes = [6, 20], strides = [1, 1]} : vector<6x220xf32> to vector<6x20xf32>
    %cst_46 = arith.constant dense<0.000000e+00> : vector<16x20xf32>
    %110 = tpu.matmul %108, %109, %cst_46 {dimension_numbers = #tpu.dot_dimension_numbers<[1], [0], [0], [1], [0, 0, 1, 1], [], []>} : vector<16x6xf32>, vector<6x20xf32>, vector<16x20xf32> -> vector<16x20xf32>
    %111 = arith.addf %107, %110 : vector<16x20xf32>
    %112 = vector.extract_strided_slice %67 {offsets = [0, 42], sizes = [16, 6], strides = [1, 1]} : vector<16x66xf32> to vector<16x6xf32>
    %113 = vector.extract_strided_slice %82 {offsets = [0, 140], sizes = [6, 20], strides = [1, 1]} : vector<6x220xf32> to vector<6x20xf32>
    %cst_47 = arith.constant dense<0.000000e+00> : vector<16x20xf32>
    %114 = tpu.matmul %112, %113, %cst_47 {dimension_numbers = #tpu.dot_dimension_numbers<[1], [0], [0], [1], [0, 0, 1, 1], [], []>} : vector<16x6xf32>, vector<6x20xf32>, vector<16x20xf32> -> vector<16x20xf32>
    %115 = arith.addf %111, %114 : vector<16x20xf32>
    %116 = vector.extract_strided_slice %67 {offsets = [0, 48], sizes = [16, 6], strides = [1, 1]} : vector<16x66xf32> to vector<16x6xf32>
    %117 = vector.extract_strided_slice %82 {offsets = [0, 160], sizes = [6, 20], strides = [1, 1]} : vector<6x220xf32> to vector<6x20xf32>
    %cst_48 = arith.constant dense<0.000000e+00> : vector<16x20xf32>
    %118 = tpu.matmul %116, %117, %cst_48 {dimension_numbers = #tpu.dot_dimension_numbers<[1], [0], [0], [1], [0, 0, 1, 1], [], []>} : vector<16x6xf32>, vector<6x20xf32>, vector<16x20xf32> -> vector<16x20xf32>
    %119 = arith.addf %115, %118 : vector<16x20xf32>
    %120 = vector.extract_strided_slice %67 {offsets = [0, 54], sizes = [16, 6], strides = [1, 1]} : vector<16x66xf32> to vector<16x6xf32>
    %121 = vector.extract_strided_slice %82 {offsets = [0, 180], sizes = [6, 20], strides = [1, 1]} : vector<6x220xf32> to vector<6x20xf32>
    %cst_49 = arith.constant dense<0.000000e+00> : vector<16x20xf32>
    %122 = tpu.matmul %120, %121, %cst_49 {dimension_numbers = #tpu.dot_dimension_numbers<[1], [0], [0], [1], [0, 0, 1, 1], [], []>} : vector<16x6xf32>, vector<6x20xf32>, vector<16x20xf32> -> vector<16x20xf32>
    %123 = arith.addf %119, %122 : vector<16x20xf32>
    %124 = vector.extract_strided_slice %67 {offsets = [0, 60], sizes = [16, 6], strides = [1, 1]} : vector<16x66xf32> to vector<16x6xf32>
    %125 = vector.extract_strided_slice %82 {offsets = [0, 200], sizes = [6, 20], strides = [1, 1]} : vector<6x220xf32> to vector<6x20xf32>
    %cst_50 = arith.constant dense<0.000000e+00> : vector<16x20xf32>
    %126 = tpu.matmul %124, %125, %cst_50 {dimension_numbers = #tpu.dot_dimension_numbers<[1], [0], [0], [1], [0, 0, 1, 1], [], []>} : vector<16x6xf32>, vector<6x20xf32>, vector<16x20xf32> -> vector<16x20xf32>
    %127 = arith.addf %123, %126 : vector<16x20xf32>
    %128 = vector.extract_strided_slice %40 {offsets = [0, 219], sizes = [6, 219], strides = [1, 1]} : vector<6x876xf32> to vector<6x219xf32>
    %129 = vector.extract_strided_slice %44 {offsets = [0, 219], sizes = [6, 219], strides = [1, 1]} : vector<6x876xf32> to vector<6x219xf32>
    %130 = vector.extract_strided_slice %128 {offsets = [0, 0], sizes = [6, 1], strides = [1, 1]} : vector<6x219xf32> to vector<6x1xf32>
    %c0_51 = arith.constant 0 : index
    %c0_52 = arith.constant 0 : index
    %131 = vector.load %arg21[%c0_51, %c0_52] : memref<6x220xf32, #tpu.memory_space<vmem>>, vector<6x1xf32>
    tpu.vector_store %arg21[%c0_51, %c0_52], %130 {strides = array<i32>} : memref<6x220xf32, #tpu.memory_space<vmem>>, vector<6x1xf32>,
    %132 = vector.extract_strided_slice %129 {offsets = [0, 0], sizes = [6, 218], strides = [1, 1]} : vector<6x219xf32> to vector<6x218xf32>
    %133 = vector.extract_strided_slice %128 {offsets = [0, 1], sizes = [6, 218], strides = [1, 1]} : vector<6x219xf32> to vector<6x218xf32>
    %134 = arith.maximumf %132, %133 : vector<6x218xf32>
    %c0_53 = arith.constant 0 : index
    %c1_54 = arith.constant 1 : index
    %135 = vector.load %arg21[%c0_53, %c1_54] : memref<6x220xf32, #tpu.memory_space<vmem>>, vector<6x218xf32>
    tpu.vector_store %arg21[%c0_53, %c1_54], %134 {strides = array<i32>} : memref<6x220xf32, #tpu.memory_space<vmem>>, vector<6x218xf32>,
    %136 = vector.extract_strided_slice %129 {offsets = [0, 218], sizes = [6, 1], strides = [1, 1]} : vector<6x219xf32> to vector<6x1xf32>
    %c0_55 = arith.constant 0 : index
    %c219_56 = arith.constant 219 : index
    %137 = vector.load %arg21[%c0_55, %c219_56] : memref<6x220xf32, #tpu.memory_space<vmem>>, vector<6x1xf32>
    tpu.vector_store %arg21[%c0_55, %c219_56], %136 {strides = array<i32>} : memref<6x220xf32, #tpu.memory_space<vmem>>, vector<6x1xf32>,
    %c0_57 = arith.constant 0 : index
    %c0_58 = arith.constant 0 : index
    %138 = vector.load %arg21[%c0_57, %c0_58] : memref<6x220xf32, #tpu.memory_space<vmem>>, vector<6x220xf32>
    %cst_59 = arith.constant 0.000000e+00 : f32
    %139 = vector.broadcast %cst_59 : f32 to vector<6x220xf32>
    %140 = arith.maximumf %138, %139 : vector<6x220xf32>
    %cst_60 = arith.constant dense<0.000000e+00> : vector<6x220xf32>
    %141 = tpu.matmul %140, %66, %cst_60 {dimension_numbers = #tpu.dot_dimension_numbers<[1], [0], [0], [1], [0, 0, 1, 1], [], []>} : vector<6x220xf32>, vector<220x220xf32>, vector<6x220xf32> -> vector<6x220xf32>
    %142 = vector.extract_strided_slice %67 {offsets = [0, 0], sizes = [16, 6], strides = [1, 1]} : vector<16x66xf32> to vector<16x6xf32>
    %143 = vector.extract_strided_slice %141 {offsets = [0, 0], sizes = [6, 20], strides = [1, 1]} : vector<6x220xf32> to vector<6x20xf32>
    %cst_61 = arith.constant dense<0.000000e+00> : vector<16x20xf32>
    %144 = tpu.matmul %142, %143, %cst_61 {dimension_numbers = #tpu.dot_dimension_numbers<[1], [0], [0], [1], [0, 0, 1, 1], [], []>} : vector<16x6xf32>, vector<6x20xf32>, vector<16x20xf32> -> vector<16x20xf32>
    %145 = vector.broadcast %68 : vector<16x1xf32> to vector<16x20xf32>
    %146 = arith.addf %145, %144 : vector<16x20xf32>
    %147 = vector.extract_strided_slice %67 {offsets = [0, 6], sizes = [16, 6], strides = [1, 1]} : vector<16x66xf32> to vector<16x6xf32>
    %148 = vector.extract_strided_slice %141 {offsets = [0, 20], sizes = [6, 20], strides = [1, 1]} : vector<6x220xf32> to vector<6x20xf32>
    %cst_62 = arith.constant dense<0.000000e+00> : vector<16x20xf32>
    %149 = tpu.matmul %147, %148, %cst_62 {dimension_numbers = #tpu.dot_dimension_numbers<[1], [0], [0], [1], [0, 0, 1, 1], [], []>} : vector<16x6xf32>, vector<6x20xf32>, vector<16x20xf32> -> vector<16x20xf32>
    %150 = arith.addf %146, %149 : vector<16x20xf32>
    %151 = vector.extract_strided_slice %67 {offsets = [0, 12], sizes = [16, 6], strides = [1, 1]} : vector<16x66xf32> to vector<16x6xf32>
    %152 = vector.extract_strided_slice %141 {offsets = [0, 40], sizes = [6, 20], strides = [1, 1]} : vector<6x220xf32> to vector<6x20xf32>
    %cst_63 = arith.constant dense<0.000000e+00> : vector<16x20xf32>
    %153 = tpu.matmul %151, %152, %cst_63 {dimension_numbers = #tpu.dot_dimension_numbers<[1], [0], [0], [1], [0, 0, 1, 1], [], []>} : vector<16x6xf32>, vector<6x20xf32>, vector<16x20xf32> -> vector<16x20xf32>
    %154 = arith.addf %150, %153 : vector<16x20xf32>
    %155 = vector.extract_strided_slice %67 {offsets = [0, 18], sizes = [16, 6], strides = [1, 1]} : vector<16x66xf32> to vector<16x6xf32>
    %156 = vector.extract_strided_slice %141 {offsets = [0, 60], sizes = [6, 20], strides = [1, 1]} : vector<6x220xf32> to vector<6x20xf32>
    %cst_64 = arith.constant dense<0.000000e+00> : vector<16x20xf32>
    %157 = tpu.matmul %155, %156, %cst_64 {dimension_numbers = #tpu.dot_dimension_numbers<[1], [0], [0], [1], [0, 0, 1, 1], [], []>} : vector<16x6xf32>, vector<6x20xf32>, vector<16x20xf32> -> vector<16x20xf32>
    %158 = arith.addf %154, %157 : vector<16x20xf32>
    %159 = vector.extract_strided_slice %67 {offsets = [0, 24], sizes = [16, 6], strides = [1, 1]} : vector<16x66xf32> to vector<16x6xf32>
    %160 = vector.extract_strided_slice %141 {offsets = [0, 80], sizes = [6, 20], strides = [1, 1]} : vector<6x220xf32> to vector<6x20xf32>
    %cst_65 = arith.constant dense<0.000000e+00> : vector<16x20xf32>
    %161 = tpu.matmul %159, %160, %cst_65 {dimension_numbers = #tpu.dot_dimension_numbers<[1], [0], [0], [1], [0, 0, 1, 1], [], []>} : vector<16x6xf32>, vector<6x20xf32>, vector<16x20xf32> -> vector<16x20xf32>
    %162 = arith.addf %158, %161 : vector<16x20xf32>
    %163 = vector.extract_strided_slice %67 {offsets = [0, 30], sizes = [16, 6], strides = [1, 1]} : vector<16x66xf32> to vector<16x6xf32>
    %164 = vector.extract_strided_slice %141 {offsets = [0, 100], sizes = [6, 20], strides = [1, 1]} : vector<6x220xf32> to vector<6x20xf32>
    %cst_66 = arith.constant dense<0.000000e+00> : vector<16x20xf32>
    %165 = tpu.matmul %163, %164, %cst_66 {dimension_numbers = #tpu.dot_dimension_numbers<[1], [0], [0], [1], [0, 0, 1, 1], [], []>} : vector<16x6xf32>, vector<6x20xf32>, vector<16x20xf32> -> vector<16x20xf32>
    %166 = arith.addf %162, %165 : vector<16x20xf32>
    %167 = vector.extract_strided_slice %67 {offsets = [0, 36], sizes = [16, 6], strides = [1, 1]} : vector<16x66xf32> to vector<16x6xf32>
    %168 = vector.extract_strided_slice %141 {offsets = [0, 120], sizes = [6, 20], strides = [1, 1]} : vector<6x220xf32> to vector<6x20xf32>
    %cst_67 = arith.constant dense<0.000000e+00> : vector<16x20xf32>
    %169 = tpu.matmul %167, %168, %cst_67 {dimension_numbers = #tpu.dot_dimension_numbers<[1], [0], [0], [1], [0, 0, 1, 1], [], []>} : vector<16x6xf32>, vector<6x20xf32>, vector<16x20xf32> -> vector<16x20xf32>
    %170 = arith.addf %166, %169 : vector<16x20xf32>
    %171 = vector.extract_strided_slice %67 {offsets = [0, 42], sizes = [16, 6], strides = [1, 1]} : vector<16x66xf32> to vector<16x6xf32>
    %172 = vector.extract_strided_slice %141 {offsets = [0, 140], sizes = [6, 20], strides = [1, 1]} : vector<6x220xf32> to vector<6x20xf32>
    %cst_68 = arith.constant dense<0.000000e+00> : vector<16x20xf32>
    %173 = tpu.matmul %171, %172, %cst_68 {dimension_numbers = #tpu.dot_dimension_numbers<[1], [0], [0], [1], [0, 0, 1, 1], [], []>} : vector<16x6xf32>, vector<6x20xf32>, vector<16x20xf32> -> vector<16x20xf32>
    %174 = arith.addf %170, %173 : vector<16x20xf32>
    %175 = vector.extract_strided_slice %67 {offsets = [0, 48], sizes = [16, 6], strides = [1, 1]} : vector<16x66xf32> to vector<16x6xf32>
    %176 = vector.extract_strided_slice %141 {offsets = [0, 160], sizes = [6, 20], strides = [1, 1]} : vector<6x220xf32> to vector<6x20xf32>
    %cst_69 = arith.constant dense<0.000000e+00> : vector<16x20xf32>
    %177 = tpu.matmul %175, %176, %cst_69 {dimension_numbers = #tpu.dot_dimension_numbers<[1], [0], [0], [1], [0, 0, 1, 1], [], []>} : vector<16x6xf32>, vector<6x20xf32>, vector<16x20xf32> -> vector<16x20xf32>
    %178 = arith.addf %174, %177 : vector<16x20xf32>
    %179 = vector.extract_strided_slice %67 {offsets = [0, 54], sizes = [16, 6], strides = [1, 1]} : vector<16x66xf32> to vector<16x6xf32>
    %180 = vector.extract_strided_slice %141 {offsets = [0, 180], sizes = [6, 20], strides = [1, 1]} : vector<6x220xf32> to vector<6x20xf32>
    %cst_70 = arith.constant dense<0.000000e+00> : vector<16x20xf32>
    %181 = tpu.matmul %179, %180, %cst_70 {dimension_numbers = #tpu.dot_dimension_numbers<[1], [0], [0], [1], [0, 0, 1, 1], [], []>} : vector<16x6xf32>, vector<6x20xf32>, vector<16x20xf32> -> vector<16x20xf32>
    %182 = arith.addf %178, %181 : vector<16x20xf32>
    %183 = vector.extract_strided_slice %67 {offsets = [0, 60], sizes = [16, 6], strides = [1, 1]} : vector<16x66xf32> to vector<16x6xf32>
    %184 = vector.extract_strided_slice %141 {offsets = [0, 200], sizes = [6, 20], strides = [1, 1]} : vector<6x220xf32> to vector<6x20xf32>
    %cst_71 = arith.constant dense<0.000000e+00> : vector<16x20xf32>
    %185 = tpu.matmul %183, %184, %cst_71 {dimension_numbers = #tpu.dot_dimension_numbers<[1], [0], [0], [1], [0, 0, 1, 1], [], []>} : vector<16x6xf32>, vector<6x20xf32>, vector<16x20xf32> -> vector<16x20xf32>
    %186 = arith.addf %182, %185 : vector<16x20xf32>
    %187 = vector.extract_strided_slice %40 {offsets = [0, 438], sizes = [6, 219], strides = [1, 1]} : vector<6x876xf32> to vector<6x219xf32>
    %188 = vector.extract_strided_slice %44 {offsets = [0, 438], sizes = [6, 219], strides = [1, 1]} : vector<6x876xf32> to vector<6x219xf32>
    %189 = vector.extract_strided_slice %187 {offsets = [0, 0], sizes = [6, 1], strides = [1, 1]} : vector<6x219xf32> to vector<6x1xf32>
    %c0_72 = arith.constant 0 : index
    %c0_73 = arith.constant 0 : index
    %190 = vector.load %arg21[%c0_72, %c0_73] : memref<6x220xf32, #tpu.memory_space<vmem>>, vector<6x1xf32>
    tpu.vector_store %arg21[%c0_72, %c0_73], %189 {strides = array<i32>} : memref<6x220xf32, #tpu.memory_space<vmem>>, vector<6x1xf32>,
    %191 = vector.extract_strided_slice %188 {offsets = [0, 0], sizes = [6, 218], strides = [1, 1]} : vector<6x219xf32> to vector<6x218xf32>
    %192 = vector.extract_strided_slice %187 {offsets = [0, 1], sizes = [6, 218], strides = [1, 1]} : vector<6x219xf32> to vector<6x218xf32>
    %193 = arith.maximumf %191, %192 : vector<6x218xf32>
    %c0_74 = arith.constant 0 : index
    %c1_75 = arith.constant 1 : index
    %194 = vector.load %arg21[%c0_74, %c1_75] : memref<6x220xf32, #tpu.memory_space<vmem>>, vector<6x218xf32>
    tpu.vector_store %arg21[%c0_74, %c1_75], %193 {strides = array<i32>} : memref<6x220xf32, #tpu.memory_space<vmem>>, vector<6x218xf32>,
    %195 = vector.extract_strided_slice %188 {offsets = [0, 218], sizes = [6, 1], strides = [1, 1]} : vector<6x219xf32> to vector<6x1xf32>
    %c0_76 = arith.constant 0 : index
    %c219_77 = arith.constant 219 : index
    %196 = vector.load %arg21[%c0_76, %c219_77] : memref<6x220xf32, #tpu.memory_space<vmem>>, vector<6x1xf32>
    tpu.vector_store %arg21[%c0_76, %c219_77], %195 {strides = array<i32>} : memref<6x220xf32, #tpu.memory_space<vmem>>, vector<6x1xf32>,
    %c0_78 = arith.constant 0 : index
    %c0_79 = arith.constant 0 : index
    %197 = vector.load %arg21[%c0_78, %c0_79] : memref<6x220xf32, #tpu.memory_space<vmem>>, vector<6x220xf32>
    %cst_80 = arith.constant 0.000000e+00 : f32
    %198 = vector.broadcast %cst_80 : f32 to vector<6x220xf32>
    %199 = arith.maximumf %197, %198 : vector<6x220xf32>
    %cst_81 = arith.constant dense<0.000000e+00> : vector<6x220xf32>
    %200 = tpu.matmul %199, %66, %cst_81 {dimension_numbers = #tpu.dot_dimension_numbers<[1], [0], [0], [1], [0, 0, 1, 1], [], []>} : vector<6x220xf32>, vector<220x220xf32>, vector<6x220xf32> -> vector<6x220xf32>
    %201 = vector.extract_strided_slice %67 {offsets = [0, 0], sizes = [16, 6], strides = [1, 1]} : vector<16x66xf32> to vector<16x6xf32>
    %202 = vector.extract_strided_slice %200 {offsets = [0, 0], sizes = [6, 20], strides = [1, 1]} : vector<6x220xf32> to vector<6x20xf32>
    %cst_82 = arith.constant dense<0.000000e+00> : vector<16x20xf32>
    %203 = tpu.matmul %201, %202, %cst_82 {dimension_numbers = #tpu.dot_dimension_numbers<[1], [0], [0], [1], [0, 0, 1, 1], [], []>} : vector<16x6xf32>, vector<6x20xf32>, vector<16x20xf32> -> vector<16x20xf32>
    %204 = vector.broadcast %68 : vector<16x1xf32> to vector<16x20xf32>
    %205 = arith.addf %204, %203 : vector<16x20xf32>
    %206 = vector.extract_strided_slice %67 {offsets = [0, 6], sizes = [16, 6], strides = [1, 1]} : vector<16x66xf32> to vector<16x6xf32>
    %207 = vector.extract_strided_slice %200 {offsets = [0, 20], sizes = [6, 20], strides = [1, 1]} : vector<6x220xf32> to vector<6x20xf32>
    %cst_83 = arith.constant dense<0.000000e+00> : vector<16x20xf32>
    %208 = tpu.matmul %206, %207, %cst_83 {dimension_numbers = #tpu.dot_dimension_numbers<[1], [0], [0], [1], [0, 0, 1, 1], [], []>} : vector<16x6xf32>, vector<6x20xf32>, vector<16x20xf32> -> vector<16x20xf32>
    %209 = arith.addf %205, %208 : vector<16x20xf32>
    %210 = vector.extract_strided_slice %67 {offsets = [0, 12], sizes = [16, 6], strides = [1, 1]} : vector<16x66xf32> to vector<16x6xf32>
    %211 = vector.extract_strided_slice %200 {offsets = [0, 40], sizes = [6, 20], strides = [1, 1]} : vector<6x220xf32> to vector<6x20xf32>
    %cst_84 = arith.constant dense<0.000000e+00> : vector<16x20xf32>
    %212 = tpu.matmul %210, %211, %cst_84 {dimension_numbers = #tpu.dot_dimension_numbers<[1], [0], [0], [1], [0, 0, 1, 1], [], []>} : vector<16x6xf32>, vector<6x20xf32>, vector<16x20xf32> -> vector<16x20xf32>
    %213 = arith.addf %209, %212 : vector<16x20xf32>
    %214 = vector.extract_strided_slice %67 {offsets = [0, 18], sizes = [16, 6], strides = [1, 1]} : vector<16x66xf32> to vector<16x6xf32>
    %215 = vector.extract_strided_slice %200 {offsets = [0, 60], sizes = [6, 20], strides = [1, 1]} : vector<6x220xf32> to vector<6x20xf32>
    %cst_85 = arith.constant dense<0.000000e+00> : vector<16x20xf32>
    %216 = tpu.matmul %214, %215, %cst_85 {dimension_numbers = #tpu.dot_dimension_numbers<[1], [0], [0], [1], [0, 0, 1, 1], [], []>} : vector<16x6xf32>, vector<6x20xf32>, vector<16x20xf32> -> vector<16x20xf32>
    %217 = arith.addf %213, %216 : vector<16x20xf32>
    %218 = vector.extract_strided_slice %67 {offsets = [0, 24], sizes = [16, 6], strides = [1, 1]} : vector<16x66xf32> to vector<16x6xf32>
    %219 = vector.extract_strided_slice %200 {offsets = [0, 80], sizes = [6, 20], strides = [1, 1]} : vector<6x220xf32> to vector<6x20xf32>
    %cst_86 = arith.constant dense<0.000000e+00> : vector<16x20xf32>
    %220 = tpu.matmul %218, %219, %cst_86 {dimension_numbers = #tpu.dot_dimension_numbers<[1], [0], [0], [1], [0, 0, 1, 1], [], []>} : vector<16x6xf32>, vector<6x20xf32>, vector<16x20xf32> -> vector<16x20xf32>
    %221 = arith.addf %217, %220 : vector<16x20xf32>
    %222 = vector.extract_strided_slice %67 {offsets = [0, 30], sizes = [16, 6], strides = [1, 1]} : vector<16x66xf32> to vector<16x6xf32>
    %223 = vector.extract_strided_slice %200 {offsets = [0, 100], sizes = [6, 20], strides = [1, 1]} : vector<6x220xf32> to vector<6x20xf32>
    %cst_87 = arith.constant dense<0.000000e+00> : vector<16x20xf32>
    %224 = tpu.matmul %222, %223, %cst_87 {dimension_numbers = #tpu.dot_dimension_numbers<[1], [0], [0], [1], [0, 0, 1, 1], [], []>} : vector<16x6xf32>, vector<6x20xf32>, vector<16x20xf32> -> vector<16x20xf32>
    %225 = arith.addf %221, %224 : vector<16x20xf32>
    %226 = vector.extract_strided_slice %67 {offsets = [0, 36], sizes = [16, 6], strides = [1, 1]} : vector<16x66xf32> to vector<16x6xf32>
    %227 = vector.extract_strided_slice %200 {offsets = [0, 120], sizes = [6, 20], strides = [1, 1]} : vector<6x220xf32> to vector<6x20xf32>
    %cst_88 = arith.constant dense<0.000000e+00> : vector<16x20xf32>
    %228 = tpu.matmul %226, %227, %cst_88 {dimension_numbers = #tpu.dot_dimension_numbers<[1], [0], [0], [1], [0, 0, 1, 1], [], []>} : vector<16x6xf32>, vector<6x20xf32>, vector<16x20xf32> -> vector<16x20xf32>
    %229 = arith.addf %225, %228 : vector<16x20xf32>
    %230 = vector.extract_strided_slice %67 {offsets = [0, 42], sizes = [16, 6], strides = [1, 1]} : vector<16x66xf32> to vector<16x6xf32>
    %231 = vector.extract_strided_slice %200 {offsets = [0, 140], sizes = [6, 20], strides = [1, 1]} : vector<6x220xf32> to vector<6x20xf32>
    %cst_89 = arith.constant dense<0.000000e+00> : vector<16x20xf32>
    %232 = tpu.matmul %230, %231, %cst_89 {dimension_numbers = #tpu.dot_dimension_numbers<[1], [0], [0], [1], [0, 0, 1, 1], [], []>} : vector<16x6xf32>, vector<6x20xf32>, vector<16x20xf32> -> vector<16x20xf32>
    %233 = arith.addf %229, %232 : vector<16x20xf32>
    %234 = vector.extract_strided_slice %67 {offsets = [0, 48], sizes = [16, 6], strides = [1, 1]} : vector<16x66xf32> to vector<16x6xf32>
    %235 = vector.extract_strided_slice %200 {offsets = [0, 160], sizes = [6, 20], strides = [1, 1]} : vector<6x220xf32> to vector<6x20xf32>
    %cst_90 = arith.constant dense<0.000000e+00> : vector<16x20xf32>
    %236 = tpu.matmul %234, %235, %cst_90 {dimension_numbers = #tpu.dot_dimension_numbers<[1], [0], [0], [1], [0, 0, 1, 1], [], []>} : vector<16x6xf32>, vector<6x20xf32>, vector<16x20xf32> -> vector<16x20xf32>
    %237 = arith.addf %233, %236 : vector<16x20xf32>
    %238 = vector.extract_strided_slice %67 {offsets = [0, 54], sizes = [16, 6], strides = [1, 1]} : vector<16x66xf32> to vector<16x6xf32>
    %239 = vector.extract_strided_slice %200 {offsets = [0, 180], sizes = [6, 20], strides = [1, 1]} : vector<6x220xf32> to vector<6x20xf32>
    %cst_91 = arith.constant dense<0.000000e+00> : vector<16x20xf32>
    %240 = tpu.matmul %238, %239, %cst_91 {dimension_numbers = #tpu.dot_dimension_numbers<[1], [0], [0], [1], [0, 0, 1, 1], [], []>} : vector<16x6xf32>, vector<6x20xf32>, vector<16x20xf32> -> vector<16x20xf32>
    %241 = arith.addf %237, %240 : vector<16x20xf32>
    %242 = vector.extract_strided_slice %67 {offsets = [0, 60], sizes = [16, 6], strides = [1, 1]} : vector<16x66xf32> to vector<16x6xf32>
    %243 = vector.extract_strided_slice %200 {offsets = [0, 200], sizes = [6, 20], strides = [1, 1]} : vector<6x220xf32> to vector<6x20xf32>
    %cst_92 = arith.constant dense<0.000000e+00> : vector<16x20xf32>
    %244 = tpu.matmul %242, %243, %cst_92 {dimension_numbers = #tpu.dot_dimension_numbers<[1], [0], [0], [1], [0, 0, 1, 1], [], []>} : vector<16x6xf32>, vector<6x20xf32>, vector<16x20xf32> -> vector<16x20xf32>
    %245 = arith.addf %241, %244 : vector<16x20xf32>
    %246 = vector.extract_strided_slice %40 {offsets = [0, 657], sizes = [6, 219], strides = [1, 1]} : vector<6x876xf32> to vector<6x219xf32>
    %247 = vector.extract_strided_slice %44 {offsets = [0, 657], sizes = [6, 219], strides = [1, 1]} : vector<6x876xf32> to vector<6x219xf32>
    %248 = vector.extract_strided_slice %246 {offsets = [0, 0], sizes = [6, 1], strides = [1, 1]} : vector<6x219xf32> to vector<6x1xf32>
    %c0_93 = arith.constant 0 : index
    %c0_94 = arith.constant 0 : index
    %249 = vector.load %arg21[%c0_93, %c0_94] : memref<6x220xf32, #tpu.memory_space<vmem>>, vector<6x1xf32>
    tpu.vector_store %arg21[%c0_93, %c0_94], %248 {strides = array<i32>} : memref<6x220xf32, #tpu.memory_space<vmem>>, vector<6x1xf32>,
    %250 = vector.extract_strided_slice %247 {offsets = [0, 0], sizes = [6, 218], strides = [1, 1]} : vector<6x219xf32> to vector<6x218xf32>
    %251 = vector.extract_strided_slice %246 {offsets = [0, 1], sizes = [6, 218], strides = [1, 1]} : vector<6x219xf32> to vector<6x218xf32>
    %252 = arith.maximumf %250, %251 : vector<6x218xf32>
    %c0_95 = arith.constant 0 : index
    %c1_96 = arith.constant 1 : index
    %253 = vector.load %arg21[%c0_95, %c1_96] : memref<6x220xf32, #tpu.memory_space<vmem>>, vector<6x218xf32>
    tpu.vector_store %arg21[%c0_95, %c1_96], %252 {strides = array<i32>} : memref<6x220xf32, #tpu.memory_space<vmem>>, vector<6x218xf32>,
    %254 = vector.extract_strided_slice %247 {offsets = [0, 218], sizes = [6, 1], strides = [1, 1]} : vector<6x219xf32> to vector<6x1xf32>
    %c0_97 = arith.constant 0 : index
    %c219_98 = arith.constant 219 : index
    %255 = vector.load %arg21[%c0_97, %c219_98] : memref<6x220xf32, #tpu.memory_space<vmem>>, vector<6x1xf32>
    tpu.vector_store %arg21[%c0_97, %c219_98], %254 {strides = array<i32>} : memref<6x220xf32, #tpu.memory_space<vmem>>, vector<6x1xf32>,
    %c0_99 = arith.constant 0 : index
    %c0_100 = arith.constant 0 : index
    %256 = vector.load %arg21[%c0_99, %c0_100] : memref<6x220xf32, #tpu.memory_space<vmem>>, vector<6x220xf32>
    %cst_101 = arith.constant 0.000000e+00 : f32
    %257 = vector.broadcast %cst_101 : f32 to vector<6x220xf32>
    %258 = arith.maximumf %256, %257 : vector<6x220xf32>
    %cst_102 = arith.constant dense<0.000000e+00> : vector<6x220xf32>
    %259 = tpu.matmul %258, %66, %cst_102 {dimension_numbers = #tpu.dot_dimension_numbers<[1], [0], [0], [1], [0, 0, 1, 1], [], []>} : vector<6x220xf32>, vector<220x220xf32>, vector<6x220xf32> -> vector<6x220xf32>
    %260 = vector.extract_strided_slice %67 {offsets = [0, 0], sizes = [16, 6], strides = [1, 1]} : vector<16x66xf32> to vector<16x6xf32>
    %261 = vector.extract_strided_slice %259 {offsets = [0, 0], sizes = [6, 20], strides = [1, 1]} : vector<6x220xf32> to vector<6x20xf32>
    %cst_103 = arith.constant dense<0.000000e+00> : vector<16x20xf32>
    %262 = tpu.matmul %260, %261, %cst_103 {dimension_numbers = #tpu.dot_dimension_numbers<[1], [0], [0], [1], [0, 0, 1, 1], [], []>} : vector<16x6xf32>, vector<6x20xf32>, vector<16x20xf32> -> vector<16x20xf32>
    %263 = vector.broadcast %68 : vector<16x1xf32> to vector<16x20xf32>
    %264 = arith.addf %263, %262 : vector<16x20xf32>
    %265 = vector.extract_strided_slice %67 {offsets = [0, 6], sizes = [16, 6], strides = [1, 1]} : vector<16x66xf32> to vector<16x6xf32>
    %266 = vector.extract_strided_slice %259 {offsets = [0, 20], sizes = [6, 20], strides = [1, 1]} : vector<6x220xf32> to vector<6x20xf32>
    %cst_104 = arith.constant dense<0.000000e+00> : vector<16x20xf32>
    %267 = tpu.matmul %265, %266, %cst_104 {dimension_numbers = #tpu.dot_dimension_numbers<[1], [0], [0], [1], [0, 0, 1, 1], [], []>} : vector<16x6xf32>, vector<6x20xf32>, vector<16x20xf32> -> vector<16x20xf32>
    %268 = arith.addf %264, %267 : vector<16x20xf32>
    %269 = vector.extract_strided_slice %67 {offsets = [0, 12], sizes = [16, 6], strides = [1, 1]} : vector<16x66xf32> to vector<16x6xf32>
    %270 = vector.extract_strided_slice %259 {offsets = [0, 40], sizes = [6, 20], strides = [1, 1]} : vector<6x220xf32> to vector<6x20xf32>
    %cst_105 = arith.constant dense<0.000000e+00> : vector<16x20xf32>
    %271 = tpu.matmul %269, %270, %cst_105 {dimension_numbers = #tpu.dot_dimension_numbers<[1], [0], [0], [1], [0, 0, 1, 1], [], []>} : vector<16x6xf32>, vector<6x20xf32>, vector<16x20xf32> -> vector<16x20xf32>
    %272 = arith.addf %268, %271 : vector<16x20xf32>
    %273 = vector.extract_strided_slice %67 {offsets = [0, 18], sizes = [16, 6], strides = [1, 1]} : vector<16x66xf32> to vector<16x6xf32>
    %274 = vector.extract_strided_slice %259 {offsets = [0, 60], sizes = [6, 20], strides = [1, 1]} : vector<6x220xf32> to vector<6x20xf32>
    %cst_106 = arith.constant dense<0.000000e+00> : vector<16x20xf32>
    %275 = tpu.matmul %273, %274, %cst_106 {dimension_numbers = #tpu.dot_dimension_numbers<[1], [0], [0], [1], [0, 0, 1, 1], [], []>} : vector<16x6xf32>, vector<6x20xf32>, vector<16x20xf32> -> vector<16x20xf32>
    %276 = arith.addf %272, %275 : vector<16x20xf32>
    %277 = vector.extract_strided_slice %67 {offsets = [0, 24], sizes = [16, 6], strides = [1, 1]} : vector<16x66xf32> to vector<16x6xf32>
    %278 = vector.extract_strided_slice %259 {offsets = [0, 80], sizes = [6, 20], strides = [1, 1]} : vector<6x220xf32> to vector<6x20xf32>
    %cst_107 = arith.constant dense<0.000000e+00> : vector<16x20xf32>
    %279 = tpu.matmul %277, %278, %cst_107 {dimension_numbers = #tpu.dot_dimension_numbers<[1], [0], [0], [1], [0, 0, 1, 1], [], []>} : vector<16x6xf32>, vector<6x20xf32>, vector<16x20xf32> -> vector<16x20xf32>
    %280 = arith.addf %276, %279 : vector<16x20xf32>
    %281 = vector.extract_strided_slice %67 {offsets = [0, 30], sizes = [16, 6], strides = [1, 1]} : vector<16x66xf32> to vector<16x6xf32>
    %282 = vector.extract_strided_slice %259 {offsets = [0, 100], sizes = [6, 20], strides = [1, 1]} : vector<6x220xf32> to vector<6x20xf32>
    %cst_108 = arith.constant dense<0.000000e+00> : vector<16x20xf32>
    %283 = tpu.matmul %281, %282, %cst_108 {dimension_numbers = #tpu.dot_dimension_numbers<[1], [0], [0], [1], [0, 0, 1, 1], [], []>} : vector<16x6xf32>, vector<6x20xf32>, vector<16x20xf32> -> vector<16x20xf32>
    %284 = arith.addf %280, %283 : vector<16x20xf32>
    %285 = vector.extract_strided_slice %67 {offsets = [0, 36], sizes = [16, 6], strides = [1, 1]} : vector<16x66xf32> to vector<16x6xf32>
    %286 = vector.extract_strided_slice %259 {offsets = [0, 120], sizes = [6, 20], strides = [1, 1]} : vector<6x220xf32> to vector<6x20xf32>
    %cst_109 = arith.constant dense<0.000000e+00> : vector<16x20xf32>
    %287 = tpu.matmul %285, %286, %cst_109 {dimension_numbers = #tpu.dot_dimension_numbers<[1], [0], [0], [1], [0, 0, 1, 1], [], []>} : vector<16x6xf32>, vector<6x20xf32>, vector<16x20xf32> -> vector<16x20xf32>
    %288 = arith.addf %284, %287 : vector<16x20xf32>
    %289 = vector.extract_strided_slice %67 {offsets = [0, 42], sizes = [16, 6], strides = [1, 1]} : vector<16x66xf32> to vector<16x6xf32>
    %290 = vector.extract_strided_slice %259 {offsets = [0, 140], sizes = [6, 20], strides = [1, 1]} : vector<6x220xf32> to vector<6x20xf32>
    %cst_110 = arith.constant dense<0.000000e+00> : vector<16x20xf32>
    %291 = tpu.matmul %289, %290, %cst_110 {dimension_numbers = #tpu.dot_dimension_numbers<[1], [0], [0], [1], [0, 0, 1, 1], [], []>} : vector<16x6xf32>, vector<6x20xf32>, vector<16x20xf32> -> vector<16x20xf32>
    %292 = arith.addf %288, %291 : vector<16x20xf32>
    %293 = vector.extract_strided_slice %67 {offsets = [0, 48], sizes = [16, 6], strides = [1, 1]} : vector<16x66xf32> to vector<16x6xf32>
    %294 = vector.extract_strided_slice %259 {offsets = [0, 160], sizes = [6, 20], strides = [1, 1]} : vector<6x220xf32> to vector<6x20xf32>
    %cst_111 = arith.constant dense<0.000000e+00> : vector<16x20xf32>
    %295 = tpu.matmul %293, %294, %cst_111 {dimension_numbers = #tpu.dot_dimension_numbers<[1], [0], [0], [1], [0, 0, 1, 1], [], []>} : vector<16x6xf32>, vector<6x20xf32>, vector<16x20xf32> -> vector<16x20xf32>
    %296 = arith.addf %292, %295 : vector<16x20xf32>
    %297 = vector.extract_strided_slice %67 {offsets = [0, 54], sizes = [16, 6], strides = [1, 1]} : vector<16x66xf32> to vector<16x6xf32>
    %298 = vector.extract_strided_slice %259 {offsets = [0, 180], sizes = [6, 20], strides = [1, 1]} : vector<6x220xf32> to vector<6x20xf32>
    %cst_112 = arith.constant dense<0.000000e+00> : vector<16x20xf32>
    %299 = tpu.matmul %297, %298, %cst_112 {dimension_numbers = #tpu.dot_dimension_numbers<[1], [0], [0], [1], [0, 0, 1, 1], [], []>} : vector<16x6xf32>, vector<6x20xf32>, vector<16x20xf32> -> vector<16x20xf32>
    %300 = arith.addf %296, %299 : vector<16x20xf32>
    %301 = vector.extract_strided_slice %67 {offsets = [0, 60], sizes = [16, 6], strides = [1, 1]} : vector<16x66xf32> to vector<16x6xf32>
    %302 = vector.extract_strided_slice %259 {offsets = [0, 200], sizes = [6, 20], strides = [1, 1]} : vector<6x220xf32> to vector<6x20xf32>
    %cst_113 = arith.constant dense<0.000000e+00> : vector<16x20xf32>
    %303 = tpu.matmul %301, %302, %cst_113 {dimension_numbers = #tpu.dot_dimension_numbers<[1], [0], [0], [1], [0, 0, 1, 1], [], []>} : vector<16x6xf32>, vector<6x20xf32>, vector<16x20xf32> -> vector<16x20xf32>
    %304 = arith.addf %300, %303 : vector<16x20xf32>
    %cst_114 = arith.constant dense<0.000000e+00> : vector<16xf32>
    %305 = vector.multi_reduction <add>, %127, %cst_114 [1] : vector<16x20xf32> to vector<16xf32>
    %306 = vector.shape_cast %305 : vector<16xf32> to vector<16x1xf32>
    %307 = arith.mulf %127, %127 : vector<16x20xf32>
    %cst_115 = arith.constant dense<0.000000e+00> : vector<16xf32>
    %308 = vector.multi_reduction <add>, %307, %cst_115 [1] : vector<16x20xf32> to vector<16xf32>
    %309 = vector.shape_cast %308 : vector<16xf32> to vector<16x1xf32>
    %cst_116 = arith.constant dense<0.000000e+00> : vector<16xf32>
    %310 = vector.multi_reduction <add>, %186, %cst_116 [1] : vector<16x20xf32> to vector<16xf32>
    %311 = vector.shape_cast %310 : vector<16xf32> to vector<16x1xf32>
    %312 = arith.addf %306, %311 : vector<16x1xf32>
    %313 = arith.mulf %186, %186 : vector<16x20xf32>
    %cst_117 = arith.constant dense<0.000000e+00> : vector<16xf32>
    %314 = vector.multi_reduction <add>, %313, %cst_117 [1] : vector<16x20xf32> to vector<16xf32>
    %315 = vector.shape_cast %314 : vector<16xf32> to vector<16x1xf32>
    %316 = arith.addf %309, %315 : vector<16x1xf32>
    %cst_118 = arith.constant dense<0.000000e+00> : vector<16xf32>
    %317 = vector.multi_reduction <add>, %245, %cst_118 [1] : vector<16x20xf32> to vector<16xf32>
    %318 = vector.shape_cast %317 : vector<16xf32> to vector<16x1xf32>
    %319 = arith.addf %312, %318 : vector<16x1xf32>
    %320 = arith.mulf %245, %245 : vector<16x20xf32>
    %cst_119 = arith.constant dense<0.000000e+00> : vector<16xf32>
    %321 = vector.multi_reduction <add>, %320, %cst_119 [1] : vector<16x20xf32> to vector<16xf32>
    %322 = vector.shape_cast %321 : vector<16xf32> to vector<16x1xf32>
    %323 = arith.addf %316, %322 : vector<16x1xf32>
    %cst_120 = arith.constant dense<0.000000e+00> : vector<16xf32>
    %324 = vector.multi_reduction <add>, %304, %cst_120 [1] : vector<16x20xf32> to vector<16xf32>
    %325 = vector.shape_cast %324 : vector<16xf32> to vector<16x1xf32>
    %326 = arith.addf %319, %325 : vector<16x1xf32>
    %327 = arith.mulf %304, %304 : vector<16x20xf32>
    %cst_121 = arith.constant dense<0.000000e+00> : vector<16xf32>
    %328 = vector.multi_reduction <add>, %327, %cst_121 [1] : vector<16x20xf32> to vector<16xf32>
    %329 = vector.shape_cast %328 : vector<16xf32> to vector<16x1xf32>
    %330 = arith.addf %323, %329 : vector<16x1xf32>
    %cst_122 = arith.constant 8.000000e+01 : f32
    %331 = vector.broadcast %cst_122 : f32 to vector<16x1xf32>
    %332 = arith.divf %326, %331 : vector<16x1xf32>
    %cst_123 = arith.constant 8.000000e+01 : f32
    %333 = vector.broadcast %cst_123 : f32 to vector<16x1xf32>
    %334 = arith.divf %330, %333 : vector<16x1xf32>
    %335 = arith.mulf %332, %332 : vector<16x1xf32>
    %336 = arith.subf %334, %335 : vector<16x1xf32>
    %cst_124 = arith.constant 9.99999974E-6 : f32
    %337 = vector.broadcast %cst_124 : f32 to vector<16x1xf32>
    %338 = arith.addf %336, %337 : vector<16x1xf32>
    %339 = math.rsqrt %338 : vector<16x1xf32>
    %c0_125 = arith.constant 0 : index
    %c0_126 = arith.constant 0 : index
    %340 = vector.load %arg8[%c0_125, %c0_126] : memref<16x1xf32, #tpu.memory_space<vmem>>, vector<16x1xf32>
    %341 = arith.mulf %339, %340 : vector<16x1xf32>
    %c0_127 = arith.constant 0 : index
    %c0_128 = arith.constant 0 : index
    %342 = vector.load %arg9[%c0_127, %c0_128] : memref<16x1xf32, #tpu.memory_space<vmem>>, vector<16x1xf32>
    %343 = arith.mulf %332, %341 : vector<16x1xf32>
    %344 = arith.subf %342, %343 : vector<16x1xf32>
    %345 = vector.broadcast %341 : vector<16x1xf32> to vector<16x20xf32>
    %346 = arith.mulf %127, %345 : vector<16x20xf32>
    %347 = vector.broadcast %344 : vector<16x1xf32> to vector<16x20xf32>
    %348 = arith.addf %346, %347 : vector<16x20xf32>
    %349 = vector.extract_strided_slice %348 {offsets = [0, 0], sizes = [16, 1], strides = [1, 1]} : vector<16x20xf32> to vector<16x1xf32>
    %c0_129 = arith.constant 0 : index
    %c0_130 = arith.constant 0 : index
    %350 = vector.load %arg22[%c0_129, %c0_130] : memref<16x11xf32, #tpu.memory_space<vmem>>, vector<16x1xf32>
    tpu.vector_store %arg22[%c0_129, %c0_130], %349 {strides = array<i32>} : memref<16x11xf32, #tpu.memory_space<vmem>>, vector<16x1xf32>,
    %351 = vector.extract_strided_slice %348 {offsets = [0, 1], sizes = [16, 1], strides = [1, 1]} : vector<16x20xf32> to vector<16x1xf32>
    %352 = vector.extract_strided_slice %348 {offsets = [0, 2], sizes = [16, 1], strides = [1, 1]} : vector<16x20xf32> to vector<16x1xf32>
    %353 = arith.maximumf %351, %352 : vector<16x1xf32>
    %c0_131 = arith.constant 0 : index
    %c1_132 = arith.constant 1 : index
    %354 = vector.load %arg22[%c0_131, %c1_132] : memref<16x11xf32, #tpu.memory_space<vmem>>, vector<16x1xf32>
    tpu.vector_store %arg22[%c0_131, %c1_132], %353 {strides = array<i32>} : memref<16x11xf32, #tpu.memory_space<vmem>>, vector<16x1xf32>,
    %355 = vector.extract_strided_slice %348 {offsets = [0, 3], sizes = [16, 1], strides = [1, 1]} : vector<16x20xf32> to vector<16x1xf32>
    %356 = vector.extract_strided_slice %348 {offsets = [0, 4], sizes = [16, 1], strides = [1, 1]} : vector<16x20xf32> to vector<16x1xf32>
    %357 = arith.maximumf %355, %356 : vector<16x1xf32>
    %c0_133 = arith.constant 0 : index
    %c2 = arith.constant 2 : index
    %358 = vector.load %arg22[%c0_133, %c2] : memref<16x11xf32, #tpu.memory_space<vmem>>, vector<16x1xf32>
    tpu.vector_store %arg22[%c0_133, %c2], %357 {strides = array<i32>} : memref<16x11xf32, #tpu.memory_space<vmem>>, vector<16x1xf32>,
    %359 = vector.extract_strided_slice %348 {offsets = [0, 5], sizes = [16, 1], strides = [1, 1]} : vector<16x20xf32> to vector<16x1xf32>
    %360 = vector.extract_strided_slice %348 {offsets = [0, 6], sizes = [16, 1], strides = [1, 1]} : vector<16x20xf32> to vector<16x1xf32>
    %361 = arith.maximumf %359, %360 : vector<16x1xf32>
    %c0_134 = arith.constant 0 : index
    %c3 = arith.constant 3 : index
    %362 = vector.load %arg22[%c0_134, %c3] : memref<16x11xf32, #tpu.memory_space<vmem>>, vector<16x1xf32>
    tpu.vector_store %arg22[%c0_134, %c3], %361 {strides = array<i32>} : memref<16x11xf32, #tpu.memory_space<vmem>>, vector<16x1xf32>,
    %363 = vector.extract_strided_slice %348 {offsets = [0, 7], sizes = [16, 1], strides = [1, 1]} : vector<16x20xf32> to vector<16x1xf32>
    %364 = vector.extract_strided_slice %348 {offsets = [0, 8], sizes = [16, 1], strides = [1, 1]} : vector<16x20xf32> to vector<16x1xf32>
    %365 = arith.maximumf %363, %364 : vector<16x1xf32>
    %c0_135 = arith.constant 0 : index
    %c4 = arith.constant 4 : index
    %366 = vector.load %arg22[%c0_135, %c4] : memref<16x11xf32, #tpu.memory_space<vmem>>, vector<16x1xf32>
    tpu.vector_store %arg22[%c0_135, %c4], %365 {strides = array<i32>} : memref<16x11xf32, #tpu.memory_space<vmem>>, vector<16x1xf32>,
    %367 = vector.extract_strided_slice %348 {offsets = [0, 9], sizes = [16, 1], strides = [1, 1]} : vector<16x20xf32> to vector<16x1xf32>
    %368 = vector.extract_strided_slice %348 {offsets = [0, 10], sizes = [16, 1], strides = [1, 1]} : vector<16x20xf32> to vector<16x1xf32>
    %369 = arith.maximumf %367, %368 : vector<16x1xf32>
    %c0_136 = arith.constant 0 : index
    %c5 = arith.constant 5 : index
    %370 = vector.load %arg22[%c0_136, %c5] : memref<16x11xf32, #tpu.memory_space<vmem>>, vector<16x1xf32>
    tpu.vector_store %arg22[%c0_136, %c5], %369 {strides = array<i32>} : memref<16x11xf32, #tpu.memory_space<vmem>>, vector<16x1xf32>,
    %371 = vector.extract_strided_slice %348 {offsets = [0, 11], sizes = [16, 1], strides = [1, 1]} : vector<16x20xf32> to vector<16x1xf32>
    %372 = vector.extract_strided_slice %348 {offsets = [0, 12], sizes = [16, 1], strides = [1, 1]} : vector<16x20xf32> to vector<16x1xf32>
    %373 = arith.maximumf %371, %372 : vector<16x1xf32>
    %c0_137 = arith.constant 0 : index
    %c6 = arith.constant 6 : index
    %374 = vector.load %arg22[%c0_137, %c6] : memref<16x11xf32, #tpu.memory_space<vmem>>, vector<16x1xf32>
    tpu.vector_store %arg22[%c0_137, %c6], %373 {strides = array<i32>} : memref<16x11xf32, #tpu.memory_space<vmem>>, vector<16x1xf32>,
    %375 = vector.extract_strided_slice %348 {offsets = [0, 13], sizes = [16, 1], strides = [1, 1]} : vector<16x20xf32> to vector<16x1xf32>
    %376 = vector.extract_strided_slice %348 {offsets = [0, 14], sizes = [16, 1], strides = [1, 1]} : vector<16x20xf32> to vector<16x1xf32>
    %377 = arith.maximumf %375, %376 : vector<16x1xf32>
    %c0_138 = arith.constant 0 : index
    %c7 = arith.constant 7 : index
    %378 = vector.load %arg22[%c0_138, %c7] : memref<16x11xf32, #tpu.memory_space<vmem>>, vector<16x1xf32>
    tpu.vector_store %arg22[%c0_138, %c7], %377 {strides = array<i32>} : memref<16x11xf32, #tpu.memory_space<vmem>>, vector<16x1xf32>,
    %379 = vector.extract_strided_slice %348 {offsets = [0, 15], sizes = [16, 1], strides = [1, 1]} : vector<16x20xf32> to vector<16x1xf32>
    %380 = vector.extract_strided_slice %348 {offsets = [0, 16], sizes = [16, 1], strides = [1, 1]} : vector<16x20xf32> to vector<16x1xf32>
    %381 = arith.maximumf %379, %380 : vector<16x1xf32>
    %c0_139 = arith.constant 0 : index
    %c8 = arith.constant 8 : index
    %382 = vector.load %arg22[%c0_139, %c8] : memref<16x11xf32, #tpu.memory_space<vmem>>, vector<16x1xf32>
    tpu.vector_store %arg22[%c0_139, %c8], %381 {strides = array<i32>} : memref<16x11xf32, #tpu.memory_space<vmem>>, vector<16x1xf32>,
    %383 = vector.extract_strided_slice %348 {offsets = [0, 17], sizes = [16, 1], strides = [1, 1]} : vector<16x20xf32> to vector<16x1xf32>
    %384 = vector.extract_strided_slice %348 {offsets = [0, 18], sizes = [16, 1], strides = [1, 1]} : vector<16x20xf32> to vector<16x1xf32>
    %385 = arith.maximumf %383, %384 : vector<16x1xf32>
    %c0_140 = arith.constant 0 : index
    %c9 = arith.constant 9 : index
    %386 = vector.load %arg22[%c0_140, %c9] : memref<16x11xf32, #tpu.memory_space<vmem>>, vector<16x1xf32>
    tpu.vector_store %arg22[%c0_140, %c9], %385 {strides = array<i32>} : memref<16x11xf32, #tpu.memory_space<vmem>>, vector<16x1xf32>,
    %387 = vector.extract_strided_slice %348 {offsets = [0, 19], sizes = [16, 1], strides = [1, 1]} : vector<16x20xf32> to vector<16x1xf32>
    %c0_141 = arith.constant 0 : index
    %c10 = arith.constant 10 : index
    %388 = vector.load %arg22[%c0_141, %c10] : memref<16x11xf32, #tpu.memory_space<vmem>>, vector<16x1xf32>
    tpu.vector_store %arg22[%c0_141, %c10], %387 {strides = array<i32>} : memref<16x11xf32, #tpu.memory_space<vmem>>, vector<16x1xf32>,
    %c0_142 = arith.constant 0 : index
    %c0_143 = arith.constant 0 : index
    %389 = vector.load %arg22[%c0_142, %c0_143] : memref<16x11xf32, #tpu.memory_space<vmem>>, vector<16x11xf32>
    %cst_144 = arith.constant 0.000000e+00 : f32
    %390 = vector.broadcast %cst_144 : f32 to vector<16x11xf32>
    %391 = arith.maximumf %389, %390 : vector<16x11xf32>
    %392 = vector.extract_strided_slice %391 {offsets = [0, 0], sizes = [1, 11], strides = [1, 1]} : vector<16x11xf32> to vector<1x11xf32>
    %c0_145 = arith.constant 0 : index
    %c0_146 = arith.constant 0 : index
    %393 = vector.load %arg23[%c0_145, %c0_146] : memref<4x176xf32, #tpu.memory_space<vmem>>, vector<1x11xf32>
    tpu.vector_store %arg23[%c0_145, %c0_146], %392 {strides = array<i32>} : memref<4x176xf32, #tpu.memory_space<vmem>>, vector<1x11xf32>,
    %394 = vector.extract_strided_slice %391 {offsets = [1, 0], sizes = [1, 11], strides = [1, 1]} : vector<16x11xf32> to vector<1x11xf32>
    %c0_147 = arith.constant 0 : index
    %c11 = arith.constant 11 : index
    %395 = vector.load %arg23[%c0_147, %c11] : memref<4x176xf32, #tpu.memory_space<vmem>>, vector<1x11xf32>
    tpu.vector_store %arg23[%c0_147, %c11], %394 {strides = array<i32>} : memref<4x176xf32, #tpu.memory_space<vmem>>, vector<1x11xf32>,
    %396 = vector.extract_strided_slice %391 {offsets = [2, 0], sizes = [1, 11], strides = [1, 1]} : vector<16x11xf32> to vector<1x11xf32>
    %c0_148 = arith.constant 0 : index
    %c22 = arith.constant 22 : index
    %397 = vector.load %arg23[%c0_148, %c22] : memref<4x176xf32, #tpu.memory_space<vmem>>, vector<1x11xf32>
    tpu.vector_store %arg23[%c0_148, %c22], %396 {strides = array<i32>} : memref<4x176xf32, #tpu.memory_space<vmem>>, vector<1x11xf32>,
    %398 = vector.extract_strided_slice %391 {offsets = [3, 0], sizes = [1, 11], strides = [1, 1]} : vector<16x11xf32> to vector<1x11xf32>
    %c0_149 = arith.constant 0 : index
    %c33 = arith.constant 33 : index
    %399 = vector.load %arg23[%c0_149, %c33] : memref<4x176xf32, #tpu.memory_space<vmem>>, vector<1x11xf32>
    tpu.vector_store %arg23[%c0_149, %c33], %398 {strides = array<i32>} : memref<4x176xf32, #tpu.memory_space<vmem>>, vector<1x11xf32>,
    %400 = vector.extract_strided_slice %391 {offsets = [4, 0], sizes = [1, 11], strides = [1, 1]} : vector<16x11xf32> to vector<1x11xf32>
    %c0_150 = arith.constant 0 : index
    %c44 = arith.constant 44 : index
    %401 = vector.load %arg23[%c0_150, %c44] : memref<4x176xf32, #tpu.memory_space<vmem>>, vector<1x11xf32>
    tpu.vector_store %arg23[%c0_150, %c44], %400 {strides = array<i32>} : memref<4x176xf32, #tpu.memory_space<vmem>>, vector<1x11xf32>,
    %402 = vector.extract_strided_slice %391 {offsets = [5, 0], sizes = [1, 11], strides = [1, 1]} : vector<16x11xf32> to vector<1x11xf32>
    %c0_151 = arith.constant 0 : index
    %c55 = arith.constant 55 : index
    %403 = vector.load %arg23[%c0_151, %c55] : memref<4x176xf32, #tpu.memory_space<vmem>>, vector<1x11xf32>
    tpu.vector_store %arg23[%c0_151, %c55], %402 {strides = array<i32>} : memref<4x176xf32, #tpu.memory_space<vmem>>, vector<1x11xf32>,
    %404 = vector.extract_strided_slice %391 {offsets = [6, 0], sizes = [1, 11], strides = [1, 1]} : vector<16x11xf32> to vector<1x11xf32>
    %c0_152 = arith.constant 0 : index
    %c66 = arith.constant 66 : index
    %405 = vector.load %arg23[%c0_152, %c66] : memref<4x176xf32, #tpu.memory_space<vmem>>, vector<1x11xf32>
    tpu.vector_store %arg23[%c0_152, %c66], %404 {strides = array<i32>} : memref<4x176xf32, #tpu.memory_space<vmem>>, vector<1x11xf32>,
    %406 = vector.extract_strided_slice %391 {offsets = [7, 0], sizes = [1, 11], strides = [1, 1]} : vector<16x11xf32> to vector<1x11xf32>
    %c0_153 = arith.constant 0 : index
    %c77 = arith.constant 77 : index
    %407 = vector.load %arg23[%c0_153, %c77] : memref<4x176xf32, #tpu.memory_space<vmem>>, vector<1x11xf32>
    tpu.vector_store %arg23[%c0_153, %c77], %406 {strides = array<i32>} : memref<4x176xf32, #tpu.memory_space<vmem>>, vector<1x11xf32>,
    %408 = vector.extract_strided_slice %391 {offsets = [8, 0], sizes = [1, 11], strides = [1, 1]} : vector<16x11xf32> to vector<1x11xf32>
    %c0_154 = arith.constant 0 : index
    %c88 = arith.constant 88 : index
    %409 = vector.load %arg23[%c0_154, %c88] : memref<4x176xf32, #tpu.memory_space<vmem>>, vector<1x11xf32>
    tpu.vector_store %arg23[%c0_154, %c88], %408 {strides = array<i32>} : memref<4x176xf32, #tpu.memory_space<vmem>>, vector<1x11xf32>,
    %410 = vector.extract_strided_slice %391 {offsets = [9, 0], sizes = [1, 11], strides = [1, 1]} : vector<16x11xf32> to vector<1x11xf32>
    %c0_155 = arith.constant 0 : index
    %c99 = arith.constant 99 : index
    %411 = vector.load %arg23[%c0_155, %c99] : memref<4x176xf32, #tpu.memory_space<vmem>>, vector<1x11xf32>
    tpu.vector_store %arg23[%c0_155, %c99], %410 {strides = array<i32>} : memref<4x176xf32, #tpu.memory_space<vmem>>, vector<1x11xf32>,
    %412 = vector.extract_strided_slice %391 {offsets = [10, 0], sizes = [1, 11], strides = [1, 1]} : vector<16x11xf32> to vector<1x11xf32>
    %c0_156 = arith.constant 0 : index
    %c110 = arith.constant 110 : index
    %413 = vector.load %arg23[%c0_156, %c110] : memref<4x176xf32, #tpu.memory_space<vmem>>, vector<1x11xf32>
    tpu.vector_store %arg23[%c0_156, %c110], %412 {strides = array<i32>} : memref<4x176xf32, #tpu.memory_space<vmem>>, vector<1x11xf32>,
    %414 = vector.extract_strided_slice %391 {offsets = [11, 0], sizes = [1, 11], strides = [1, 1]} : vector<16x11xf32> to vector<1x11xf32>
    %c0_157 = arith.constant 0 : index
    %c121 = arith.constant 121 : index
    %415 = vector.load %arg23[%c0_157, %c121] : memref<4x176xf32, #tpu.memory_space<vmem>>, vector<1x11xf32>
    tpu.vector_store %arg23[%c0_157, %c121], %414 {strides = array<i32>} : memref<4x176xf32, #tpu.memory_space<vmem>>, vector<1x11xf32>,
    %416 = vector.extract_strided_slice %391 {offsets = [12, 0], sizes = [1, 11], strides = [1, 1]} : vector<16x11xf32> to vector<1x11xf32>
    %c0_158 = arith.constant 0 : index
    %c132 = arith.constant 132 : index
    %417 = vector.load %arg23[%c0_158, %c132] : memref<4x176xf32, #tpu.memory_space<vmem>>, vector<1x11xf32>
    tpu.vector_store %arg23[%c0_158, %c132], %416 {strides = array<i32>} : memref<4x176xf32, #tpu.memory_space<vmem>>, vector<1x11xf32>,
    %418 = vector.extract_strided_slice %391 {offsets = [13, 0], sizes = [1, 11], strides = [1, 1]} : vector<16x11xf32> to vector<1x11xf32>
    %c0_159 = arith.constant 0 : index
    %c143 = arith.constant 143 : index
    %419 = vector.load %arg23[%c0_159, %c143] : memref<4x176xf32, #tpu.memory_space<vmem>>, vector<1x11xf32>
    tpu.vector_store %arg23[%c0_159, %c143], %418 {strides = array<i32>} : memref<4x176xf32, #tpu.memory_space<vmem>>, vector<1x11xf32>,
    %420 = vector.extract_strided_slice %391 {offsets = [14, 0], sizes = [1, 11], strides = [1, 1]} : vector<16x11xf32> to vector<1x11xf32>
    %c0_160 = arith.constant 0 : index
    %c154 = arith.constant 154 : index
    %421 = vector.load %arg23[%c0_160, %c154] : memref<4x176xf32, #tpu.memory_space<vmem>>, vector<1x11xf32>
    tpu.vector_store %arg23[%c0_160, %c154], %420 {strides = array<i32>} : memref<4x176xf32, #tpu.memory_space<vmem>>, vector<1x11xf32>,
    %422 = vector.extract_strided_slice %391 {offsets = [15, 0], sizes = [1, 11], strides = [1, 1]} : vector<16x11xf32> to vector<1x11xf32>
    %c0_161 = arith.constant 0 : index
    %c165 = arith.constant 165 : index
    %423 = vector.load %arg23[%c0_161, %c165] : memref<4x176xf32, #tpu.memory_space<vmem>>, vector<1x11xf32>
    tpu.vector_store %arg23[%c0_161, %c165], %422 {strides = array<i32>} : memref<4x176xf32, #tpu.memory_space<vmem>>, vector<1x11xf32>,
    %424 = vector.broadcast %341 : vector<16x1xf32> to vector<16x20xf32>
    %425 = arith.mulf %186, %424 : vector<16x20xf32>
    %426 = vector.broadcast %344 : vector<16x1xf32> to vector<16x20xf32>
    %427 = arith.addf %425, %426 : vector<16x20xf32>
    %428 = vector.extract_strided_slice %427 {offsets = [0, 0], sizes = [16, 1], strides = [1, 1]} : vector<16x20xf32> to vector<16x1xf32>
    %c0_162 = arith.constant 0 : index
    %c0_163 = arith.constant 0 : index
    %429 = vector.load %arg22[%c0_162, %c0_163] : memref<16x11xf32, #tpu.memory_space<vmem>>, vector<16x1xf32>
    tpu.vector_store %arg22[%c0_162, %c0_163], %428 {strides = array<i32>} : memref<16x11xf32, #tpu.memory_space<vmem>>, vector<16x1xf32>,
    %430 = vector.extract_strided_slice %427 {offsets = [0, 1], sizes = [16, 1], strides = [1, 1]} : vector<16x20xf32> to vector<16x1xf32>
    %431 = vector.extract_strided_slice %427 {offsets = [0, 2], sizes = [16, 1], strides = [1, 1]} : vector<16x20xf32> to vector<16x1xf32>
    %432 = arith.maximumf %430, %431 : vector<16x1xf32>
    %c0_164 = arith.constant 0 : index
    %c1_165 = arith.constant 1 : index
    %433 = vector.load %arg22[%c0_164, %c1_165] : memref<16x11xf32, #tpu.memory_space<vmem>>, vector<16x1xf32>
    tpu.vector_store %arg22[%c0_164, %c1_165], %432 {strides = array<i32>} : memref<16x11xf32, #tpu.memory_space<vmem>>, vector<16x1xf32>,
    %434 = vector.extract_strided_slice %427 {offsets = [0, 3], sizes = [16, 1], strides = [1, 1]} : vector<16x20xf32> to vector<16x1xf32>
    %435 = vector.extract_strided_slice %427 {offsets = [0, 4], sizes = [16, 1], strides = [1, 1]} : vector<16x20xf32> to vector<16x1xf32>
    %436 = arith.maximumf %434, %435 : vector<16x1xf32>
    %c0_166 = arith.constant 0 : index
    %c2_167 = arith.constant 2 : index
    %437 = vector.load %arg22[%c0_166, %c2_167] : memref<16x11xf32, #tpu.memory_space<vmem>>, vector<16x1xf32>
    tpu.vector_store %arg22[%c0_166, %c2_167], %436 {strides = array<i32>} : memref<16x11xf32, #tpu.memory_space<vmem>>, vector<16x1xf32>,
    %438 = vector.extract_strided_slice %427 {offsets = [0, 5], sizes = [16, 1], strides = [1, 1]} : vector<16x20xf32> to vector<16x1xf32>
    %439 = vector.extract_strided_slice %427 {offsets = [0, 6], sizes = [16, 1], strides = [1, 1]} : vector<16x20xf32> to vector<16x1xf32>
    %440 = arith.maximumf %438, %439 : vector<16x1xf32>
    %c0_168 = arith.constant 0 : index
    %c3_169 = arith.constant 3 : index
    %441 = vector.load %arg22[%c0_168, %c3_169] : memref<16x11xf32, #tpu.memory_space<vmem>>, vector<16x1xf32>
    tpu.vector_store %arg22[%c0_168, %c3_169], %440 {strides = array<i32>} : memref<16x11xf32, #tpu.memory_space<vmem>>, vector<16x1xf32>,
    %442 = vector.extract_strided_slice %427 {offsets = [0, 7], sizes = [16, 1], strides = [1, 1]} : vector<16x20xf32> to vector<16x1xf32>
    %443 = vector.extract_strided_slice %427 {offsets = [0, 8], sizes = [16, 1], strides = [1, 1]} : vector<16x20xf32> to vector<16x1xf32>
    %444 = arith.maximumf %442, %443 : vector<16x1xf32>
    %c0_170 = arith.constant 0 : index
    %c4_171 = arith.constant 4 : index
    %445 = vector.load %arg22[%c0_170, %c4_171] : memref<16x11xf32, #tpu.memory_space<vmem>>, vector<16x1xf32>
    tpu.vector_store %arg22[%c0_170, %c4_171], %444 {strides = array<i32>} : memref<16x11xf32, #tpu.memory_space<vmem>>, vector<16x1xf32>,
    %446 = vector.extract_strided_slice %427 {offsets = [0, 9], sizes = [16, 1], strides = [1, 1]} : vector<16x20xf32> to vector<16x1xf32>
    %447 = vector.extract_strided_slice %427 {offsets = [0, 10], sizes = [16, 1], strides = [1, 1]} : vector<16x20xf32> to vector<16x1xf32>
    %448 = arith.maximumf %446, %447 : vector<16x1xf32>
    %c0_172 = arith.constant 0 : index
    %c5_173 = arith.constant 5 : index
    %449 = vector.load %arg22[%c0_172, %c5_173] : memref<16x11xf32, #tpu.memory_space<vmem>>, vector<16x1xf32>
    tpu.vector_store %arg22[%c0_172, %c5_173], %448 {strides = array<i32>} : memref<16x11xf32, #tpu.memory_space<vmem>>, vector<16x1xf32>,
    %450 = vector.extract_strided_slice %427 {offsets = [0, 11], sizes = [16, 1], strides = [1, 1]} : vector<16x20xf32> to vector<16x1xf32>
    %451 = vector.extract_strided_slice %427 {offsets = [0, 12], sizes = [16, 1], strides = [1, 1]} : vector<16x20xf32> to vector<16x1xf32>
    %452 = arith.maximumf %450, %451 : vector<16x1xf32>
    %c0_174 = arith.constant 0 : index
    %c6_175 = arith.constant 6 : index
    %453 = vector.load %arg22[%c0_174, %c6_175] : memref<16x11xf32, #tpu.memory_space<vmem>>, vector<16x1xf32>
    tpu.vector_store %arg22[%c0_174, %c6_175], %452 {strides = array<i32>} : memref<16x11xf32, #tpu.memory_space<vmem>>, vector<16x1xf32>,
    %454 = vector.extract_strided_slice %427 {offsets = [0, 13], sizes = [16, 1], strides = [1, 1]} : vector<16x20xf32> to vector<16x1xf32>
    %455 = vector.extract_strided_slice %427 {offsets = [0, 14], sizes = [16, 1], strides = [1, 1]} : vector<16x20xf32> to vector<16x1xf32>
    %456 = arith.maximumf %454, %455 : vector<16x1xf32>
    %c0_176 = arith.constant 0 : index
    %c7_177 = arith.constant 7 : index
    %457 = vector.load %arg22[%c0_176, %c7_177] : memref<16x11xf32, #tpu.memory_space<vmem>>, vector<16x1xf32>
    tpu.vector_store %arg22[%c0_176, %c7_177], %456 {strides = array<i32>} : memref<16x11xf32, #tpu.memory_space<vmem>>, vector<16x1xf32>,
    %458 = vector.extract_strided_slice %427 {offsets = [0, 15], sizes = [16, 1], strides = [1, 1]} : vector<16x20xf32> to vector<16x1xf32>
    %459 = vector.extract_strided_slice %427 {offsets = [0, 16], sizes = [16, 1], strides = [1, 1]} : vector<16x20xf32> to vector<16x1xf32>
    %460 = arith.maximumf %458, %459 : vector<16x1xf32>
    %c0_178 = arith.constant 0 : index
    %c8_179 = arith.constant 8 : index
    %461 = vector.load %arg22[%c0_178, %c8_179] : memref<16x11xf32, #tpu.memory_space<vmem>>, vector<16x1xf32>
    tpu.vector_store %arg22[%c0_178, %c8_179], %460 {strides = array<i32>} : memref<16x11xf32, #tpu.memory_space<vmem>>, vector<16x1xf32>,
    %462 = vector.extract_strided_slice %427 {offsets = [0, 17], sizes = [16, 1], strides = [1, 1]} : vector<16x20xf32> to vector<16x1xf32>
    %463 = vector.extract_strided_slice %427 {offsets = [0, 18], sizes = [16, 1], strides = [1, 1]} : vector<16x20xf32> to vector<16x1xf32>
    %464 = arith.maximumf %462, %463 : vector<16x1xf32>
    %c0_180 = arith.constant 0 : index
    %c9_181 = arith.constant 9 : index
    %465 = vector.load %arg22[%c0_180, %c9_181] : memref<16x11xf32, #tpu.memory_space<vmem>>, vector<16x1xf32>
    tpu.vector_store %arg22[%c0_180, %c9_181], %464 {strides = array<i32>} : memref<16x11xf32, #tpu.memory_space<vmem>>, vector<16x1xf32>,
    %466 = vector.extract_strided_slice %427 {offsets = [0, 19], sizes = [16, 1], strides = [1, 1]} : vector<16x20xf32> to vector<16x1xf32>
    %c0_182 = arith.constant 0 : index
    %c10_183 = arith.constant 10 : index
    %467 = vector.load %arg22[%c0_182, %c10_183] : memref<16x11xf32, #tpu.memory_space<vmem>>, vector<16x1xf32>
    tpu.vector_store %arg22[%c0_182, %c10_183], %466 {strides = array<i32>} : memref<16x11xf32, #tpu.memory_space<vmem>>, vector<16x1xf32>,
    %c0_184 = arith.constant 0 : index
    %c0_185 = arith.constant 0 : index
    %468 = vector.load %arg22[%c0_184, %c0_185] : memref<16x11xf32, #tpu.memory_space<vmem>>, vector<16x11xf32>
    %cst_186 = arith.constant 0.000000e+00 : f32
    %469 = vector.broadcast %cst_186 : f32 to vector<16x11xf32>
    %470 = arith.maximumf %468, %469 : vector<16x11xf32>
    %471 = vector.extract_strided_slice %470 {offsets = [0, 0], sizes = [1, 11], strides = [1, 1]} : vector<16x11xf32> to vector<1x11xf32>
    %c1_187 = arith.constant 1 : index
    %c0_188 = arith.constant 0 : index
    %472 = vector.load %arg23[%c1_187, %c0_188] : memref<4x176xf32, #tpu.memory_space<vmem>>, vector<1x11xf32>
    tpu.vector_store %arg23[%c1_187, %c0_188], %471 {strides = array<i32>} : memref<4x176xf32, #tpu.memory_space<vmem>>, vector<1x11xf32>,
    %473 = vector.extract_strided_slice %470 {offsets = [1, 0], sizes = [1, 11], strides = [1, 1]} : vector<16x11xf32> to vector<1x11xf32>
    %c1_189 = arith.constant 1 : index
    %c11_190 = arith.constant 11 : index
    %474 = vector.load %arg23[%c1_189, %c11_190] : memref<4x176xf32, #tpu.memory_space<vmem>>, vector<1x11xf32>
    tpu.vector_store %arg23[%c1_189, %c11_190], %473 {strides = array<i32>} : memref<4x176xf32, #tpu.memory_space<vmem>>, vector<1x11xf32>,
    %475 = vector.extract_strided_slice %470 {offsets = [2, 0], sizes = [1, 11], strides = [1, 1]} : vector<16x11xf32> to vector<1x11xf32>
    %c1_191 = arith.constant 1 : index
    %c22_192 = arith.constant 22 : index
    %476 = vector.load %arg23[%c1_191, %c22_192] : memref<4x176xf32, #tpu.memory_space<vmem>>, vector<1x11xf32>
    tpu.vector_store %arg23[%c1_191, %c22_192], %475 {strides = array<i32>} : memref<4x176xf32, #tpu.memory_space<vmem>>, vector<1x11xf32>,
    %477 = vector.extract_strided_slice %470 {offsets = [3, 0], sizes = [1, 11], strides = [1, 1]} : vector<16x11xf32> to vector<1x11xf32>
    %c1_193 = arith.constant 1 : index
    %c33_194 = arith.constant 33 : index
    %478 = vector.load %arg23[%c1_193, %c33_194] : memref<4x176xf32, #tpu.memory_space<vmem>>, vector<1x11xf32>
    tpu.vector_store %arg23[%c1_193, %c33_194], %477 {strides = array<i32>} : memref<4x176xf32, #tpu.memory_space<vmem>>, vector<1x11xf32>,
    %479 = vector.extract_strided_slice %470 {offsets = [4, 0], sizes = [1, 11], strides = [1, 1]} : vector<16x11xf32> to vector<1x11xf32>
    %c1_195 = arith.constant 1 : index
    %c44_196 = arith.constant 44 : index
    %480 = vector.load %arg23[%c1_195, %c44_196] : memref<4x176xf32, #tpu.memory_space<vmem>>, vector<1x11xf32>
    tpu.vector_store %arg23[%c1_195, %c44_196], %479 {strides = array<i32>} : memref<4x176xf32, #tpu.memory_space<vmem>>, vector<1x11xf32>,
    %481 = vector.extract_strided_slice %470 {offsets = [5, 0], sizes = [1, 11], strides = [1, 1]} : vector<16x11xf32> to vector<1x11xf32>
    %c1_197 = arith.constant 1 : index
    %c55_198 = arith.constant 55 : index
    %482 = vector.load %arg23[%c1_197, %c55_198] : memref<4x176xf32, #tpu.memory_space<vmem>>, vector<1x11xf32>
    tpu.vector_store %arg23[%c1_197, %c55_198], %481 {strides = array<i32>} : memref<4x176xf32, #tpu.memory_space<vmem>>, vector<1x11xf32>,
    %483 = vector.extract_strided_slice %470 {offsets = [6, 0], sizes = [1, 11], strides = [1, 1]} : vector<16x11xf32> to vector<1x11xf32>
    %c1_199 = arith.constant 1 : index
    %c66_200 = arith.constant 66 : index
    %484 = vector.load %arg23[%c1_199, %c66_200] : memref<4x176xf32, #tpu.memory_space<vmem>>, vector<1x11xf32>
    tpu.vector_store %arg23[%c1_199, %c66_200], %483 {strides = array<i32>} : memref<4x176xf32, #tpu.memory_space<vmem>>, vector<1x11xf32>,
    %485 = vector.extract_strided_slice %470 {offsets = [7, 0], sizes = [1, 11], strides = [1, 1]} : vector<16x11xf32> to vector<1x11xf32>
    %c1_201 = arith.constant 1 : index
    %c77_202 = arith.constant 77 : index
    %486 = vector.load %arg23[%c1_201, %c77_202] : memref<4x176xf32, #tpu.memory_space<vmem>>, vector<1x11xf32>
    tpu.vector_store %arg23[%c1_201, %c77_202], %485 {strides = array<i32>} : memref<4x176xf32, #tpu.memory_space<vmem>>, vector<1x11xf32>,
    %487 = vector.extract_strided_slice %470 {offsets = [8, 0], sizes = [1, 11], strides = [1, 1]} : vector<16x11xf32> to vector<1x11xf32>
    %c1_203 = arith.constant 1 : index
    %c88_204 = arith.constant 88 : index
    %488 = vector.load %arg23[%c1_203, %c88_204] : memref<4x176xf32, #tpu.memory_space<vmem>>, vector<1x11xf32>
    tpu.vector_store %arg23[%c1_203, %c88_204], %487 {strides = array<i32>} : memref<4x176xf32, #tpu.memory_space<vmem>>, vector<1x11xf32>,
    %489 = vector.extract_strided_slice %470 {offsets = [9, 0], sizes = [1, 11], strides = [1, 1]} : vector<16x11xf32> to vector<1x11xf32>
    %c1_205 = arith.constant 1 : index
    %c99_206 = arith.constant 99 : index
    %490 = vector.load %arg23[%c1_205, %c99_206] : memref<4x176xf32, #tpu.memory_space<vmem>>, vector<1x11xf32>
    tpu.vector_store %arg23[%c1_205, %c99_206], %489 {strides = array<i32>} : memref<4x176xf32, #tpu.memory_space<vmem>>, vector<1x11xf32>,
    %491 = vector.extract_strided_slice %470 {offsets = [10, 0], sizes = [1, 11], strides = [1, 1]} : vector<16x11xf32> to vector<1x11xf32>
    %c1_207 = arith.constant 1 : index
    %c110_208 = arith.constant 110 : index
    %492 = vector.load %arg23[%c1_207, %c110_208] : memref<4x176xf32, #tpu.memory_space<vmem>>, vector<1x11xf32>
    tpu.vector_store %arg23[%c1_207, %c110_208], %491 {strides = array<i32>} : memref<4x176xf32, #tpu.memory_space<vmem>>, vector<1x11xf32>,
    %493 = vector.extract_strided_slice %470 {offsets = [11, 0], sizes = [1, 11], strides = [1, 1]} : vector<16x11xf32> to vector<1x11xf32>
    %c1_209 = arith.constant 1 : index
    %c121_210 = arith.constant 121 : index
    %494 = vector.load %arg23[%c1_209, %c121_210] : memref<4x176xf32, #tpu.memory_space<vmem>>, vector<1x11xf32>
    tpu.vector_store %arg23[%c1_209, %c121_210], %493 {strides = array<i32>} : memref<4x176xf32, #tpu.memory_space<vmem>>, vector<1x11xf32>,
    %495 = vector.extract_strided_slice %470 {offsets = [12, 0], sizes = [1, 11], strides = [1, 1]} : vector<16x11xf32> to vector<1x11xf32>
    %c1_211 = arith.constant 1 : index
    %c132_212 = arith.constant 132 : index
    %496 = vector.load %arg23[%c1_211, %c132_212] : memref<4x176xf32, #tpu.memory_space<vmem>>, vector<1x11xf32>
    tpu.vector_store %arg23[%c1_211, %c132_212], %495 {strides = array<i32>} : memref<4x176xf32, #tpu.memory_space<vmem>>, vector<1x11xf32>,
    %497 = vector.extract_strided_slice %470 {offsets = [13, 0], sizes = [1, 11], strides = [1, 1]} : vector<16x11xf32> to vector<1x11xf32>
    %c1_213 = arith.constant 1 : index
    %c143_214 = arith.constant 143 : index
    %498 = vector.load %arg23[%c1_213, %c143_214] : memref<4x176xf32, #tpu.memory_space<vmem>>, vector<1x11xf32>
    tpu.vector_store %arg23[%c1_213, %c143_214], %497 {strides = array<i32>} : memref<4x176xf32, #tpu.memory_space<vmem>>, vector<1x11xf32>,
    %499 = vector.extract_strided_slice %470 {offsets = [14, 0], sizes = [1, 11], strides = [1, 1]} : vector<16x11xf32> to vector<1x11xf32>
    %c1_215 = arith.constant 1 : index
    %c154_216 = arith.constant 154 : index
    %500 = vector.load %arg23[%c1_215, %c154_216] : memref<4x176xf32, #tpu.memory_space<vmem>>, vector<1x11xf32>
    tpu.vector_store %arg23[%c1_215, %c154_216], %499 {strides = array<i32>} : memref<4x176xf32, #tpu.memory_space<vmem>>, vector<1x11xf32>,
    %501 = vector.extract_strided_slice %470 {offsets = [15, 0], sizes = [1, 11], strides = [1, 1]} : vector<16x11xf32> to vector<1x11xf32>
    %c1_217 = arith.constant 1 : index
    %c165_218 = arith.constant 165 : index
    %502 = vector.load %arg23[%c1_217, %c165_218] : memref<4x176xf32, #tpu.memory_space<vmem>>, vector<1x11xf32>
    tpu.vector_store %arg23[%c1_217, %c165_218], %501 {strides = array<i32>} : memref<4x176xf32, #tpu.memory_space<vmem>>, vector<1x11xf32>,
    %503 = vector.broadcast %341 : vector<16x1xf32> to vector<16x20xf32>
    %504 = arith.mulf %245, %503 : vector<16x20xf32>
    %505 = vector.broadcast %344 : vector<16x1xf32> to vector<16x20xf32>
    %506 = arith.addf %504, %505 : vector<16x20xf32>
    %507 = vector.extract_strided_slice %506 {offsets = [0, 0], sizes = [16, 1], strides = [1, 1]} : vector<16x20xf32> to vector<16x1xf32>
    %c0_219 = arith.constant 0 : index
    %c0_220 = arith.constant 0 : index
    %508 = vector.load %arg22[%c0_219, %c0_220] : memref<16x11xf32, #tpu.memory_space<vmem>>, vector<16x1xf32>
    tpu.vector_store %arg22[%c0_219, %c0_220], %507 {strides = array<i32>} : memref<16x11xf32, #tpu.memory_space<vmem>>, vector<16x1xf32>,
    %509 = vector.extract_strided_slice %506 {offsets = [0, 1], sizes = [16, 1], strides = [1, 1]} : vector<16x20xf32> to vector<16x1xf32>
    %510 = vector.extract_strided_slice %506 {offsets = [0, 2], sizes = [16, 1], strides = [1, 1]} : vector<16x20xf32> to vector<16x1xf32>
    %511 = arith.maximumf %509, %510 : vector<16x1xf32>
    %c0_221 = arith.constant 0 : index
    %c1_222 = arith.constant 1 : index
    %512 = vector.load %arg22[%c0_221, %c1_222] : memref<16x11xf32, #tpu.memory_space<vmem>>, vector<16x1xf32>
    tpu.vector_store %arg22[%c0_221, %c1_222], %511 {strides = array<i32>} : memref<16x11xf32, #tpu.memory_space<vmem>>, vector<16x1xf32>,
    %513 = vector.extract_strided_slice %506 {offsets = [0, 3], sizes = [16, 1], strides = [1, 1]} : vector<16x20xf32> to vector<16x1xf32>
    %514 = vector.extract_strided_slice %506 {offsets = [0, 4], sizes = [16, 1], strides = [1, 1]} : vector<16x20xf32> to vector<16x1xf32>
    %515 = arith.maximumf %513, %514 : vector<16x1xf32>
    %c0_223 = arith.constant 0 : index
    %c2_224 = arith.constant 2 : index
    %516 = vector.load %arg22[%c0_223, %c2_224] : memref<16x11xf32, #tpu.memory_space<vmem>>, vector<16x1xf32>
    tpu.vector_store %arg22[%c0_223, %c2_224], %515 {strides = array<i32>} : memref<16x11xf32, #tpu.memory_space<vmem>>, vector<16x1xf32>,
    %517 = vector.extract_strided_slice %506 {offsets = [0, 5], sizes = [16, 1], strides = [1, 1]} : vector<16x20xf32> to vector<16x1xf32>
    %518 = vector.extract_strided_slice %506 {offsets = [0, 6], sizes = [16, 1], strides = [1, 1]} : vector<16x20xf32> to vector<16x1xf32>
    %519 = arith.maximumf %517, %518 : vector<16x1xf32>
    %c0_225 = arith.constant 0 : index
    %c3_226 = arith.constant 3 : index
    %520 = vector.load %arg22[%c0_225, %c3_226] : memref<16x11xf32, #tpu.memory_space<vmem>>, vector<16x1xf32>
    tpu.vector_store %arg22[%c0_225, %c3_226], %519 {strides = array<i32>} : memref<16x11xf32, #tpu.memory_space<vmem>>, vector<16x1xf32>,
    %521 = vector.extract_strided_slice %506 {offsets = [0, 7], sizes = [16, 1], strides = [1, 1]} : vector<16x20xf32> to vector<16x1xf32>
    %522 = vector.extract_strided_slice %506 {offsets = [0, 8], sizes = [16, 1], strides = [1, 1]} : vector<16x20xf32> to vector<16x1xf32>
    %523 = arith.maximumf %521, %522 : vector<16x1xf32>
    %c0_227 = arith.constant 0 : index
    %c4_228 = arith.constant 4 : index
    %524 = vector.load %arg22[%c0_227, %c4_228] : memref<16x11xf32, #tpu.memory_space<vmem>>, vector<16x1xf32>
    tpu.vector_store %arg22[%c0_227, %c4_228], %523 {strides = array<i32>} : memref<16x11xf32, #tpu.memory_space<vmem>>, vector<16x1xf32>,
    %525 = vector.extract_strided_slice %506 {offsets = [0, 9], sizes = [16, 1], strides = [1, 1]} : vector<16x20xf32> to vector<16x1xf32>
    %526 = vector.extract_strided_slice %506 {offsets = [0, 10], sizes = [16, 1], strides = [1, 1]} : vector<16x20xf32> to vector<16x1xf32>
    %527 = arith.maximumf %525, %526 : vector<16x1xf32>
    %c0_229 = arith.constant 0 : index
    %c5_230 = arith.constant 5 : index
    %528 = vector.load %arg22[%c0_229, %c5_230] : memref<16x11xf32, #tpu.memory_space<vmem>>, vector<16x1xf32>
    tpu.vector_store %arg22[%c0_229, %c5_230], %527 {strides = array<i32>} : memref<16x11xf32, #tpu.memory_space<vmem>>, vector<16x1xf32>,
    %529 = vector.extract_strided_slice %506 {offsets = [0, 11], sizes = [16, 1], strides = [1, 1]} : vector<16x20xf32> to vector<16x1xf32>
    %530 = vector.extract_strided_slice %506 {offsets = [0, 12], sizes = [16, 1], strides = [1, 1]} : vector<16x20xf32> to vector<16x1xf32>
    %531 = arith.maximumf %529, %530 : vector<16x1xf32>
    %c0_231 = arith.constant 0 : index
    %c6_232 = arith.constant 6 : index
    %532 = vector.load %arg22[%c0_231, %c6_232] : memref<16x11xf32, #tpu.memory_space<vmem>>, vector<16x1xf32>
    tpu.vector_store %arg22[%c0_231, %c6_232], %531 {strides = array<i32>} : memref<16x11xf32, #tpu.memory_space<vmem>>, vector<16x1xf32>,
    %533 = vector.extract_strided_slice %506 {offsets = [0, 13], sizes = [16, 1], strides = [1, 1]} : vector<16x20xf32> to vector<16x1xf32>
    %534 = vector.extract_strided_slice %506 {offsets = [0, 14], sizes = [16, 1], strides = [1, 1]} : vector<16x20xf32> to vector<16x1xf32>
    %535 = arith.maximumf %533, %534 : vector<16x1xf32>
    %c0_233 = arith.constant 0 : index
    %c7_234 = arith.constant 7 : index
    %536 = vector.load %arg22[%c0_233, %c7_234] : memref<16x11xf32, #tpu.memory_space<vmem>>, vector<16x1xf32>
    tpu.vector_store %arg22[%c0_233, %c7_234], %535 {strides = array<i32>} : memref<16x11xf32, #tpu.memory_space<vmem>>, vector<16x1xf32>,
    %537 = vector.extract_strided_slice %506 {offsets = [0, 15], sizes = [16, 1], strides = [1, 1]} : vector<16x20xf32> to vector<16x1xf32>
    %538 = vector.extract_strided_slice %506 {offsets = [0, 16], sizes = [16, 1], strides = [1, 1]} : vector<16x20xf32> to vector<16x1xf32>
    %539 = arith.maximumf %537, %538 : vector<16x1xf32>
    %c0_235 = arith.constant 0 : index
    %c8_236 = arith.constant 8 : index
    %540 = vector.load %arg22[%c0_235, %c8_236] : memref<16x11xf32, #tpu.memory_space<vmem>>, vector<16x1xf32>
    tpu.vector_store %arg22[%c0_235, %c8_236], %539 {strides = array<i32>} : memref<16x11xf32, #tpu.memory_space<vmem>>, vector<16x1xf32>,
    %541 = vector.extract_strided_slice %506 {offsets = [0, 17], sizes = [16, 1], strides = [1, 1]} : vector<16x20xf32> to vector<16x1xf32>
    %542 = vector.extract_strided_slice %506 {offsets = [0, 18], sizes = [16, 1], strides = [1, 1]} : vector<16x20xf32> to vector<16x1xf32>
    %543 = arith.maximumf %541, %542 : vector<16x1xf32>
    %c0_237 = arith.constant 0 : index
    %c9_238 = arith.constant 9 : index
    %544 = vector.load %arg22[%c0_237, %c9_238] : memref<16x11xf32, #tpu.memory_space<vmem>>, vector<16x1xf32>
    tpu.vector_store %arg22[%c0_237, %c9_238], %543 {strides = array<i32>} : memref<16x11xf32, #tpu.memory_space<vmem>>, vector<16x1xf32>,
    %545 = vector.extract_strided_slice %506 {offsets = [0, 19], sizes = [16, 1], strides = [1, 1]} : vector<16x20xf32> to vector<16x1xf32>
    %c0_239 = arith.constant 0 : index
    %c10_240 = arith.constant 10 : index
    %546 = vector.load %arg22[%c0_239, %c10_240] : memref<16x11xf32, #tpu.memory_space<vmem>>, vector<16x1xf32>
    tpu.vector_store %arg22[%c0_239, %c10_240], %545 {strides = array<i32>} : memref<16x11xf32, #tpu.memory_space<vmem>>, vector<16x1xf32>,
    %c0_241 = arith.constant 0 : index
    %c0_242 = arith.constant 0 : index
    %547 = vector.load %arg22[%c0_241, %c0_242] : memref<16x11xf32, #tpu.memory_space<vmem>>, vector<16x11xf32>
    %cst_243 = arith.constant 0.000000e+00 : f32
    %548 = vector.broadcast %cst_243 : f32 to vector<16x11xf32>
    %549 = arith.maximumf %547, %548 : vector<16x11xf32>
    %550 = vector.extract_strided_slice %549 {offsets = [0, 0], sizes = [1, 11], strides = [1, 1]} : vector<16x11xf32> to vector<1x11xf32>
    %c2_244 = arith.constant 2 : index
    %c0_245 = arith.constant 0 : index
    %551 = vector.load %arg23[%c2_244, %c0_245] : memref<4x176xf32, #tpu.memory_space<vmem>>, vector<1x11xf32>
    tpu.vector_store %arg23[%c2_244, %c0_245], %550 {strides = array<i32>} : memref<4x176xf32, #tpu.memory_space<vmem>>, vector<1x11xf32>,
    %552 = vector.extract_strided_slice %549 {offsets = [1, 0], sizes = [1, 11], strides = [1, 1]} : vector<16x11xf32> to vector<1x11xf32>
    %c2_246 = arith.constant 2 : index
    %c11_247 = arith.constant 11 : index
    %553 = vector.load %arg23[%c2_246, %c11_247] : memref<4x176xf32, #tpu.memory_space<vmem>>, vector<1x11xf32>
    tpu.vector_store %arg23[%c2_246, %c11_247], %552 {strides = array<i32>} : memref<4x176xf32, #tpu.memory_space<vmem>>, vector<1x11xf32>,
    %554 = vector.extract_strided_slice %549 {offsets = [2, 0], sizes = [1, 11], strides = [1, 1]} : vector<16x11xf32> to vector<1x11xf32>
    %c2_248 = arith.constant 2 : index
    %c22_249 = arith.constant 22 : index
    %555 = vector.load %arg23[%c2_248, %c22_249] : memref<4x176xf32, #tpu.memory_space<vmem>>, vector<1x11xf32>
    tpu.vector_store %arg23[%c2_248, %c22_249], %554 {strides = array<i32>} : memref<4x176xf32, #tpu.memory_space<vmem>>, vector<1x11xf32>,
    %556 = vector.extract_strided_slice %549 {offsets = [3, 0], sizes = [1, 11], strides = [1, 1]} : vector<16x11xf32> to vector<1x11xf32>
    %c2_250 = arith.constant 2 : index
    %c33_251 = arith.constant 33 : index
    %557 = vector.load %arg23[%c2_250, %c33_251] : memref<4x176xf32, #tpu.memory_space<vmem>>, vector<1x11xf32>
    tpu.vector_store %arg23[%c2_250, %c33_251], %556 {strides = array<i32>} : memref<4x176xf32, #tpu.memory_space<vmem>>, vector<1x11xf32>,
    %558 = vector.extract_strided_slice %549 {offsets = [4, 0], sizes = [1, 11], strides = [1, 1]} : vector<16x11xf32> to vector<1x11xf32>
    %c2_252 = arith.constant 2 : index
    %c44_253 = arith.constant 44 : index
    %559 = vector.load %arg23[%c2_252, %c44_253] : memref<4x176xf32, #tpu.memory_space<vmem>>, vector<1x11xf32>
    tpu.vector_store %arg23[%c2_252, %c44_253], %558 {strides = array<i32>} : memref<4x176xf32, #tpu.memory_space<vmem>>, vector<1x11xf32>,
    %560 = vector.extract_strided_slice %549 {offsets = [5, 0], sizes = [1, 11], strides = [1, 1]} : vector<16x11xf32> to vector<1x11xf32>
    %c2_254 = arith.constant 2 : index
    %c55_255 = arith.constant 55 : index
    %561 = vector.load %arg23[%c2_254, %c55_255] : memref<4x176xf32, #tpu.memory_space<vmem>>, vector<1x11xf32>
    tpu.vector_store %arg23[%c2_254, %c55_255], %560 {strides = array<i32>} : memref<4x176xf32, #tpu.memory_space<vmem>>, vector<1x11xf32>,
    %562 = vector.extract_strided_slice %549 {offsets = [6, 0], sizes = [1, 11], strides = [1, 1]} : vector<16x11xf32> to vector<1x11xf32>
    %c2_256 = arith.constant 2 : index
    %c66_257 = arith.constant 66 : index
    %563 = vector.load %arg23[%c2_256, %c66_257] : memref<4x176xf32, #tpu.memory_space<vmem>>, vector<1x11xf32>
    tpu.vector_store %arg23[%c2_256, %c66_257], %562 {strides = array<i32>} : memref<4x176xf32, #tpu.memory_space<vmem>>, vector<1x11xf32>,
    %564 = vector.extract_strided_slice %549 {offsets = [7, 0], sizes = [1, 11], strides = [1, 1]} : vector<16x11xf32> to vector<1x11xf32>
    %c2_258 = arith.constant 2 : index
    %c77_259 = arith.constant 77 : index
    %565 = vector.load %arg23[%c2_258, %c77_259] : memref<4x176xf32, #tpu.memory_space<vmem>>, vector<1x11xf32>
    tpu.vector_store %arg23[%c2_258, %c77_259], %564 {strides = array<i32>} : memref<4x176xf32, #tpu.memory_space<vmem>>, vector<1x11xf32>,
    %566 = vector.extract_strided_slice %549 {offsets = [8, 0], sizes = [1, 11], strides = [1, 1]} : vector<16x11xf32> to vector<1x11xf32>
    %c2_260 = arith.constant 2 : index
    %c88_261 = arith.constant 88 : index
    %567 = vector.load %arg23[%c2_260, %c88_261] : memref<4x176xf32, #tpu.memory_space<vmem>>, vector<1x11xf32>
    tpu.vector_store %arg23[%c2_260, %c88_261], %566 {strides = array<i32>} : memref<4x176xf32, #tpu.memory_space<vmem>>, vector<1x11xf32>,
    %568 = vector.extract_strided_slice %549 {offsets = [9, 0], sizes = [1, 11], strides = [1, 1]} : vector<16x11xf32> to vector<1x11xf32>
    %c2_262 = arith.constant 2 : index
    %c99_263 = arith.constant 99 : index
    %569 = vector.load %arg23[%c2_262, %c99_263] : memref<4x176xf32, #tpu.memory_space<vmem>>, vector<1x11xf32>
    tpu.vector_store %arg23[%c2_262, %c99_263], %568 {strides = array<i32>} : memref<4x176xf32, #tpu.memory_space<vmem>>, vector<1x11xf32>,
    %570 = vector.extract_strided_slice %549 {offsets = [10, 0], sizes = [1, 11], strides = [1, 1]} : vector<16x11xf32> to vector<1x11xf32>
    %c2_264 = arith.constant 2 : index
    %c110_265 = arith.constant 110 : index
    %571 = vector.load %arg23[%c2_264, %c110_265] : memref<4x176xf32, #tpu.memory_space<vmem>>, vector<1x11xf32>
    tpu.vector_store %arg23[%c2_264, %c110_265], %570 {strides = array<i32>} : memref<4x176xf32, #tpu.memory_space<vmem>>, vector<1x11xf32>,
    %572 = vector.extract_strided_slice %549 {offsets = [11, 0], sizes = [1, 11], strides = [1, 1]} : vector<16x11xf32> to vector<1x11xf32>
    %c2_266 = arith.constant 2 : index
    %c121_267 = arith.constant 121 : index
    %573 = vector.load %arg23[%c2_266, %c121_267] : memref<4x176xf32, #tpu.memory_space<vmem>>, vector<1x11xf32>
    tpu.vector_store %arg23[%c2_266, %c121_267], %572 {strides = array<i32>} : memref<4x176xf32, #tpu.memory_space<vmem>>, vector<1x11xf32>,
    %574 = vector.extract_strided_slice %549 {offsets = [12, 0], sizes = [1, 11], strides = [1, 1]} : vector<16x11xf32> to vector<1x11xf32>
    %c2_268 = arith.constant 2 : index
    %c132_269 = arith.constant 132 : index
    %575 = vector.load %arg23[%c2_268, %c132_269] : memref<4x176xf32, #tpu.memory_space<vmem>>, vector<1x11xf32>
    tpu.vector_store %arg23[%c2_268, %c132_269], %574 {strides = array<i32>} : memref<4x176xf32, #tpu.memory_space<vmem>>, vector<1x11xf32>,
    %576 = vector.extract_strided_slice %549 {offsets = [13, 0], sizes = [1, 11], strides = [1, 1]} : vector<16x11xf32> to vector<1x11xf32>
    %c2_270 = arith.constant 2 : index
    %c143_271 = arith.constant 143 : index
    %577 = vector.load %arg23[%c2_270, %c143_271] : memref<4x176xf32, #tpu.memory_space<vmem>>, vector<1x11xf32>
    tpu.vector_store %arg23[%c2_270, %c143_271], %576 {strides = array<i32>} : memref<4x176xf32, #tpu.memory_space<vmem>>, vector<1x11xf32>,
    %578 = vector.extract_strided_slice %549 {offsets = [14, 0], sizes = [1, 11], strides = [1, 1]} : vector<16x11xf32> to vector<1x11xf32>
    %c2_272 = arith.constant 2 : index
    %c154_273 = arith.constant 154 : index
    %579 = vector.load %arg23[%c2_272, %c154_273] : memref<4x176xf32, #tpu.memory_space<vmem>>, vector<1x11xf32>
    tpu.vector_store %arg23[%c2_272, %c154_273], %578 {strides = array<i32>} : memref<4x176xf32, #tpu.memory_space<vmem>>, vector<1x11xf32>,
    %580 = vector.extract_strided_slice %549 {offsets = [15, 0], sizes = [1, 11], strides = [1, 1]} : vector<16x11xf32> to vector<1x11xf32>
    %c2_274 = arith.constant 2 : index
    %c165_275 = arith.constant 165 : index
    %581 = vector.load %arg23[%c2_274, %c165_275] : memref<4x176xf32, #tpu.memory_space<vmem>>, vector<1x11xf32>
    tpu.vector_store %arg23[%c2_274, %c165_275], %580 {strides = array<i32>} : memref<4x176xf32, #tpu.memory_space<vmem>>, vector<1x11xf32>,
    %582 = vector.broadcast %341 : vector<16x1xf32> to vector<16x20xf32>
    %583 = arith.mulf %304, %582 : vector<16x20xf32>
    %584 = vector.broadcast %344 : vector<16x1xf32> to vector<16x20xf32>
    %585 = arith.addf %583, %584 : vector<16x20xf32>
    %586 = vector.extract_strided_slice %585 {offsets = [0, 0], sizes = [16, 1], strides = [1, 1]} : vector<16x20xf32> to vector<16x1xf32>
    %c0_276 = arith.constant 0 : index
    %c0_277 = arith.constant 0 : index
    %587 = vector.load %arg22[%c0_276, %c0_277] : memref<16x11xf32, #tpu.memory_space<vmem>>, vector<16x1xf32>
    tpu.vector_store %arg22[%c0_276, %c0_277], %586 {strides = array<i32>} : memref<16x11xf32, #tpu.memory_space<vmem>>, vector<16x1xf32>,
    %588 = vector.extract_strided_slice %585 {offsets = [0, 1], sizes = [16, 1], strides = [1, 1]} : vector<16x20xf32> to vector<16x1xf32>
    %589 = vector.extract_strided_slice %585 {offsets = [0, 2], sizes = [16, 1], strides = [1, 1]} : vector<16x20xf32> to vector<16x1xf32>
    %590 = arith.maximumf %588, %589 : vector<16x1xf32>
    %c0_278 = arith.constant 0 : index
    %c1_279 = arith.constant 1 : index
    %591 = vector.load %arg22[%c0_278, %c1_279] : memref<16x11xf32, #tpu.memory_space<vmem>>, vector<16x1xf32>
    tpu.vector_store %arg22[%c0_278, %c1_279], %590 {strides = array<i32>} : memref<16x11xf32, #tpu.memory_space<vmem>>, vector<16x1xf32>,
    %592 = vector.extract_strided_slice %585 {offsets = [0, 3], sizes = [16, 1], strides = [1, 1]} : vector<16x20xf32> to vector<16x1xf32>
    %593 = vector.extract_strided_slice %585 {offsets = [0, 4], sizes = [16, 1], strides = [1, 1]} : vector<16x20xf32> to vector<16x1xf32>
    %594 = arith.maximumf %592, %593 : vector<16x1xf32>
    %c0_280 = arith.constant 0 : index
    %c2_281 = arith.constant 2 : index
    %595 = vector.load %arg22[%c0_280, %c2_281] : memref<16x11xf32, #tpu.memory_space<vmem>>, vector<16x1xf32>
    tpu.vector_store %arg22[%c0_280, %c2_281], %594 {strides = array<i32>} : memref<16x11xf32, #tpu.memory_space<vmem>>, vector<16x1xf32>,
    %596 = vector.extract_strided_slice %585 {offsets = [0, 5], sizes = [16, 1], strides = [1, 1]} : vector<16x20xf32> to vector<16x1xf32>
    %597 = vector.extract_strided_slice %585 {offsets = [0, 6], sizes = [16, 1], strides = [1, 1]} : vector<16x20xf32> to vector<16x1xf32>
    %598 = arith.maximumf %596, %597 : vector<16x1xf32>
    %c0_282 = arith.constant 0 : index
    %c3_283 = arith.constant 3 : index
    %599 = vector.load %arg22[%c0_282, %c3_283] : memref<16x11xf32, #tpu.memory_space<vmem>>, vector<16x1xf32>
    tpu.vector_store %arg22[%c0_282, %c3_283], %598 {strides = array<i32>} : memref<16x11xf32, #tpu.memory_space<vmem>>, vector<16x1xf32>,
    %600 = vector.extract_strided_slice %585 {offsets = [0, 7], sizes = [16, 1], strides = [1, 1]} : vector<16x20xf32> to vector<16x1xf32>
    %601 = vector.extract_strided_slice %585 {offsets = [0, 8], sizes = [16, 1], strides = [1, 1]} : vector<16x20xf32> to vector<16x1xf32>
    %602 = arith.maximumf %600, %601 : vector<16x1xf32>
    %c0_284 = arith.constant 0 : index
    %c4_285 = arith.constant 4 : index
    %603 = vector.load %arg22[%c0_284, %c4_285] : memref<16x11xf32, #tpu.memory_space<vmem>>, vector<16x1xf32>
    tpu.vector_store %arg22[%c0_284, %c4_285], %602 {strides = array<i32>} : memref<16x11xf32, #tpu.memory_space<vmem>>, vector<16x1xf32>,
    %604 = vector.extract_strided_slice %585 {offsets = [0, 9], sizes = [16, 1], strides = [1, 1]} : vector<16x20xf32> to vector<16x1xf32>
    %605 = vector.extract_strided_slice %585 {offsets = [0, 10], sizes = [16, 1], strides = [1, 1]} : vector<16x20xf32> to vector<16x1xf32>
    %606 = arith.maximumf %604, %605 : vector<16x1xf32>
    %c0_286 = arith.constant 0 : index
    %c5_287 = arith.constant 5 : index
    %607 = vector.load %arg22[%c0_286, %c5_287] : memref<16x11xf32, #tpu.memory_space<vmem>>, vector<16x1xf32>
    tpu.vector_store %arg22[%c0_286, %c5_287], %606 {strides = array<i32>} : memref<16x11xf32, #tpu.memory_space<vmem>>, vector<16x1xf32>,
    %608 = vector.extract_strided_slice %585 {offsets = [0, 11], sizes = [16, 1], strides = [1, 1]} : vector<16x20xf32> to vector<16x1xf32>
    %609 = vector.extract_strided_slice %585 {offsets = [0, 12], sizes = [16, 1], strides = [1, 1]} : vector<16x20xf32> to vector<16x1xf32>
    %610 = arith.maximumf %608, %609 : vector<16x1xf32>
    %c0_288 = arith.constant 0 : index
    %c6_289 = arith.constant 6 : index
    %611 = vector.load %arg22[%c0_288, %c6_289] : memref<16x11xf32, #tpu.memory_space<vmem>>, vector<16x1xf32>
    tpu.vector_store %arg22[%c0_288, %c6_289], %610 {strides = array<i32>} : memref<16x11xf32, #tpu.memory_space<vmem>>, vector<16x1xf32>,
    %612 = vector.extract_strided_slice %585 {offsets = [0, 13], sizes = [16, 1], strides = [1, 1]} : vector<16x20xf32> to vector<16x1xf32>
    %613 = vector.extract_strided_slice %585 {offsets = [0, 14], sizes = [16, 1], strides = [1, 1]} : vector<16x20xf32> to vector<16x1xf32>
    %614 = arith.maximumf %612, %613 : vector<16x1xf32>
    %c0_290 = arith.constant 0 : index
    %c7_291 = arith.constant 7 : index
    %615 = vector.load %arg22[%c0_290, %c7_291] : memref<16x11xf32, #tpu.memory_space<vmem>>, vector<16x1xf32>
    tpu.vector_store %arg22[%c0_290, %c7_291], %614 {strides = array<i32>} : memref<16x11xf32, #tpu.memory_space<vmem>>, vector<16x1xf32>,
    %616 = vector.extract_strided_slice %585 {offsets = [0, 15], sizes = [16, 1], strides = [1, 1]} : vector<16x20xf32> to vector<16x1xf32>
    %617 = vector.extract_strided_slice %585 {offsets = [0, 16], sizes = [16, 1], strides = [1, 1]} : vector<16x20xf32> to vector<16x1xf32>
    %618 = arith.maximumf %616, %617 : vector<16x1xf32>
    %c0_292 = arith.constant 0 : index
    %c8_293 = arith.constant 8 : index
    %619 = vector.load %arg22[%c0_292, %c8_293] : memref<16x11xf32, #tpu.memory_space<vmem>>, vector<16x1xf32>
    tpu.vector_store %arg22[%c0_292, %c8_293], %618 {strides = array<i32>} : memref<16x11xf32, #tpu.memory_space<vmem>>, vector<16x1xf32>,
    %620 = vector.extract_strided_slice %585 {offsets = [0, 17], sizes = [16, 1], strides = [1, 1]} : vector<16x20xf32> to vector<16x1xf32>
    %621 = vector.extract_strided_slice %585 {offsets = [0, 18], sizes = [16, 1], strides = [1, 1]} : vector<16x20xf32> to vector<16x1xf32>
    %622 = arith.maximumf %620, %621 : vector<16x1xf32>
    %c0_294 = arith.constant 0 : index
    %c9_295 = arith.constant 9 : index
    %623 = vector.load %arg22[%c0_294, %c9_295] : memref<16x11xf32, #tpu.memory_space<vmem>>, vector<16x1xf32>
    tpu.vector_store %arg22[%c0_294, %c9_295], %622 {strides = array<i32>} : memref<16x11xf32, #tpu.memory_space<vmem>>, vector<16x1xf32>,
    %624 = vector.extract_strided_slice %585 {offsets = [0, 19], sizes = [16, 1], strides = [1, 1]} : vector<16x20xf32> to vector<16x1xf32>
    %c0_296 = arith.constant 0 : index
    %c10_297 = arith.constant 10 : index
    %625 = vector.load %arg22[%c0_296, %c10_297] : memref<16x11xf32, #tpu.memory_space<vmem>>, vector<16x1xf32>
    tpu.vector_store %arg22[%c0_296, %c10_297], %624 {strides = array<i32>} : memref<16x11xf32, #tpu.memory_space<vmem>>, vector<16x1xf32>,
    %c0_298 = arith.constant 0 : index
    %c0_299 = arith.constant 0 : index
    %626 = vector.load %arg22[%c0_298, %c0_299] : memref<16x11xf32, #tpu.memory_space<vmem>>, vector<16x11xf32>
    %cst_300 = arith.constant 0.000000e+00 : f32
    %627 = vector.broadcast %cst_300 : f32 to vector<16x11xf32>
    %628 = arith.maximumf %626, %627 : vector<16x11xf32>
    %629 = vector.extract_strided_slice %628 {offsets = [0, 0], sizes = [1, 11], strides = [1, 1]} : vector<16x11xf32> to vector<1x11xf32>
    %c3_301 = arith.constant 3 : index
    %c0_302 = arith.constant 0 : index
    %630 = vector.load %arg23[%c3_301, %c0_302] : memref<4x176xf32, #tpu.memory_space<vmem>>, vector<1x11xf32>
    tpu.vector_store %arg23[%c3_301, %c0_302], %629 {strides = array<i32>} : memref<4x176xf32, #tpu.memory_space<vmem>>, vector<1x11xf32>,
    %631 = vector.extract_strided_slice %628 {offsets = [1, 0], sizes = [1, 11], strides = [1, 1]} : vector<16x11xf32> to vector<1x11xf32>
    %c3_303 = arith.constant 3 : index
    %c11_304 = arith.constant 11 : index
    %632 = vector.load %arg23[%c3_303, %c11_304] : memref<4x176xf32, #tpu.memory_space<vmem>>, vector<1x11xf32>
    tpu.vector_store %arg23[%c3_303, %c11_304], %631 {strides = array<i32>} : memref<4x176xf32, #tpu.memory_space<vmem>>, vector<1x11xf32>,
    %633 = vector.extract_strided_slice %628 {offsets = [2, 0], sizes = [1, 11], strides = [1, 1]} : vector<16x11xf32> to vector<1x11xf32>
    %c3_305 = arith.constant 3 : index
    %c22_306 = arith.constant 22 : index
    %634 = vector.load %arg23[%c3_305, %c22_306] : memref<4x176xf32, #tpu.memory_space<vmem>>, vector<1x11xf32>
    tpu.vector_store %arg23[%c3_305, %c22_306], %633 {strides = array<i32>} : memref<4x176xf32, #tpu.memory_space<vmem>>, vector<1x11xf32>,
    %635 = vector.extract_strided_slice %628 {offsets = [3, 0], sizes = [1, 11], strides = [1, 1]} : vector<16x11xf32> to vector<1x11xf32>
    %c3_307 = arith.constant 3 : index
    %c33_308 = arith.constant 33 : index
    %636 = vector.load %arg23[%c3_307, %c33_308] : memref<4x176xf32, #tpu.memory_space<vmem>>, vector<1x11xf32>
    tpu.vector_store %arg23[%c3_307, %c33_308], %635 {strides = array<i32>} : memref<4x176xf32, #tpu.memory_space<vmem>>, vector<1x11xf32>,
    %637 = vector.extract_strided_slice %628 {offsets = [4, 0], sizes = [1, 11], strides = [1, 1]} : vector<16x11xf32> to vector<1x11xf32>
    %c3_309 = arith.constant 3 : index
    %c44_310 = arith.constant 44 : index
    %638 = vector.load %arg23[%c3_309, %c44_310] : memref<4x176xf32, #tpu.memory_space<vmem>>, vector<1x11xf32>
    tpu.vector_store %arg23[%c3_309, %c44_310], %637 {strides = array<i32>} : memref<4x176xf32, #tpu.memory_space<vmem>>, vector<1x11xf32>,
    %639 = vector.extract_strided_slice %628 {offsets = [5, 0], sizes = [1, 11], strides = [1, 1]} : vector<16x11xf32> to vector<1x11xf32>
    %c3_311 = arith.constant 3 : index
    %c55_312 = arith.constant 55 : index
    %640 = vector.load %arg23[%c3_311, %c55_312] : memref<4x176xf32, #tpu.memory_space<vmem>>, vector<1x11xf32>
    tpu.vector_store %arg23[%c3_311, %c55_312], %639 {strides = array<i32>} : memref<4x176xf32, #tpu.memory_space<vmem>>, vector<1x11xf32>,
    %641 = vector.extract_strided_slice %628 {offsets = [6, 0], sizes = [1, 11], strides = [1, 1]} : vector<16x11xf32> to vector<1x11xf32>
    %c3_313 = arith.constant 3 : index
    %c66_314 = arith.constant 66 : index
    %642 = vector.load %arg23[%c3_313, %c66_314] : memref<4x176xf32, #tpu.memory_space<vmem>>, vector<1x11xf32>
    tpu.vector_store %arg23[%c3_313, %c66_314], %641 {strides = array<i32>} : memref<4x176xf32, #tpu.memory_space<vmem>>, vector<1x11xf32>,
    %643 = vector.extract_strided_slice %628 {offsets = [7, 0], sizes = [1, 11], strides = [1, 1]} : vector<16x11xf32> to vector<1x11xf32>
    %c3_315 = arith.constant 3 : index
    %c77_316 = arith.constant 77 : index
    %644 = vector.load %arg23[%c3_315, %c77_316] : memref<4x176xf32, #tpu.memory_space<vmem>>, vector<1x11xf32>
    tpu.vector_store %arg23[%c3_315, %c77_316], %643 {strides = array<i32>} : memref<4x176xf32, #tpu.memory_space<vmem>>, vector<1x11xf32>,
    %645 = vector.extract_strided_slice %628 {offsets = [8, 0], sizes = [1, 11], strides = [1, 1]} : vector<16x11xf32> to vector<1x11xf32>
    %c3_317 = arith.constant 3 : index
    %c88_318 = arith.constant 88 : index
    %646 = vector.load %arg23[%c3_317, %c88_318] : memref<4x176xf32, #tpu.memory_space<vmem>>, vector<1x11xf32>
    tpu.vector_store %arg23[%c3_317, %c88_318], %645 {strides = array<i32>} : memref<4x176xf32, #tpu.memory_space<vmem>>, vector<1x11xf32>,
    %647 = vector.extract_strided_slice %628 {offsets = [9, 0], sizes = [1, 11], strides = [1, 1]} : vector<16x11xf32> to vector<1x11xf32>
    %c3_319 = arith.constant 3 : index
    %c99_320 = arith.constant 99 : index
    %648 = vector.load %arg23[%c3_319, %c99_320] : memref<4x176xf32, #tpu.memory_space<vmem>>, vector<1x11xf32>
    tpu.vector_store %arg23[%c3_319, %c99_320], %647 {strides = array<i32>} : memref<4x176xf32, #tpu.memory_space<vmem>>, vector<1x11xf32>,
    %649 = vector.extract_strided_slice %628 {offsets = [10, 0], sizes = [1, 11], strides = [1, 1]} : vector<16x11xf32> to vector<1x11xf32>
    %c3_321 = arith.constant 3 : index
    %c110_322 = arith.constant 110 : index
    %650 = vector.load %arg23[%c3_321, %c110_322] : memref<4x176xf32, #tpu.memory_space<vmem>>, vector<1x11xf32>
    tpu.vector_store %arg23[%c3_321, %c110_322], %649 {strides = array<i32>} : memref<4x176xf32, #tpu.memory_space<vmem>>, vector<1x11xf32>,
    %651 = vector.extract_strided_slice %628 {offsets = [11, 0], sizes = [1, 11], strides = [1, 1]} : vector<16x11xf32> to vector<1x11xf32>
    %c3_323 = arith.constant 3 : index
    %c121_324 = arith.constant 121 : index
    %652 = vector.load %arg23[%c3_323, %c121_324] : memref<4x176xf32, #tpu.memory_space<vmem>>, vector<1x11xf32>
    tpu.vector_store %arg23[%c3_323, %c121_324], %651 {strides = array<i32>} : memref<4x176xf32, #tpu.memory_space<vmem>>, vector<1x11xf32>,
    %653 = vector.extract_strided_slice %628 {offsets = [12, 0], sizes = [1, 11], strides = [1, 1]} : vector<16x11xf32> to vector<1x11xf32>
    %c3_325 = arith.constant 3 : index
    %c132_326 = arith.constant 132 : index
    %654 = vector.load %arg23[%c3_325, %c132_326] : memref<4x176xf32, #tpu.memory_space<vmem>>, vector<1x11xf32>
    tpu.vector_store %arg23[%c3_325, %c132_326], %653 {strides = array<i32>} : memref<4x176xf32, #tpu.memory_space<vmem>>, vector<1x11xf32>,
    %655 = vector.extract_strided_slice %628 {offsets = [13, 0], sizes = [1, 11], strides = [1, 1]} : vector<16x11xf32> to vector<1x11xf32>
    %c3_327 = arith.constant 3 : index
    %c143_328 = arith.constant 143 : index
    %656 = vector.load %arg23[%c3_327, %c143_328] : memref<4x176xf32, #tpu.memory_space<vmem>>, vector<1x11xf32>
    tpu.vector_store %arg23[%c3_327, %c143_328], %655 {strides = array<i32>} : memref<4x176xf32, #tpu.memory_space<vmem>>, vector<1x11xf32>,
    %657 = vector.extract_strided_slice %628 {offsets = [14, 0], sizes = [1, 11], strides = [1, 1]} : vector<16x11xf32> to vector<1x11xf32>
    %c3_329 = arith.constant 3 : index
    %c154_330 = arith.constant 154 : index
    %658 = vector.load %arg23[%c3_329, %c154_330] : memref<4x176xf32, #tpu.memory_space<vmem>>, vector<1x11xf32>
    tpu.vector_store %arg23[%c3_329, %c154_330], %657 {strides = array<i32>} : memref<4x176xf32, #tpu.memory_space<vmem>>, vector<1x11xf32>,
    %659 = vector.extract_strided_slice %628 {offsets = [15, 0], sizes = [1, 11], strides = [1, 1]} : vector<16x11xf32> to vector<1x11xf32>
    %c3_331 = arith.constant 3 : index
    %c165_332 = arith.constant 165 : index
    %660 = vector.load %arg23[%c3_331, %c165_332] : memref<4x176xf32, #tpu.memory_space<vmem>>, vector<1x11xf32>
    tpu.vector_store %arg23[%c3_331, %c165_332], %659 {strides = array<i32>} : memref<4x176xf32, #tpu.memory_space<vmem>>, vector<1x11xf32>,
    %c0_333 = arith.constant 0 : index
    %c0_334 = arith.constant 0 : index
    %661 = vector.load %arg23[%c0_333, %c0_334] : memref<4x176xf32, #tpu.memory_space<vmem>>, vector<4x176xf32>
    %c0_335 = arith.constant 0 : index
    %c0_336 = arith.constant 0 : index
    %662 = vector.load %arg10[%c0_335, %c0_336] : memref<176x256xf32, #tpu.memory_space<vmem>>, vector<176x256xf32>
    %cst_337 = arith.constant dense<0.000000e+00> : vector<4x256xf32>
    %663 = tpu.matmul %661, %662, %cst_337 {dimension_numbers = #tpu.dot_dimension_numbers<[1], [0], [0], [1], [0, 0, 1, 1], [], []>} : vector<4x176xf32>, vector<176x256xf32>, vector<4x256xf32> -> vector<4x256xf32>
    %c0_338 = arith.constant 0 : index
    %c0_339 = arith.constant 0 : index
    %664 = vector.load %arg11[%c0_338, %c0_339] : memref<1x256xf32, #tpu.memory_space<vmem>>, vector<1x256xf32>
    %665 = vector.broadcast %664 : vector<1x256xf32> to vector<4x256xf32>
    %666 = arith.addf %663, %665 : vector<4x256xf32>
    %cst_340 = arith.constant dense<0.000000e+00> : vector<256xf32>
    %667 = vector.multi_reduction <add>, %666, %cst_340 [0] : vector<4x256xf32> to vector<256xf32>
    %668 = vector.shape_cast %667 : vector<256xf32> to vector<1x256xf32>
    %cst_341 = arith.constant 4.000000e+00 : f32
    %669 = vector.broadcast %cst_341 : f32 to vector<1x256xf32>
    %670 = arith.divf %668, %669 : vector<1x256xf32>
    %671 = arith.mulf %666, %666 : vector<4x256xf32>
    %cst_342 = arith.constant dense<0.000000e+00> : vector<256xf32>
    %672 = vector.multi_reduction <add>, %671, %cst_342 [0] : vector<4x256xf32> to vector<256xf32>
    %673 = vector.shape_cast %672 : vector<256xf32> to vector<1x256xf32>
    %cst_343 = arith.constant 4.000000e+00 : f32
    %674 = vector.broadcast %cst_343 : f32 to vector<1x256xf32>
    %675 = arith.divf %673, %674 : vector<1x256xf32>
    %676 = arith.mulf %670, %670 : vector<1x256xf32>
    %677 = arith.subf %675, %676 : vector<1x256xf32>
    %678 = vector.broadcast %670 : vector<1x256xf32> to vector<4x256xf32>
    %679 = arith.subf %666, %678 : vector<4x256xf32>
    %cst_344 = arith.constant 9.99999974E-6 : f32
    %680 = vector.broadcast %cst_344 : f32 to vector<1x256xf32>
    %681 = arith.addf %677, %680 : vector<1x256xf32>
    %682 = math.rsqrt %681 : vector<1x256xf32>
    %683 = vector.broadcast %682 : vector<1x256xf32> to vector<4x256xf32>
    %684 = arith.mulf %679, %683 : vector<4x256xf32>
    %c0_345 = arith.constant 0 : index
    %c0_346 = arith.constant 0 : index
    %685 = vector.load %arg12[%c0_345, %c0_346] : memref<1x256xf32, #tpu.memory_space<vmem>>, vector<1x256xf32>
    %686 = vector.broadcast %685 : vector<1x256xf32> to vector<4x256xf32>
    %687 = arith.mulf %684, %686 : vector<4x256xf32>
    %c0_347 = arith.constant 0 : index
    %c0_348 = arith.constant 0 : index
    %688 = vector.load %arg13[%c0_347, %c0_348] : memref<1x256xf32, #tpu.memory_space<vmem>>, vector<1x256xf32>
    %689 = vector.broadcast %688 : vector<1x256xf32> to vector<4x256xf32>
    %690 = arith.addf %687, %689 : vector<4x256xf32>
    %cst_349 = arith.constant 0.000000e+00 : f32
    %691 = vector.broadcast %cst_349 : f32 to vector<4x256xf32>
    %692 = arith.maximumf %690, %691 : vector<4x256xf32>
    %c0_350 = arith.constant 0 : index
    %c0_351 = arith.constant 0 : index
    %693 = vector.load %arg14[%c0_350, %c0_351] : memref<256x120xf32, #tpu.memory_space<vmem>>, vector<256x120xf32>
    %cst_352 = arith.constant dense<0.000000e+00> : vector<4x120xf32>
    %694 = tpu.matmul %692, %693, %cst_352 {dimension_numbers = #tpu.dot_dimension_numbers<[1], [0], [0], [1], [0, 0, 1, 1], [], []>} : vector<4x256xf32>, vector<256x120xf32>, vector<4x120xf32> -> vector<4x120xf32>
    %c0_353 = arith.constant 0 : index
    %c0_354 = arith.constant 0 : index
    %695 = vector.load %arg15[%c0_353, %c0_354] : memref<1x120xf32, #tpu.memory_space<vmem>>, vector<1x120xf32>
    %696 = vector.broadcast %695 : vector<1x120xf32> to vector<4x120xf32>
    %697 = arith.addf %694, %696 : vector<4x120xf32>
    %cst_355 = arith.constant 0.000000e+00 : f32
    %698 = vector.broadcast %cst_355 : f32 to vector<4x120xf32>
    %699 = arith.maximumf %697, %698 : vector<4x120xf32>
    %c0_356 = arith.constant 0 : index
    %c0_357 = arith.constant 0 : index
    %700 = vector.load %arg16[%c0_356, %c0_357] : memref<120x84xf32, #tpu.memory_space<vmem>>, vector<120x84xf32>
    %cst_358 = arith.constant dense<0.000000e+00> : vector<4x84xf32>
    %701 = tpu.matmul %699, %700, %cst_358 {dimension_numbers = #tpu.dot_dimension_numbers<[1], [0], [0], [1], [0, 0, 1, 1], [], []>} : vector<4x120xf32>, vector<120x84xf32>, vector<4x84xf32> -> vector<4x84xf32>
    %c0_359 = arith.constant 0 : index
    %c0_360 = arith.constant 0 : index
    %702 = vector.load %arg17[%c0_359, %c0_360] : memref<1x84xf32, #tpu.memory_space<vmem>>, vector<1x84xf32>
    %703 = vector.broadcast %702 : vector<1x84xf32> to vector<4x84xf32>
    %704 = arith.addf %701, %703 : vector<4x84xf32>
    %c0_361 = arith.constant 0 : index
    %c0_362 = arith.constant 0 : index
    %705 = vector.load %arg18[%c0_361, %c0_362] : memref<84x5xf32, #tpu.memory_space<vmem>>, vector<84x5xf32>
    %cst_363 = arith.constant dense<0.000000e+00> : vector<4x5xf32>
    %706 = tpu.matmul %704, %705, %cst_363 {dimension_numbers = #tpu.dot_dimension_numbers<[1], [0], [0], [1], [0, 0, 1, 1], [], []>} : vector<4x84xf32>, vector<84x5xf32>, vector<4x5xf32> -> vector<4x5xf32>
    %c0_364 = arith.constant 0 : index
    %c0_365 = arith.constant 0 : index
    %707 = vector.load %arg19[%c0_364, %c0_365] : memref<1x5xf32, #tpu.memory_space<vmem>>, vector<1x5xf32>
    %708 = vector.broadcast %707 : vector<1x5xf32> to vector<4x5xf32>
    %709 = arith.addf %706, %708 : vector<4x5xf32>
    %cst_366 = arith.constant dense<0xFF800000> : vector<4xf32>
    %710 = vector.multi_reduction <maximumf>, %709, %cst_366 [1] : vector<4x5xf32> to vector<4xf32>
    %711 = vector.shape_cast %710 : vector<4xf32> to vector<4x1xf32>
    %712 = vector.broadcast %711 : vector<4x1xf32> to vector<4x5xf32>
    %713 = arith.subf %709, %712 : vector<4x5xf32>
    %714 = math.exp %713 : vector<4x5xf32>
    %cst_367 = arith.constant dense<0.000000e+00> : vector<4xf32>
    %715 = vector.multi_reduction <add>, %714, %cst_367 [1] : vector<4x5xf32> to vector<4xf32>
    %716 = vector.shape_cast %715 : vector<4xf32> to vector<4x1xf32>
    %717 = tpu.reciprocal %716 : vector<4x1xf32> -> vector<4x1xf32>
    %718 = vector.broadcast %717 : vector<4x1xf32> to vector<4x5xf32>
    %719 = arith.mulf %714, %718 : vector<4x5xf32>
    %c0_368 = arith.constant 0 : index
    %c0_369 = arith.constant 0 : index
    %720 = vector.load %arg20[%c0_368, %c0_369] : memref<4x5xf32, #tpu.memory_space<vmem>>, vector<4x5xf32>
    tpu.vector_store %arg20[%c0_368, %c0_369], %719 {strides = array<i32>} : memref<4x5xf32, #tpu.memory_space<vmem>>, vector<4x5xf32>,
    return
  }
}

</mosaic_0001>

<bundles_post_ra>
// kernel: squeeze.1
= control target key start
LH: loop header
LB: loop body
LE: loop exit
PB: predicated region body
PF: predicated region fallthrough
CT: control target
= control target key end

     0   :  { %vm382_vm0 = vcmask 1047556   ;;  %s5595_s17 = smov 127   ;;  %s5596_s18 = smov 126   ;;  %vm361_vm1 = vcmask 171008   ;;  %vm3845_vm2 = vcmask 957440   ;;  %vm4281_vm3 = vcmask 1022976   ;;  %s9845_s0 = inlined_call_operand.vmem [shape: f32[4,9198], index: 0, kind: input, shape index: {}]   ;;  %s9846_s1 = inlined_call_operand.vmem [shape: f32[4,438,21], index: 1, kind: output, shape index: {}]  }
   0x1   :  { %v4529_v0 = vld [vmem:[%s9845_s0 + $0xd0] sm:$0xf]  ;;  %v4519_v1 = vld [vmem:[%s9845_s0 + $0xf8] sm:$0xf]  ;;  %v4550_v2 = vld [vmem:[%s9845_s0 + $0x7c] sm:$0xf] }
   0x2   :  { %103 = vst [vmem:[#allocation0 + $0x1a0] sm:$0xf] %v4529_v0  ;;  %53 = vst [vmem:[#allocation0 + $0x1f0] sm:$0xf] %v4519_v1  ;;  %v4571_v3 = vld [vmem:[%s9845_s0 + $0x28] sm:$0xf] }
   0x3   :  { %208 = vst [vmem:[#allocation0 + $0xf8] sm:$0xf] %v4550_v2  ;;  %313 = vst [vmem:[#allocation0 + $0x50] sm:$0xf] %v4571_v3  ;;  %v4530_v4 = vld [vmem:[%s9845_s0 + $0xcc] sm:$0xf] }
   0x4   :  { %v4551_v5 = vld [vmem:[%s9845_s0 + $0x78] sm:$0xf]  ;;  %v4572_v6 = vld [vmem:[%s9845_s0 + $0x24] sm:$0xf]  ;;  %108 = vst [vmem:[#allocation0 + $0x198] sm:$0xf] %v4530_v4 }
   0x5   :  { %213 = vst [vmem:[#allocation0 + $0xf0] sm:$0xf] %v4551_v5  ;;  %318 = vst [vmem:[#allocation0 + $0x48] sm:$0xf] %v4572_v6  ;;  %v4540_v7 = vld [vmem:[%s9845_s0 + $0xa4] sm:$0xf] }
   0x6   :  { %v4561_v8 = vld [vmem:[%s9845_s0 + $0x50] sm:$0xf]  ;;  %v4541_v9 = vld [vmem:[%s9845_s0 + $0xa0] sm:$0xf]  ;;  %158 = vst [vmem:[#allocation0 + $0x148] sm:$0xf] %v4540_v7 }
   0x7   :  { %263 = vst [vmem:[#allocation0 + $0xa0] sm:$0xf] %v4561_v8  ;;  %163 = vst [vmem:[#allocation0 + $0x140] sm:$0xf] %v4541_v9  ;;  %v4562_v10 = vld [vmem:[%s9845_s0 + $0x4c] sm:$0xf] }
   0x8   :  { %v4520_v11 = vld [vmem:[%s9845_s0 + $0xf4] sm:$0xf]  ;;  %268 = vst [vmem:[#allocation0 + $0x98] sm:$0xf] %v4562_v10  ;;  %v4573_v13 = vld [vmem:[%s9845_s0 + $0x20] sm:$0xf] }
   0x9   :  { %58 = vst [vmem:[#allocation0 + $0x1e8] sm:$0xf] %v4520_v11  ;;  %v4552_v12 = vld [vmem:[%s9845_s0 + $0x74] sm:$0xf]  ;;  %v4510_v14 = vld [vmem:[%s9845_s0 + $0x11c] sm:$0xf] }
   0xa   :  { %218 = vst [vmem:[#allocation0 + $0xe8] sm:$0xf] %v4552_v12  ;;  %323 = vst [vmem:[#allocation0 + $0x40] sm:$0xf] %v4573_v13  ;;  %v4531_v15 = vld [vmem:[%s9845_s0 + $0xc8] sm:$0xf] }
   0xb   :  { %8 = vst [vmem:[#allocation0 + $0x238] sm:$0xf] %v4510_v14  ;;  %v4542_v16 = vld [vmem:[%s9845_s0 + $0x9c] sm:$0xf]  ;;  %v4563_v17 = vld [vmem:[%s9845_s0 + $0x48] sm:$0xf] }
   0xc   :  { %113 = vst [vmem:[#allocation0 + $0x190] sm:$0xf] %v4531_v15  ;;  %168 = vst [vmem:[#allocation0 + $0x138] sm:$0xf] %v4542_v16  ;;  %v4521_v18 = vld [vmem:[%s9845_s0 + $0xf0] sm:$0xf] }
   0xd   :  { %273 = vst [vmem:[#allocation0 + $0x90] sm:$0xf] %v4563_v17  ;;  %v4553_v19 = vld [vmem:[%s9845_s0 + $0x70] sm:$0xf]  ;;  %63 = vst [vmem:[#allocation0 + $0x1e0] sm:$0xf] %v4521_v18 }
   0xe   :  { %v392_v20 = vld [vmem:[#allocation0 + $0x1a3] ss:$-1 sm:$0xf]   ;;  %v412_v21 = vld [vmem:[#allocation0 + $0x1f3] ss:$-1 sm:$0xf]  }
   0xf   :  { %223 = vst [vmem:[#allocation0 + $0xe0] sm:$0xf] %v4553_v19  ;;  %393 = vrot.lane.b32.xlu0 %v392_v20, %s5595_s17  ;;  %413 = vrot.lane.b32.xlu1 %v412_v21, %s5596_s18  ;;  %v379_v22 = vld [vmem:[#allocation0 + $0x53] ss:$-1 sm:$0xf]   ;;  %s5597_s19 = smov 125  }
  0x10   :  { %v381_v23 = vld [vmem:[#allocation0 + $0xff] ss:$-1 sm:$0xf0]   ;;  %v419_v26 = vld.sshfl [vmem:[#allocation0 + $0x48] sm:$0xff pattern:$0x33333012]  }
  0x11   :  { %v383_v24 = vsel %vm382_vm0, %v381_v23, %v379_v22  ;;  %v436_v25 = vld.sshfl [vmem:[#allocation0 + $0x198] sm:$0xff pattern:$0x33333012]   ;;  %v421_v27 = vld.sshfl [vmem:[#allocation0 + $0xf0] sm:$0xff pattern:$0x30122222]  }
  0x12   :  { %v399_v28 = vld [vmem:[#allocation0 + $0xa3] ss:$-1 sm:$0xf]   ;;  %v401_v29 = vld [vmem:[#allocation0 + $0x14f] ss:$-1 sm:$0xf0]   ;;  %v423_v30 = vsel %vm382_vm0, %v421_v27, %v419_v26 }
  0x13   :  { %384 = vrot.lane.b32.xlu0 %v383_v24, %s5595_s17  ;;  %437 = vrot.lane.b32.xlu1 %v436_v25, %s5597_s19  ;;  %v403_v31 = vsel %vm382_vm0, %v401_v29, %v399_v28  ;;  %v445_v32 = vld.sshfl [vmem:[#allocation0 + $0x98] sm:$0xff pattern:$0x33333012]   ;;  %v447_v33 = vld.sshfl [vmem:[#allocation0 + $0x140] sm:$0xff pattern:$0x30122222]  }
  0x14   :  { %v5795_v34 = vld.sshfl [vmem:[#allocation0 + $0x1e8] sm:$0xff pattern:$0x33333012]   ;;  %v471_v35 = vld.sshfl [vmem:[#allocation0 + $0x40] sm:$0xff pattern:$0x33333012]   ;;  %v5801_v39 = vsel %vm382_vm0, %v447_v33, %v445_v32 }
  0x15   :  { %v473_v36 = vld.sshfl [vmem:[#allocation0 + $0xe8] sm:$0xff pattern:$0x30122222]   ;;  %v488_v37 = vld.sshfl [vmem:[#allocation0 + $0x190] sm:$0xff pattern:$0x33333012]  }
  0x16   :  { %v4574_v38 = vld [vmem:[%s9845_s0 + $0x1c] sm:$0xf]  ;;  %v490_v40 = vld.sshfl [vmem:[#allocation0 + $0x238] sm:$0xff pattern:$0x30122222]   ;;  %s5598_s7 = smov 124   ;;  %v5833_v52 = vsel %vm382_vm0, %v473_v36, %v471_v35 }
  0x17   :  { %424 = vrot.lane.b32.xlu0 %v423_v30, %s5597_s19  ;;  %404 = vrot.lane.b32.xlu1 %v403_v31, %s5596_s18  ;;  %328 = vst [vmem:[#allocation0 + $0x38] sm:$0xf] %v4574_v38  ;;  %v4511_v41 = vld [vmem:[%s9845_s0 + $0x118] sm:$0xf]  ;;  %v4532_v42 = vld [vmem:[%s9845_s0 + $0xc4] sm:$0xf]  ;;  %v5836_v53 = vsel %vm382_vm0, %v490_v40, %v488_v37 }
  0x18   :  { %13 = vst [vmem:[#allocation0 + $0x230] sm:$0xf] %v4511_v41  ;;  %v4543_v43 = vld [vmem:[%s9845_s0 + $0x98] sm:$0xf]  ;;  %v4564_v44 = vld [vmem:[%s9845_s0 + $0x44] sm:$0xf] }
  0x19   :  { %118 = vst [vmem:[#allocation0 + $0x188] sm:$0xf] %v4532_v42  ;;  %173 = vst [vmem:[#allocation0 + $0x130] sm:$0xf] %v4543_v43  ;;  %v4522_v45 = vld [vmem:[%s9845_s0 + $0xec] sm:$0xf] }
  0x1a   :  { %278 = vst [vmem:[#allocation0 + $0x88] sm:$0xf] %v4564_v44  ;;  %v4554_v46 = vld [vmem:[%s9845_s0 + $0x6c] sm:$0xf]  ;;  %v4575_v47 = vld [vmem:[%s9845_s0 + $0x18] sm:$0xf] }
  0x1b   :  { %450 = vrot.lane.b32.xlu0 %v5801_v39, %s5598_s7  ;;  %463 = vrot.lane.b32.xlu1 %v5795_v34, %s5598_s7  ;;  %v505_v48 = vld.sshfl [vmem:[#allocation0 + $0x90] sm:$0xff pattern:$0x22222301]   ;;  %v507_v49 = vld.sshfl [vmem:[#allocation0 + $0x138] sm:$0xff pattern:$0x23011111]  }
  0x1c   :  { %68 = vst [vmem:[#allocation0 + $0x1d8] sm:$0xf] %v4522_v45  ;;  %228 = vst [vmem:[#allocation0 + $0xd8] sm:$0xf] %v4554_v46  ;;  %v4512_v50 = vld [vmem:[%s9845_s0 + $0x114] sm:$0xf]  ;;  %v5873_v2 = vsel %vm382_vm0, %v507_v49, %v505_v48 }
  0x1d   :  { %333 = vst [vmem:[#allocation0 + $0x30] sm:$0xf] %v4575_v47  ;;  %v4533_v51 = vld [vmem:[%s9845_s0 + $0xc0] sm:$0xf]  ;;  %18 = vst [vmem:[#allocation0 + $0x228] sm:$0xf] %v4512_v50 }
  0x1e   :  { %123 = vst [vmem:[#allocation0 + $0x180] sm:$0xf] %v4533_v51  ;;  %v4544_v54 = vld [vmem:[%s9845_s0 + $0x94] sm:$0xf]  ;;  %v4565_v55 = vld [vmem:[%s9845_s0 + $0x40] sm:$0xf] }
  0x1f   :  { %v4523_v56 = vld [vmem:[%s9845_s0 + $0xe8] sm:$0xf]  ;;  %178 = vst [vmem:[#allocation0 + $0x128] sm:$0xf] %v4544_v54  ;;  %283 = vst [vmem:[#allocation0 + $0x80] sm:$0xf] %v4565_v55 }
  0x20   :  { %73 = vst [vmem:[#allocation0 + $0x1d0] sm:$0xf] %v4523_v56  ;;  %v4555_v57 = vld [vmem:[%s9845_s0 + $0x68] sm:$0xf]  ;;  %v4576_v58 = vld [vmem:[%s9845_s0 + $0x14] sm:$0xf] }
  0x21   :  { %v4513_v59 = vld [vmem:[%s9845_s0 + $0x110] sm:$0xf]  ;;  %v5856_v60 = vld.sshfl [vmem:[#allocation0 + $0x1e0] sm:$0xff pattern:$0x22222301]   ;;  %s5599_s30 = smov 123  }
  0x22   :  { %233 = vst [vmem:[#allocation0 + $0xd0] sm:$0xf] %v4555_v57  ;;  %338 = vst [vmem:[#allocation0 + $0x28] sm:$0xf] %v4576_v58  ;;  %v4534_v61 = vld [vmem:[%s9845_s0 + $0xbc] sm:$0xf]  ;;  %476 = vrot.lane.b32.xlu0 %v5833_v52, %s5599_s30  ;;  %493 = vrot.lane.b32.xlu1 %v5836_v53, %s5599_s30 }
  0x23   :  { %23 = vst [vmem:[#allocation0 + $0x220] sm:$0xf] %v4513_v59  ;;  %v4545_v62 = vld [vmem:[%s9845_s0 + $0x90] sm:$0xf]  ;;  %v4566_v63 = vld [vmem:[%s9845_s0 + $0x3c] sm:$0xf] }
  0x24   :  { %v533_v0 = vld.sshfl [vmem:[#allocation0 + $0xe0] sm:$0xff pattern:$0x23011111]   ;;  %128 = vst [vmem:[#allocation0 + $0x178] sm:$0xf] %v4534_v61  ;;  %s5600_s6 = smov 122  }
  0x25   :  { %183 = vst [vmem:[#allocation0 + $0x120] sm:$0xf] %v4545_v62  ;;  %288 = vst [vmem:[#allocation0 + $0x78] sm:$0xf] %v4566_v63  ;;  %v4524_v1 = vld [vmem:[%s9845_s0 + $0xe4] sm:$0xf] }
  0x26   :  { %v531_v3 = vld.sshfl [vmem:[#allocation0 + $0x38] sm:$0xff pattern:$0x22222301]   ;;  %78 = vst [vmem:[#allocation0 + $0x1c8] sm:$0xf] %v4524_v1  ;;  %510 = vrot.lane.b32.xlu0 %v5873_v2, %s5600_s6  ;;  %523 = vrot.lane.b32.xlu1 %v5856_v60, %s5600_s6  ;;  %s5601_s7 = smov 121  }
  0x27   :  { %v4556_v4 = vld [vmem:[%s9845_s0 + $0x64] sm:$0xf]  ;;  %v548_v5 = vld.sshfl [vmem:[#allocation0 + $0x188] sm:$0xff pattern:$0x22222301]   ;;  %v5881_v7 = vsel %vm382_vm0, %v533_v0, %v531_v3  ;;  %s5602_s10 = smov 120  }
  0x28   :  { %v550_v6 = vld.sshfl [vmem:[#allocation0 + $0x230] sm:$0xff pattern:$0x23011111]   ;;  %238 = vst [vmem:[#allocation0 + $0xc8] sm:$0xf] %v4556_v4  ;;  %s5603_s4 = smov 119  }
  0x29   :  { %v5884_v8 = vsel %vm382_vm0, %v550_v6, %v548_v5  ;;  %v565_v9 = vld.sshfl [vmem:[#allocation0 + $0x88] sm:$0xff pattern:$0x22222301]   ;;  %v567_v10 = vld.sshfl [vmem:[#allocation0 + $0x130] sm:$0xff pattern:$0x23011111]  }
  0x2a   :  { %536 = vrot.lane.b32.xlu0 %v5881_v7, %s5601_s7  ;;  %553 = vrot.lane.b32.xlu1 %v5884_v8, %s5601_s7  ;;  %v5888_v11 = vld.sshfl [vmem:[#allocation0 + $0x1d8] sm:$0xff pattern:$0x22222301]   ;;  %v5891_v12 = vsel %vm382_vm0, %v567_v10, %v565_v9  ;;  %v591_v13 = vld.sshfl [vmem:[#allocation0 + $0x30] sm:$0xff pattern:$0x11111230]  }
  0x2b   :  { %v593_v14 = vld.sshfl [vmem:[#allocation0 + $0xd8] sm:$0xff pattern:$0x12300000]   ;;  %v608_v15 = vld.sshfl [vmem:[#allocation0 + $0x180] sm:$0xff pattern:$0x11111230]  }
  0x2c   :  { %v610_v16 = vld.sshfl [vmem:[#allocation0 + $0x228] sm:$0xff pattern:$0x12300000]   ;;  %v4577_v17 = vld [vmem:[%s9845_s0 + $0x10] sm:$0xf]  ;;  %v5905_v22 = vsel %vm382_vm0, %v593_v14, %v591_v13  ;;  %s5604_s23 = smov 118  }
  0x2d   :  { %v625_v18 = vld.sshfl [vmem:[#allocation0 + $0x80] sm:$0xff pattern:$0x11111230]   ;;  %v627_v19 = vld.sshfl [vmem:[#allocation0 + $0x128] sm:$0xff pattern:$0x12300000]   ;;  %v5908_v23 = vsel %vm382_vm0, %v610_v16, %v608_v15 }
  0x2e   :  { %570 = vrot.lane.b32.xlu0 %v5891_v12, %s5602_s10  ;;  %583 = vrot.lane.b32.xlu1 %v5888_v11, %s5602_s10  ;;  %343 = vst [vmem:[#allocation0 + $0x20] sm:$0xf] %v4577_v17  ;;  %v4514_v20 = vld [vmem:[%s9845_s0 + $0x10c] sm:$0xf]  ;;  %v4535_v21 = vld [vmem:[%s9845_s0 + $0xb8] sm:$0xf]  ;;  %v5948_v42 = vsel %vm382_vm0, %v627_v19, %v625_v18 }
  0x2f   :  { %28 = vst [vmem:[#allocation0 + $0x218] sm:$0xf] %v4514_v20  ;;  %133 = vst [vmem:[#allocation0 + $0x170] sm:$0xf] %v4535_v21  ;;  %v4546_v24 = vld [vmem:[%s9845_s0 + $0x8c] sm:$0xf] }
  0x30   :  { %v4567_v25 = vld [vmem:[%s9845_s0 + $0x38] sm:$0xf]  ;;  %v4525_v26 = vld [vmem:[%s9845_s0 + $0xe0] sm:$0xf]  ;;  %188 = vst [vmem:[#allocation0 + $0x118] sm:$0xf] %v4546_v24 }
  0x31   :  { %293 = vst [vmem:[#allocation0 + $0x70] sm:$0xf] %v4567_v25  ;;  %83 = vst [vmem:[#allocation0 + $0x1c0] sm:$0xf] %v4525_v26  ;;  %v4557_v27 = vld [vmem:[%s9845_s0 + $0x60] sm:$0xf] }
  0x32   :  { %v4578_v28 = vld [vmem:[%s9845_s0 + $0xc] sm:$0xf]  ;;  %v4515_v29 = vld [vmem:[%s9845_s0 + $0x108] sm:$0xf]  ;;  %243 = vst [vmem:[#allocation0 + $0xc0] sm:$0xf] %v4557_v27  ;;  %596 = vrot.lane.b32.xlu0 %v5905_v22, %s5603_s4  ;;  %613 = vrot.lane.b32.xlu1 %v5908_v23, %s5603_s4 }
  0x33   :  { %v5928_v30 = vld.sshfl [vmem:[#allocation0 + $0x1d0] sm:$0xff pattern:$0x11111230]   ;;  %348 = vst [vmem:[#allocation0 + $0x18] sm:$0xf] %v4578_v28  ;;  %s5605_s24 = smov 117  }
  0x34   :  { %33 = vst [vmem:[#allocation0 + $0x210] sm:$0xf] %v4515_v29  ;;  %v4536_v31 = vld [vmem:[%s9845_s0 + $0xb4] sm:$0xf]  ;;  %v4547_v32 = vld [vmem:[%s9845_s0 + $0x88] sm:$0xf] }
  0x35   :  { %v4568_v33 = vld [vmem:[%s9845_s0 + $0x34] sm:$0xf]  ;;  %v651_v35 = vld [vmem:[#allocation0 + $0x2b] ss:$-1 sm:$0xf]   ;;  %s5606_s25 = smov 116  }
  0x36   :  { %v653_v36 = vld [vmem:[#allocation0 + $0xd7] ss:$-1 sm:$0xf0]   ;;  %v664_v37 = vld [vmem:[#allocation0 + $0x17b] ss:$-1 sm:$0xf]   ;;  %630 = vrot.lane.b32.xlu0 %v5948_v42, %s5604_s23  ;;  %643 = vrot.lane.b32.xlu1 %v5928_v30, %s5604_s23 }
  0x37   :  { %v666_v38 = vld [vmem:[#allocation0 + $0x227] ss:$-1 sm:$0xf0]   ;;  %138 = vst [vmem:[#allocation0 + $0x168] sm:$0xf] %v4536_v31  ;;  %v655_v50 = vsel %vm382_vm0, %v653_v36, %v651_v35  ;;  %s5607_s7 = smov 115  }
  0x38   :  { %193 = vst [vmem:[#allocation0 + $0x110] sm:$0xf] %v4547_v32  ;;  %298 = vst [vmem:[#allocation0 + $0x68] sm:$0xf] %v4568_v33  ;;  %v4526_v40 = vld [vmem:[%s9845_s0 + $0xdc] sm:$0xf]  ;;  %v668_v51 = vsel %vm382_vm0, %v666_v38, %v664_v37 }
  0x39   :  { %v4558_v41 = vld [vmem:[%s9845_s0 + $0x5c] sm:$0xf]  ;;  %88 = vst [vmem:[#allocation0 + $0x1b8] sm:$0xf] %v4526_v40  ;;  %v4579_v43 = vld [vmem:[%s9845_s0 + $0x8] sm:$0xf] }
  0x3a   :  { %248 = vst [vmem:[#allocation0 + $0xb8] sm:$0xf] %v4558_v41  ;;  %v4516_v44 = vld [vmem:[%s9845_s0 + $0x104] sm:$0xf]  ;;  %v4537_v45 = vld [vmem:[%s9845_s0 + $0xb0] sm:$0xf]  ;;  %656 = vrot.lane.b32.xlu0 %v655_v50, %s5605_s24  ;;  %669 = vrot.lane.b32.xlu1 %v668_v51, %s5605_s24 }
  0x3b   :  { %353 = vst [vmem:[#allocation0 + $0x10] sm:$0xf] %v4579_v43  ;;  %38 = vst [vmem:[#allocation0 + $0x208] sm:$0xf] %v4516_v44  ;;  %v4548_v46 = vld [vmem:[%s9845_s0 + $0x84] sm:$0xf] }
  0x3c   :  { %143 = vst [vmem:[#allocation0 + $0x160] sm:$0xf] %v4537_v45  ;;  %v4569_v47 = vld [vmem:[%s9845_s0 + $0x30] sm:$0xf]  ;;  %v4527_v48 = vld [vmem:[%s9845_s0 + $0xd8] sm:$0xf] }
  0x3d   :  { %198 = vst [vmem:[#allocation0 + $0x108] sm:$0xf] %v4548_v46  ;;  %303 = vst [vmem:[#allocation0 + $0x60] sm:$0xf] %v4569_v47  ;;  %v4559_v49 = vld [vmem:[%s9845_s0 + $0x58] sm:$0xf] }
  0x3e   :  { %93 = vst [vmem:[#allocation0 + $0x1b0] sm:$0xf] %v4527_v48  ;;  %253 = vst [vmem:[#allocation0 + $0xb0] sm:$0xf] %v4559_v49  ;;  %v4580_v3 = vld [vmem:[%s9845_s0 + $0x4] sm:$0xf] }
  0x3f   :  { %v677_v54 = vld [vmem:[#allocation0 + $0x7b] ss:$-1 sm:$0xf]   ;;  %v679_v55 = vld [vmem:[#allocation0 + $0x127] ss:$-1 sm:$0xf0]  }
  0x40   :  { %v690_v56 = vld [vmem:[#allocation0 + $0x1cb] ss:$-1 sm:$0xf]   ;;  %v681_v57 = vsel %vm382_vm0, %v679_v55, %v677_v54  ;;  %v697_v58 = vld [vmem:[#allocation0 + $0x23] ss:$-1 sm:$0xf]  }
  0x41   :  { %v699_v59 = vld [vmem:[#allocation0 + $0xcf] ss:$-1 sm:$0xf0]   ;;  %v710_v61 = vld [vmem:[#allocation0 + $0x173] ss:$-1 sm:$0xf]   ;;  %682 = vrot.lane.b32.xlu0 %v681_v57, %s5606_s25  ;;  %691 = vrot.lane.b32.xlu1 %v690_v56, %s5606_s25 }
  0x42   :  { %v712_v62 = vld [vmem:[#allocation0 + $0x21f] ss:$-1 sm:$0xf0]   ;;  %v701_v63 = vsel %vm382_vm0, %v699_v59, %v697_v58  ;;  %v723_v1 = vld.sshfl [vmem:[#allocation0 + $0x70] sm:$0xff pattern:$0x33333012]  }
  0x43   :  { %v714_v0 = vsel %vm382_vm0, %v712_v62, %v710_v61  ;;  %v725_v4 = vld.sshfl [vmem:[#allocation0 + $0x118] sm:$0xff pattern:$0x30122222]   ;;  %357 = vst [vmem:[#allocation0 + $0x8] sm:$0xf] %v4580_v3  ;;  %s5609_s18 = smov 113  }
  0x44   :  { %v4517_v5 = vld [vmem:[%s9845_s0 + $0x100] sm:$0xf]  ;;  %v4538_v9 = vld [vmem:[%s9845_s0 + $0xac] sm:$0xf]  ;;  %v4528_v16 = vld [vmem:[%s9845_s0 + $0xd4] sm:$0xf]  ;;  %v6002_v18 = vsel %vm382_vm0, %v725_v4, %v723_v1 }
  0x45   :  { %v5984_v6 = vld.sshfl [vmem:[#allocation0 + $0x1c0] sm:$0xff pattern:$0x33333012]   ;;  %43 = vst [vmem:[#allocation0 + $0x200] sm:$0xf] %v4517_v5  ;;  %702 = vrot.lane.b32.xlu0 %v701_v63, %s5607_s7  ;;  %715 = vrot.lane.b32.xlu1 %v714_v0, %s5607_s7  ;;  %s5610_s23 = smov 112  }
  0x46   :  { %v4549_v10 = vld [vmem:[%s9845_s0 + $0x80] sm:$0xf]  ;;  %v4570_v13 = vld [vmem:[%s9845_s0 + $0x2c] sm:$0xf]  ;;  %148 = vst [vmem:[#allocation0 + $0x158] sm:$0xf] %v4538_v9 }
  0x47   :  { %v749_v14 = vld.sshfl [vmem:[#allocation0 + $0x18] sm:$0xff pattern:$0x33333012]   ;;  %v751_v15 = vld.sshfl [vmem:[#allocation0 + $0xc0] sm:$0xff pattern:$0x30122222]  }
  0x48   :  { %203 = vst [vmem:[#allocation0 + $0x100] sm:$0xf] %v4549_v10  ;;  %308 = vst [vmem:[#allocation0 + $0x58] sm:$0xf] %v4570_v13  ;;  %v4560_v17 = vld [vmem:[%s9845_s0 + $0x54] sm:$0xf]  ;;  %v6016_v26 = vsel %vm382_vm0, %v751_v15, %v749_v14 }
  0x49   :  { %98 = vst [vmem:[#allocation0 + $0x1a8] sm:$0xf] %v4528_v16  ;;  %258 = vst [vmem:[#allocation0 + $0xa8] sm:$0xf] %v4560_v17  ;;  %v358_v19 = vld [vmem:[%s9845_s0] sm:$0xf] }
  0x4a   :  { %v4518_v20 = vld [vmem:[%s9845_s0 + $0xfc] sm:$0xf]  ;;  %v4539_v21 = vld [vmem:[%s9845_s0 + $0xa8] sm:$0xf]  ;;  %359 = vst [vmem:[#allocation0] sm:$0xf] %v358_v19 }
  0x4b   :  { %v766_v24 = vld.sshfl [vmem:[#allocation0 + $0x168] sm:$0xff pattern:$0x33333012]   ;;  %v768_v25 = vld.sshfl [vmem:[#allocation0 + $0x210] sm:$0xff pattern:$0x30122222]  }
  0x4c   :  { %48 = vst [vmem:[#allocation0 + $0x1f8] sm:$0xf] %v4518_v20  ;;  %153 = vst [vmem:[#allocation0 + $0x150] sm:$0xf] %v4539_v21  ;;  %s5608_s0 = smov 114   ;;  %v6019_v27 = vsel %vm382_vm0, %v768_v25, %v766_v24  ;;  %s5611_s26 = smov 111  }
  0x4d   :  { %728 = vrot.lane.b32.xlu0 %v6002_v18, %s5608_s0  ;;  %741 = vrot.lane.b32.xlu1 %v5984_v6, %s5608_s0  ;;  %v783_v28 = vld.sshfl [vmem:[#allocation0 + $0x68] sm:$0xff pattern:$0x33333012]   ;;  %v785_v29 = vld.sshfl [vmem:[#allocation0 + $0x110] sm:$0xff pattern:$0x30122222]  }
  0x4e   :  { %v6021_v31 = vld.sshfl [vmem:[#allocation0 + $0x1b8] sm:$0xff pattern:$0x33333012]   ;;  %v809_v32 = vld.sshfl [vmem:[#allocation0 + $0x10] sm:$0xff pattern:$0x22222301]   ;;  %v6026_v35 = vsel %vm382_vm0, %v785_v29, %v783_v28 }
  0x4f   :  { %v811_v33 = vld.sshfl [vmem:[#allocation0 + $0xb8] sm:$0xff pattern:$0x23011111]   ;;  %v826_v36 = vld.sshfl [vmem:[#allocation0 + $0x160] sm:$0xff pattern:$0x22222301]  }
  0x50   :  { %v828_v38 = vld.sshfl [vmem:[#allocation0 + $0x208] sm:$0xff pattern:$0x23011111]   ;;  %v6043_v43 = vsel %vm382_vm0, %v811_v33, %v809_v32  ;;  %v843_v45 = vld.sshfl [vmem:[#allocation0 + $0x60] sm:$0xff pattern:$0x22222301]  }
  0x51   :  { %754 = vrot.lane.b32.xlu0 %v6016_v26, %s5609_s18  ;;  %771 = vrot.lane.b32.xlu1 %v6019_v27, %s5609_s18  ;;  %v360_v37 = vld [vmem:[#allocation0] sm:$0xf]   ;;  %v6046_v44 = vsel %vm382_vm0, %v828_v38, %v826_v36  ;;  %v845_v46 = vld.sshfl [vmem:[#allocation0 + $0x108] sm:$0xff pattern:$0x23011111]   ;;  %s5612_s27 = smov 110  }
  0x52   :  { %362 = vst.msk [vmem:[%s9846_s1] ss:$440 sm:$0xf] %vm361_vm1, %v360_v37   ;;  %v6050_v47 = vld.sshfl [vmem:[#allocation0 + $0x1b0] sm:$0xff pattern:$0x22222301]   ;;  %v6053_v48 = vsel %vm382_vm0, %v845_v46, %v843_v45 }
  0x53   :  { %v369_v40 = vld [vmem:[#allocation0 + $0x150] sm:$0xf]   ;;  %v374_v41 = vld [vmem:[#allocation0 + $0x1f8] sm:$0xf]   ;;  %s5613_s28 = smov 109   ;;  %s5614_s2 = smov 108  }
  0x54   :  { %4582 = vst.msk [vmem:[%s9846_s1 + $0x100] ss:$440 sm:$0xf] %vm361_vm1, %v369_v40   ;;  %4583 = vst.msk [vmem:[%s9846_s1 + $0x180] ss:$440 sm:$0xf] %vm361_vm1, %v374_v41  }
  0x55   :  { %788 = vrot.lane.b32.xlu0 %v6026_v35, %s5610_s23  ;;  %801 = vrot.lane.b32.xlu1 %v6021_v31, %s5610_s23  ;;  %v869_v49 = vld.sshfl [vmem:[#allocation0 + $0x8] sm:$0xff pattern:$0x11111230]   ;;  %v871_v50 = vld.sshfl [vmem:[#allocation0 + $0xb0] sm:$0xff pattern:$0x12300000]  }
  0x56   :  { %v886_v51 = vld.sshfl [vmem:[#allocation0 + $0x158] sm:$0xff pattern:$0x11111230]   ;;  %v888_v54 = vld.sshfl [vmem:[#allocation0 + $0x200] sm:$0xff pattern:$0x12300000]   ;;  %v873_v55 = vsel %vm382_vm0, %v871_v50, %v869_v49 }
  0x57   :  { %v890_v56 = vsel %vm382_vm0, %v888_v54, %v886_v51  ;;  %v903_v57 = vld.sshfl [vmem:[#allocation0 + $0x58] sm:$0xff pattern:$0x11111230]   ;;  %v905_v58 = vld.sshfl [vmem:[#allocation0 + $0x100] sm:$0xff pattern:$0x12300000]  }
  0x58   :  { %v6059_v59 = vld.sshfl [vmem:[#allocation0 + $0x1a8] sm:$0xff pattern:$0x11111230]   ;;  %v6062_v62 = vsel %vm382_vm0, %v905_v58, %v903_v57  ;;  %v928_v63 = vld.sshfl [vmem:[#allocation0] sm:$0xff pattern:$0x11111230]  }
  0x59   :  { %814 = vrot.lane.b32.xlu0 %v6043_v43, %s5611_s26  ;;  %831 = vrot.lane.b32.xlu1 %v6046_v44, %s5611_s26  ;;  %v364_v61 = vld [vmem:[#allocation0 + $0xa8] sm:$0xf]   ;;  %v945_v1 = vld.sshfl [vmem:[#allocation0 + $0x150] sm:$0xff pattern:$0x11111230]   ;;  %s5615_s3 = smov 107  }
  0x5a   :  { %v930_v0 = vld.sshfl [vmem:[#allocation0 + $0xa8] sm:$0xff pattern:$0x12300000]   ;;  %4581 = vst.msk [vmem:[%s9846_s1 + $0x80] ss:$440 sm:$0xf] %vm361_vm1, %v364_v61  }
  0x5b   :  { %v947_v3 = vld.sshfl [vmem:[#allocation0 + $0x1f8] sm:$0xff pattern:$0x12300000]   ;;  %v6071_v4 = vsel %vm382_vm0, %v930_v0, %v928_v63  ;;  %v962_v9 = vld [vmem:[#allocation0 + $0x53] ss:$-1 sm:$0xf]  }
  0x5c   :  { %v6074_v5 = vsel %vm382_vm0, %v947_v3, %v945_v1  ;;  %v964_v10 = vld [vmem:[#allocation0 + $0xff] ss:$-1 sm:$0xf0]   ;;  %v975_v14 = vld [vmem:[#allocation0 + $0x1a3] ss:$-1 sm:$0xf]  }
  0x5d   :  { %848 = vrot.lane.b32.xlu0 %v6053_v48, %s5612_s27  ;;  %861 = vrot.lane.b32.xlu1 %v6050_v47, %s5612_s27  ;;  %v966_v13 = vsel %vm382_vm0, %v964_v10, %v962_v9  ;;  %v982_v15 = vld [vmem:[#allocation0 + $0xa3] ss:$-1 sm:$0xf]   ;;  %v984_v16 = vld [vmem:[#allocation0 + $0x14f] ss:$-1 sm:$0xf0]  }
  0x5e   :  { %s5616_s4 = smov 106   ;;  %v986_v17 = vsel %vm382_vm0, %v984_v16, %v982_v15  ;;  %v995_v19 = vld [vmem:[#allocation0 + $0x1f3] ss:$-1 sm:$0xf]   ;;  %s5617_s5 = smov 105   ;;  %vm3353_vm4 = vcmask 883712  }
  0x5f   :  { %v1002_v20 = vld [vmem:[#allocation0 + $0x4b] ss:$-1 sm:$0xf]   ;;  %v1004_v21 = vld [vmem:[#allocation0 + $0xf7] ss:$-1 sm:$0xf0]  }
  0x60   :  { %v1006_v24 = vsel %vm382_vm0, %v1004_v21, %v1002_v20  ;;  %v1015_v25 = vld [vmem:[#allocation0 + $0x19b] ss:$-1 sm:$0xf]   ;;  %s5618_s6 = smov 104   ;;  %s5619_s7 = smov 103   ;;  %vm3393_vm5 = vcmask 891904  }
  0x61   :  { %874 = vrot.lane.b32.xlu0 %v873_v55, %s5613_s28  ;;  %891 = vrot.lane.b32.xlu1 %v890_v56, %s5613_s28  ;;  %s5620_s8 = smov 102   ;;  %s5621_s9 = smov 101   ;;  %v1275_v28 = vld [vmem:[#allocation0 + $0x1cb] ss:$-1 sm:$0xf]   ;;  %vm3433_vm6 = vcmask 900096  }
  0x62   :  { %s5622_s10 = smov 100   ;;  %s5623_s11 = smov 99   ;;  %v1282_v32 = vld [vmem:[#allocation0 + $0x23] ss:$-1 sm:$0xf]   ;;  %vm3485_vm7 = vcmask 908288  }
  0x63   :  { %s5624_s16 = smov 98   ;;  %s5625_s24 = smov 97   ;;  %v1284_v33 = vld [vmem:[#allocation0 + $0xcf] ss:$-1 sm:$0xf0]   ;;  %vm3537_vm8 = vcmask 916480  }
  0x64   :  { %v1295_v38 = vld [vmem:[#allocation0 + $0x173] ss:$-1 sm:$0xf]   ;;  %v1297_v40 = vld [vmem:[#allocation0 + $0x21f] ss:$-1 sm:$0xf0]   ;;  %v1286_v41 = vsel %vm382_vm0, %v1284_v33, %v1282_v32 }
  0x65   :  { %908 = vrot.lane.b32.xlu0 %v6062_v62, %s5614_s2  ;;  %921 = vrot.lane.b32.xlu1 %v6059_v59, %s5614_s2  ;;  %s5627_s20 = smov 95   ;;  %v1299_v45 = vsel %vm382_vm0, %v1297_v40, %v1295_v38  ;;  %v1471_v56 = vld.sshfl [vmem:[#allocation0 + $0x158] sm:$0xff pattern:$0x22222301]   ;;  %s5634_s29 = smov 88   ;;  %vm3605_vm9 = vcmask 924672  }
  0x66   :  { %v1473_v57 = vld.sshfl [vmem:[#allocation0 + $0x200] sm:$0xff pattern:$0x23011111]   ;;  %v1547_v1 = vld [vmem:[#allocation0 + $0x53] ss:$-1 sm:$0xf]  }
  0x67   :  { %v1549_v3 = vld [vmem:[#allocation0 + $0xff] ss:$-1 sm:$0xf0]   ;;  %s5637_s28 = smov 85   ;;  %s5645_s22 = smov 77   ;;  %vm3657_vm10 = vcmask 932864  }
  0x68   :  { %v1580_v16 = vld [vmem:[#allocation0 + $0x1f3] ss:$-1 sm:$0xf]   ;;  %v1587_v20 = vld [vmem:[#allocation0 + $0x4b] ss:$-1 sm:$0xf]  }
  0x69   :  { %933 = vrot.lane.b32.xlu0 %v6071_v4, %s5615_s3  ;;  %950 = vrot.lane.b32.xlu1 %v6074_v5, %s5615_s3  ;;  %v1589_v21 = vld [vmem:[#allocation0 + $0xf7] ss:$-1 sm:$0xf0]   ;;  %v6566_v38 = vld.sshfl [vmem:[#allocation0 + $0x1e0] sm:$0xff pattern:$0x33333012]  }
  0x6a   :  { %s5648_s19 = smov 74   ;;  %s5656_s14 = smov 66   ;;  %vm3725_vm11 = vcmask 941056   ;;  %vm3777_vm12 = vcmask 949248   ;;  %vm3897_vm13 = vcmask 965632   ;;  %vm3949_vm14 = vcmask 973824  }
  0x6b   :  { %s5669_s26 = smov 53   ;;  %s5680_s23 = smov 42   ;;  %vm3989_vm15 = vcmask 982016  }
  0x6c   :  { %s5698_s27 = smov 24   ;;  %s5701_s30 = smov 21  }
  0x6d   :  { %967 = vrot.lane.b32.xlu0 %v966_v13, %s5616_s4  ;;  %976 = vrot.lane.b32.xlu1 %v975_v14, %s5616_s4  ;;  %v1567_v13 = vld [vmem:[#allocation0 + $0xa3] ss:$-1 sm:$0xf]   ;;  %v1569_v14 = vld [vmem:[#allocation0 + $0x14f] ss:$-1 sm:$0xf0]  }
  0x6e   :  { %v1571_v15 = vsel %vm382_vm0, %v1569_v14, %v1567_v13  ;;  %s5690_s4 = smov 32   ;;  %s5712_s21 = smov 10  }
  0x71   :  { %987 = vrot.lane.b32.xlu0 %v986_v17, %s5617_s5  ;;  %996 = vrot.lane.b32.xlu1 %v995_v19, %s5617_s5  ;;  %s5711_s5 = smov 11  }
  0x75   :  { %1007 = vrot.lane.b32.xlu0 %v1006_v24, %s5618_s6  ;;  %1016 = vrot.lane.b32.xlu1 %v1015_v25, %s5618_s6  ;;  %v1591_v24 = vsel %vm382_vm0, %v1589_v21, %v1587_v20  ;;  %v1600_v25 = vld [vmem:[#allocation0 + $0x19b] ss:$-1 sm:$0xf]   ;;  %s5658_s6 = smov 64  }
  0x79   :  { %1027 = vrot.lane.b32.xlu0 %v5801_v39, %s5619_s7  ;;  %1040 = vrot.lane.b32.xlu1 %v5795_v34, %s5619_s7  ;;  %s5635_s7 = smov 87  }
  0x7d   :  { %1053 = vrot.lane.b32.xlu0 %v5833_v52, %s5620_s8  ;;  %1070 = vrot.lane.b32.xlu1 %v5836_v53, %s5620_s8  ;;  %v1228_v52 = vld.sshfl [vmem:[#allocation0 + $0x28] sm:$0xff pattern:$0x11111230]   ;;  %v1230_v53 = vld.sshfl [vmem:[#allocation0 + $0xd0] sm:$0xff pattern:$0x12300000]  }
  0x7e   :  { %s5626_s8 = smov 96  }
  0x81   :  { %1087 = vrot.lane.b32.xlu0 %v5873_v2, %s5621_s9  ;;  %1100 = vrot.lane.b32.xlu1 %v5856_v60, %s5621_s9  ;;  %v394_v34 = vpop.permute.xlu0 %393   ;;  %v414_v39 = vpop.permute.xlu1 %413  }
  0x82   :  { %4586 = vst.msk [vmem:[%s9846_s1 + $0x665] ss:$-440 sm:$0xf] %vm361_vm1, %v394_v34   ;;  %4589 = vst.msk [vmem:[%s9846_s1 + $0x6a2] ss:$-440 sm:$0xf] %vm361_vm1, %v414_v39  }
  0x85   :  { %1113 = vrot.lane.b32.xlu0 %v5881_v7, %s5622_s10  ;;  %1130 = vrot.lane.b32.xlu1 %v5884_v8, %s5622_s10  ;;  %v385_v60 = vpop.permute.xlu0 %384   ;;  %v438_v2 = vpop.permute.xlu1 %437   ;;  %v1245_v7 = vld.sshfl [vmem:[#allocation0 + $0x178] sm:$0xff pattern:$0x11111230]   ;;  %v1247_v8 = vld.sshfl [vmem:[#allocation0 + $0x220] sm:$0xff pattern:$0x12300000]  }
  0x86   :  { %4584 = vst.msk [vmem:[%s9846_s1 + $0x565] ss:$-440 sm:$0xf] %vm361_vm1, %v385_v60   ;;  %4585 = vst.msk [vmem:[%s9846_s1 + $0xcc5] ss:$-440 sm:$0xf0] %vm361_vm1, %v385_v60  }
  0x87   :  { %4594 = vst.msk [vmem:[%s9846_s1 + $0x4a7] ss:$-440 sm:$0x7] %vm361_vm1, %v438_v2   ;;  %4595 = vst.msk [vmem:[%s9846_s1 + $0x65c] sm:$0x8] %vm361_vm1, %v438_v2  }
  0x88   :  { %v6495_v60 = vld.sshfl [vmem:[#allocation0 + $0x1e8] sm:$0xff pattern:$0x33333012]  }
  0x89   :  { %1147 = vrot.lane.b32.xlu0 %v5891_v12, %s5623_s11  ;;  %1160 = vrot.lane.b32.xlu1 %v5888_v11, %s5623_s11  ;;  %v6120_v11 = vsel %vm382_vm0, %v1230_v53, %v1228_v52  ;;  %v6123_v12 = vsel %vm382_vm0, %v1247_v8, %v1245_v7  ;;  %v1607_v52 = vld.sshfl [vmem:[#allocation0 + $0x98] sm:$0xff pattern:$0x33333012]   ;;  %v1609_v53 = vld.sshfl [vmem:[#allocation0 + $0x140] sm:$0xff pattern:$0x30122222]  }
  0x8a   :  { %v6498_v2 = vsel %vm382_vm0, %v1609_v53, %v1607_v52  ;;  %v1633_v7 = vld.sshfl [vmem:[#allocation0 + $0x40] sm:$0xff pattern:$0x33333012]   ;;  %v1635_v8 = vld.sshfl [vmem:[#allocation0 + $0xe8] sm:$0xff pattern:$0x30122222]  }
  0x8d   :  { %1173 = vrot.lane.b32.xlu0 %v5905_v22, %s5624_s16  ;;  %1190 = vrot.lane.b32.xlu1 %v5908_v23, %s5624_s16  ;;  %v425_v22 = vpop.permute.xlu0 %424   ;;  %v405_v23 = vpop.permute.xlu1 %404   ;;  %s5636_s16 = smov 86  }
  0x8e   :  { %4590 = vst.msk [vmem:[%s9846_s1 + $0x3a7] ss:$-440 sm:$0x7] %vm361_vm1, %v425_v22   ;;  %4591 = vst.msk [vmem:[%s9846_s1 + $0x907] ss:$-312 sm:$0x18] %vm361_vm1, %v425_v22  }
  0x8f   :  { %4592 = vst.msk [vmem:[%s9846_s1 + $0xb07] ss:$-440 sm:$0x60] %vm361_vm1, %v425_v22   ;;  %4593 = vst.msk [vmem:[%s9846_s1 + $0x5d8] sm:$0x80] %vm361_vm1, %v425_v22  }
  0x90   :  { %4587 = vst.msk [vmem:[%s9846_s1 + $0x5a2] ss:$-440 sm:$0xf] %vm361_vm1, %v405_v23   ;;  %4588 = vst.msk [vmem:[%s9846_s1 + $0xd02] ss:$-440 sm:$0xf0] %vm361_vm1, %v405_v23  }
  0x91   :  { %1207 = vrot.lane.b32.xlu0 %v5948_v42, %s5625_s24  ;;  %1220 = vrot.lane.b32.xlu1 %v5928_v30, %s5625_s24  ;;  %v1262_v30 = vld [vmem:[#allocation0 + $0x7b] ss:$-1 sm:$0xf]   ;;  %v1264_v42 = vld [vmem:[#allocation0 + $0x127] ss:$-1 sm:$0xf0]   ;;  %v451_v36 = vpop.permute.xlu0 %450   ;;  %v464_v37 = vpop.permute.xlu1 %463  }
  0x92   :  { %v1266_v29 = vsel %vm382_vm0, %v1264_v42, %v1262_v30  ;;  %4596 = vst.msk [vmem:[%s9846_s1 + $0x3e4] ss:$-440 sm:$0x7] %vm361_vm1, %v451_v36   ;;  %4597 = vst.msk [vmem:[%s9846_s1 + $0x944] ss:$-312 sm:$0x18] %vm361_vm1, %v451_v36  }
  0x93   :  { %4598 = vst.msk [vmem:[%s9846_s1 + $0xb44] ss:$-440 sm:$0x60] %vm361_vm1, %v451_v36   ;;  %4599 = vst.msk [vmem:[%s9846_s1 + $0x615] sm:$0x80] %vm361_vm1, %v451_v36  }
  0x94   :  { %4600 = vst.msk [vmem:[%s9846_s1 + $0x4e4] ss:$-440 sm:$0x7] %vm361_vm1, %v464_v37   ;;  %4601 = vst.msk [vmem:[%s9846_s1 + $0x699] sm:$0x8] %vm361_vm1, %v464_v37  }
  0x95   :  { %1233 = vrot.lane.b32.xlu0 %v6120_v11, %s5626_s8  ;;  %1250 = vrot.lane.b32.xlu1 %v6123_v12, %s5626_s8  ;;  %v477_v46 = vpop.permute.xlu0 %476   ;;  %v494_v49 = vpop.permute.xlu1 %493   ;;  %s5628_s8 = smov 94   ;;  %v1650_v30 = vld.sshfl [vmem:[#allocation0 + $0x190] sm:$0xff pattern:$0x33333012]  }
  0x96   :  { %4602 = vst.msk [vmem:[%s9846_s1 + $0x3a1] ss:$-440 sm:$0x7] %vm361_vm1, %v477_v46   ;;  %4603 = vst.msk [vmem:[%s9846_s1 + $0x901] ss:$-312 sm:$0x18] %vm361_vm1, %v477_v46  }
  0x97   :  { %4604 = vst.msk [vmem:[%s9846_s1 + $0xb01] ss:$-440 sm:$0x60] %vm361_vm1, %v477_v46   ;;  %4605 = vst.msk [vmem:[%s9846_s1 + $0x5d2] sm:$0x80] %vm361_vm1, %v477_v46  }
  0x98   :  { %4606 = vst.msk [vmem:[%s9846_s1 + $0x4a1] ss:$-440 sm:$0x7] %vm361_vm1, %v494_v49   ;;  %4607 = vst.msk [vmem:[%s9846_s1 + $0xa01] ss:$-312 sm:$0x18] %vm361_vm1, %v494_v49  }
  0x99   :  { %1267 = vrot.lane.b32.xlu0 %v1266_v29, %s5627_s20  ;;  %1276 = vrot.lane.b32.xlu1 %v1275_v28, %s5627_s20  ;;  %4608 = vst.msk [vmem:[%s9846_s1 + $0xc01] ss:$-440 sm:$0x60] %vm361_vm1, %v494_v49   ;;  %4609 = vst.msk [vmem:[%s9846_s1 + $0x6d2] sm:$0x80] %vm361_vm1, %v494_v49   ;;  %v511_v50 = vpop.permute.xlu0 %510   ;;  %v524_v51 = vpop.permute.xlu1 %523   ;;  %s5629_s20 = smov 93   ;;  %v6535_v28 = vsel %vm382_vm0, %v1635_v8, %v1633_v7 }
  0x9a   :  { %4610 = vst.msk [vmem:[%s9846_s1 + $0x226] ss:$-440 sm:$0x3] %vm361_vm1, %v511_v50   ;;  %4611 = vst.msk [vmem:[%s9846_s1 + $0x906] ss:$-440 sm:$0xc] %vm361_vm1, %v511_v50  }
  0x9b   :  { %4612 = vst.msk [vmem:[%s9846_s1 + $0x986] ss:$-440 sm:$0x30] %vm361_vm1, %v511_v50   ;;  %4613 = vst.msk [vmem:[%s9846_s1 + $0x1066] ss:$-440 sm:$0xc0] %vm361_vm1, %v511_v50  }
  0x9c   :  { %4614 = vst.msk [vmem:[%s9846_s1 + $0x326] ss:$-440 sm:$0x3] %vm361_vm1, %v524_v51   ;;  %4615 = vst.msk [vmem:[%s9846_s1 + $0xa06] ss:$-440 sm:$0xc] %vm361_vm1, %v524_v51  }
  0x9d   :  { %1287 = vrot.lane.b32.xlu0 %v1286_v41, %s5628_s8  ;;  %1300 = vrot.lane.b32.xlu1 %v1299_v45, %s5628_s8  ;;  %s5630_s8 = smov 92   ;;  %v1652_v42 = vld.sshfl [vmem:[#allocation0 + $0x238] sm:$0xff pattern:$0x30122222]  }
  0x9e   :  { %v6538_v29 = vsel %vm382_vm0, %v1652_v42, %v1650_v30  ;;  %v1667_v36 = vld.sshfl [vmem:[#allocation0 + $0x90] sm:$0xff pattern:$0x33333012]   ;;  %v1669_v37 = vld.sshfl [vmem:[#allocation0 + $0x138] sm:$0xff pattern:$0x30122222]  }
  0x9f   :  { %v6569_v40 = vsel %vm382_vm0, %v1669_v37, %v1667_v36  ;;  %v1693_v41 = vld.sshfl [vmem:[#allocation0 + $0x38] sm:$0xff pattern:$0x22222301]   ;;  %v1695_v45 = vld.sshfl [vmem:[#allocation0 + $0xe0] sm:$0xff pattern:$0x23011111]  }
  0xa0   :  { %v1710_v50 = vld.sshfl [vmem:[#allocation0 + $0x188] sm:$0xff pattern:$0x22222301]   ;;  %v1712_v51 = vld.sshfl [vmem:[#allocation0 + $0x230] sm:$0xff pattern:$0x23011111]  }
  0xa1   :  { %1313 = vrot.lane.b32.xlu0 %v6002_v18, %s5629_s20  ;;  %1326 = vrot.lane.b32.xlu1 %v5984_v6, %s5629_s20  ;;  %v537_v6 = vpop.permute.xlu0 %536   ;;  %v554_v18 = vpop.permute.xlu1 %553   ;;  %s5631_s20 = smov 91   ;;  %v1893_v7 = vld [vmem:[#allocation0 + $0x73] ss:$-1 sm:$0xf]  }
  0xa2   :  { %4616 = vst.msk [vmem:[%s9846_s1 + $0x1e3] ss:$-440 sm:$0x3] %vm361_vm1, %v537_v6   ;;  %4617 = vst.msk [vmem:[%s9846_s1 + $0x8c3] ss:$-440 sm:$0xc] %vm361_vm1, %v537_v6  }
  0xa3   :  { %4618 = vst.msk [vmem:[%s9846_s1 + $0x943] ss:$-440 sm:$0x30] %vm361_vm1, %v537_v6   ;;  %4619 = vst.msk [vmem:[%s9846_s1 + $0x1023] ss:$-440 sm:$0xc0] %vm361_vm1, %v537_v6   ;;  %v6606_v6 = vsel %vm382_vm0, %v1695_v45, %v1693_v41 }
  0xa4   :  { %4620 = vst.msk [vmem:[%s9846_s1 + $0x2e3] ss:$-440 sm:$0x3] %vm361_vm1, %v554_v18   ;;  %4621 = vst.msk [vmem:[%s9846_s1 + $0x9c3] ss:$-440 sm:$0xc] %vm361_vm1, %v554_v18  }
  0xa5   :  { %4622 = vst.msk [vmem:[%s9846_s1 + $0xa43] ss:$-440 sm:$0x30] %vm361_vm1, %v554_v18   ;;  %4623 = vst.msk [vmem:[%s9846_s1 + $0x1123] ss:$-440 sm:$0xc0] %vm361_vm1, %v554_v18   ;;  %1339 = vrot.lane.b32.xlu0 %v6016_v26, %s5630_s8  ;;  %1356 = vrot.lane.b32.xlu1 %v6019_v27, %s5630_s8  ;;  %v571_v26 = vpop.permute.xlu0 %570   ;;  %v584_v27 = vpop.permute.xlu1 %583   ;;  %v6609_v18 = vsel %vm382_vm0, %v1712_v51, %v1710_v50 }
  0xa6   :  { %4624 = vst.msk [vmem:[%s9846_s1 + $0x220] ss:$-440 sm:$0x3] %vm361_vm1, %v571_v26   ;;  %4625 = vst.msk [vmem:[%s9846_s1 + $0x900] ss:$-440 sm:$0xc] %vm361_vm1, %v571_v26  }
  0xa7   :  { %4626 = vst.msk [vmem:[%s9846_s1 + $0x980] ss:$-440 sm:$0x30] %vm361_vm1, %v571_v26   ;;  %4627 = vst.msk [vmem:[%s9846_s1 + $0x1060] ss:$-440 sm:$0xc0] %vm361_vm1, %v571_v26  }
  0xa8   :  { %4628 = vst.msk [vmem:[%s9846_s1 + $0x320] ss:$-440 sm:$0x3] %vm361_vm1, %v584_v27   ;;  %4629 = vst.msk [vmem:[%s9846_s1 + $0xa00] ss:$-440 sm:$0xc] %vm361_vm1, %v584_v27  }
  0xa9   :  { %1373 = vrot.lane.b32.xlu0 %v6026_v35, %s5631_s20  ;;  %1386 = vrot.lane.b32.xlu1 %v6021_v31, %s5631_s20  ;;  %v597_v31 = vpop.permute.xlu0 %596   ;;  %v614_v35 = vpop.permute.xlu1 %613   ;;  %s5632_s8 = smov 90   ;;  %s5633_s20 = smov 89   ;;  %v1895_v8 = vld [vmem:[#allocation0 + $0x11f] ss:$-1 sm:$0xf0]  }
  0xaa   :  { %4630 = vst.msk [vmem:[%s9846_s1 + $0x25] ss:$1320 sm:$0x3] %vm361_vm1, %v597_v31   ;;  %4631 = vst.msk [vmem:[%s9846_s1 + $0x705] ss:$-440 sm:$0xc] %vm361_vm1, %v597_v31  }
  0xab   :  { %4632 = vst.msk [vmem:[%s9846_s1 - $0x13fb] ss:$1320 sm:$0x30] %vm361_vm1, %v597_v31   ;;  %4633 = vst.msk [vmem:[%s9846_s1 + $0xe65] ss:$-440 sm:$0xc0] %vm361_vm1, %v597_v31  }
  0xac   :  { %4634 = vst.msk [vmem:[%s9846_s1 + $0x125] ss:$1320 sm:$0x3] %vm361_vm1, %v614_v35   ;;  %4635 = vst.msk [vmem:[%s9846_s1 + $0x805] ss:$-440 sm:$0xc] %vm361_vm1, %v614_v35  }
  0xad   :  { %4636 = vst.msk [vmem:[%s9846_s1 - $0x12fb] ss:$1320 sm:$0x30] %vm361_vm1, %v614_v35   ;;  %4637 = vst.msk [vmem:[%s9846_s1 + $0xf65] ss:$-440 sm:$0xc0] %vm361_vm1, %v614_v35   ;;  %1399 = vrot.lane.b32.xlu0 %v6043_v43, %s5632_s8  ;;  %1416 = vrot.lane.b32.xlu1 %v6046_v44, %s5632_s8  ;;  %v631_v54 = vpop.permute.xlu0 %630   ;;  %v644_v55 = vpop.permute.xlu1 %643  }
  0xae   :  { %v1454_v43 = vld.sshfl [vmem:[#allocation0 + $0x8] sm:$0xff pattern:$0x22222301]   ;;  %v1456_v44 = vld.sshfl [vmem:[#allocation0 + $0xb0] sm:$0xff pattern:$0x23011111]  }
  0xaf   :  { %4638 = vst.msk [vmem:[%s9846_s1 + $0x62] ss:$1320 sm:$0x3] %vm361_vm1, %v631_v54   ;;  %4639 = vst.msk [vmem:[%s9846_s1 + $0x742] ss:$-440 sm:$0xc] %vm361_vm1, %v631_v54  }
  0xb0   :  { %4640 = vst.msk [vmem:[%s9846_s1 - $0x13be] ss:$1320 sm:$0x30] %vm361_vm1, %v631_v54   ;;  %4641 = vst.msk [vmem:[%s9846_s1 + $0xea2] ss:$-440 sm:$0xc0] %vm361_vm1, %v631_v54  }
  0xb1   :  { %4642 = vst.msk [vmem:[%s9846_s1 + $0x162] ss:$1320 sm:$0x3] %vm361_vm1, %v644_v55   ;;  %4643 = vst.msk [vmem:[%s9846_s1 + $0x842] ss:$-440 sm:$0xc] %vm361_vm1, %v644_v55   ;;  %1433 = vrot.lane.b32.xlu0 %v6053_v48, %s5633_s20  ;;  %1446 = vrot.lane.b32.xlu1 %v6050_v47, %s5633_s20  ;;  %v6357_v47 = vsel %vm382_vm0, %v1456_v44, %v1454_v43  ;;  %v6360_v48 = vsel %vm382_vm0, %v1473_v57, %v1471_v56  ;;  %v657_v58 = vpop.permute.xlu0 %656   ;;  %v670_v61 = vpop.permute.xlu1 %669  }
  0xb2   :  { %4644 = vst.msk [vmem:[%s9846_s1 + $0x547] ss:$-440 sm:$0xf] %vm361_vm1, %v657_v58   ;;  %4645 = vst.msk [vmem:[%s9846_s1 + $0xca7] ss:$-440 sm:$0xf0] %vm361_vm1, %v657_v58  }
  0xb3   :  { %4646 = vst.msk [vmem:[%s9846_s1 + $0x647] ss:$-440 sm:$0xf] %vm361_vm1, %v670_v61   ;;  %4647 = vst.msk [vmem:[%s9846_s1 + $0xda7] ss:$-440 sm:$0xf0] %vm361_vm1, %v670_v61  }
  0xb4   :  { %v1727_v31 = vld.sshfl [vmem:[#allocation0 + $0x88] sm:$0xff pattern:$0x22222301]   ;;  %v1729_v35 = vld.sshfl [vmem:[#allocation0 + $0x130] sm:$0xff pattern:$0x23011111]  }
  0xb5   :  { %1459 = vrot.lane.b32.xlu0 %v6357_v47, %s5634_s29  ;;  %1476 = vrot.lane.b32.xlu1 %v6360_v48, %s5634_s29  ;;  %v683_v63 = vpop.permute.xlu0 %682   ;;  %v692_v0 = vpop.permute.xlu1 %691   ;;  %v6637_v43 = vld.sshfl [vmem:[#allocation0 + $0x1d8] sm:$0xff pattern:$0x22222301]   ;;  %v6640_v44 = vsel %vm382_vm0, %v1729_v35, %v1727_v31  ;;  %v1753_v54 = vld.sshfl [vmem:[#allocation0 + $0x30] sm:$0xff pattern:$0x11111230]  }
  0xb6   :  { %4648 = vst.msk [vmem:[%s9846_s1 + $0x584] ss:$-440 sm:$0xf] %vm361_vm1, %v683_v63   ;;  %4649 = vst.msk [vmem:[%s9846_s1 + $0xce4] ss:$-440 sm:$0xf0] %vm361_vm1, %v683_v63  }
  0xb7   :  { %4650 = vst.msk [vmem:[%s9846_s1 + $0x684] ss:$-440 sm:$0xf] %vm361_vm1, %v692_v0   ;;  %v1755_v55 = vld.sshfl [vmem:[#allocation0 + $0xd8] sm:$0xff pattern:$0x12300000]  }
  0xb8   :  { %v1770_v58 = vld.sshfl [vmem:[#allocation0 + $0x180] sm:$0xff pattern:$0x11111230]   ;;  %v1772_v61 = vld.sshfl [vmem:[#allocation0 + $0x228] sm:$0xff pattern:$0x12300000]   ;;  %v1757_v63 = vsel %vm382_vm0, %v1755_v55, %v1753_v54 }
  0xb9   :  { %1493 = vrot.lane.b32.xlu0 %v6062_v62, %s5635_s7  ;;  %1506 = vrot.lane.b32.xlu1 %v6059_v59, %s5635_s7  ;;  %v703_v59 = vpop.permute.xlu0 %702   ;;  %v716_v62 = vpop.permute.xlu1 %715   ;;  %v1774_v0 = vsel %vm382_vm0, %v1772_v61, %v1770_v58  ;;  %s5646_s29 = smov 76   ;;  %s5647_s7 = smov 75   ;;  %v1913_v30 = vld.sshfl [vmem:[#allocation0 + $0x18] sm:$0xff pattern:$0x33333012]  }
  0xba   :  { %4651 = vst.msk [vmem:[%s9846_s1 + $0x541] ss:$-440 sm:$0xf] %vm361_vm1, %v703_v59   ;;  %4652 = vst.msk [vmem:[%s9846_s1 + $0xca1] ss:$-440 sm:$0xf0] %vm361_vm1, %v703_v59  }
  0xbb   :  { %4653 = vst.msk [vmem:[%s9846_s1 + $0x641] ss:$-440 sm:$0xf] %vm361_vm1, %v716_v62   ;;  %4654 = vst.msk [vmem:[%s9846_s1 + $0xda1] ss:$-440 sm:$0xf0] %vm361_vm1, %v716_v62  }
  0xbc   :  { %v1915_v42 = vld.sshfl [vmem:[#allocation0 + $0xc0] sm:$0xff pattern:$0x30122222]   ;;  %v1930_v36 = vld.sshfl [vmem:[#allocation0 + $0x168] sm:$0xff pattern:$0x33333012]  }
  0xbd   :  { %1518 = vrot.lane.b32.xlu0 %v6071_v4, %s5636_s16  ;;  %1535 = vrot.lane.b32.xlu1 %v6074_v5, %s5636_s16  ;;  %v1551_v4 = vsel %vm382_vm0, %v1549_v3, %v1547_v1  ;;  %v1560_v5 = vld [vmem:[#allocation0 + $0x1a3] ss:$-1 sm:$0xf]   ;;  %s5638_s16 = smov 84   ;;  %v6808_v41 = vsel %vm382_vm0, %v1915_v42, %v1913_v30  ;;  %s5677_s20 = smov 45  }
  0xbe   :  { %v1787_v1 = vld.sshfl [vmem:[#allocation0 + $0x80] sm:$0xff pattern:$0x11111230]   ;;  %v1789_v3 = vld.sshfl [vmem:[#allocation0 + $0x128] sm:$0xff pattern:$0x12300000]  }
  0xbf   :  { %v729_v9 = vpop.permute.xlu0 %728   ;;  %v742_v10 = vpop.permute.xlu1 %741   ;;  %v1932_v37 = vld.sshfl [vmem:[#allocation0 + $0x210] sm:$0xff pattern:$0x30122222]   ;;  %v1947_v50 = vld.sshfl [vmem:[#allocation0 + $0x68] sm:$0xff pattern:$0x33333012]  }
  0xc0   :  { %4655 = vst.msk [vmem:[%s9846_s1 + $0x3c6] ss:$-440 sm:$0x7] %vm361_vm1, %v729_v9   ;;  %4656 = vst.msk [vmem:[%s9846_s1 + $0x926] ss:$-312 sm:$0x18] %vm361_vm1, %v729_v9   ;;  %v6811_v45 = vsel %vm382_vm0, %v1932_v37, %v1930_v36 }
  0xc1   :  { %4657 = vst.msk [vmem:[%s9846_s1 + $0xb26] ss:$-440 sm:$0x60] %vm361_vm1, %v729_v9   ;;  %4658 = vst.msk [vmem:[%s9846_s1 + $0x5f7] sm:$0x80] %vm361_vm1, %v729_v9   ;;  %1552 = vrot.lane.b32.xlu0 %v1551_v4, %s5637_s28  ;;  %1561 = vrot.lane.b32.xlu1 %v1560_v5, %s5637_s28  ;;  %s5639_s28 = smov 83   ;;  %v6691_v4 = vsel %vm382_vm0, %v1789_v3, %v1787_v1 }
  0xc2   :  { %4659 = vst.msk [vmem:[%s9846_s1 + $0x4c6] ss:$-440 sm:$0x7] %vm361_vm1, %v742_v10   ;;  %4660 = vst.msk [vmem:[%s9846_s1 + $0x67b] sm:$0x8] %vm361_vm1, %v742_v10  }
  0xc3   :  { %v755_v17 = vpop.permute.xlu0 %754   ;;  %v772_v19 = vpop.permute.xlu1 %771   ;;  %v6693_v5 = vld.sshfl [vmem:[#allocation0 + $0x1d0] sm:$0xff pattern:$0x11111230]   ;;  %v1975_v35 = vld.sshfl [vmem:[#allocation0 + $0xb8] sm:$0xff pattern:$0x23011111]  }
  0xc4   :  { %4661 = vst.msk [vmem:[%s9846_s1 + $0x383] ss:$-440 sm:$0x7] %vm361_vm1, %v755_v17   ;;  %4662 = vst.msk [vmem:[%s9846_s1 + $0x8e3] ss:$-312 sm:$0x18] %vm361_vm1, %v755_v17  }
  0xc5   :  { %4663 = vst.msk [vmem:[%s9846_s1 + $0xae3] ss:$-440 sm:$0x60] %vm361_vm1, %v755_v17   ;;  %4664 = vst.msk [vmem:[%s9846_s1 + $0x5b4] sm:$0x80] %vm361_vm1, %v755_v17   ;;  %1572 = vrot.lane.b32.xlu0 %v1571_v15, %s5638_s16  ;;  %1581 = vrot.lane.b32.xlu1 %v1580_v16, %s5638_s16  ;;  %s5640_s16 = smov 82  }
  0xc6   :  { %4665 = vst.msk [vmem:[%s9846_s1 + $0x483] ss:$-440 sm:$0x7] %vm361_vm1, %v772_v19   ;;  %4666 = vst.msk [vmem:[%s9846_s1 + $0x9e3] ss:$-312 sm:$0x18] %vm361_vm1, %v772_v19  }
  0xc7   :  { %4667 = vst.msk [vmem:[%s9846_s1 + $0xbe3] ss:$-440 sm:$0x60] %vm361_vm1, %v772_v19   ;;  %4668 = vst.msk [vmem:[%s9846_s1 + $0x6b4] sm:$0x80] %vm361_vm1, %v772_v19   ;;  %v789_v34 = vpop.permute.xlu0 %788   ;;  %v802_v39 = vpop.permute.xlu1 %801  }
  0xc8   :  { %4669 = vst.msk [vmem:[%s9846_s1 + $0x3c0] ss:$-440 sm:$0x7] %vm361_vm1, %v789_v34   ;;  %4670 = vst.msk [vmem:[%s9846_s1 + $0x920] ss:$-312 sm:$0x18] %vm361_vm1, %v789_v34  }
  0xc9   :  { %4671 = vst.msk [vmem:[%s9846_s1 + $0xb20] ss:$-440 sm:$0x60] %vm361_vm1, %v789_v34   ;;  %4672 = vst.msk [vmem:[%s9846_s1 + $0x5f1] sm:$0x80] %vm361_vm1, %v789_v34   ;;  %1592 = vrot.lane.b32.xlu0 %v1591_v24, %s5639_s28  ;;  %1601 = vrot.lane.b32.xlu1 %v1600_v25, %s5639_s28  ;;  %s5641_s28 = smov 81  }
  0xca   :  { %4673 = vst.msk [vmem:[%s9846_s1 + $0x4c0] ss:$-440 sm:$0x7] %vm361_vm1, %v802_v39   ;;  %4674 = vst.msk [vmem:[%s9846_s1 + $0x675] sm:$0x8] %vm361_vm1, %v802_v39  }
  0xcb   :  { %v815_v22 = vpop.permute.xlu0 %814   ;;  %v832_v23 = vpop.permute.xlu1 %831   ;;  %v1847_v15 = vld [vmem:[#allocation0 + $0x7b] ss:$-1 sm:$0xf]   ;;  %v1849_v16 = vld [vmem:[#allocation0 + $0x127] ss:$-1 sm:$0xf0]  }
  0xcc   :  { %4675 = vst.msk [vmem:[%s9846_s1 + $0x1c5] ss:$-440 sm:$0x3] %vm361_vm1, %v815_v22   ;;  %4676 = vst.msk [vmem:[%s9846_s1 + $0x8a5] ss:$-440 sm:$0xc] %vm361_vm1, %v815_v22  }
  0xcd   :  { %4677 = vst.msk [vmem:[%s9846_s1 + $0x925] ss:$-440 sm:$0x30] %vm361_vm1, %v815_v22   ;;  %4678 = vst.msk [vmem:[%s9846_s1 + $0x1005] ss:$-440 sm:$0xc0] %vm361_vm1, %v815_v22   ;;  %1612 = vrot.lane.b32.xlu0 %v6498_v2, %s5640_s16  ;;  %1625 = vrot.lane.b32.xlu1 %v6495_v60, %s5640_s16 }
  0xce   :  { %4679 = vst.msk [vmem:[%s9846_s1 + $0x2c5] ss:$-440 sm:$0x3] %vm361_vm1, %v832_v23   ;;  %4680 = vst.msk [vmem:[%s9846_s1 + $0x9a5] ss:$-440 sm:$0xc] %vm361_vm1, %v832_v23  }
  0xcf   :  { %4681 = vst.msk [vmem:[%s9846_s1 + $0xa25] ss:$-440 sm:$0x30] %vm361_vm1, %v832_v23   ;;  %4682 = vst.msk [vmem:[%s9846_s1 + $0x1105] ss:$-440 sm:$0xc0] %vm361_vm1, %v832_v23   ;;  %v849_v32 = vpop.permute.xlu0 %848   ;;  %v862_v33 = vpop.permute.xlu1 %861   ;;  %v1897_v23 = vsel %vm382_vm0, %v1895_v8, %v1893_v7 }
  0xd0   :  { %4683 = vst.msk [vmem:[%s9846_s1 + $0x202] ss:$-440 sm:$0x3] %vm361_vm1, %v849_v32   ;;  %4684 = vst.msk [vmem:[%s9846_s1 + $0x8e2] ss:$-440 sm:$0xc] %vm361_vm1, %v849_v32  }
  0xd1   :  { %4685 = vst.msk [vmem:[%s9846_s1 + $0x962] ss:$-440 sm:$0x30] %vm361_vm1, %v849_v32   ;;  %4686 = vst.msk [vmem:[%s9846_s1 + $0x1042] ss:$-440 sm:$0xc0] %vm361_vm1, %v849_v32   ;;  %1638 = vrot.lane.b32.xlu0 %v6535_v28, %s5641_s28  ;;  %1655 = vrot.lane.b32.xlu1 %v6538_v29, %s5641_s28 }
  0xd2   :  { %4687 = vst.msk [vmem:[%s9846_s1 + $0x302] ss:$-440 sm:$0x3] %vm361_vm1, %v862_v33   ;;  %4688 = vst.msk [vmem:[%s9846_s1 + $0x9e2] ss:$-440 sm:$0xc] %vm361_vm1, %v862_v33  }
  0xd3   :  { %v875_v46 = vpop.permute.xlu0 %874   ;;  %v892_v49 = vpop.permute.xlu1 %891   ;;  %s5642_s16 = smov 80   ;;  %s5643_s28 = smov 79   ;;  %v1867_v17 = vld [vmem:[#allocation0 + $0x23] ss:$-1 sm:$0xf]  }
  0xd4   :  { %4689 = vst.msk [vmem:[%s9846_s1 + $0x7] ss:$1320 sm:$0x3] %vm361_vm1, %v875_v46   ;;  %4690 = vst.msk [vmem:[%s9846_s1 + $0x6e7] ss:$-440 sm:$0xc] %vm361_vm1, %v875_v46  }
  0xd5   :  { %4691 = vst.msk [vmem:[%s9846_s1 - $0x1419] ss:$1320 sm:$0x30] %vm361_vm1, %v875_v46   ;;  %4692 = vst.msk [vmem:[%s9846_s1 + $0xe47] ss:$-440 sm:$0xc0] %vm361_vm1, %v875_v46   ;;  %1672 = vrot.lane.b32.xlu0 %v6569_v40, %s5642_s16  ;;  %1685 = vrot.lane.b32.xlu1 %v6566_v38, %s5642_s16 }
  0xd6   :  { %4693 = vst.msk [vmem:[%s9846_s1 + $0x107] ss:$1320 sm:$0x3] %vm361_vm1, %v892_v49   ;;  %4694 = vst.msk [vmem:[%s9846_s1 + $0x7e7] ss:$-440 sm:$0xc] %vm361_vm1, %v892_v49  }
  0xd7   :  { %4695 = vst.msk [vmem:[%s9846_s1 - $0x1319] ss:$1320 sm:$0x30] %vm361_vm1, %v892_v49   ;;  %4696 = vst.msk [vmem:[%s9846_s1 + $0xf47] ss:$-440 sm:$0xc0] %vm361_vm1, %v892_v49   ;;  %v909_v26 = vpop.permute.xlu0 %908   ;;  %v922_v27 = vpop.permute.xlu1 %921  }
  0xd8   :  { %4697 = vst.msk [vmem:[%s9846_s1 + $0x44] ss:$1320 sm:$0x3] %vm361_vm1, %v909_v26   ;;  %4698 = vst.msk [vmem:[%s9846_s1 + $0x724] ss:$-440 sm:$0xc] %vm361_vm1, %v909_v26  }
  0xd9   :  { %4699 = vst.msk [vmem:[%s9846_s1 - $0x13dc] ss:$1320 sm:$0x30] %vm361_vm1, %v909_v26   ;;  %4700 = vst.msk [vmem:[%s9846_s1 + $0xe84] ss:$-440 sm:$0xc0] %vm361_vm1, %v909_v26   ;;  %1698 = vrot.lane.b32.xlu0 %v6606_v6, %s5643_s28  ;;  %1715 = vrot.lane.b32.xlu1 %v6609_v18, %s5643_s28 }
  0xda   :  { %4701 = vst.msk [vmem:[%s9846_s1 + $0x144] ss:$1320 sm:$0x3] %vm361_vm1, %v922_v27   ;;  %4702 = vst.msk [vmem:[%s9846_s1 + $0x824] ss:$-440 sm:$0xc] %vm361_vm1, %v922_v27  }
  0xdb   :  { %v934_v56 = vpop.permute.xlu0 %933   ;;  %v951_v57 = vpop.permute.xlu1 %950   ;;  %s5644_s16 = smov 78   ;;  %v1869_v19 = vld [vmem:[#allocation0 + $0xcf] ss:$-1 sm:$0xf0]  }
  0xdc   :  { %4703 = vst.msk [vmem:[%s9846_s1 + $0x1] ss:$1320 sm:$0x3] %vm361_vm1, %v934_v56   ;;  %4704 = vst.msk [vmem:[%s9846_s1 + $0x6e1] ss:$-440 sm:$0xc] %vm361_vm1, %v934_v56   ;;  %v1871_v34 = vsel %vm382_vm0, %v1869_v19, %v1867_v17 }
  0xdd   :  { %4705 = vst.msk [vmem:[%s9846_s1 - $0x141f] ss:$1320 sm:$0x30] %vm361_vm1, %v934_v56   ;;  %4706 = vst.msk [vmem:[%s9846_s1 + $0xe41] ss:$-440 sm:$0xc0] %vm361_vm1, %v934_v56   ;;  %1732 = vrot.lane.b32.xlu0 %v6640_v44, %s5644_s16  ;;  %1745 = vrot.lane.b32.xlu1 %v6637_v43, %s5644_s16 }
  0xde   :  { %4707 = vst.msk [vmem:[%s9846_s1 + $0x101] ss:$1320 sm:$0x3] %vm361_vm1, %v951_v57   ;;  %4708 = vst.msk [vmem:[%s9846_s1 + $0x7e1] ss:$-440 sm:$0xc] %vm361_vm1, %v951_v57  }
  0xdf   :  { %4709 = vst.msk [vmem:[%s9846_s1 - $0x131f] ss:$1320 sm:$0x30] %vm361_vm1, %v951_v57   ;;  %4710 = vst.msk [vmem:[%s9846_s1 + $0xf41] ss:$-440 sm:$0xc0] %vm361_vm1, %v951_v57   ;;  %v968_v59 = vpop.permute.xlu0 %967   ;;  %v977_v62 = vpop.permute.xlu1 %976  }
  0xe0   :  { %4711 = vst.msk [vmem:[%s9846_s1 + $0x566] ss:$-440 sm:$0xf] %vm361_vm1, %v968_v59   ;;  %4712 = vst.msk [vmem:[%s9846_s1 + $0xcc6] ss:$-440 sm:$0xf0] %vm361_vm1, %v968_v59  }
  0xe1   :  { %4713 = vst.msk [vmem:[%s9846_s1 + $0x666] ss:$-440 sm:$0xf] %vm361_vm1, %v977_v62   ;;  %1758 = vrot.lane.b32.xlu0 %v1757_v63, %s5645_s22  ;;  %1775 = vrot.lane.b32.xlu1 %v1774_v0, %s5645_s22  ;;  %v1880_v24 = vld [vmem:[#allocation0 + $0x173] ss:$-1 sm:$0xf]  }
  0xe2   :  { %v1882_v25 = vld [vmem:[#allocation0 + $0x21f] ss:$-1 sm:$0xf0]   ;;  %v1906_v22 = vld [vmem:[#allocation0 + $0x1c3] ss:$-1 sm:$0xf]  }
  0xe3   :  { %v988_v9 = vpop.permute.xlu0 %987   ;;  %v997_v10 = vpop.permute.xlu1 %996   ;;  %v1884_v39 = vsel %vm382_vm0, %v1882_v25, %v1880_v24  ;;  %v1949_v51 = vld.sshfl [vmem:[#allocation0 + $0x110] sm:$0xff pattern:$0x30122222]   ;;  %v6847_v26 = vld.sshfl [vmem:[#allocation0 + $0x1b8] sm:$0xff pattern:$0x33333012]  }
  0xe4   :  { %4714 = vst.msk [vmem:[%s9846_s1 + $0x5a3] ss:$-440 sm:$0xf] %vm361_vm1, %v988_v9   ;;  %4715 = vst.msk [vmem:[%s9846_s1 + $0xd03] ss:$-440 sm:$0xf0] %vm361_vm1, %v988_v9   ;;  %v6850_v27 = vsel %vm382_vm0, %v1949_v51, %v1947_v50 }
  0xe5   :  { %4716 = vst.msk [vmem:[%s9846_s1 + $0x6a3] ss:$-440 sm:$0xf] %vm361_vm1, %v997_v10   ;;  %1792 = vrot.lane.b32.xlu0 %v6691_v4, %s5646_s29  ;;  %1805 = vrot.lane.b32.xlu1 %v6693_v5, %s5646_s29  ;;  %v1973_v31 = vld.sshfl [vmem:[#allocation0 + $0x10] sm:$0xff pattern:$0x22222301]  }
  0xe6   :  { %v1990_v56 = vld.sshfl [vmem:[#allocation0 + $0x160] sm:$0xff pattern:$0x22222301]   ;;  %v1992_v57 = vld.sshfl [vmem:[#allocation0 + $0x208] sm:$0xff pattern:$0x23011111]   ;;  %v1977_v58 = vsel %vm382_vm0, %v1975_v35, %v1973_v31 }
  0xe7   :  { %v1008_v13 = vpop.permute.xlu0 %1007   ;;  %v1017_v14 = vpop.permute.xlu1 %1016   ;;  %v1994_v61 = vsel %vm382_vm0, %v1992_v57, %v1990_v56  ;;  %v2007_v59 = vld.sshfl [vmem:[#allocation0 + $0x60] sm:$0xff pattern:$0x22222301]   ;;  %v2009_v62 = vld.sshfl [vmem:[#allocation0 + $0x108] sm:$0xff pattern:$0x23011111]  }
  0xe8   :  { %4717 = vst.msk [vmem:[%s9846_s1 + $0x560] ss:$-440 sm:$0xf] %vm361_vm1, %v1008_v13   ;;  %4718 = vst.msk [vmem:[%s9846_s1 + $0xcc0] ss:$-440 sm:$0xf0] %vm361_vm1, %v1008_v13   ;;  %v6913_v1 = vsel %vm382_vm0, %v2009_v62, %v2007_v59 }
  0xe9   :  { %4719 = vst.msk [vmem:[%s9846_s1 + $0x660] ss:$-440 sm:$0xf] %vm361_vm1, %v1017_v14   ;;  %1818 = vrot.lane.b32.xlu0 %v6120_v11, %s5647_s7  ;;  %1835 = vrot.lane.b32.xlu1 %v6123_v12, %s5647_s7  ;;  %v1860_v11 = vld [vmem:[#allocation0 + $0x1cb] ss:$-1 sm:$0xf]   ;;  %v1851_v12 = vsel %vm382_vm0, %v1849_v16, %v1847_v15 }
  0xea   :  { %s5649_s7 = smov 73   ;;  %v6915_v3 = vld.sshfl [vmem:[#allocation0 + $0x1b0] sm:$0xff pattern:$0x22222301]   ;;  %s5657_s22 = smov 65  }
  0xeb   :  { %v1028_v20 = vpop.permute.xlu0 %1027   ;;  %v1041_v21 = vpop.permute.xlu1 %1040   ;;  %v2067_v15 = vld.sshfl [vmem:[#allocation0 + $0x58] sm:$0xff pattern:$0x11111230]   ;;  %v2069_v16 = vld.sshfl [vmem:[#allocation0 + $0x100] sm:$0xff pattern:$0x12300000]  }
  0xec   :  { %4720 = vst.msk [vmem:[%s9846_s1 + $0x3e5] ss:$-440 sm:$0x7] %vm361_vm1, %v1028_v20   ;;  %4721 = vst.msk [vmem:[%s9846_s1 + $0x945] ss:$-312 sm:$0x18] %vm361_vm1, %v1028_v20  }
  0xed   :  { %4722 = vst.msk [vmem:[%s9846_s1 + $0xb45] ss:$-440 sm:$0x60] %vm361_vm1, %v1028_v20   ;;  %4723 = vst.msk [vmem:[%s9846_s1 + $0x616] sm:$0x80] %vm361_vm1, %v1028_v20   ;;  %1852 = vrot.lane.b32.xlu0 %v1851_v12, %s5648_s19  ;;  %1861 = vrot.lane.b32.xlu1 %v1860_v11, %s5648_s19  ;;  %s5650_s19 = smov 72  }
  0xee   :  { %4724 = vst.msk [vmem:[%s9846_s1 + $0x4e5] ss:$-440 sm:$0x7] %vm361_vm1, %v1041_v21   ;;  %4725 = vst.msk [vmem:[%s9846_s1 + $0x69a] sm:$0x8] %vm361_vm1, %v1041_v21   ;;  %s5666_s29 = smov 56  }
  0xef   :  { %v1054_v52 = vpop.permute.xlu0 %1053   ;;  %v1071_v53 = vpop.permute.xlu1 %1070   ;;  %v2092_v11 = vld.sshfl [vmem:[#allocation0] sm:$0xff pattern:$0x11111230]   ;;  %v2094_v12 = vld.sshfl [vmem:[#allocation0 + $0xa8] sm:$0xff pattern:$0x12300000]  }
  0xf0   :  { %4726 = vst.msk [vmem:[%s9846_s1 + $0x3a2] ss:$-440 sm:$0x7] %vm361_vm1, %v1054_v52   ;;  %4727 = vst.msk [vmem:[%s9846_s1 + $0x902] ss:$-312 sm:$0x18] %vm361_vm1, %v1054_v52   ;;  %v6997_v24 = vsel %vm382_vm0, %v2094_v12, %v2092_v11 }
  0xf1   :  { %4728 = vst.msk [vmem:[%s9846_s1 + $0xb02] ss:$-440 sm:$0x60] %vm361_vm1, %v1054_v52   ;;  %4729 = vst.msk [vmem:[%s9846_s1 + $0x5d3] sm:$0x80] %vm361_vm1, %v1054_v52   ;;  %1872 = vrot.lane.b32.xlu0 %v1871_v34, %s5649_s7  ;;  %1885 = vrot.lane.b32.xlu1 %v1884_v39, %s5649_s7  ;;  %s5651_s7 = smov 71  }
  0xf2   :  { %4730 = vst.msk [vmem:[%s9846_s1 + $0x4a2] ss:$-440 sm:$0x7] %vm361_vm1, %v1071_v53   ;;  %4731 = vst.msk [vmem:[%s9846_s1 + $0xa02] ss:$-312 sm:$0x18] %vm361_vm1, %v1071_v53  }
  0xf3   :  { %4732 = vst.msk [vmem:[%s9846_s1 + $0xc02] ss:$-440 sm:$0x60] %vm361_vm1, %v1071_v53   ;;  %4733 = vst.msk [vmem:[%s9846_s1 + $0x6d3] sm:$0x80] %vm361_vm1, %v1071_v53   ;;  %v1088_v32 = vpop.permute.xlu0 %1087   ;;  %v1101_v33 = vpop.permute.xlu1 %1100  }
  0xf4   :  { %4734 = vst.msk [vmem:[%s9846_s1 + $0x227] ss:$-440 sm:$0x3] %vm361_vm1, %v1088_v32   ;;  %4735 = vst.msk [vmem:[%s9846_s1 + $0x907] ss:$-440 sm:$0xc] %vm361_vm1, %v1088_v32  }
  0xf5   :  { %4736 = vst.msk [vmem:[%s9846_s1 + $0x987] ss:$-440 sm:$0x30] %vm361_vm1, %v1088_v32   ;;  %4737 = vst.msk [vmem:[%s9846_s1 + $0x1067] ss:$-440 sm:$0xc0] %vm361_vm1, %v1088_v32   ;;  %1898 = vrot.lane.b32.xlu0 %v1897_v23, %s5650_s19  ;;  %1907 = vrot.lane.b32.xlu1 %v1906_v22, %s5650_s19 }
  0xf6   :  { %4738 = vst.msk [vmem:[%s9846_s1 + $0x327] ss:$-440 sm:$0x3] %vm361_vm1, %v1101_v33   ;;  %4739 = vst.msk [vmem:[%s9846_s1 + $0xa07] ss:$-440 sm:$0xc] %vm361_vm1, %v1101_v33  }
  0xf7   :  { %v1114_v46 = vpop.permute.xlu0 %1113   ;;  %v1131_v49 = vpop.permute.xlu1 %1130   ;;  %s5652_s19 = smov 70   ;;  %v2109_v20 = vld.sshfl [vmem:[#allocation0 + $0x150] sm:$0xff pattern:$0x11111230]  }
  0xf8   :  { %4740 = vst.msk [vmem:[%s9846_s1 + $0x1e4] ss:$-440 sm:$0x3] %vm361_vm1, %v1114_v46   ;;  %4741 = vst.msk [vmem:[%s9846_s1 + $0x8c4] ss:$-440 sm:$0xc] %vm361_vm1, %v1114_v46  }
  0xf9   :  { %4742 = vst.msk [vmem:[%s9846_s1 + $0x944] ss:$-440 sm:$0x30] %vm361_vm1, %v1114_v46   ;;  %4743 = vst.msk [vmem:[%s9846_s1 + $0x1024] ss:$-440 sm:$0xc0] %vm361_vm1, %v1114_v46   ;;  %1918 = vrot.lane.b32.xlu0 %v6808_v41, %s5651_s7  ;;  %1935 = vrot.lane.b32.xlu1 %v6811_v45, %s5651_s7 }
  0xfa   :  { %4744 = vst.msk [vmem:[%s9846_s1 + $0x2e4] ss:$-440 sm:$0x3] %vm361_vm1, %v1131_v49   ;;  %4745 = vst.msk [vmem:[%s9846_s1 + $0x9c4] ss:$-440 sm:$0xc] %vm361_vm1, %v1131_v49  }
  0xfb   :  { %4746 = vst.msk [vmem:[%s9846_s1 + $0xa44] ss:$-440 sm:$0x30] %vm361_vm1, %v1131_v49   ;;  %4747 = vst.msk [vmem:[%s9846_s1 + $0x1124] ss:$-440 sm:$0xc0] %vm361_vm1, %v1131_v49   ;;  %v1148_v54 = vpop.permute.xlu0 %1147   ;;  %v1161_v55 = vpop.permute.xlu1 %1160  }
  0xfc   :  { %4748 = vst.msk [vmem:[%s9846_s1 + $0x221] ss:$-440 sm:$0x3] %vm361_vm1, %v1148_v54   ;;  %4749 = vst.msk [vmem:[%s9846_s1 + $0x901] ss:$-440 sm:$0xc] %vm361_vm1, %v1148_v54  }
  0xfd   :  { %4750 = vst.msk [vmem:[%s9846_s1 + $0x981] ss:$-440 sm:$0x30] %vm361_vm1, %v1148_v54   ;;  %4751 = vst.msk [vmem:[%s9846_s1 + $0x1061] ss:$-440 sm:$0xc0] %vm361_vm1, %v1148_v54   ;;  %1952 = vrot.lane.b32.xlu0 %v6850_v27, %s5652_s19  ;;  %1965 = vrot.lane.b32.xlu1 %v6847_v26, %s5652_s19 }
  0xfe   :  { %4752 = vst.msk [vmem:[%s9846_s1 + $0x321] ss:$-440 sm:$0x3] %vm361_vm1, %v1161_v55   ;;  %4753 = vst.msk [vmem:[%s9846_s1 + $0xa01] ss:$-440 sm:$0xc] %vm361_vm1, %v1161_v55  }
  0xff   :  { %v1174_v63 = vpop.permute.xlu0 %1173   ;;  %v1191_v0 = vpop.permute.xlu1 %1190   ;;  %s5653_s7 = smov 69   ;;  %s5654_s19 = smov 68   ;;  %v2111_v21 = vld.sshfl [vmem:[#allocation0 + $0x1f8] sm:$0xff pattern:$0x12300000]  }
 0x100   :  { %4754 = vst.msk [vmem:[%s9846_s1 + $0x26] ss:$1320 sm:$0x3] %vm361_vm1, %v1174_v63   ;;  %4755 = vst.msk [vmem:[%s9846_s1 + $0x706] ss:$-440 sm:$0xc] %vm361_vm1, %v1174_v63   ;;  %v7000_v25 = vsel %vm382_vm0, %v2111_v21, %v2109_v20 }
 0x101   :  { %4756 = vst.msk [vmem:[%s9846_s1 - $0x13fa] ss:$1320 sm:$0x30] %vm361_vm1, %v1174_v63   ;;  %4757 = vst.msk [vmem:[%s9846_s1 + $0xe66] ss:$-440 sm:$0xc0] %vm361_vm1, %v1174_v63   ;;  %1978 = vrot.lane.b32.xlu0 %v1977_v58, %s5653_s7  ;;  %1995 = vrot.lane.b32.xlu1 %v1994_v61, %s5653_s7 }
 0x102   :  { %4758 = vst.msk [vmem:[%s9846_s1 + $0x126] ss:$1320 sm:$0x3] %vm361_vm1, %v1191_v0   ;;  %4759 = vst.msk [vmem:[%s9846_s1 + $0x806] ss:$-440 sm:$0xc] %vm361_vm1, %v1191_v0  }
 0x103   :  { %4760 = vst.msk [vmem:[%s9846_s1 - $0x12fa] ss:$1320 sm:$0x30] %vm361_vm1, %v1191_v0   ;;  %4761 = vst.msk [vmem:[%s9846_s1 + $0xf66] ss:$-440 sm:$0xc0] %vm361_vm1, %v1191_v0   ;;  %v1208_v9 = vpop.permute.xlu0 %1207   ;;  %v1221_v10 = vpop.permute.xlu1 %1220  }
 0x104   :  { %4762 = vst.msk [vmem:[%s9846_s1 + $0x63] ss:$1320 sm:$0x3] %vm361_vm1, %v1208_v9   ;;  %4763 = vst.msk [vmem:[%s9846_s1 + $0x743] ss:$-440 sm:$0xc] %vm361_vm1, %v1208_v9  }
 0x105   :  { %4764 = vst.msk [vmem:[%s9846_s1 - $0x13bd] ss:$1320 sm:$0x30] %vm361_vm1, %v1208_v9   ;;  %4765 = vst.msk [vmem:[%s9846_s1 + $0xea3] ss:$-440 sm:$0xc0] %vm361_vm1, %v1208_v9   ;;  %2012 = vrot.lane.b32.xlu0 %v6913_v1, %s5654_s19  ;;  %2025 = vrot.lane.b32.xlu1 %v6915_v3, %s5654_s19 }
 0x106   :  { %4766 = vst.msk [vmem:[%s9846_s1 + $0x163] ss:$1320 sm:$0x3] %vm361_vm1, %v1221_v10   ;;  %4767 = vst.msk [vmem:[%s9846_s1 + $0x843] ss:$-440 sm:$0xc] %vm361_vm1, %v1221_v10  }
 0x107   :  { %v1234_v13 = vpop.permute.xlu0 %1233   ;;  %v1251_v14 = vpop.permute.xlu1 %1250   ;;  %s5655_s7 = smov 67   ;;  %v2126_v52 = vld.sshfl [vmem:[#allocation0 + $0x50] sm:$0xff pattern:$0x11111230]  }
 0x108   :  { %4768 = vst.msk [vmem:[%s9846_s1 + $0x20] ss:$1320 sm:$0x3] %vm361_vm1, %v1234_v13   ;;  %4769 = vst.msk [vmem:[%s9846_s1 + $0x700] ss:$-440 sm:$0xc] %vm361_vm1, %v1234_v13  }
 0x109   :  { %4770 = vst.msk [vmem:[%s9846_s1 - $0x1400] ss:$1320 sm:$0x30] %vm361_vm1, %v1234_v13   ;;  %4771 = vst.msk [vmem:[%s9846_s1 + $0xe60] ss:$-440 sm:$0xc0] %vm361_vm1, %v1234_v13   ;;  %2038 = vrot.lane.b32.xlu0 %v6357_v47, %s5655_s7  ;;  %2055 = vrot.lane.b32.xlu1 %v6360_v48, %s5655_s7  ;;  %v6980_v48 = vsel %vm382_vm0, %v2069_v16, %v2067_v15 }
 0x10a   :  { %4772 = vst.msk [vmem:[%s9846_s1 + $0x120] ss:$1320 sm:$0x3] %vm361_vm1, %v1251_v14   ;;  %4773 = vst.msk [vmem:[%s9846_s1 + $0x800] ss:$-440 sm:$0xc] %vm361_vm1, %v1251_v14  }
 0x10b   :  { %4774 = vst.msk [vmem:[%s9846_s1 - $0x1300] ss:$1320 sm:$0x30] %vm361_vm1, %v1251_v14   ;;  %4775 = vst.msk [vmem:[%s9846_s1 + $0xf60] ss:$-440 sm:$0xc0] %vm361_vm1, %v1251_v14   ;;  %v1268_v17 = vpop.permute.xlu0 %1267   ;;  %v1277_v19 = vpop.permute.xlu1 %1276  }
 0x10c   :  { %v6977_v47 = vld.sshfl [vmem:[#allocation0 + $0x1a8] sm:$0xff pattern:$0x11111230]   ;;  %4776 = vst.msk [vmem:[%s9846_s1 + $0x585] ss:$-440 sm:$0xf] %vm361_vm1, %v1268_v17  }
 0x10d   :  { %4777 = vst.msk [vmem:[%s9846_s1 + $0xce5] ss:$-440 sm:$0xf0] %vm361_vm1, %v1268_v17   ;;  %4778 = vst.msk [vmem:[%s9846_s1 + $0x685] ss:$-440 sm:$0xf] %vm361_vm1, %v1277_v19   ;;  %2072 = vrot.lane.b32.xlu0 %v6980_v48, %s5656_s14  ;;  %2085 = vrot.lane.b32.xlu1 %v6977_v47, %s5656_s14 }
 0x10e   :  { %v2128_v53 = vld.sshfl [vmem:[#allocation0 + $0xf8] sm:$0xff pattern:$0x12300000]   ;;  %v7023_v8 = vld.sshfl [vmem:[#allocation0 + $0x1a0] sm:$0xff pattern:$0x11111230]  }
 0x10f   :  { %v1288_v34 = vpop.permute.xlu0 %1287   ;;  %v1301_v39 = vpop.permute.xlu1 %1300   ;;  %v7021_v7 = vsel %vm382_vm0, %v2128_v53, %v2126_v52  ;;  %v2152_v30 = vld [vmem:[#allocation0 + $0xa3] ss:$-1 sm:$0xf]   ;;  %v2154_v42 = vld [vmem:[#allocation0 + $0x14f] ss:$-1 sm:$0xf0]  }
 0x110   :  { %4779 = vst.msk [vmem:[%s9846_s1 + $0x542] ss:$-440 sm:$0xf] %vm361_vm1, %v1288_v34   ;;  %4780 = vst.msk [vmem:[%s9846_s1 + $0xca2] ss:$-440 sm:$0xf0] %vm361_vm1, %v1288_v34   ;;  %v2156_v32 = vsel %vm382_vm0, %v2154_v42, %v2152_v30 }
 0x111   :  { %4781 = vst.msk [vmem:[%s9846_s1 + $0x642] ss:$-440 sm:$0xf] %vm361_vm1, %v1301_v39   ;;  %4782 = vst.msk [vmem:[%s9846_s1 + $0xda2] ss:$-440 sm:$0xf0] %vm361_vm1, %v1301_v39   ;;  %2097 = vrot.lane.b32.xlu0 %v6997_v24, %s5657_s22  ;;  %2114 = vrot.lane.b32.xlu1 %v7000_v25, %s5657_s22 }
 0x112   :  { %v2165_v33 = vld [vmem:[#allocation0 + $0x1f3] ss:$-1 sm:$0xf]   ;;  %v2172_v46 = vld [vmem:[#allocation0 + $0x4b] ss:$-1 sm:$0xf]  }
 0x113   :  { %v1314_v22 = vpop.permute.xlu0 %1313   ;;  %v1327_v23 = vpop.permute.xlu1 %1326   ;;  %v2174_v49 = vld [vmem:[#allocation0 + $0xf7] ss:$-1 sm:$0xf0]   ;;  %s5659_s22 = smov 63   ;;  %s5667_s7 = smov 55  }
 0x114   :  { %4783 = vst.msk [vmem:[%s9846_s1 + $0x3c7] ss:$-440 sm:$0x7] %vm361_vm1, %v1314_v22   ;;  %4784 = vst.msk [vmem:[%s9846_s1 + $0x927] ss:$-312 sm:$0x18] %vm361_vm1, %v1314_v22   ;;  %v2176_v50 = vsel %vm382_vm0, %v2174_v49, %v2172_v46 }
 0x115   :  { %4785 = vst.msk [vmem:[%s9846_s1 + $0xb27] ss:$-440 sm:$0x60] %vm361_vm1, %v1314_v22   ;;  %4786 = vst.msk [vmem:[%s9846_s1 + $0x5f8] sm:$0x80] %vm361_vm1, %v1314_v22   ;;  %2131 = vrot.lane.b32.xlu0 %v7021_v7, %s5658_s6  ;;  %2144 = vrot.lane.b32.xlu1 %v7023_v8, %s5658_s6  ;;  %s5660_s6 = smov 62  }
 0x116   :  { %4787 = vst.msk [vmem:[%s9846_s1 + $0x4c7] ss:$-440 sm:$0x7] %vm361_vm1, %v1327_v23   ;;  %4788 = vst.msk [vmem:[%s9846_s1 + $0x67c] sm:$0x8] %vm361_vm1, %v1327_v23   ;;  %s5668_s14 = smov 54  }
 0x117   :  { %v1340_v36 = vpop.permute.xlu0 %1339   ;;  %v1357_v37 = vpop.permute.xlu1 %1356   ;;  %v2185_v51 = vld [vmem:[#allocation0 + $0x19b] ss:$-1 sm:$0xf]   ;;  %v2355_v58 = vld.sshfl [vmem:[#allocation0 + $0x180] sm:$0xff pattern:$0x22222301]  }
 0x118   :  { %4789 = vst.msk [vmem:[%s9846_s1 + $0x384] ss:$-440 sm:$0x7] %vm361_vm1, %v1340_v36   ;;  %4790 = vst.msk [vmem:[%s9846_s1 + $0x8e4] ss:$-312 sm:$0x18] %vm361_vm1, %v1340_v36  }
 0x119   :  { %4791 = vst.msk [vmem:[%s9846_s1 + $0xae4] ss:$-440 sm:$0x60] %vm361_vm1, %v1340_v36   ;;  %4792 = vst.msk [vmem:[%s9846_s1 + $0x5b5] sm:$0x80] %vm361_vm1, %v1340_v36   ;;  %2157 = vrot.lane.b32.xlu0 %v2156_v32, %s5659_s22  ;;  %2166 = vrot.lane.b32.xlu1 %v2165_v33, %s5659_s22  ;;  %s5661_s22 = smov 61  }
 0x11a   :  { %4793 = vst.msk [vmem:[%s9846_s1 + $0x484] ss:$-440 sm:$0x7] %vm361_vm1, %v1357_v37   ;;  %4794 = vst.msk [vmem:[%s9846_s1 + $0x9e4] ss:$-312 sm:$0x18] %vm361_vm1, %v1357_v37  }
 0x11b   :  { %4795 = vst.msk [vmem:[%s9846_s1 + $0xbe4] ss:$-440 sm:$0x60] %vm361_vm1, %v1357_v37   ;;  %4796 = vst.msk [vmem:[%s9846_s1 + $0x6b5] sm:$0x80] %vm361_vm1, %v1357_v37   ;;  %v1374_v31 = vpop.permute.xlu0 %1373   ;;  %v1387_v35 = vpop.permute.xlu1 %1386  }
 0x11c   :  { %4797 = vst.msk [vmem:[%s9846_s1 + $0x3c1] ss:$-440 sm:$0x7] %vm361_vm1, %v1374_v31   ;;  %4798 = vst.msk [vmem:[%s9846_s1 + $0x921] ss:$-312 sm:$0x18] %vm361_vm1, %v1374_v31  }
 0x11d   :  { %4799 = vst.msk [vmem:[%s9846_s1 + $0xb21] ss:$-440 sm:$0x60] %vm361_vm1, %v1374_v31   ;;  %4800 = vst.msk [vmem:[%s9846_s1 + $0x5f2] sm:$0x80] %vm361_vm1, %v1374_v31   ;;  %2177 = vrot.lane.b32.xlu0 %v2176_v50, %s5660_s6  ;;  %2186 = vrot.lane.b32.xlu1 %v2185_v51, %s5660_s6  ;;  %s5662_s6 = smov 60  }
 0x11e   :  { %4801 = vst.msk [vmem:[%s9846_s1 + $0x4c1] ss:$-440 sm:$0x7] %vm361_vm1, %v1387_v35   ;;  %4802 = vst.msk [vmem:[%s9846_s1 + $0x676] sm:$0x8] %vm361_vm1, %v1387_v35  }
 0x11f   :  { %v1400_v54 = vpop.permute.xlu0 %1399   ;;  %v1417_v55 = vpop.permute.xlu1 %1416   ;;  %v2357_v61 = vld.sshfl [vmem:[#allocation0 + $0x228] sm:$0xff pattern:$0x23011111]   ;;  %v2400_v62 = vld.sshfl [vmem:[#allocation0 + $0xd0] sm:$0xff pattern:$0x12300000]  }
 0x120   :  { %4803 = vst.msk [vmem:[%s9846_s1 + $0x1c6] ss:$-440 sm:$0x3] %vm361_vm1, %v1400_v54   ;;  %4804 = vst.msk [vmem:[%s9846_s1 + $0x8a6] ss:$-440 sm:$0xc] %vm361_vm1, %v1400_v54  }
 0x121   :  { %4805 = vst.msk [vmem:[%s9846_s1 + $0x926] ss:$-440 sm:$0x30] %vm361_vm1, %v1400_v54   ;;  %4806 = vst.msk [vmem:[%s9846_s1 + $0x1006] ss:$-440 sm:$0xc0] %vm361_vm1, %v1400_v54   ;;  %2197 = vrot.lane.b32.xlu0 %v6498_v2, %s5661_s22  ;;  %2210 = vrot.lane.b32.xlu1 %v6495_v60, %s5661_s22 }
 0x122   :  { %4807 = vst.msk [vmem:[%s9846_s1 + $0x2c6] ss:$-440 sm:$0x3] %vm361_vm1, %v1417_v55   ;;  %4808 = vst.msk [vmem:[%s9846_s1 + $0x9a6] ss:$-440 sm:$0xc] %vm361_vm1, %v1417_v55  }
 0x123   :  { %4809 = vst.msk [vmem:[%s9846_s1 + $0xa26] ss:$-440 sm:$0x30] %vm361_vm1, %v1417_v55   ;;  %4810 = vst.msk [vmem:[%s9846_s1 + $0x1106] ss:$-440 sm:$0xc0] %vm361_vm1, %v1417_v55   ;;  %v1434_v60 = vpop.permute.xlu0 %1433   ;;  %v1447_v2 = vpop.permute.xlu1 %1446  }
 0x124   :  { %4811 = vst.msk [vmem:[%s9846_s1 + $0x203] ss:$-440 sm:$0x3] %vm361_vm1, %v1434_v60   ;;  %4812 = vst.msk [vmem:[%s9846_s1 + $0x8e3] ss:$-440 sm:$0xc] %vm361_vm1, %v1434_v60  }
 0x125   :  { %4813 = vst.msk [vmem:[%s9846_s1 + $0x963] ss:$-440 sm:$0x30] %vm361_vm1, %v1434_v60   ;;  %4814 = vst.msk [vmem:[%s9846_s1 + $0x1043] ss:$-440 sm:$0xc0] %vm361_vm1, %v1434_v60   ;;  %2223 = vrot.lane.b32.xlu0 %v6535_v28, %s5662_s6  ;;  %2240 = vrot.lane.b32.xlu1 %v6538_v29, %s5662_s6 }
 0x126   :  { %4815 = vst.msk [vmem:[%s9846_s1 + $0x303] ss:$-440 sm:$0x3] %vm361_vm1, %v1447_v2   ;;  %4816 = vst.msk [vmem:[%s9846_s1 + $0x9e3] ss:$-440 sm:$0xc] %vm361_vm1, %v1447_v2  }
 0x127   :  { %v1460_v28 = vpop.permute.xlu0 %1459   ;;  %v1477_v29 = vpop.permute.xlu1 %1476   ;;  %s5663_s22 = smov 59   ;;  %s5664_s6 = smov 58   ;;  %v2398_v59 = vld.sshfl [vmem:[#allocation0 + $0x28] sm:$0xff pattern:$0x11111230]  }
 0x128   :  { %4817 = vst.msk [vmem:[%s9846_s1 + $0x1c0] ss:$-440 sm:$0x3] %vm361_vm1, %v1460_v28   ;;  %4818 = vst.msk [vmem:[%s9846_s1 + $0x8a0] ss:$-440 sm:$0xc] %vm361_vm1, %v1460_v28  }
 0x129   :  { %4819 = vst.msk [vmem:[%s9846_s1 + $0x920] ss:$-440 sm:$0x30] %vm361_vm1, %v1460_v28   ;;  %4820 = vst.msk [vmem:[%s9846_s1 + $0x1000] ss:$-440 sm:$0xc0] %vm361_vm1, %v1460_v28   ;;  %2257 = vrot.lane.b32.xlu0 %v6569_v40, %s5663_s22  ;;  %2270 = vrot.lane.b32.xlu1 %v6566_v38, %s5663_s22 }
 0x12a   :  { %4821 = vst.msk [vmem:[%s9846_s1 + $0x2c0] ss:$-440 sm:$0x3] %vm361_vm1, %v1477_v29   ;;  %4822 = vst.msk [vmem:[%s9846_s1 + $0x9a0] ss:$-440 sm:$0xc] %vm361_vm1, %v1477_v29  }
 0x12b   :  { %4823 = vst.msk [vmem:[%s9846_s1 + $0xa20] ss:$-440 sm:$0x30] %vm361_vm1, %v1477_v29   ;;  %4824 = vst.msk [vmem:[%s9846_s1 + $0x1100] ss:$-440 sm:$0xc0] %vm361_vm1, %v1477_v29   ;;  %v1494_v38 = vpop.permute.xlu0 %1493   ;;  %v1507_v40 = vpop.permute.xlu1 %1506  }
 0x12c   :  { %4825 = vst.msk [vmem:[%s9846_s1 + $0x45] ss:$1320 sm:$0x3] %vm361_vm1, %v1494_v38   ;;  %4826 = vst.msk [vmem:[%s9846_s1 + $0x725] ss:$-440 sm:$0xc] %vm361_vm1, %v1494_v38  }
 0x12d   :  { %4827 = vst.msk [vmem:[%s9846_s1 - $0x13db] ss:$1320 sm:$0x30] %vm361_vm1, %v1494_v38   ;;  %4828 = vst.msk [vmem:[%s9846_s1 + $0xe85] ss:$-440 sm:$0xc0] %vm361_vm1, %v1494_v38   ;;  %2283 = vrot.lane.b32.xlu0 %v6606_v6, %s5664_s6  ;;  %2300 = vrot.lane.b32.xlu1 %v6609_v18, %s5664_s6 }
 0x12e   :  { %4829 = vst.msk [vmem:[%s9846_s1 + $0x145] ss:$1320 sm:$0x3] %vm361_vm1, %v1507_v40   ;;  %4830 = vst.msk [vmem:[%s9846_s1 + $0x825] ss:$-440 sm:$0xc] %vm361_vm1, %v1507_v40  }
 0x12f   :  { %v2338_v6 = vld.sshfl [vmem:[#allocation0 + $0x30] sm:$0xff pattern:$0x22222301]   ;;  %v2340_v18 = vld.sshfl [vmem:[#allocation0 + $0xd8] sm:$0xff pattern:$0x23011111]   ;;  %v1519_v56 = vpop.permute.xlu0 %1518   ;;  %v1536_v57 = vpop.permute.xlu1 %1535  }
 0x130   :  { %4831 = vst.msk [vmem:[%s9846_s1 + $0x2] ss:$1320 sm:$0x3] %vm361_vm1, %v1519_v56   ;;  %4832 = vst.msk [vmem:[%s9846_s1 + $0x6e2] ss:$-440 sm:$0xc] %vm361_vm1, %v1519_v56  }
 0x131   :  { %4833 = vst.msk [vmem:[%s9846_s1 - $0x141e] ss:$1320 sm:$0x30] %vm361_vm1, %v1519_v56   ;;  %4834 = vst.msk [vmem:[%s9846_s1 + $0xe42] ss:$-440 sm:$0xc0] %vm361_vm1, %v1519_v56  }
 0x132   :  { %4835 = vst.msk [vmem:[%s9846_s1 + $0x102] ss:$1320 sm:$0x3] %vm361_vm1, %v1536_v57   ;;  %4836 = vst.msk [vmem:[%s9846_s1 + $0x7e2] ss:$-440 sm:$0xc] %vm361_vm1, %v1536_v57  }
 0x133   :  { %4837 = vst.msk [vmem:[%s9846_s1 - $0x131e] ss:$1320 sm:$0x30] %vm361_vm1, %v1536_v57   ;;  %4838 = vst.msk [vmem:[%s9846_s1 + $0xf42] ss:$-440 sm:$0xc0] %vm361_vm1, %v1536_v57   ;;  %v1553_v63 = vpop.permute.xlu0 %1552   ;;  %v1562_v0 = vpop.permute.xlu1 %1561  }
 0x134   :  { %s5665_s22 = smov 57   ;;  %4839 = vst.msk [vmem:[%s9846_s1 + $0x567] ss:$-440 sm:$0xf] %vm361_vm1, %v1553_v63  }
 0x135   :  { %2317 = vrot.lane.b32.xlu0 %v6640_v44, %s5665_s22  ;;  %2330 = vrot.lane.b32.xlu1 %v6637_v43, %s5665_s22  ;;  %v7264_v43 = vsel %vm382_vm0, %v2340_v18, %v2338_v6  ;;  %v7267_v44 = vsel %vm382_vm0, %v2357_v61, %v2355_v58  ;;  %4840 = vst.msk [vmem:[%s9846_s1 + $0xcc7] ss:$-440 sm:$0xf0] %vm361_vm1, %v1553_v63   ;;  %4841 = vst.msk [vmem:[%s9846_s1 + $0x667] ss:$-440 sm:$0xf] %vm361_vm1, %v1562_v0  }
 0x136   :  { %v2415_v13 = vld.sshfl [vmem:[#allocation0 + $0x178] sm:$0xff pattern:$0x11111230]   ;;  %v2417_v14 = vld.sshfl [vmem:[#allocation0 + $0x220] sm:$0xff pattern:$0x12300000]  }
 0x137   :  { %v1573_v9 = vpop.permute.xlu0 %1572   ;;  %v1582_v10 = vpop.permute.xlu1 %1581   ;;  %v2432_v11 = vld [vmem:[#allocation0 + $0x7b] ss:$-1 sm:$0xf]   ;;  %v2434_v12 = vld [vmem:[#allocation0 + $0x127] ss:$-1 sm:$0xf0]  }
 0x138   :  { %4842 = vst.msk [vmem:[%s9846_s1 + $0x5a4] ss:$-440 sm:$0xf] %vm361_vm1, %v1573_v9   ;;  %4843 = vst.msk [vmem:[%s9846_s1 + $0xd04] ss:$-440 sm:$0xf0] %vm361_vm1, %v1573_v9   ;;  %v2436_v19 = vsel %vm382_vm0, %v2434_v12, %v2432_v11 }
 0x139   :  { %2343 = vrot.lane.b32.xlu0 %v7264_v43, %s5666_s29  ;;  %2360 = vrot.lane.b32.xlu1 %v7267_v44, %s5666_s29  ;;  %4844 = vst.msk [vmem:[%s9846_s1 + $0x6a4] ss:$-440 sm:$0xf] %vm361_vm1, %v1582_v10   ;;  %v2445_v17 = vld [vmem:[#allocation0 + $0x1cb] ss:$-1 sm:$0xf]  }
 0x13a   :  { %v2452_v20 = vld [vmem:[#allocation0 + $0x23] ss:$-1 sm:$0xf]   ;;  %v2454_v21 = vld [vmem:[#allocation0 + $0xcf] ss:$-1 sm:$0xf0]  }
 0x13b   :  { %v1593_v15 = vpop.permute.xlu0 %1592   ;;  %v1602_v16 = vpop.permute.xlu1 %1601   ;;  %v2465_v52 = vld [vmem:[#allocation0 + $0x173] ss:$-1 sm:$0xf]   ;;  %v2467_v53 = vld [vmem:[#allocation0 + $0x21f] ss:$-1 sm:$0xf0]   ;;  %v2456_v22 = vsel %vm382_vm0, %v2454_v21, %v2452_v20 }
 0x13c   :  { %4845 = vst.msk [vmem:[%s9846_s1 + $0x561] ss:$-440 sm:$0xf] %vm361_vm1, %v1593_v15   ;;  %4846 = vst.msk [vmem:[%s9846_s1 + $0xcc1] ss:$-440 sm:$0xf0] %vm361_vm1, %v1593_v15   ;;  %v2469_v23 = vsel %vm382_vm0, %v2467_v53, %v2465_v52 }
 0x13d   :  { %2377 = vrot.lane.b32.xlu0 %v6691_v4, %s5667_s7  ;;  %2390 = vrot.lane.b32.xlu1 %v6693_v5, %s5667_s7  ;;  %v7298_v4 = vsel %vm382_vm0, %v2400_v62, %v2398_v59  ;;  %v7301_v5 = vsel %vm382_vm0, %v2417_v14, %v2415_v13  ;;  %4847 = vst.msk [vmem:[%s9846_s1 + $0x661] ss:$-440 sm:$0xf] %vm361_vm1, %v1602_v16   ;;  %v2478_v32 = vld [vmem:[#allocation0 + $0x73] ss:$-1 sm:$0xf]  }
 0x13e   :  { %v2480_v33 = vld [vmem:[#allocation0 + $0x11f] ss:$-1 sm:$0xf0]   ;;  %v2491_v37 = vld [vmem:[#allocation0 + $0x1c3] ss:$-1 sm:$0xf]  }
 0x13f   :  { %v1613_v34 = vpop.permute.xlu0 %1612   ;;  %v1626_v39 = vpop.permute.xlu1 %1625   ;;  %v2482_v36 = vsel %vm382_vm0, %v2480_v33, %v2478_v32  ;;  %v2575_v54 = vld.sshfl [vmem:[#allocation0 + $0x160] sm:$0xff pattern:$0x33333012]   ;;  %v2577_v55 = vld.sshfl [vmem:[#allocation0 + $0x208] sm:$0xff pattern:$0x30122222]  }
 0x140   :  { %4848 = vst.msk [vmem:[%s9846_s1 + $0x3e6] ss:$-440 sm:$0x7] %vm361_vm1, %v1613_v34   ;;  %4849 = vst.msk [vmem:[%s9846_s1 + $0x946] ss:$-312 sm:$0x18] %vm361_vm1, %v1613_v34  }
 0x141   :  { %2403 = vrot.lane.b32.xlu0 %v7298_v4, %s5668_s14  ;;  %2420 = vrot.lane.b32.xlu1 %v7301_v5, %s5668_s14  ;;  %4850 = vst.msk [vmem:[%s9846_s1 + $0xb46] ss:$-440 sm:$0x60] %vm361_vm1, %v1613_v34   ;;  %4851 = vst.msk [vmem:[%s9846_s1 + $0x617] sm:$0x80] %vm361_vm1, %v1613_v34   ;;  %s5670_s14 = smov 52  }
 0x142   :  { %4852 = vst.msk [vmem:[%s9846_s1 + $0x4e6] ss:$-440 sm:$0x7] %vm361_vm1, %v1626_v39   ;;  %4853 = vst.msk [vmem:[%s9846_s1 + $0x69b] sm:$0x8] %vm361_vm1, %v1626_v39   ;;  %s5678_s29 = smov 44  }
 0x143   :  { %v1639_v30 = vpop.permute.xlu0 %1638   ;;  %v1656_v42 = vpop.permute.xlu1 %1655   ;;  %v2618_v28 = vld.sshfl [vmem:[#allocation0 + $0x8] sm:$0xff pattern:$0x22222301]   ;;  %v2620_v29 = vld.sshfl [vmem:[#allocation0 + $0xb0] sm:$0xff pattern:$0x23011111]  }
 0x144   :  { %4854 = vst.msk [vmem:[%s9846_s1 + $0x3a3] ss:$-440 sm:$0x7] %vm361_vm1, %v1639_v30   ;;  %4855 = vst.msk [vmem:[%s9846_s1 + $0x903] ss:$-312 sm:$0x18] %vm361_vm1, %v1639_v30  }
 0x145   :  { %2437 = vrot.lane.b32.xlu0 %v2436_v19, %s5669_s26  ;;  %2446 = vrot.lane.b32.xlu1 %v2445_v17, %s5669_s26  ;;  %4856 = vst.msk [vmem:[%s9846_s1 + $0xb03] ss:$-440 sm:$0x60] %vm361_vm1, %v1639_v30   ;;  %4857 = vst.msk [vmem:[%s9846_s1 + $0x5d4] sm:$0x80] %vm361_vm1, %v1639_v30   ;;  %s5671_s26 = smov 51  }
 0x146   :  { %4858 = vst.msk [vmem:[%s9846_s1 + $0x4a3] ss:$-440 sm:$0x7] %vm361_vm1, %v1656_v42   ;;  %4859 = vst.msk [vmem:[%s9846_s1 + $0xa03] ss:$-312 sm:$0x18] %vm361_vm1, %v1656_v42  }
 0x147   :  { %4860 = vst.msk [vmem:[%s9846_s1 + $0xc03] ss:$-440 sm:$0x60] %vm361_vm1, %v1656_v42   ;;  %4861 = vst.msk [vmem:[%s9846_s1 + $0x6d4] sm:$0x80] %vm361_vm1, %v1656_v42   ;;  %v1673_v46 = vpop.permute.xlu0 %1672   ;;  %v1686_v49 = vpop.permute.xlu1 %1685   ;;  %s5679_s7 = smov 43  }
 0x148   :  { %4862 = vst.msk [vmem:[%s9846_s1 + $0x3e0] ss:$-440 sm:$0x7] %vm361_vm1, %v1673_v46   ;;  %4863 = vst.msk [vmem:[%s9846_s1 + $0x940] ss:$-312 sm:$0x18] %vm361_vm1, %v1673_v46  }
 0x149   :  { %2457 = vrot.lane.b32.xlu0 %v2456_v22, %s5670_s14  ;;  %2470 = vrot.lane.b32.xlu1 %v2469_v23, %s5670_s14  ;;  %4864 = vst.msk [vmem:[%s9846_s1 + $0xb40] ss:$-440 sm:$0x60] %vm361_vm1, %v1673_v46   ;;  %4865 = vst.msk [vmem:[%s9846_s1 + $0x611] sm:$0x80] %vm361_vm1, %v1673_v46   ;;  %s5672_s14 = smov 50  }
 0x14a   :  { %4866 = vst.msk [vmem:[%s9846_s1 + $0x4e0] ss:$-440 sm:$0x7] %vm361_vm1, %v1686_v49   ;;  %4867 = vst.msk [vmem:[%s9846_s1 + $0x695] sm:$0x8] %vm361_vm1, %v1686_v49  }
 0x14b   :  { %v1699_v50 = vpop.permute.xlu0 %1698   ;;  %v1716_v51 = vpop.permute.xlu1 %1715   ;;  %v2635_v6 = vld.sshfl [vmem:[#allocation0 + $0x158] sm:$0xff pattern:$0x22222301]   ;;  %v2637_v18 = vld.sshfl [vmem:[#allocation0 + $0x200] sm:$0xff pattern:$0x23011111]  }
 0x14c   :  { %4868 = vst.msk [vmem:[%s9846_s1 + $0x1e5] ss:$-440 sm:$0x3] %vm361_vm1, %v1699_v50   ;;  %4869 = vst.msk [vmem:[%s9846_s1 + $0x8c5] ss:$-440 sm:$0xc] %vm361_vm1, %v1699_v50  }
 0x14d   :  { %2483 = vrot.lane.b32.xlu0 %v2482_v36, %s5671_s26  ;;  %2492 = vrot.lane.b32.xlu1 %v2491_v37, %s5671_s26  ;;  %4870 = vst.msk [vmem:[%s9846_s1 + $0x945] ss:$-440 sm:$0x30] %vm361_vm1, %v1699_v50   ;;  %4871 = vst.msk [vmem:[%s9846_s1 + $0x1025] ss:$-440 sm:$0xc0] %vm361_vm1, %v1699_v50  }
 0x14e   :  { %4872 = vst.msk [vmem:[%s9846_s1 + $0x2e5] ss:$-440 sm:$0x3] %vm361_vm1, %v1716_v51   ;;  %4873 = vst.msk [vmem:[%s9846_s1 + $0x9c5] ss:$-440 sm:$0xc] %vm361_vm1, %v1716_v51  }
 0x14f   :  { %4874 = vst.msk [vmem:[%s9846_s1 + $0xa45] ss:$-440 sm:$0x30] %vm361_vm1, %v1716_v51   ;;  %4875 = vst.msk [vmem:[%s9846_s1 + $0x1125] ss:$-440 sm:$0xc0] %vm361_vm1, %v1716_v51   ;;  %v1733_v31 = vpop.permute.xlu0 %1732   ;;  %v1746_v35 = vpop.permute.xlu1 %1745  }
 0x150   :  { %4876 = vst.msk [vmem:[%s9846_s1 + $0x222] ss:$-440 sm:$0x3] %vm361_vm1, %v1733_v31   ;;  %4877 = vst.msk [vmem:[%s9846_s1 + $0x902] ss:$-440 sm:$0xc] %vm361_vm1, %v1733_v31  }
 0x151   :  { %2503 = vrot.lane.b32.xlu0 %v6808_v41, %s5672_s14  ;;  %2520 = vrot.lane.b32.xlu1 %v6811_v45, %s5672_s14  ;;  %v2558_v41 = vld.sshfl [vmem:[#allocation0 + $0x10] sm:$0xff pattern:$0x33333012]   ;;  %v2560_v45 = vld.sshfl [vmem:[#allocation0 + $0xb8] sm:$0xff pattern:$0x30122222]  }
 0x152   :  { %4878 = vst.msk [vmem:[%s9846_s1 + $0x982] ss:$-440 sm:$0x30] %vm361_vm1, %v1733_v31   ;;  %4879 = vst.msk [vmem:[%s9846_s1 + $0x1062] ss:$-440 sm:$0xc0] %vm361_vm1, %v1733_v31  }
 0x153   :  { %4880 = vst.msk [vmem:[%s9846_s1 + $0x322] ss:$-440 sm:$0x3] %vm361_vm1, %v1746_v35   ;;  %4881 = vst.msk [vmem:[%s9846_s1 + $0xa02] ss:$-440 sm:$0xc] %vm361_vm1, %v1746_v35   ;;  %v1759_v60 = vpop.permute.xlu0 %1758   ;;  %v1776_v2 = vpop.permute.xlu1 %1775  }
 0x154   :  { %s5673_s26 = smov 49   ;;  %4882 = vst.msk [vmem:[%s9846_s1 + $0x27] ss:$1320 sm:$0x3] %vm361_vm1, %v1759_v60   ;;  %s5674_s14 = smov 48  }
 0x155   :  { %2537 = vrot.lane.b32.xlu0 %v6850_v27, %s5673_s26  ;;  %2550 = vrot.lane.b32.xlu1 %v6847_v26, %s5673_s26  ;;  %v7462_v26 = vsel %vm382_vm0, %v2560_v45, %v2558_v41  ;;  %v7465_v27 = vsel %vm382_vm0, %v2577_v55, %v2575_v54  ;;  %4883 = vst.msk [vmem:[%s9846_s1 + $0x707] ss:$-440 sm:$0xc] %vm361_vm1, %v1759_v60   ;;  %4884 = vst.msk [vmem:[%s9846_s1 - $0x13f9] ss:$1320 sm:$0x30] %vm361_vm1, %v1759_v60  }
 0x156   :  { %4885 = vst.msk [vmem:[%s9846_s1 + $0xe67] ss:$-440 sm:$0xc0] %vm361_vm1, %v1759_v60   ;;  %4886 = vst.msk [vmem:[%s9846_s1 + $0x127] ss:$1320 sm:$0x3] %vm361_vm1, %v1776_v2  }
 0x157   :  { %4887 = vst.msk [vmem:[%s9846_s1 + $0x807] ss:$-440 sm:$0xc] %vm361_vm1, %v1776_v2   ;;  %4888 = vst.msk [vmem:[%s9846_s1 - $0x12f9] ss:$1320 sm:$0x30] %vm361_vm1, %v1776_v2   ;;  %v1793_v38 = vpop.permute.xlu0 %1792   ;;  %v1806_v40 = vpop.permute.xlu1 %1805  }
 0x158   :  { %4889 = vst.msk [vmem:[%s9846_s1 + $0xf67] ss:$-440 sm:$0xc0] %vm361_vm1, %v1776_v2   ;;  %4890 = vst.msk [vmem:[%s9846_s1 + $0x64] ss:$1320 sm:$0x3] %vm361_vm1, %v1793_v38  }
 0x159   :  { %2563 = vrot.lane.b32.xlu0 %v7462_v26, %s5674_s14  ;;  %2580 = vrot.lane.b32.xlu1 %v7465_v27, %s5674_s14  ;;  %4891 = vst.msk [vmem:[%s9846_s1 + $0x744] ss:$-440 sm:$0xc] %vm361_vm1, %v1793_v38   ;;  %4892 = vst.msk [vmem:[%s9846_s1 - $0x13bc] ss:$1320 sm:$0x30] %vm361_vm1, %v1793_v38  }
 0x15a   :  { %4893 = vst.msk [vmem:[%s9846_s1 + $0xea4] ss:$-440 sm:$0xc0] %vm361_vm1, %v1793_v38   ;;  %4894 = vst.msk [vmem:[%s9846_s1 + $0x164] ss:$1320 sm:$0x3] %vm361_vm1, %v1806_v40  }
 0x15b   :  { %4895 = vst.msk [vmem:[%s9846_s1 + $0x844] ss:$-440 sm:$0xc] %vm361_vm1, %v1806_v40   ;;  %s5675_s26 = smov 47   ;;  %v1819_v56 = vpop.permute.xlu0 %1818   ;;  %v1836_v57 = vpop.permute.xlu1 %1835   ;;  %s5676_s14 = smov 46  }
 0x15c   :  { %4896 = vst.msk [vmem:[%s9846_s1 + $0x21] ss:$1320 sm:$0x3] %vm361_vm1, %v1819_v56   ;;  %4897 = vst.msk [vmem:[%s9846_s1 + $0x701] ss:$-440 sm:$0xc] %vm361_vm1, %v1819_v56  }
 0x15d   :  { %2597 = vrot.lane.b32.xlu0 %v6913_v1, %s5675_s26  ;;  %2610 = vrot.lane.b32.xlu1 %v6915_v3, %s5675_s26  ;;  %v7528_v1 = vsel %vm382_vm0, %v2620_v29, %v2618_v28  ;;  %v7531_v3 = vsel %vm382_vm0, %v2637_v18, %v2635_v6  ;;  %4898 = vst.msk [vmem:[%s9846_s1 - $0x13ff] ss:$1320 sm:$0x30] %vm361_vm1, %v1819_v56   ;;  %4899 = vst.msk [vmem:[%s9846_s1 + $0xe61] ss:$-440 sm:$0xc0] %vm361_vm1, %v1819_v56  }
 0x15e   :  { %4900 = vst.msk [vmem:[%s9846_s1 + $0x121] ss:$1320 sm:$0x3] %vm361_vm1, %v1836_v57   ;;  %4901 = vst.msk [vmem:[%s9846_s1 + $0x801] ss:$-440 sm:$0xc] %vm361_vm1, %v1836_v57  }
 0x15f   :  { %4902 = vst.msk [vmem:[%s9846_s1 - $0x12ff] ss:$1320 sm:$0x30] %vm361_vm1, %v1836_v57   ;;  %4903 = vst.msk [vmem:[%s9846_s1 + $0xf61] ss:$-440 sm:$0xc0] %vm361_vm1, %v1836_v57   ;;  %v1853_v58 = vpop.permute.xlu0 %1852   ;;  %v1862_v61 = vpop.permute.xlu1 %1861  }
 0x160   :  { %4904 = vst.msk [vmem:[%s9846_s1 + $0x586] ss:$-440 sm:$0xf] %vm361_vm1, %v1853_v58   ;;  %4905 = vst.msk [vmem:[%s9846_s1 + $0xce6] ss:$-440 sm:$0xf0] %vm361_vm1, %v1853_v58  }
 0x161   :  { %2623 = vrot.lane.b32.xlu0 %v7528_v1, %s5676_s14  ;;  %2640 = vrot.lane.b32.xlu1 %v7531_v3, %s5676_s14  ;;  %4906 = vst.msk [vmem:[%s9846_s1 + $0x686] ss:$-440 sm:$0xf] %vm361_vm1, %v1862_v61   ;;  %v2951_v63 = vld.sshfl [vmem:[#allocation0 + $0x80] sm:$0xff pattern:$0x11111230]  }
 0x162   :  { %v2953_v0 = vld.sshfl [vmem:[#allocation0 + $0x128] sm:$0xff pattern:$0x12300000]   ;;  %v3011_v59 = vld.sshfl [vmem:[#allocation0 + $0x78] sm:$0xff pattern:$0x11111230]  }
 0x163   :  { %v3013_v62 = vld.sshfl [vmem:[#allocation0 + $0x120] sm:$0xff pattern:$0x12300000]   ;;  %v7599_v9 = vld.sshfl [vmem:[#allocation0 + $0x1d0] sm:$0xff pattern:$0x11111230]   ;;  %v7602_v14 = vsel %vm382_vm0, %v2953_v0, %v2951_v63 }
 0x164   :  { %v7605_v15 = vsel %vm382_vm0, %v3013_v62, %v3011_v59  ;;  %v7607_v16 = vld.sshfl [vmem:[#allocation0 + $0x1c8] sm:$0xff pattern:$0x11111230]   ;;  %v2759_v21 = vld [vmem:[#allocation0 + $0xf7] ss:$-1 sm:$0xf0]  }
 0x165   :  { %2657 = vrot.lane.b32.xlu0 %v6980_v48, %s5677_s20  ;;  %2670 = vrot.lane.b32.xlu1 %v6977_v47, %s5677_s20  ;;  %v1873_v47 = vpop.permute.xlu0 %1872   ;;  %v1886_v48 = vpop.permute.xlu1 %1885   ;;  %v7623_v11 = vsel %vm3845_vm2, %v7602_v14, %v7605_v15  ;;  %v7627_v12 = vsel %vm3845_vm2, %v7599_v9, %v7607_v16  ;;  %v2757_v20 = vld [vmem:[#allocation0 + $0x4b] ss:$-1 sm:$0xf]   ;;  %v2770_v39 = vld [vmem:[#allocation0 + $0x19b] ss:$-1 sm:$0xf]  }
 0x166   :  { %4907 = vst.msk [vmem:[%s9846_s1 + $0x543] ss:$-440 sm:$0xf] %vm361_vm1, %v1873_v47   ;;  %4908 = vst.msk [vmem:[%s9846_s1 + $0xca3] ss:$-440 sm:$0xf0] %vm361_vm1, %v1873_v47   ;;  %v2761_v34 = vsel %vm382_vm0, %v2759_v21, %v2757_v20 }
 0x167   :  { %4909 = vst.msk [vmem:[%s9846_s1 + $0x643] ss:$-440 sm:$0xf] %vm361_vm1, %v1886_v48   ;;  %4910 = vst.msk [vmem:[%s9846_s1 + $0xda3] ss:$-440 sm:$0xf0] %vm361_vm1, %v1886_v48  }
 0x168   :  { %v2777_v22 = vld [vmem:[#allocation0 + $0x9b] ss:$-1 sm:$0xf]   ;;  %v2779_v23 = vld [vmem:[#allocation0 + $0x147] ss:$-1 sm:$0xf0]  }
 0x169   :  { %2682 = vrot.lane.b32.xlu0 %v6997_v24, %s5678_s29  ;;  %2699 = vrot.lane.b32.xlu1 %v7000_v25, %s5678_s29  ;;  %v2737_v24 = vld [vmem:[#allocation0 + $0xa3] ss:$-1 sm:$0xf]   ;;  %v2739_v25 = vld [vmem:[#allocation0 + $0x14f] ss:$-1 sm:$0xf0]   ;;  %v1899_v10 = vpop.permute.xlu0 %1898   ;;  %v1908_v13 = vpop.permute.xlu1 %1907   ;;  %v2781_v42 = vsel %vm382_vm0, %v2779_v23, %v2777_v22 }
 0x16a   :  { %4911 = vst.msk [vmem:[%s9846_s1 + $0x580] ss:$-440 sm:$0xf] %vm361_vm1, %v1899_v10   ;;  %4912 = vst.msk [vmem:[%s9846_s1 + $0xce0] ss:$-440 sm:$0xf0] %vm361_vm1, %v1899_v10  }
 0x16b   :  { %4913 = vst.msk [vmem:[%s9846_s1 + $0x680] ss:$-440 sm:$0xf] %vm361_vm1, %v1908_v13   ;;  %v2790_v30 = vld [vmem:[#allocation0 + $0x1eb] ss:$-1 sm:$0xf]  }
 0x16c   :  { %v2797_v32 = vld.sshfl [vmem:[#allocation0 + $0x40] sm:$0xff pattern:$0x33333012]   ;;  %v2799_v33 = vld.sshfl [vmem:[#allocation0 + $0xe8] sm:$0xff pattern:$0x30122222]  }
 0x16d   :  { %2716 = vrot.lane.b32.xlu0 %v7021_v7, %s5679_s7  ;;  %2729 = vrot.lane.b32.xlu1 %v7023_v8, %s5679_s7  ;;  %v2741_v7 = vsel %vm382_vm0, %v2739_v25, %v2737_v24  ;;  %v2750_v8 = vld [vmem:[#allocation0 + $0x1f3] ss:$-1 sm:$0xf]   ;;  %v1919_v17 = vpop.permute.xlu0 %1918   ;;  %v1936_v19 = vpop.permute.xlu1 %1935   ;;  %s5681_s7 = smov 41   ;;  %v7725_v50 = vsel %vm382_vm0, %v2799_v33, %v2797_v32  ;;  %s5688_s14 = smov 34   ;;  %vm4041_vm2 = vcmask 990208  }
 0x16e   :  { %4914 = vst.msk [vmem:[%s9846_s1 + $0x385] ss:$-440 sm:$0x7] %vm361_vm1, %v1919_v17   ;;  %4915 = vst.msk [vmem:[%s9846_s1 + $0x8e5] ss:$-312 sm:$0x18] %vm361_vm1, %v1919_v17  }
 0x16f   :  { %4916 = vst.msk [vmem:[%s9846_s1 + $0xae5] ss:$-440 sm:$0x60] %vm361_vm1, %v1919_v17   ;;  %4917 = vst.msk [vmem:[%s9846_s1 + $0x5b6] sm:$0x80] %vm361_vm1, %v1919_v17   ;;  %s5689_s20 = smov 33  }
 0x170   :  { %4918 = vst.msk [vmem:[%s9846_s1 + $0x485] ss:$-440 sm:$0x7] %vm361_vm1, %v1936_v19   ;;  %4919 = vst.msk [vmem:[%s9846_s1 + $0x9e5] ss:$-312 sm:$0x18] %vm361_vm1, %v1936_v19  }
 0x171   :  { %4920 = vst.msk [vmem:[%s9846_s1 + $0xbe5] ss:$-440 sm:$0x60] %vm361_vm1, %v1936_v19   ;;  %4921 = vst.msk [vmem:[%s9846_s1 + $0x6b6] sm:$0x80] %vm361_vm1, %v1936_v19   ;;  %2742 = vrot.lane.b32.xlu0 %v2741_v7, %s5680_s23  ;;  %2751 = vrot.lane.b32.xlu1 %v2750_v8, %s5680_s23  ;;  %v1953_v52 = vpop.permute.xlu0 %1952   ;;  %v1966_v53 = vpop.permute.xlu1 %1965   ;;  %s5682_s23 = smov 40  }
 0x172   :  { %4922 = vst.msk [vmem:[%s9846_s1 + $0x3c2] ss:$-440 sm:$0x7] %vm361_vm1, %v1953_v52   ;;  %4923 = vst.msk [vmem:[%s9846_s1 + $0x922] ss:$-312 sm:$0x18] %vm361_vm1, %v1953_v52  }
 0x173   :  { %4924 = vst.msk [vmem:[%s9846_s1 + $0xb22] ss:$-440 sm:$0x60] %vm361_vm1, %v1953_v52   ;;  %4925 = vst.msk [vmem:[%s9846_s1 + $0x5f3] sm:$0x80] %vm361_vm1, %v1953_v52  }
 0x174   :  { %4926 = vst.msk [vmem:[%s9846_s1 + $0x4c2] ss:$-440 sm:$0x7] %vm361_vm1, %v1966_v53   ;;  %4927 = vst.msk [vmem:[%s9846_s1 + $0x677] sm:$0x8] %vm361_vm1, %v1966_v53  }
 0x175   :  { %2762 = vrot.lane.b32.xlu0 %v2761_v34, %s5681_s7  ;;  %2771 = vrot.lane.b32.xlu1 %v2770_v39, %s5681_s7  ;;  %v1979_v36 = vpop.permute.xlu0 %1978   ;;  %v1996_v37 = vpop.permute.xlu1 %1995   ;;  %v7690_v46 = vld.sshfl [vmem:[#allocation0 + $0x190] sm:$0xff pattern:$0x33333012]   ;;  %v2816_v49 = vld.sshfl [vmem:[#allocation0 + $0x238] sm:$0xff pattern:$0x30122222]  }
 0x176   :  { %4928 = vst.msk [vmem:[%s9846_s1 + $0x1c7] ss:$-440 sm:$0x3] %vm361_vm1, %v1979_v36   ;;  %4929 = vst.msk [vmem:[%s9846_s1 + $0x8a7] ss:$-440 sm:$0xc] %vm361_vm1, %v1979_v36   ;;  %v7729_v51 = vsel %vm382_vm0, %v2816_v49, %v7690_v46 }
 0x177   :  { %4930 = vst.msk [vmem:[%s9846_s1 + $0x927] ss:$-440 sm:$0x30] %vm361_vm1, %v1979_v36   ;;  %4931 = vst.msk [vmem:[%s9846_s1 + $0x1007] ss:$-440 sm:$0xc0] %vm361_vm1, %v1979_v36  }
 0x178   :  { %4932 = vst.msk [vmem:[%s9846_s1 + $0x2c7] ss:$-440 sm:$0x3] %vm361_vm1, %v1996_v37   ;;  %4933 = vst.msk [vmem:[%s9846_s1 + $0x9a7] ss:$-440 sm:$0xc] %vm361_vm1, %v1996_v37  }
 0x179   :  { %4934 = vst.msk [vmem:[%s9846_s1 + $0xa27] ss:$-440 sm:$0x30] %vm361_vm1, %v1996_v37   ;;  %4935 = vst.msk [vmem:[%s9846_s1 + $0x1107] ss:$-440 sm:$0xc0] %vm361_vm1, %v1996_v37   ;;  %2782 = vrot.lane.b32.xlu0 %v2781_v42, %s5682_s23  ;;  %2791 = vrot.lane.b32.xlu1 %v2790_v30, %s5682_s23  ;;  %v2013_v41 = vpop.permute.xlu0 %2012   ;;  %v2026_v45 = vpop.permute.xlu1 %2025  }
 0x17a   :  { %v2831_v31 = vld.sshfl [vmem:[#allocation0 + $0x90] sm:$0xff pattern:$0x33333012]   ;;  %v2833_v35 = vld.sshfl [vmem:[#allocation0 + $0x138] sm:$0xff pattern:$0x30122222]  }
 0x17b   :  { %4936 = vst.msk [vmem:[%s9846_s1 + $0x204] ss:$-440 sm:$0x3] %vm361_vm1, %v2013_v41   ;;  %4937 = vst.msk [vmem:[%s9846_s1 + $0x8e4] ss:$-440 sm:$0xc] %vm361_vm1, %v2013_v41   ;;  %v7760_v55 = vsel %vm382_vm0, %v2833_v35, %v2831_v31 }
 0x17c   :  { %4938 = vst.msk [vmem:[%s9846_s1 + $0x964] ss:$-440 sm:$0x30] %vm361_vm1, %v2013_v41   ;;  %4939 = vst.msk [vmem:[%s9846_s1 + $0x1044] ss:$-440 sm:$0xc0] %vm361_vm1, %v2013_v41  }
 0x17d   :  { %4940 = vst.msk [vmem:[%s9846_s1 + $0x304] ss:$-440 sm:$0x3] %vm361_vm1, %v2026_v45   ;;  %4941 = vst.msk [vmem:[%s9846_s1 + $0x9e4] ss:$-440 sm:$0xc] %vm361_vm1, %v2026_v45   ;;  %v2039_v28 = vpop.permute.xlu0 %2038   ;;  %v2056_v29 = vpop.permute.xlu1 %2055  }
 0x17e   :  { %s5683_s7 = smov 39   ;;  %v7757_v54 = vld.sshfl [vmem:[#allocation0 + $0x1e0] sm:$0xff pattern:$0x33333012]   ;;  %s5684_s23 = smov 38  }
 0x17f   :  { %2802 = vrot.lane.b32.xlu0 %v7725_v50, %s5683_s7  ;;  %2819 = vrot.lane.b32.xlu1 %v7729_v51, %s5683_s7  ;;  %v2857_v60 = vld.sshfl [vmem:[#allocation0 + $0x38] sm:$0xff pattern:$0x22222301]   ;;  %v2859_v2 = vld.sshfl [vmem:[#allocation0 + $0xe0] sm:$0xff pattern:$0x23011111]  }
 0x180   :  { %v2874_v38 = vld.sshfl [vmem:[#allocation0 + $0x188] sm:$0xff pattern:$0x22222301]   ;;  %v2876_v40 = vld.sshfl [vmem:[#allocation0 + $0x230] sm:$0xff pattern:$0x23011111]   ;;  %v7797_v6 = vsel %vm382_vm0, %v2859_v2, %v2857_v60 }
 0x181   :  { %4942 = vst.msk [vmem:[%s9846_s1 + $0x1c1] ss:$-440 sm:$0x3] %vm361_vm1, %v2039_v28   ;;  %4943 = vst.msk [vmem:[%s9846_s1 + $0x8a1] ss:$-440 sm:$0xc] %vm361_vm1, %v2039_v28   ;;  %v7800_v18 = vsel %vm382_vm0, %v2876_v40, %v2874_v38  ;;  %v2073_v56 = vpop.permute.xlu0 %2072   ;;  %v2086_v57 = vpop.permute.xlu1 %2085  }
 0x182   :  { %4944 = vst.msk [vmem:[%s9846_s1 + $0x921] ss:$-440 sm:$0x30] %vm361_vm1, %v2039_v28   ;;  %4945 = vst.msk [vmem:[%s9846_s1 + $0x1001] ss:$-440 sm:$0xc0] %vm361_vm1, %v2039_v28  }
 0x183   :  { %4946 = vst.msk [vmem:[%s9846_s1 + $0x2c1] ss:$-440 sm:$0x3] %vm361_vm1, %v2056_v29   ;;  %4947 = vst.msk [vmem:[%s9846_s1 + $0x9a1] ss:$-440 sm:$0xc] %vm361_vm1, %v2056_v29   ;;  %2836 = vrot.lane.b32.xlu0 %v7760_v55, %s5684_s23  ;;  %2849 = vrot.lane.b32.xlu1 %v7757_v54, %s5684_s23 }
 0x184   :  { %4948 = vst.msk [vmem:[%s9846_s1 + $0xa21] ss:$-440 sm:$0x30] %vm361_vm1, %v2056_v29   ;;  %4949 = vst.msk [vmem:[%s9846_s1 + $0x1101] ss:$-440 sm:$0xc0] %vm361_vm1, %v2056_v29  }
 0x185   :  { %v2891_v58 = vld.sshfl [vmem:[#allocation0 + $0x88] sm:$0xff pattern:$0x22222301]   ;;  %v2893_v61 = vld.sshfl [vmem:[#allocation0 + $0x130] sm:$0xff pattern:$0x23011111]   ;;  %v2098_v63 = vpop.permute.xlu0 %2097   ;;  %v2115_v0 = vpop.permute.xlu1 %2114  }
 0x186   :  { %4950 = vst.msk [vmem:[%s9846_s1 + $0x46] ss:$1320 sm:$0x3] %vm361_vm1, %v2073_v56   ;;  %4951 = vst.msk [vmem:[%s9846_s1 + $0x726] ss:$-440 sm:$0xc] %vm361_vm1, %v2073_v56   ;;  %v7829_v47 = vsel %vm382_vm0, %v2893_v61, %v2891_v58 }
 0x187   :  { %4952 = vst.msk [vmem:[%s9846_s1 - $0x13da] ss:$1320 sm:$0x30] %vm361_vm1, %v2073_v56   ;;  %4953 = vst.msk [vmem:[%s9846_s1 + $0xe86] ss:$-440 sm:$0xc0] %vm361_vm1, %v2073_v56  }
 0x188   :  { %4954 = vst.msk [vmem:[%s9846_s1 + $0x146] ss:$1320 sm:$0x3] %vm361_vm1, %v2086_v57   ;;  %4955 = vst.msk [vmem:[%s9846_s1 + $0x826] ss:$-440 sm:$0xc] %vm361_vm1, %v2086_v57  }
 0x189   :  { %s5685_s7 = smov 37   ;;  %v7831_v48 = vld.sshfl [vmem:[#allocation0 + $0x1d8] sm:$0xff pattern:$0x22222301]   ;;  %s5686_s23 = smov 36   ;;  %v2132_v13 = vpop.permute.xlu0 %2131   ;;  %v2145_v7 = vpop.permute.xlu1 %2144  }
 0x18a   :  { %2862 = vrot.lane.b32.xlu0 %v7797_v6, %s5685_s7  ;;  %2879 = vrot.lane.b32.xlu1 %v7800_v18, %s5685_s7  ;;  %v3177_v59 = vld.sshfl [vmem:[#allocation0 + $0x60] sm:$0xff pattern:$0x22222301]   ;;  %v3179_v62 = vld.sshfl [vmem:[#allocation0 + $0x108] sm:$0xff pattern:$0x23011111]  }
 0x18b   :  { %4956 = vst.msk [vmem:[%s9846_s1 + $0x3] ss:$1320 sm:$0x3] %vm361_vm1, %v2098_v63   ;;  %4957 = vst.msk [vmem:[%s9846_s1 + $0x6e3] ss:$-440 sm:$0xc] %vm361_vm1, %v2098_v63   ;;  %v7870_v8 = vsel %vm382_vm0, %v3179_v62, %v3177_v59 }
 0x18c   :  { %4958 = vst.msk [vmem:[%s9846_s1 - $0x141d] ss:$1320 sm:$0x30] %vm361_vm1, %v2098_v63   ;;  %4959 = vst.msk [vmem:[%s9846_s1 + $0xe43] ss:$-440 sm:$0xc0] %vm361_vm1, %v2098_v63  }
 0x18d   :  { %4960 = vst.msk [vmem:[%s9846_s1 + $0x103] ss:$1320 sm:$0x3] %vm361_vm1, %v2115_v0   ;;  %4961 = vst.msk [vmem:[%s9846_s1 + $0x7e3] ss:$-440 sm:$0xc] %vm361_vm1, %v2115_v0  }
 0x18e   :  { %4962 = vst.msk [vmem:[%s9846_s1 - $0x131d] ss:$1320 sm:$0x30] %vm361_vm1, %v2115_v0   ;;  %4963 = vst.msk [vmem:[%s9846_s1 + $0xf43] ss:$-440 sm:$0xc0] %vm361_vm1, %v2115_v0   ;;  %2896 = vrot.lane.b32.xlu0 %v7829_v47, %s5686_s23  ;;  %2909 = vrot.lane.b32.xlu1 %v7831_v48, %s5686_s23 }
 0x18f   :  { %v3237_v24 = vld.sshfl [vmem:[#allocation0 + $0x58] sm:$0xff pattern:$0x22222301]   ;;  %v3239_v25 = vld.sshfl [vmem:[#allocation0 + $0x100] sm:$0xff pattern:$0x23011111]  }
 0x190   :  { %v7867_v10 = vld.sshfl [vmem:[#allocation0 + $0x1b0] sm:$0xff pattern:$0x22222301]   ;;  %v7873_v17 = vsel %vm382_vm0, %v3239_v25, %v3237_v24  ;;  %v7875_v19 = vld.sshfl [vmem:[#allocation0 + $0x1a8] sm:$0xff pattern:$0x22222301]  }
 0x191   :  { %4964 = vst.msk [vmem:[%s9846_s1 + $0x40] ss:$1320 sm:$0x3] %vm361_vm1, %v2132_v13   ;;  %4965 = vst.msk [vmem:[%s9846_s1 + $0x720] ss:$-440 sm:$0xc] %vm361_vm1, %v2132_v13   ;;  %v7903_v20 = vsel %vm4281_vm3, %v7870_v8, %v7873_v17  ;;  %v7907_v21 = vsel %vm4281_vm3, %v7867_v10, %v7875_v19 }
 0x192   :  { %4966 = vst.msk [vmem:[%s9846_s1 - $0x13e0] ss:$1320 sm:$0x30] %vm361_vm1, %v2132_v13   ;;  %4967 = vst.msk [vmem:[%s9846_s1 + $0xe80] ss:$-440 sm:$0xc0] %vm361_vm1, %v2132_v13  }
 0x193   :  { %4968 = vst.msk [vmem:[%s9846_s1 + $0x140] ss:$1320 sm:$0x3] %vm361_vm1, %v2145_v7   ;;  %4969 = vst.msk [vmem:[%s9846_s1 + $0x820] ss:$-440 sm:$0xc] %vm361_vm1, %v2145_v7  }
 0x194   :  { %s5687_s7 = smov 35   ;;  %v3050_v22 = vld [vmem:[#allocation0 + $0x173] ss:$-1 sm:$0xf]   ;;  %vm4093_vm3 = vcmask 998400  }
 0x195   :  { %2922 = vrot.lane.b32.xlu0 %v7264_v43, %s5687_s7  ;;  %2939 = vrot.lane.b32.xlu1 %v7267_v44, %s5687_s7  ;;  %v2158_v43 = vpop.permute.xlu0 %2157   ;;  %v2167_v44 = vpop.permute.xlu1 %2166   ;;  %v3052_v23 = vld [vmem:[#allocation0 + $0x21f] ss:$-1 sm:$0xf0]   ;;  %v3063_v32 = vld [vmem:[#allocation0 + $0x73] ss:$-1 sm:$0xf]  }
 0x196   :  { %4970 = vst.msk [vmem:[%s9846_s1 + $0x5a5] ss:$-440 sm:$0xf] %vm361_vm1, %v2158_v43   ;;  %4971 = vst.msk [vmem:[%s9846_s1 + $0xd05] ss:$-440 sm:$0xf0] %vm361_vm1, %v2158_v43  }
 0x197   :  { %4972 = vst.msk [vmem:[%s9846_s1 + $0x6a5] ss:$-440 sm:$0xf] %vm361_vm1, %v2167_v44   ;;  %v3065_v33 = vld [vmem:[#allocation0 + $0x11f] ss:$-1 sm:$0xf0]  }
 0x198   :  { %v3076_v36 = vld [vmem:[#allocation0 + $0x1c3] ss:$-1 sm:$0xf]   ;;  %v3067_v37 = vsel %vm382_vm0, %v3065_v33, %v3063_v32  ;;  %v3083_v49 = vld.sshfl [vmem:[#allocation0 + $0x18] sm:$0xff pattern:$0x33333012]  }
 0x199   :  { %2956 = vrot.lane.b32.xlu0 %v7602_v14, %s5688_s14  ;;  %2969 = vrot.lane.b32.xlu1 %v7599_v9, %s5688_s14  ;;  %v2178_v34 = vpop.permute.xlu0 %2177   ;;  %v2187_v39 = vpop.permute.xlu1 %2186   ;;  %v3085_v41 = vld.sshfl [vmem:[#allocation0 + $0xc0] sm:$0xff pattern:$0x30122222]   ;;  %v3100_v35 = vld.sshfl [vmem:[#allocation0 + $0x168] sm:$0xff pattern:$0x33333012]  }
 0x19a   :  { %4973 = vst.msk [vmem:[%s9846_s1 + $0x562] ss:$-440 sm:$0xf] %vm361_vm1, %v2178_v34   ;;  %4974 = vst.msk [vmem:[%s9846_s1 + $0xcc2] ss:$-440 sm:$0xf0] %vm361_vm1, %v2178_v34   ;;  %v8025_v2 = vsel %vm382_vm0, %v3085_v41, %v3083_v49 }
 0x19b   :  { %4975 = vst.msk [vmem:[%s9846_s1 + $0x662] ss:$-440 sm:$0xf] %vm361_vm1, %v2187_v39   ;;  %v3102_v60 = vld.sshfl [vmem:[#allocation0 + $0x210] sm:$0xff pattern:$0x30122222]  }
 0x19c   :  { %v8028_v28 = vsel %vm382_vm0, %v3102_v60, %v3100_v35  ;;  %v3117_v40 = vld.sshfl [vmem:[#allocation0 + $0x68] sm:$0xff pattern:$0x33333012]   ;;  %v3119_v56 = vld.sshfl [vmem:[#allocation0 + $0x110] sm:$0xff pattern:$0x30122222]  }
 0x19d   :  { %2982 = vrot.lane.b32.xlu0 %v7298_v4, %s5689_s20  ;;  %2999 = vrot.lane.b32.xlu1 %v7301_v5, %s5689_s20  ;;  %v3037_v4 = vld [vmem:[#allocation0 + $0x23] ss:$-1 sm:$0xf]   ;;  %v3039_v5 = vld [vmem:[#allocation0 + $0xcf] ss:$-1 sm:$0xf0]   ;;  %v2198_v52 = vpop.permute.xlu0 %2197   ;;  %v2211_v53 = vpop.permute.xlu1 %2210   ;;  %v8065_v57 = vsel %vm382_vm0, %v3119_v56, %v3117_v40 }
 0x19e   :  { %4976 = vst.msk [vmem:[%s9846_s1 + $0x3e7] ss:$-440 sm:$0x7] %vm361_vm1, %v2198_v52   ;;  %4977 = vst.msk [vmem:[%s9846_s1 + $0x947] ss:$-312 sm:$0x18] %vm361_vm1, %v2198_v52  }
 0x19f   :  { %4978 = vst.msk [vmem:[%s9846_s1 + $0xb47] ss:$-440 sm:$0x60] %vm361_vm1, %v2198_v52   ;;  %4979 = vst.msk [vmem:[%s9846_s1 + $0x618] sm:$0x80] %vm361_vm1, %v2198_v52   ;;  %s5691_s20 = smov 31  }
 0x1a0   :  { %4980 = vst.msk [vmem:[%s9846_s1 + $0x4e7] ss:$-440 sm:$0x7] %vm361_vm1, %v2211_v53   ;;  %4981 = vst.msk [vmem:[%s9846_s1 + $0x69c] sm:$0x8] %vm361_vm1, %v2211_v53   ;;  %s5699_s7 = smov 23  }
 0x1a1   :  { %3016 = vrot.lane.b32.xlu0 %v7605_v15, %s5690_s4  ;;  %3029 = vrot.lane.b32.xlu1 %v7607_v16, %s5690_s4  ;;  %v3041_v15 = vsel %vm382_vm0, %v3039_v5, %v3037_v4  ;;  %v3054_v16 = vsel %vm382_vm0, %v3052_v23, %v3050_v22  ;;  %v2224_v30 = vpop.permute.xlu0 %2223   ;;  %v2241_v42 = vpop.permute.xlu1 %2240   ;;  %s5692_s4 = smov 30   ;;  %v8067_v58 = vld.sshfl [vmem:[#allocation0 + $0x1b8] sm:$0xff pattern:$0x33333012]   ;;  %s5700_s14 = smov 22  }
 0x1a2   :  { %4982 = vst.msk [vmem:[%s9846_s1 + $0x3a4] ss:$-440 sm:$0x7] %vm361_vm1, %v2224_v30   ;;  %4983 = vst.msk [vmem:[%s9846_s1 + $0x904] ss:$-312 sm:$0x18] %vm361_vm1, %v2224_v30  }
 0x1a3   :  { %4984 = vst.msk [vmem:[%s9846_s1 + $0xb04] ss:$-440 sm:$0x60] %vm361_vm1, %v2224_v30   ;;  %4985 = vst.msk [vmem:[%s9846_s1 + $0x5d5] sm:$0x80] %vm361_vm1, %v2224_v30  }
 0x1a4   :  { %4986 = vst.msk [vmem:[%s9846_s1 + $0x4a4] ss:$-440 sm:$0x7] %vm361_vm1, %v2241_v42   ;;  %4987 = vst.msk [vmem:[%s9846_s1 + $0xa04] ss:$-312 sm:$0x18] %vm361_vm1, %v2241_v42  }
 0x1a5   :  { %4988 = vst.msk [vmem:[%s9846_s1 + $0xc04] ss:$-440 sm:$0x60] %vm361_vm1, %v2241_v42   ;;  %4989 = vst.msk [vmem:[%s9846_s1 + $0x6d5] sm:$0x80] %vm361_vm1, %v2241_v42   ;;  %3042 = vrot.lane.b32.xlu0 %v3041_v15, %s5691_s20  ;;  %3055 = vrot.lane.b32.xlu1 %v3054_v16, %s5691_s20  ;;  %v2258_v45 = vpop.permute.xlu0 %2257   ;;  %v2271_v31 = vpop.permute.xlu1 %2270   ;;  %s5693_s20 = smov 29  }
 0x1a6   :  { %4990 = vst.msk [vmem:[%s9846_s1 + $0x3e1] ss:$-440 sm:$0x7] %vm361_vm1, %v2258_v45   ;;  %4991 = vst.msk [vmem:[%s9846_s1 + $0x941] ss:$-312 sm:$0x18] %vm361_vm1, %v2258_v45  }
 0x1a7   :  { %4992 = vst.msk [vmem:[%s9846_s1 + $0xb41] ss:$-440 sm:$0x60] %vm361_vm1, %v2258_v45   ;;  %4993 = vst.msk [vmem:[%s9846_s1 + $0x612] sm:$0x80] %vm361_vm1, %v2258_v45  }
 0x1a8   :  { %4994 = vst.msk [vmem:[%s9846_s1 + $0x4e1] ss:$-440 sm:$0x7] %vm361_vm1, %v2271_v31   ;;  %4995 = vst.msk [vmem:[%s9846_s1 + $0x696] sm:$0x8] %vm361_vm1, %v2271_v31  }
 0x1a9   :  { %3068 = vrot.lane.b32.xlu0 %v3067_v37, %s5692_s4  ;;  %3077 = vrot.lane.b32.xlu1 %v3076_v36, %s5692_s4  ;;  %v2284_v29 = vpop.permute.xlu0 %2283   ;;  %v2301_v38 = vpop.permute.xlu1 %2300   ;;  %s5694_s4 = smov 28   ;;  %v3279_v13 = vld.sshfl [vmem:[#allocation0 + $0x150] sm:$0xff pattern:$0x11111230]  }
 0x1aa   :  { %4996 = vst.msk [vmem:[%s9846_s1 + $0x1e6] ss:$-440 sm:$0x3] %vm361_vm1, %v2284_v29   ;;  %4997 = vst.msk [vmem:[%s9846_s1 + $0x8c6] ss:$-440 sm:$0xc] %vm361_vm1, %v2284_v29  }
 0x1ab   :  { %4998 = vst.msk [vmem:[%s9846_s1 + $0x946] ss:$-440 sm:$0x30] %vm361_vm1, %v2284_v29   ;;  %4999 = vst.msk [vmem:[%s9846_s1 + $0x1026] ss:$-440 sm:$0xc0] %vm361_vm1, %v2284_v29  }
 0x1ac   :  { %5000 = vst.msk [vmem:[%s9846_s1 + $0x2e6] ss:$-440 sm:$0x3] %vm361_vm1, %v2301_v38   ;;  %5001 = vst.msk [vmem:[%s9846_s1 + $0x9c6] ss:$-440 sm:$0xc] %vm361_vm1, %v2301_v38  }
 0x1ad   :  { %5002 = vst.msk [vmem:[%s9846_s1 + $0xa46] ss:$-440 sm:$0x30] %vm361_vm1, %v2301_v38   ;;  %5003 = vst.msk [vmem:[%s9846_s1 + $0x1126] ss:$-440 sm:$0xc0] %vm361_vm1, %v2301_v38   ;;  %3088 = vrot.lane.b32.xlu0 %v8025_v2, %s5693_s20  ;;  %3105 = vrot.lane.b32.xlu1 %v8028_v28, %s5693_s20  ;;  %v2318_v61 = vpop.permute.xlu0 %2317   ;;  %v2331_v63 = vpop.permute.xlu1 %2330  }
 0x1ae   :  { %5004 = vst.msk [vmem:[%s9846_s1 + $0x223] ss:$-440 sm:$0x3] %vm361_vm1, %v2318_v61   ;;  %5005 = vst.msk [vmem:[%s9846_s1 + $0x903] ss:$-440 sm:$0xc] %vm361_vm1, %v2318_v61  }
 0x1af   :  { %5006 = vst.msk [vmem:[%s9846_s1 + $0x983] ss:$-440 sm:$0x30] %vm361_vm1, %v2318_v61   ;;  %5007 = vst.msk [vmem:[%s9846_s1 + $0x1063] ss:$-440 sm:$0xc0] %vm361_vm1, %v2318_v61  }
 0x1b0   :  { %5008 = vst.msk [vmem:[%s9846_s1 + $0x323] ss:$-440 sm:$0x3] %vm361_vm1, %v2331_v63   ;;  %5009 = vst.msk [vmem:[%s9846_s1 + $0xa03] ss:$-440 sm:$0xc] %vm361_vm1, %v2331_v63  }
 0x1b1   :  { %3122 = vrot.lane.b32.xlu0 %v8065_v57, %s5694_s4  ;;  %3135 = vrot.lane.b32.xlu1 %v8067_v58, %s5694_s4  ;;  %v2344_v0 = vpop.permute.xlu0 %2343   ;;  %v2361_v59 = vpop.permute.xlu1 %2360   ;;  %s5695_s20 = smov 27   ;;  %s5696_s4 = smov 26   ;;  %v3281_v7 = vld.sshfl [vmem:[#allocation0 + $0x1f8] sm:$0xff pattern:$0x12300000]  }
 0x1b2   :  { %5010 = vst.msk [vmem:[%s9846_s1 + $0x1e0] ss:$-440 sm:$0x3] %vm361_vm1, %v2344_v0   ;;  %5011 = vst.msk [vmem:[%s9846_s1 + $0x8c0] ss:$-440 sm:$0xc] %vm361_vm1, %v2344_v0  }
 0x1b3   :  { %5012 = vst.msk [vmem:[%s9846_s1 + $0x940] ss:$-440 sm:$0x30] %vm361_vm1, %v2344_v0   ;;  %5013 = vst.msk [vmem:[%s9846_s1 + $0x1020] ss:$-440 sm:$0xc0] %vm361_vm1, %v2344_v0  }
 0x1b4   :  { %5014 = vst.msk [vmem:[%s9846_s1 + $0x2e0] ss:$-440 sm:$0x3] %vm361_vm1, %v2361_v59   ;;  %5015 = vst.msk [vmem:[%s9846_s1 + $0x9c0] ss:$-440 sm:$0xc] %vm361_vm1, %v2361_v59  }
 0x1b5   :  { %5016 = vst.msk [vmem:[%s9846_s1 + $0xa40] ss:$-440 sm:$0x30] %vm361_vm1, %v2361_v59   ;;  %5017 = vst.msk [vmem:[%s9846_s1 + $0x1120] ss:$-440 sm:$0xc0] %vm361_vm1, %v2361_v59   ;;  %3148 = vrot.lane.b32.xlu0 %v7462_v26, %s5695_s20  ;;  %3165 = vrot.lane.b32.xlu1 %v7465_v27, %s5695_s20  ;;  %v2378_v26 = vpop.permute.xlu0 %2377   ;;  %v2391_v27 = vpop.permute.xlu1 %2390  }
 0x1b6   :  { %5018 = vst.msk [vmem:[%s9846_s1 + $0x65] ss:$1320 sm:$0x3] %vm361_vm1, %v2378_v26   ;;  %5019 = vst.msk [vmem:[%s9846_s1 + $0x745] ss:$-440 sm:$0xc] %vm361_vm1, %v2378_v26  }
 0x1b7   :  { %5020 = vst.msk [vmem:[%s9846_s1 - $0x13bb] ss:$1320 sm:$0x30] %vm361_vm1, %v2378_v26   ;;  %5021 = vst.msk [vmem:[%s9846_s1 + $0xea5] ss:$-440 sm:$0xc0] %vm361_vm1, %v2378_v26  }
 0x1b8   :  { %5022 = vst.msk [vmem:[%s9846_s1 + $0x165] ss:$1320 sm:$0x3] %vm361_vm1, %v2391_v27   ;;  %5023 = vst.msk [vmem:[%s9846_s1 + $0x845] ss:$-440 sm:$0xc] %vm361_vm1, %v2391_v27  }
 0x1b9   :  { %3182 = vrot.lane.b32.xlu0 %v7870_v8, %s5696_s4  ;;  %3195 = vrot.lane.b32.xlu1 %v7867_v10, %s5696_s4  ;;  %v2404_v62 = vpop.permute.xlu0 %2403   ;;  %v2421_v24 = vpop.permute.xlu1 %2420   ;;  %s5697_s20 = smov 25   ;;  %v3296_v34 = vld.sshfl [vmem:[#allocation0 + $0x50] sm:$0xff pattern:$0x11111230]  }
 0x1ba   :  { %5024 = vst.msk [vmem:[%s9846_s1 + $0x22] ss:$1320 sm:$0x3] %vm361_vm1, %v2404_v62   ;;  %5025 = vst.msk [vmem:[%s9846_s1 + $0x702] ss:$-440 sm:$0xc] %vm361_vm1, %v2404_v62  }
 0x1bb   :  { %5026 = vst.msk [vmem:[%s9846_s1 - $0x13fe] ss:$1320 sm:$0x30] %vm361_vm1, %v2404_v62   ;;  %5027 = vst.msk [vmem:[%s9846_s1 + $0xe62] ss:$-440 sm:$0xc0] %vm361_vm1, %v2404_v62  }
 0x1bc   :  { %5028 = vst.msk [vmem:[%s9846_s1 + $0x122] ss:$1320 sm:$0x3] %vm361_vm1, %v2421_v24   ;;  %5029 = vst.msk [vmem:[%s9846_s1 + $0x802] ss:$-440 sm:$0xc] %vm361_vm1, %v2421_v24  }
 0x1bd   :  { %5030 = vst.msk [vmem:[%s9846_s1 - $0x12fe] ss:$1320 sm:$0x30] %vm361_vm1, %v2421_v24   ;;  %5031 = vst.msk [vmem:[%s9846_s1 + $0xf62] ss:$-440 sm:$0xc0] %vm361_vm1, %v2421_v24   ;;  %3208 = vrot.lane.b32.xlu0 %v7528_v1, %s5697_s20  ;;  %3225 = vrot.lane.b32.xlu1 %v7531_v3, %s5697_s20  ;;  %v2438_v25 = vpop.permute.xlu0 %2437   ;;  %v2447_v10 = vpop.permute.xlu1 %2446  }
 0x1be   :  { %v3262_v1 = vld.sshfl [vmem:[#allocation0] sm:$0xff pattern:$0x11111230]   ;;  %v3264_v3 = vld.sshfl [vmem:[#allocation0 + $0xa8] sm:$0xff pattern:$0x12300000]  }
 0x1bf   :  { %5032 = vst.msk [vmem:[%s9846_s1 + $0x587] ss:$-440 sm:$0xf] %vm361_vm1, %v2438_v25   ;;  %5033 = vst.msk [vmem:[%s9846_s1 + $0xce7] ss:$-440 sm:$0xf0] %vm361_vm1, %v2438_v25  }
 0x1c0   :  { %5034 = vst.msk [vmem:[%s9846_s1 + $0x687] ss:$-440 sm:$0xf] %vm361_vm1, %v2447_v10   ;;  %v3298_v39 = vld.sshfl [vmem:[#allocation0 + $0xf8] sm:$0xff pattern:$0x12300000]  }
 0x1c1   :  { %3242 = vrot.lane.b32.xlu0 %v7873_v17, %s5698_s27  ;;  %3255 = vrot.lane.b32.xlu1 %v7875_v19, %s5698_s27  ;;  %v8204_v17 = vsel %vm382_vm0, %v3264_v3, %v3262_v1  ;;  %v8207_v19 = vsel %vm382_vm0, %v3281_v7, %v3279_v13  ;;  %v2458_v43 = vpop.permute.xlu0 %2457   ;;  %v2471_v44 = vpop.permute.xlu1 %2470   ;;  %v8227_v4 = vld.sshfl [vmem:[#allocation0 + $0x1a0] sm:$0xff pattern:$0x11111230]   ;;  %v8230_v5 = vsel %vm382_vm0, %v3298_v39, %v3296_v34  ;;  %v3324_v53 = vld [vmem:[#allocation0 + $0x14f] ss:$-1 sm:$0xf0]  }
 0x1c2   :  { %5035 = vst.msk [vmem:[%s9846_s1 + $0x544] ss:$-440 sm:$0xf] %vm361_vm1, %v2458_v43   ;;  %5036 = vst.msk [vmem:[%s9846_s1 + $0xca4] ss:$-440 sm:$0xf0] %vm361_vm1, %v2458_v43  }
 0x1c3   :  { %5037 = vst.msk [vmem:[%s9846_s1 + $0x644] ss:$-440 sm:$0xf] %vm361_vm1, %v2471_v44   ;;  %5038 = vst.msk [vmem:[%s9846_s1 + $0xda4] ss:$-440 sm:$0xf0] %vm361_vm1, %v2471_v44  }
 0x1c4   :  { %v3322_v52 = vld [vmem:[#allocation0 + $0xa3] ss:$-1 sm:$0xf]   ;;  %v3342_v15 = vld [vmem:[#allocation0 + $0x4b] ss:$-1 sm:$0xf]  }
 0x1c5   :  { %3267 = vrot.lane.b32.xlu0 %v8204_v17, %s5699_s7  ;;  %3284 = vrot.lane.b32.xlu1 %v8207_v19, %s5699_s7  ;;  %v2484_v22 = vpop.permute.xlu0 %2483   ;;  %v2493_v23 = vpop.permute.xlu1 %2492   ;;  %v3344_v16 = vld [vmem:[#allocation0 + $0xf7] ss:$-1 sm:$0xf0]   ;;  %v3350_v42 = vld [vmem:[#allocation0 + $0xff] ss:$-1 sm:$0xf0]   ;;  %v3326_v33 = vsel %vm382_vm0, %v3324_v53, %v3322_v52 }
 0x1c6   :  { %5039 = vst.msk [vmem:[%s9846_s1 + $0x581] ss:$-440 sm:$0xf] %vm361_vm1, %v2484_v22   ;;  %5040 = vst.msk [vmem:[%s9846_s1 + $0xce1] ss:$-440 sm:$0xf0] %vm361_vm1, %v2484_v22   ;;  %v3346_v45 = vsel %vm382_vm0, %v3344_v16, %v3342_v15 }
 0x1c7   :  { %5041 = vst.msk [vmem:[%s9846_s1 + $0x681] ss:$-440 sm:$0xf] %vm361_vm1, %v2493_v23   ;;  %v3348_v30 = vld [vmem:[#allocation0 + $0x53] ss:$-1 sm:$0xf]  }
 0x1c8   :  { %v3335_v32 = vld [vmem:[#allocation0 + $0x1f3] ss:$-1 sm:$0xf]   ;;  %v3368_v36 = vld [vmem:[#allocation0 + $0x19b] ss:$-1 sm:$0xf]   ;;  %v3352_v31 = vsel %vm382_vm0, %v3350_v42, %v3348_v30 }
 0x1c9   :  { %3301 = vrot.lane.b32.xlu0 %v8230_v5, %s5700_s14  ;;  %3314 = vrot.lane.b32.xlu1 %v8227_v4, %s5700_s14  ;;  %v3370_v37 = vld [vmem:[#allocation0 + $0x1a3] ss:$-1 sm:$0xf]   ;;  %v2504_v49 = vpop.permute.xlu0 %2503   ;;  %v2521_v41 = vpop.permute.xlu1 %2520   ;;  %v3382_v35 = vld [vmem:[#allocation0 + $0x9b] ss:$-1 sm:$0xf]   ;;  %v3354_v40 = vsel %vm3353_vm4, %v3352_v31, %v3346_v45 }
 0x1ca   :  { %v3384_v60 = vld [vmem:[#allocation0 + $0x147] ss:$-1 sm:$0xf0]   ;;  %5042 = vst.msk [vmem:[%s9846_s1 + $0x386] ss:$-440 sm:$0x7] %vm361_vm1, %v2504_v49   ;;  %v3372_v56 = vsel %vm3353_vm4, %v3370_v37, %v3368_v36 }
 0x1cb   :  { %5043 = vst.msk [vmem:[%s9846_s1 + $0x8e6] ss:$-312 sm:$0x18] %vm361_vm1, %v2504_v49   ;;  %5044 = vst.msk [vmem:[%s9846_s1 + $0xae6] ss:$-440 sm:$0x60] %vm361_vm1, %v2504_v49   ;;  %v3386_v0 = vsel %vm382_vm0, %v3384_v60, %v3382_v35 }
 0x1cc   :  { %5045 = vst.msk [vmem:[%s9846_s1 + $0x5b7] sm:$0x80] %vm361_vm1, %v2504_v49   ;;  %5046 = vst.msk [vmem:[%s9846_s1 + $0x486] ss:$-440 sm:$0x7] %vm361_vm1, %v2521_v41   ;;  %s5702_s14 = smov 20  }
 0x1cd   :  { %5047 = vst.msk [vmem:[%s9846_s1 + $0x9e6] ss:$-312 sm:$0x18] %vm361_vm1, %v2521_v41   ;;  %5048 = vst.msk [vmem:[%s9846_s1 + $0xbe6] ss:$-440 sm:$0x60] %vm361_vm1, %v2521_v41   ;;  %3327 = vrot.lane.b32.xlu0 %v3326_v33, %s5701_s30  ;;  %3336 = vrot.lane.b32.xlu1 %v3335_v32, %s5701_s30  ;;  %v2538_v61 = vpop.permute.xlu0 %2537   ;;  %v2551_v63 = vpop.permute.xlu1 %2550  }
 0x1ce   :  { %5049 = vst.msk [vmem:[%s9846_s1 + $0x6b7] sm:$0x80] %vm361_vm1, %v2521_v41   ;;  %v3388_v29 = vld [vmem:[#allocation0 + $0xa3] ss:$-1 sm:$0xf]   ;;  %s5703_s30 = smov 19  }
 0x1cf   :  { %v3390_v38 = vld [vmem:[#allocation0 + $0x14f] ss:$-1 sm:$0xf0]   ;;  %v3410_v27 = vld [vmem:[#allocation0 + $0x1f3] ss:$-1 sm:$0xf]  }
 0x1d0   :  { %v3392_v59 = vsel %vm382_vm0, %v3390_v38, %v3388_v29  ;;  %v3408_v26 = vld [vmem:[#allocation0 + $0x1eb] ss:$-1 sm:$0xf]   ;;  %5050 = vst.msk [vmem:[%s9846_s1 + $0x3c3] ss:$-440 sm:$0x7] %vm361_vm1, %v2538_v61  }
 0x1d1   :  { %5051 = vst.msk [vmem:[%s9846_s1 + $0x923] ss:$-312 sm:$0x18] %vm361_vm1, %v2538_v61   ;;  %5052 = vst.msk [vmem:[%s9846_s1 + $0xb23] ss:$-440 sm:$0x60] %vm361_vm1, %v2538_v61   ;;  %3355 = vrot.lane.b32.xlu0 %v3354_v40, %s5702_s14  ;;  %3373 = vrot.lane.b32.xlu1 %v3372_v56, %s5702_s14  ;;  %v3394_v1 = vsel %vm3393_vm5, %v3392_v59, %v3386_v0  ;;  %v3412_v3 = vsel %vm3393_vm5, %v3410_v27, %v3408_v26  ;;  %v2564_v25 = vpop.permute.xlu0 %2563   ;;  %v2581_v10 = vpop.permute.xlu1 %2580  }
 0x1d2   :  { %5053 = vst.msk [vmem:[%s9846_s1 + $0x5f4] sm:$0x80] %vm361_vm1, %v2538_v61   ;;  %5054 = vst.msk [vmem:[%s9846_s1 + $0x4c3] ss:$-440 sm:$0x7] %vm361_vm1, %v2551_v63   ;;  %s5704_s14 = smov 18  }
 0x1d3   :  { %5055 = vst.msk [vmem:[%s9846_s1 + $0x678] sm:$0x8] %vm361_vm1, %v2551_v63   ;;  %v3428_v62 = vld.sshfl [vmem:[#allocation0 + $0x48] sm:$0xff pattern:$0x33333012]   ;;  %s5709_s20 = smov 13  }
 0x1d4   :  { %v3430_v24 = vld.sshfl [vmem:[#allocation0 + $0xf0] sm:$0xff pattern:$0x30122222]   ;;  %v3458_v7 = vld.sshfl [vmem:[#allocation0 + $0x198] sm:$0xff pattern:$0x33333012]  }
 0x1d5   :  { %v3432_v13 = vsel %vm382_vm0, %v3430_v24, %v3428_v62  ;;  %5056 = vst.msk [vmem:[%s9846_s1 + $0x380] ss:$-440 sm:$0x7] %vm361_vm1, %v2564_v25   ;;  %5057 = vst.msk [vmem:[%s9846_s1 + $0x8e0] ss:$-312 sm:$0x18] %vm361_vm1, %v2564_v25   ;;  %3395 = vrot.lane.b32.xlu0 %v3394_v1, %s5703_s30  ;;  %3413 = vrot.lane.b32.xlu1 %v3412_v3, %s5703_s30  ;;  %v3460_v46 = vsel %vm3433_vm6, %v3458_v7, %v7690_v46  ;;  %v2598_v52 = vpop.permute.xlu0 %2597   ;;  %v2611_v53 = vpop.permute.xlu1 %2610  }
 0x1d6   :  { %5058 = vst.msk [vmem:[%s9846_s1 + $0xae0] ss:$-440 sm:$0x60] %vm361_vm1, %v2564_v25   ;;  %5059 = vst.msk [vmem:[%s9846_s1 + $0x5b1] sm:$0x80] %vm361_vm1, %v2564_v25   ;;  %v3434_v34 = vsel %vm3433_vm6, %v3432_v13, %v7725_v50  ;;  %s5705_s30 = smov 17  }
 0x1d7   :  { %5060 = vst.msk [vmem:[%s9846_s1 + $0x480] ss:$-440 sm:$0x7] %vm361_vm1, %v2581_v10   ;;  %5061 = vst.msk [vmem:[%s9846_s1 + $0x9e0] ss:$-312 sm:$0x18] %vm361_vm1, %v2581_v10  }
 0x1d8   :  { %5062 = vst.msk [vmem:[%s9846_s1 + $0xbe0] ss:$-440 sm:$0x60] %vm361_vm1, %v2581_v10   ;;  %5063 = vst.msk [vmem:[%s9846_s1 + $0x6b1] sm:$0x80] %vm361_vm1, %v2581_v10   ;;  %s5710_s27 = smov 12  }
 0x1d9   :  { %v3480_v43 = vld.sshfl [vmem:[#allocation0 + $0x98] sm:$0xff pattern:$0x33333012]   ;;  %v3482_v44 = vld.sshfl [vmem:[#allocation0 + $0x140] sm:$0xff pattern:$0x30122222]   ;;  %3435 = vrot.lane.b32.xlu0 %v3434_v34, %s5704_s14  ;;  %3461 = vrot.lane.b32.xlu1 %v3460_v46, %s5704_s14  ;;  %v2624_v42 = vpop.permute.xlu0 %2623   ;;  %v2641_v32 = vpop.permute.xlu1 %2640  }
 0x1da   :  { %v3510_v39 = vld.sshfl [vmem:[#allocation0 + $0x1e8] sm:$0xff pattern:$0x33333012]   ;;  %v3484_v22 = vsel %vm382_vm0, %v3482_v44, %v3480_v43  ;;  %v3526_v23 = vld.sshfl [vmem:[#allocation0 + $0x38] sm:$0xff pattern:$0x33333012]  }
 0x1db   :  { %v3528_v15 = vld.sshfl [vmem:[#allocation0 + $0xe0] sm:$0xff pattern:$0x30122222]   ;;  %5064 = vst.msk [vmem:[%s9846_s1 + $0x205] ss:$-440 sm:$0x3] %vm361_vm1, %v2598_v52   ;;  %v3486_v55 = vsel %vm3485_vm7, %v3484_v22, %v7760_v55  ;;  %v3512_v54 = vsel %vm3485_vm7, %v3510_v39, %v7757_v54 }
 0x1dc   :  { %5065 = vst.msk [vmem:[%s9846_s1 + $0x8e5] ss:$-440 sm:$0xc] %vm361_vm1, %v2598_v52   ;;  %5066 = vst.msk [vmem:[%s9846_s1 + $0x965] ss:$-440 sm:$0x30] %vm361_vm1, %v2598_v52   ;;  %v3530_v33 = vsel %vm382_vm0, %v3528_v15, %v3526_v23 }
 0x1dd   :  { %5067 = vst.msk [vmem:[%s9846_s1 + $0x1045] ss:$-440 sm:$0xc0] %vm361_vm1, %v2598_v52   ;;  %5068 = vst.msk [vmem:[%s9846_s1 + $0x305] ss:$-440 sm:$0x3] %vm361_vm1, %v2611_v53   ;;  %3487 = vrot.lane.b32.xlu0 %v3486_v55, %s5705_s30  ;;  %3513 = vrot.lane.b32.xlu1 %v3512_v54, %s5705_s30  ;;  %v3538_v50 = vsel %vm3537_vm8, %v7725_v50, %v3530_v33  ;;  %v2658_v45 = vpop.permute.xlu0 %2657   ;;  %v2671_v31 = vpop.permute.xlu1 %2670  }
 0x1de   :  { %5069 = vst.msk [vmem:[%s9846_s1 + $0x9e5] ss:$-440 sm:$0xc] %vm361_vm1, %v2611_v53   ;;  %v3560_v16 = vld.sshfl [vmem:[#allocation0 + $0x188] sm:$0xff pattern:$0x33333012]  }
 0x1df   :  { %v3562_v30 = vld.sshfl [vmem:[#allocation0 + $0x230] sm:$0xff pattern:$0x30122222]   ;;  %5070 = vst.msk [vmem:[%s9846_s1 + $0x1c2] ss:$-440 sm:$0x3] %vm361_vm1, %v2624_v42  }
 0x1e0   :  { %v3564_v36 = vsel %vm382_vm0, %v3562_v30, %v3560_v16  ;;  %5071 = vst.msk [vmem:[%s9846_s1 + $0x8a2] ss:$-440 sm:$0xc] %vm361_vm1, %v2624_v42   ;;  %5072 = vst.msk [vmem:[%s9846_s1 + $0x922] ss:$-440 sm:$0x30] %vm361_vm1, %v2624_v42  }
 0x1e1   :  { %5073 = vst.msk [vmem:[%s9846_s1 + $0x1002] ss:$-440 sm:$0xc0] %vm361_vm1, %v2624_v42   ;;  %5074 = vst.msk [vmem:[%s9846_s1 + $0x2c2] ss:$-440 sm:$0x3] %vm361_vm1, %v2641_v32   ;;  %v3572_v51 = vsel %vm3537_vm8, %v7729_v51, %v3564_v36  ;;  %v2683_v56 = vpop.permute.xlu0 %2682   ;;  %v2700_v61 = vpop.permute.xlu1 %2699  }
 0x1e2   :  { %5075 = vst.msk [vmem:[%s9846_s1 + $0x9a2] ss:$-440 sm:$0xc] %vm361_vm1, %v2641_v32   ;;  %5076 = vst.msk [vmem:[%s9846_s1 + $0xa22] ss:$-440 sm:$0x30] %vm361_vm1, %v2641_v32  }
 0x1e3   :  { %5077 = vst.msk [vmem:[%s9846_s1 + $0x1102] ss:$-440 sm:$0xc0] %vm361_vm1, %v2641_v32   ;;  %v3600_v37 = vld.sshfl [vmem:[#allocation0 + $0x90] sm:$0xff pattern:$0x22222301]  }
 0x1e4   :  { %v3602_v49 = vld.sshfl [vmem:[#allocation0 + $0x138] sm:$0xff pattern:$0x23011111]   ;;  %v3630_v41 = vld.sshfl [vmem:[#allocation0 + $0x1e0] sm:$0xff pattern:$0x22222301]  }
 0x1e5   :  { %v3604_v35 = vsel %vm382_vm0, %v3602_v49, %v3600_v37  ;;  %v3646_v60 = vld.sshfl [vmem:[#allocation0 + $0x30] sm:$0xff pattern:$0x22222301]   ;;  %v3648_v29 = vld.sshfl [vmem:[#allocation0 + $0xd8] sm:$0xff pattern:$0x23011111]   ;;  %v3632_v48 = vsel %vm3605_vm9, %v3630_v41, %v7831_v48  ;;  %v2717_v25 = vpop.permute.xlu0 %2716   ;;  %v2730_v10 = vpop.permute.xlu1 %2729  }
 0x1e6   :  { %5078 = vst.msk [vmem:[%s9846_s1 + $0x47] ss:$1320 sm:$0x3] %vm361_vm1, %v2658_v45   ;;  %5079 = vst.msk [vmem:[%s9846_s1 + $0x727] ss:$-440 sm:$0xc] %vm361_vm1, %v2658_v45   ;;  %v3606_v47 = vsel %vm3605_vm9, %v3604_v35, %v7829_v47  ;;  %v3650_v63 = vsel %vm382_vm0, %v3648_v29, %v3646_v60 }
 0x1e7   :  { %5080 = vst.msk [vmem:[%s9846_s1 - $0x13d9] ss:$1320 sm:$0x30] %vm361_vm1, %v2658_v45   ;;  %5081 = vst.msk [vmem:[%s9846_s1 + $0xe87] ss:$-440 sm:$0xc0] %vm361_vm1, %v2658_v45   ;;  %v3658_v6 = vsel %vm3657_vm10, %v7797_v6, %v3650_v63 }
 0x1e8   :  { %5082 = vst.msk [vmem:[%s9846_s1 + $0x147] ss:$1320 sm:$0x3] %vm361_vm1, %v2671_v31   ;;  %5083 = vst.msk [vmem:[%s9846_s1 + $0x827] ss:$-440 sm:$0xc] %vm361_vm1, %v2671_v31  }
 0x1e9   :  { %v3680_v38 = vld.sshfl [vmem:[#allocation0 + $0x180] sm:$0xff pattern:$0x22222301]   ;;  %v3682_v40 = vld.sshfl [vmem:[#allocation0 + $0x228] sm:$0xff pattern:$0x23011111]   ;;  %v2743_v39 = vpop.permute.xlu0 %2742   ;;  %v2752_v52 = vpop.permute.xlu1 %2751  }
 0x1ea   :  { %s5706_s14 = smov 16   ;;  %v3684_v0 = vsel %vm382_vm0, %v3682_v40, %v3680_v38  ;;  %v3720_v59 = vld.sshfl [vmem:[#allocation0 + $0x88] sm:$0xff pattern:$0x11111230]   ;;  %s5707_s30 = smov 15   ;;  %vm4161_vm4 = vcmask 1006592  }
 0x1eb   :  { %3539 = vrot.lane.b32.xlu0 %v3538_v50, %s5706_s14  ;;  %3573 = vrot.lane.b32.xlu1 %v3572_v51, %s5706_s14  ;;  %5084 = vst.msk [vmem:[%s9846_s1 + $0x4] ss:$1320 sm:$0x3] %vm361_vm1, %v2683_v56   ;;  %5085 = vst.msk [vmem:[%s9846_s1 + $0x6e4] ss:$-440 sm:$0xc] %vm361_vm1, %v2683_v56   ;;  %v3692_v18 = vsel %vm3657_vm10, %v7800_v18, %v3684_v0 }
 0x1ec   :  { %5086 = vst.msk [vmem:[%s9846_s1 - $0x141c] ss:$1320 sm:$0x30] %vm361_vm1, %v2683_v56   ;;  %5087 = vst.msk [vmem:[%s9846_s1 + $0xe44] ss:$-440 sm:$0xc0] %vm361_vm1, %v2683_v56  }
 0x1ed   :  { %5088 = vst.msk [vmem:[%s9846_s1 + $0x104] ss:$1320 sm:$0x3] %vm361_vm1, %v2700_v61   ;;  %5089 = vst.msk [vmem:[%s9846_s1 + $0x7e4] ss:$-440 sm:$0xc] %vm361_vm1, %v2700_v61   ;;  %v2763_v32 = vpop.permute.xlu0 %2762   ;;  %v2772_v33 = vpop.permute.xlu1 %2771  }
 0x1ee   :  { %5090 = vst.msk [vmem:[%s9846_s1 - $0x131c] ss:$1320 sm:$0x30] %vm361_vm1, %v2700_v61   ;;  %5091 = vst.msk [vmem:[%s9846_s1 + $0xf44] ss:$-440 sm:$0xc0] %vm361_vm1, %v2700_v61  }
 0x1ef   :  { %v3722_v26 = vld.sshfl [vmem:[#allocation0 + $0x130] sm:$0xff pattern:$0x12300000]   ;;  %3607 = vrot.lane.b32.xlu0 %v3606_v47, %s5707_s30  ;;  %3633 = vrot.lane.b32.xlu1 %v3632_v48, %s5707_s30  ;;  %v3750_v27 = vld.sshfl [vmem:[#allocation0 + $0x1d8] sm:$0xff pattern:$0x11111230]  }
 0x1f0   :  { %v3766_v62 = vld.sshfl [vmem:[#allocation0 + $0x28] sm:$0xff pattern:$0x11111230]   ;;  %v3768_v24 = vld.sshfl [vmem:[#allocation0 + $0xd0] sm:$0xff pattern:$0x12300000]   ;;  %v3724_v13 = vsel %vm382_vm0, %v3722_v26, %v3720_v59  ;;  %v3752_v9 = vsel %vm3725_vm11, %v3750_v27, %v7599_v9 }
 0x1f1   :  { %v3772_v1 = vld.sshfl [vmem:[#allocation0 + $0x30] sm:$0xff pattern:$0x11111230]   ;;  %v3774_v3 = vld.sshfl [vmem:[#allocation0 + $0xd8] sm:$0xff pattern:$0x12300000]   ;;  %v3726_v14 = vsel %vm3725_vm11, %v3724_v13, %v7602_v14  ;;  %v3770_v46 = vsel %vm382_vm0, %v3768_v24, %v3766_v62  ;;  %v2783_v41 = vpop.permute.xlu0 %2782   ;;  %v2792_v45 = vpop.permute.xlu1 %2791  }
 0x1f2   :  { %v3800_v7 = vld.sshfl [vmem:[#allocation0 + $0x178] sm:$0xff pattern:$0x11111230]   ;;  %v3802_v43 = vld.sshfl [vmem:[#allocation0 + $0x220] sm:$0xff pattern:$0x12300000]   ;;  %v3776_v53 = vsel %vm382_vm0, %v3774_v3, %v3772_v1 }
 0x1f3   :  { %5092 = vst.msk [vmem:[%s9846_s1 + $0x41] ss:$1320 sm:$0x3] %vm361_vm1, %v2717_v25   ;;  %5093 = vst.msk [vmem:[%s9846_s1 + $0x721] ss:$-440 sm:$0xc] %vm361_vm1, %v2717_v25   ;;  %v3804_v22 = vsel %vm382_vm0, %v3802_v43, %v3800_v7  ;;  %v3778_v15 = vsel %vm3777_vm12, %v3776_v53, %v3770_v46 }
 0x1f4   :  { %5094 = vst.msk [vmem:[%s9846_s1 - $0x13df] ss:$1320 sm:$0x30] %vm361_vm1, %v2717_v25   ;;  %5095 = vst.msk [vmem:[%s9846_s1 + $0xe81] ss:$-440 sm:$0xc0] %vm361_vm1, %v2717_v25  }
 0x1f5   :  { %5096 = vst.msk [vmem:[%s9846_s1 + $0x141] ss:$1320 sm:$0x3] %vm361_vm1, %v2730_v10   ;;  %5097 = vst.msk [vmem:[%s9846_s1 + $0x821] ss:$-440 sm:$0xc] %vm361_vm1, %v2730_v10   ;;  %v2803_v26 = vpop.permute.xlu0 %2802   ;;  %v2820_v27 = vpop.permute.xlu1 %2819  }
 0x1f6   :  { %v3806_v44 = vld.sshfl [vmem:[#allocation0 + $0x180] sm:$0xff pattern:$0x11111230]   ;;  %v3808_v34 = vld.sshfl [vmem:[#allocation0 + $0x228] sm:$0xff pattern:$0x12300000]  }
 0x1f7   :  { %s5708_s14 = smov 14   ;;  %v3810_v23 = vsel %vm382_vm0, %v3808_v34, %v3806_v44  ;;  %5098 = vst.msk [vmem:[%s9846_s1 + $0x5a6] ss:$-440 sm:$0xf] %vm361_vm1, %v2743_v39   ;;  %5110 = vst.msk [vmem:[%s9846_s1 + $0x5d6] sm:$0x80] %vm361_vm1, %v2803_v26  }
 0x1f8   :  { %3659 = vrot.lane.b32.xlu0 %v3658_v6, %s5708_s14  ;;  %3693 = vrot.lane.b32.xlu1 %v3692_v18, %s5708_s14  ;;  %5099 = vst.msk [vmem:[%s9846_s1 + $0xd06] ss:$-440 sm:$0xf0] %vm361_vm1, %v2743_v39   ;;  %5100 = vst.msk [vmem:[%s9846_s1 + $0x6a6] ss:$-440 sm:$0xf] %vm361_vm1, %v2752_v52   ;;  %v3812_v16 = vsel %vm3777_vm12, %v3810_v23, %v3804_v22 }
 0x1f9   :  { %v3886_v30 = vld [vmem:[#allocation0 + $0x23] ss:$-1 sm:$0xf]   ;;  %v3888_v55 = vld [vmem:[#allocation0 + $0xcf] ss:$-1 sm:$0xf0]   ;;  %v2837_v7 = vpop.permute.xlu0 %2836   ;;  %v2850_v43 = vpop.permute.xlu1 %2849  }
 0x1fa   :  { %v3892_v54 = vld [vmem:[#allocation0 + $0x2b] ss:$-1 sm:$0xf]   ;;  %v3894_v42 = vld [vmem:[#allocation0 + $0xd7] ss:$-1 sm:$0xf0]   ;;  %v3890_v31 = vsel %vm382_vm0, %v3888_v55, %v3886_v30 }
 0x1fb   :  { %v3912_v36 = vld [vmem:[#allocation0 + $0x173] ss:$-1 sm:$0xf]   ;;  %v3914_v37 = vld [vmem:[#allocation0 + $0x21f] ss:$-1 sm:$0xf0]   ;;  %v3896_v35 = vsel %vm382_vm0, %v3894_v42, %v3892_v54 }
 0x1fc   :  { %3727 = vrot.lane.b32.xlu0 %v3726_v14, %s5709_s20  ;;  %3753 = vrot.lane.b32.xlu1 %v3752_v9, %s5709_s20  ;;  %5101 = vst.msk [vmem:[%s9846_s1 + $0x563] ss:$-440 sm:$0xf] %vm361_vm1, %v2763_v32   ;;  %5102 = vst.msk [vmem:[%s9846_s1 + $0xcc3] ss:$-440 sm:$0xf0] %vm361_vm1, %v2763_v32   ;;  %v3916_v60 = vsel %vm382_vm0, %v3914_v37, %v3912_v36  ;;  %v3898_v61 = vsel %vm3897_vm13, %v3896_v35, %v3890_v31 }
 0x1fd   :  { %5103 = vst.msk [vmem:[%s9846_s1 + $0x663] ss:$-440 sm:$0xf] %vm361_vm1, %v2772_v33   ;;  %v3918_v49 = vld [vmem:[#allocation0 + $0x17b] ss:$-1 sm:$0xf]   ;;  %v2863_v22 = vpop.permute.xlu0 %2862   ;;  %v2880_v23 = vpop.permute.xlu1 %2879  }
 0x1fe   :  { %v3920_v50 = vld [vmem:[#allocation0 + $0x227] ss:$-1 sm:$0xf0]   ;;  %v3938_v51 = vld [vmem:[#allocation0 + $0x73] ss:$-1 sm:$0xf]  }
 0x1ff   :  { %v3922_v29 = vsel %vm382_vm0, %v3920_v50, %v3918_v49  ;;  %v3940_v38 = vld [vmem:[#allocation0 + $0x11f] ss:$-1 sm:$0xf0]   ;;  %5104 = vst.msk [vmem:[%s9846_s1 + $0x5a0] ss:$-440 sm:$0xf] %vm361_vm1, %v2783_v41  }
 0x200   :  { %3779 = vrot.lane.b32.xlu0 %v3778_v15, %s5710_s27  ;;  %3813 = vrot.lane.b32.xlu1 %v3812_v16, %s5710_s27  ;;  %v3944_v40 = vld [vmem:[#allocation0 + $0x7b] ss:$-1 sm:$0xf]   ;;  %5105 = vst.msk [vmem:[%s9846_s1 + $0xd00] ss:$-440 sm:$0xf0] %vm361_vm1, %v2783_v41   ;;  %v3924_v63 = vsel %vm3897_vm13, %v3922_v29, %v3916_v60  ;;  %v3942_v62 = vsel %vm382_vm0, %v3940_v38, %v3938_v51 }
 0x201   :  { %5106 = vst.msk [vmem:[%s9846_s1 + $0x6a0] ss:$-440 sm:$0xf] %vm361_vm1, %v2792_v45   ;;  %v3946_v47 = vld [vmem:[#allocation0 + $0x127] ss:$-1 sm:$0xf0]   ;;  %v2897_v42 = vpop.permute.xlu0 %2896   ;;  %v2910_v32 = vpop.permute.xlu1 %2909  }
 0x202   :  { %v3978_v48 = vld [vmem:[#allocation0 + $0x1b] ss:$-1 sm:$0xf]   ;;  %v3980_v56 = vld [vmem:[#allocation0 + $0xc7] ss:$-1 sm:$0xf0]   ;;  %v3948_v24 = vsel %vm382_vm0, %v3946_v47, %v3944_v40 }
 0x203   :  { %v3984_v0 = vld [vmem:[#allocation0 + $0x23] ss:$-1 sm:$0xf]   ;;  %v3986_v59 = vld [vmem:[#allocation0 + $0xcf] ss:$-1 sm:$0xf0]   ;;  %v3950_v25 = vsel %vm3949_vm14, %v3948_v24, %v3942_v62  ;;  %v3982_v13 = vsel %vm382_vm0, %v3980_v56, %v3978_v48 }
 0x204   :  { %3847 = vrot.lane.b32.xlu0 %v7623_v11, %s5711_s5  ;;  %3873 = vrot.lane.b32.xlu1 %v7627_v12, %s5711_s5  ;;  %v3964_v11 = vld [vmem:[#allocation0 + $0x1c3] ss:$-1 sm:$0xf]   ;;  %v3966_v12 = vld [vmem:[#allocation0 + $0x1cb] ss:$-1 sm:$0xf]   ;;  %v3988_v44 = vsel %vm382_vm0, %v3986_v59, %v3984_v0 }
 0x205   :  { %v4004_v6 = vld [vmem:[#allocation0 + $0x16b] ss:$-1 sm:$0xf]   ;;  %v4006_v18 = vld [vmem:[#allocation0 + $0x217] ss:$-1 sm:$0xf0]   ;;  %v3968_v10 = vsel %vm3949_vm14, %v3966_v12, %v3964_v11  ;;  %v3990_v39 = vsel %vm3989_vm15, %v3988_v44, %v3982_v13 }
 0x206   :  { %5107 = vst.msk [vmem:[%s9846_s1 + $0x3a5] ss:$-440 sm:$0x7] %vm361_vm1, %v2803_v26   ;;  %5108 = vst.msk [vmem:[%s9846_s1 + $0x905] ss:$-312 sm:$0x18] %vm361_vm1, %v2803_v26   ;;  %v4008_v34 = vsel %vm382_vm0, %v4006_v18, %v4004_v6 }
 0x207   :  { %5109 = vst.msk [vmem:[%s9846_s1 + $0xb05] ss:$-440 sm:$0x60] %vm361_vm1, %v2803_v26   ;;  %5111 = vst.msk [vmem:[%s9846_s1 + $0x4a5] ss:$-440 sm:$0x7] %vm361_vm1, %v2820_v27   ;;  %v2923_v35 = vpop.permute.xlu0 %2922   ;;  %v2940_v60 = vpop.permute.xlu1 %2939  }
 0x208   :  { %5112 = vst.msk [vmem:[%s9846_s1 + $0xa05] ss:$-312 sm:$0x18] %vm361_vm1, %v2820_v27   ;;  %5113 = vst.msk [vmem:[%s9846_s1 + $0xc05] ss:$-440 sm:$0x60] %vm361_vm1, %v2820_v27   ;;  %3899 = vrot.lane.b32.xlu0 %v3898_v61, %s5712_s21  ;;  %3925 = vrot.lane.b32.xlu1 %v3924_v63, %s5712_s21 }
 0x209   :  { %5114 = vst.msk [vmem:[%s9846_s1 + $0x6d6] sm:$0x80] %vm361_vm1, %v2820_v27   ;;  %v4010_v1 = vld [vmem:[#allocation0 + $0x173] ss:$-1 sm:$0xf]   ;;  %s5713_s5 = smov 9  }
 0x20a   :  { %v4012_v3 = vld [vmem:[#allocation0 + $0x21f] ss:$-1 sm:$0xf0]   ;;  %5115 = vst.msk [vmem:[%s9846_s1 + $0x3e2] ss:$-440 sm:$0x7] %vm361_vm1, %v2837_v7  }
 0x20b   :  { %v4014_v14 = vsel %vm382_vm0, %v4012_v3, %v4010_v1  ;;  %5116 = vst.msk [vmem:[%s9846_s1 + $0x942] ss:$-312 sm:$0x18] %vm361_vm1, %v2837_v7   ;;  %5117 = vst.msk [vmem:[%s9846_s1 + $0xb42] ss:$-440 sm:$0x60] %vm361_vm1, %v2837_v7   ;;  %v2957_v61 = vpop.permute.xlu0 %2956   ;;  %v2970_v63 = vpop.permute.xlu1 %2969  }
 0x20c   :  { %5118 = vst.msk [vmem:[%s9846_s1 + $0x613] sm:$0x80] %vm361_vm1, %v2837_v7   ;;  %5119 = vst.msk [vmem:[%s9846_s1 + $0x4e2] ss:$-440 sm:$0x7] %vm361_vm1, %v2850_v43   ;;  %3951 = vrot.lane.b32.xlu0 %v3950_v25, %s5713_s5  ;;  %3969 = vrot.lane.b32.xlu1 %v3968_v10, %s5713_s5  ;;  %v4016_v52 = vsel %vm3989_vm15, %v4014_v14, %v4008_v34  ;;  %s5714_s21 = smov 8  }
 0x20d   :  { %5120 = vst.msk [vmem:[%s9846_s1 + $0x697] sm:$0x8] %vm361_vm1, %v2850_v43   ;;  %v4036_v9 = vld.sshfl [vmem:[#allocation0 + $0x70] sm:$0xff pattern:$0x33333012]   ;;  %s5715_s5 = smov 7  }
 0x20e   :  { %v4038_v46 = vld.sshfl [vmem:[#allocation0 + $0x118] sm:$0xff pattern:$0x30122222]   ;;  %v4066_v53 = vld.sshfl [vmem:[#allocation0 + $0x1c0] sm:$0xff pattern:$0x33333012]  }
 0x20f   :  { %v4040_v15 = vsel %vm382_vm0, %v4038_v46, %v4036_v9  ;;  %v4082_v16 = vld.sshfl [vmem:[#allocation0 + $0x10] sm:$0xff pattern:$0x33333012]   ;;  %v4084_v30 = vld.sshfl [vmem:[#allocation0 + $0xb8] sm:$0xff pattern:$0x30122222]   ;;  %v4068_v58 = vsel %vm4041_vm2, %v4066_v53, %v8067_v58  ;;  %v2983_v24 = vpop.permute.xlu0 %2982   ;;  %v3000_v6 = vpop.permute.xlu1 %2999  }
 0x210   :  { %5121 = vst.msk [vmem:[%s9846_s1 + $0x1e7] ss:$-440 sm:$0x3] %vm361_vm1, %v2863_v22   ;;  %5122 = vst.msk [vmem:[%s9846_s1 + $0x8c7] ss:$-440 sm:$0xc] %vm361_vm1, %v2863_v22   ;;  %3991 = vrot.lane.b32.xlu0 %v3990_v39, %s5714_s21  ;;  %4017 = vrot.lane.b32.xlu1 %v4016_v52, %s5714_s21  ;;  %v4042_v57 = vsel %vm4041_vm2, %v4040_v15, %v8065_v57  ;;  %v4086_v33 = vsel %vm382_vm0, %v4084_v30, %v4082_v16 }
 0x211   :  { %5123 = vst.msk [vmem:[%s9846_s1 + $0x947] ss:$-440 sm:$0x30] %vm361_vm1, %v2863_v22   ;;  %5124 = vst.msk [vmem:[%s9846_s1 + $0x1027] ss:$-440 sm:$0xc0] %vm361_vm1, %v2863_v22   ;;  %v4094_v2 = vsel %vm4093_vm3, %v8025_v2, %v4086_v33 }
 0x212   :  { %5125 = vst.msk [vmem:[%s9846_s1 + $0x2e7] ss:$-440 sm:$0x3] %vm361_vm1, %v2880_v23   ;;  %5126 = vst.msk [vmem:[%s9846_s1 + $0x9c7] ss:$-440 sm:$0xc] %vm361_vm1, %v2880_v23  }
 0x213   :  { %5127 = vst.msk [vmem:[%s9846_s1 + $0xa47] ss:$-440 sm:$0x30] %vm361_vm1, %v2880_v23   ;;  %5128 = vst.msk [vmem:[%s9846_s1 + $0x1127] ss:$-440 sm:$0xc0] %vm361_vm1, %v2880_v23   ;;  %v3017_v10 = vpop.permute.xlu0 %3016   ;;  %v3030_v13 = vpop.permute.xlu1 %3029  }
 0x214   :  { %v4116_v55 = vld.sshfl [vmem:[#allocation0 + $0x160] sm:$0xff pattern:$0x33333012]   ;;  %v4118_v54 = vld.sshfl [vmem:[#allocation0 + $0x208] sm:$0xff pattern:$0x30122222]   ;;  %4043 = vrot.lane.b32.xlu0 %v4042_v57, %s5715_s5  ;;  %4069 = vrot.lane.b32.xlu1 %v4068_v58, %s5715_s5 }
 0x215   :  { %v4120_v36 = vsel %vm382_vm0, %v4118_v54, %v4116_v55  ;;  %v4156_v37 = vld.sshfl [vmem:[#allocation0 + $0x68] sm:$0xff pattern:$0x22222301]   ;;  %5129 = vst.msk [vmem:[%s9846_s1 + $0x224] ss:$-440 sm:$0x3] %vm361_vm1, %v2897_v42  }
 0x216   :  { %5130 = vst.msk [vmem:[%s9846_s1 + $0x904] ss:$-440 sm:$0xc] %vm361_vm1, %v2897_v42   ;;  %5131 = vst.msk [vmem:[%s9846_s1 + $0x984] ss:$-440 sm:$0x30] %vm361_vm1, %v2897_v42   ;;  %v4128_v28 = vsel %vm4093_vm3, %v8028_v28, %v4120_v36 }
 0x217   :  { %5132 = vst.msk [vmem:[%s9846_s1 + $0x1064] ss:$-440 sm:$0xc0] %vm361_vm1, %v2897_v42   ;;  %5133 = vst.msk [vmem:[%s9846_s1 + $0x324] ss:$-440 sm:$0x3] %vm361_vm1, %v2910_v32  }
 0x218   :  { %5134 = vst.msk [vmem:[%s9846_s1 + $0xa04] ss:$-440 sm:$0xc] %vm361_vm1, %v2910_v32   ;;  %v4158_v49 = vld.sshfl [vmem:[#allocation0 + $0x110] sm:$0xff pattern:$0x23011111]  }
 0x219   :  { %v4186_v50 = vld.sshfl [vmem:[#allocation0 + $0x1b8] sm:$0xff pattern:$0x22222301]   ;;  %v4202_v51 = vld.sshfl [vmem:[#allocation0 + $0x8] sm:$0xff pattern:$0x22222301]   ;;  %v4160_v29 = vsel %vm382_vm0, %v4158_v49, %v4156_v37 }
 0x21a   :  { %v4204_v41 = vld.sshfl [vmem:[#allocation0 + $0xb0] sm:$0xff pattern:$0x23011111]   ;;  %v4210_v31 = vld.sshfl [vmem:[#allocation0 + $0xb8] sm:$0xff pattern:$0x23011111]   ;;  %v4162_v8 = vsel %vm4161_vm4, %v4160_v29, %v7870_v8 }
 0x21b   :  { %v4208_v45 = vld.sshfl [vmem:[#allocation0 + $0x10] sm:$0xff pattern:$0x22222301]   ;;  %v4236_v38 = vld.sshfl [vmem:[#allocation0 + $0x158] sm:$0xff pattern:$0x22222301]   ;;  %v4206_v56 = vsel %vm382_vm0, %v4204_v41, %v4202_v51 }
 0x21c   :  { %v4238_v40 = vld.sshfl [vmem:[#allocation0 + $0x200] sm:$0xff pattern:$0x23011111]   ;;  %5135 = vst.msk [vmem:[%s9846_s1 + $0x1e1] ss:$-440 sm:$0x3] %vm361_vm1, %v2923_v35   ;;  %v4212_v0 = vsel %vm382_vm0, %v4210_v31, %v4208_v45 }
 0x21d   :  { %5136 = vst.msk [vmem:[%s9846_s1 + $0x8c1] ss:$-440 sm:$0xc] %vm361_vm1, %v2923_v35   ;;  %5137 = vst.msk [vmem:[%s9846_s1 + $0x941] ss:$-440 sm:$0x30] %vm361_vm1, %v2923_v35   ;;  %v4240_v59 = vsel %vm382_vm0, %v4238_v40, %v4236_v38 }
 0x21e   :  { %5138 = vst.msk [vmem:[%s9846_s1 + $0x1021] ss:$-440 sm:$0xc0] %vm361_vm1, %v2923_v35   ;;  %5139 = vst.msk [vmem:[%s9846_s1 + $0x2e1] ss:$-440 sm:$0x3] %vm361_vm1, %v2940_v60  }
 0x21f   :  { %5140 = vst.msk [vmem:[%s9846_s1 + $0x9c1] ss:$-440 sm:$0xc] %vm361_vm1, %v2940_v60   ;;  %5141 = vst.msk [vmem:[%s9846_s1 + $0xa41] ss:$-440 sm:$0x30] %vm361_vm1, %v2940_v60  }
 0x220   :  { %5142 = vst.msk [vmem:[%s9846_s1 + $0x1121] ss:$-440 sm:$0xc0] %vm361_vm1, %v2940_v60   ;;  %v4242_v47 = vld.sshfl [vmem:[#allocation0 + $0x160] sm:$0xff pattern:$0x22222301]  }
 0x221   :  { %v4244_v11 = vld.sshfl [vmem:[#allocation0 + $0x208] sm:$0xff pattern:$0x23011111]   ;;  %s5716_s21 = smov 6   ;;  %vm4213_vm5 = vcmask 1014784   ;;  %s5717_s5 = smov 5  }
 0x222   :  { %4095 = vrot.lane.b32.xlu0 %v4094_v2, %s5716_s21  ;;  %4129 = vrot.lane.b32.xlu1 %v4128_v28, %s5716_s21  ;;  %v5594_v12 = vld.sshfl [vmem:[#allocation0 + $0x1b0] sm:$0xff pattern:$0x22222301]   ;;  %v4246_v26 = vsel %vm382_vm0, %v4244_v11, %v4242_v47  ;;  %5143 = vst.msk [vmem:[%s9846_s1 + $0x66] ss:$1320 sm:$0x3] %vm361_vm1, %v2957_v61   ;;  %v4214_v27 = vsel %vm4213_vm5, %v4212_v0, %v4206_v56 }
 0x223   :  { %v4188_v48 = vsel %vm4161_vm4, %v4186_v50, %v5594_v12  ;;  %5144 = vst.msk [vmem:[%s9846_s1 + $0x746] ss:$-440 sm:$0xc] %vm361_vm1, %v2957_v61   ;;  %5145 = vst.msk [vmem:[%s9846_s1 - $0x13ba] ss:$1320 sm:$0x30] %vm361_vm1, %v2957_v61   ;;  %v4248_v62 = vsel %vm4213_vm5, %v4246_v26, %v4240_v59 }
 0x224   :  { %5146 = vst.msk [vmem:[%s9846_s1 + $0xea6] ss:$-440 sm:$0xc0] %vm361_vm1, %v2957_v61   ;;  %5147 = vst.msk [vmem:[%s9846_s1 + $0x166] ss:$1320 sm:$0x3] %vm361_vm1, %v2970_v63  }
 0x225   :  { %5148 = vst.msk [vmem:[%s9846_s1 + $0x846] ss:$-440 sm:$0xc] %vm361_vm1, %v2970_v63   ;;  %v4327_v18 = vld.sshfl [vmem:[#allocation0 + $0x8] sm:$0xff pattern:$0x11111230]  }
 0x226   :  { %4163 = vrot.lane.b32.xlu0 %v4162_v8, %s5717_s5  ;;  %4189 = vrot.lane.b32.xlu1 %v4188_v48, %s5717_s5  ;;  %v4329_v1 = vld.sshfl [vmem:[#allocation0 + $0xb0] sm:$0xff pattern:$0x12300000]   ;;  %5149 = vst.msk [vmem:[%s9846_s1 + $0x23] ss:$1320 sm:$0x3] %vm361_vm1, %v2983_v24  }
 0x227   :  { %5150 = vst.msk [vmem:[%s9846_s1 + $0x703] ss:$-440 sm:$0xc] %vm361_vm1, %v2983_v24   ;;  %5151 = vst.msk [vmem:[%s9846_s1 - $0x13fd] ss:$1320 sm:$0x30] %vm361_vm1, %v2983_v24   ;;  %v4331_v7 = vsel %vm382_vm0, %v4329_v1, %v4327_v18 }
 0x228   :  { %5152 = vst.msk [vmem:[%s9846_s1 + $0xe63] ss:$-440 sm:$0xc0] %vm361_vm1, %v2983_v24   ;;  %5153 = vst.msk [vmem:[%s9846_s1 + $0x123] ss:$1320 sm:$0x3] %vm361_vm1, %v3000_v6  }
 0x229   :  { %5154 = vst.msk [vmem:[%s9846_s1 + $0x803] ss:$-440 sm:$0xc] %vm361_vm1, %v3000_v6   ;;  %5155 = vst.msk [vmem:[%s9846_s1 - $0x12fd] ss:$1320 sm:$0x30] %vm361_vm1, %v3000_v6  }
 0x22a   :  { %5156 = vst.msk [vmem:[%s9846_s1 + $0xf63] ss:$-440 sm:$0xc0] %vm361_vm1, %v3000_v6   ;;  %v4361_v3 = vld.sshfl [vmem:[#allocation0 + $0x158] sm:$0xff pattern:$0x11111230]  }
 0x22b   :  { %v4363_v25 = vld.sshfl [vmem:[#allocation0 + $0x200] sm:$0xff pattern:$0x12300000]   ;;  %s5718_s21 = smov 4   ;;  %vm4332_vm6 = vcmask 1031168   ;;  %s5719_s5 = smov 3  }
 0x22c   :  { %4215 = vrot.lane.b32.xlu0 %v4214_v27, %s5718_s21  ;;  %4249 = vrot.lane.b32.xlu1 %v4248_v62, %s5718_s21  ;;  %v4365_v43 = vsel %vm382_vm0, %v4363_v25, %v4361_v3  ;;  %5157 = vst.msk [vmem:[%s9846_s1 + $0x60] ss:$1320 sm:$0x3] %vm361_vm1, %v3017_v10   ;;  %5158 = vst.msk [vmem:[%s9846_s1 + $0x740] ss:$-440 sm:$0xc] %vm361_vm1, %v3017_v10  }
 0x22d   :  { %5159 = vst.msk [vmem:[%s9846_s1 - $0x13c0] ss:$1320 sm:$0x30] %vm361_vm1, %v3017_v10   ;;  %5160 = vst.msk [vmem:[%s9846_s1 + $0xea0] ss:$-440 sm:$0xc0] %vm361_vm1, %v3017_v10  }
 0x22e   :  { %5161 = vst.msk [vmem:[%s9846_s1 + $0x160] ss:$1320 sm:$0x3] %vm361_vm1, %v3030_v13   ;;  %5162 = vst.msk [vmem:[%s9846_s1 + $0x840] ss:$-440 sm:$0xc] %vm361_vm1, %v3030_v13  }
 0x22f   :  { %v4395_v44 = vld.sshfl [vmem:[#allocation0 + $0x58] sm:$0xff pattern:$0x11111230]   ;;  %v4397_v34 = vld.sshfl [vmem:[#allocation0 + $0x100] sm:$0xff pattern:$0x12300000]  }
 0x230   :  { %4283 = vrot.lane.b32.xlu0 %v7903_v20, %s5719_s5  ;;  %4309 = vrot.lane.b32.xlu1 %v7907_v21, %s5719_s5  ;;  %v4333_v20 = vsel %vm4332_vm6, %v4331_v7, %v8204_v17  ;;  %v4367_v21 = vsel %vm4332_vm6, %v4365_v43, %v8207_v19  ;;  %v3043_v17 = vpop.permute.xlu0 %3042   ;;  %v3056_v19 = vpop.permute.xlu1 %3055   ;;  %v4399_v14 = vsel %vm382_vm0, %v4397_v34, %v4395_v44  ;;  %vm4400_vm0 = vcmask 1039360   ;;  %v4425_v9 = vld.sshfl [vmem:[#allocation0 + $0x1a8] sm:$0xff pattern:$0x11111230]   ;;  %s5720_s14 = smov 2   ;;  %s5721_s20 = smov 1  }
 0x231   :  { %5163 = vst.msk [vmem:[%s9846_s1 + $0x545] ss:$-440 sm:$0xf] %vm361_vm1, %v3043_v17   ;;  %5164 = vst.msk [vmem:[%s9846_s1 + $0xca5] ss:$-440 sm:$0xf0] %vm361_vm1, %v3043_v17   ;;  %v4401_v5 = vsel %vm4400_vm0, %v4399_v14, %v8230_v5  ;;  %v4427_v4 = vsel %vm4400_vm0, %v4425_v9, %v8227_v4 }
 0x232   :  { %5165 = vst.msk [vmem:[%s9846_s1 + $0x645] ss:$-440 sm:$0xf] %vm361_vm1, %v3056_v19   ;;  %5166 = vst.msk [vmem:[%s9846_s1 + $0xda5] ss:$-440 sm:$0xf0] %vm361_vm1, %v3056_v19  }
 0x233   :  { %vm3362_vm7 = vcmask 171168   ;;  %vm3397_vm8 = vcmask 154624   ;;  %vm3402_vm9 = vcmask 171160   ;;  %vm3437_vm10 = vcmask 146432  }
 0x234   :  { %4334 = vrot.lane.b32.xlu0 %v4333_v20, %s5720_s14  ;;  %4368 = vrot.lane.b32.xlu1 %v4367_v21, %s5720_s14  ;;  %v3069_v46 = vpop.permute.xlu0 %3068   ;;  %v3078_v39 = vpop.permute.xlu1 %3077   ;;  %vm3446_vm11 = vcmask 171152   ;;  %vm3489_vm12 = vcmask 138240   ;;  %vm3498_vm13 = vcmask 171144   ;;  %vm3541_vm14 = vcmask 130048  }
 0x235   :  { %5167 = vst.msk [vmem:[%s9846_s1 + $0x582] ss:$-440 sm:$0xf] %vm361_vm1, %v3069_v46   ;;  %5168 = vst.msk [vmem:[%s9846_s1 + $0xce2] ss:$-440 sm:$0xf0] %vm361_vm1, %v3069_v46  }
 0x236   :  { %5169 = vst.msk [vmem:[%s9846_s1 + $0x682] ss:$-440 sm:$0xf] %vm361_vm1, %v3078_v39   ;;  %vm3550_vm15 = vcmask 171136   ;;  %vm3609_vm2 = vcmask 121856   ;;  %vm3618_vm3 = vcmask 171128  }
 0x237   :  { %vm3661_vm4 = vcmask 113664   ;;  %vm3670_vm5 = vcmask 171120   ;;  %vm3729_vm6 = vcmask 105472   ;;  %vm3738_vm0 = vcmask 171112  }
 0x238   :  { %4402 = vrot.lane.b32.xlu0 %v4401_v5, %s5721_s20  ;;  %4428 = vrot.lane.b32.xlu1 %v4427_v4, %s5721_s20  ;;  %v3089_v52 = vpop.permute.xlu0 %3088   ;;  %v3106_v53 = vpop.permute.xlu1 %3105  }
 0x239   :  { %5170 = vst.msk [vmem:[%s9846_s1 + $0x387] ss:$-440 sm:$0x7] %vm361_vm1, %v3089_v52   ;;  %5171 = vst.msk [vmem:[%s9846_s1 + $0x8e7] ss:$-312 sm:$0x18] %vm361_vm1, %v3089_v52  }
 0x23a   :  { %5172 = vst.msk [vmem:[%s9846_s1 + $0xae7] ss:$-440 sm:$0x60] %vm361_vm1, %v3089_v52   ;;  %5173 = vst.msk [vmem:[%s9846_s1 + $0x5b8] sm:$0x80] %vm361_vm1, %v3089_v52  }
 0x23b   :  { %5174 = vst.msk [vmem:[%s9846_s1 + $0x487] ss:$-440 sm:$0x7] %vm361_vm1, %v3106_v53   ;;  %5175 = vst.msk [vmem:[%s9846_s1 + $0x9e7] ss:$-312 sm:$0x18] %vm361_vm1, %v3106_v53  }
 0x23c   :  { %5176 = vst.msk [vmem:[%s9846_s1 + $0xbe7] ss:$-440 sm:$0x60] %vm361_vm1, %v3106_v53   ;;  %5177 = vst.msk [vmem:[%s9846_s1 + $0x6b8] sm:$0x80] %vm361_vm1, %v3106_v53   ;;  %v3123_v22 = vpop.permute.xlu0 %3122   ;;  %v3136_v23 = vpop.permute.xlu1 %3135  }
 0x23d   :  { %5178 = vst.msk [vmem:[%s9846_s1 + $0x3c4] ss:$-440 sm:$0x7] %vm361_vm1, %v3123_v22   ;;  %5179 = vst.msk [vmem:[%s9846_s1 + $0x924] ss:$-312 sm:$0x18] %vm361_vm1, %v3123_v22  }
 0x23e   :  { %5180 = vst.msk [vmem:[%s9846_s1 + $0xb24] ss:$-440 sm:$0x60] %vm361_vm1, %v3123_v22   ;;  %5181 = vst.msk [vmem:[%s9846_s1 + $0x5f5] sm:$0x80] %vm361_vm1, %v3123_v22  }
 0x23f   :  { %5182 = vst.msk [vmem:[%s9846_s1 + $0x4c4] ss:$-440 sm:$0x7] %vm361_vm1, %v3136_v23   ;;  %5183 = vst.msk [vmem:[%s9846_s1 + $0x679] sm:$0x8] %vm361_vm1, %v3136_v23  }
 0x240   :  { %v3149_v15 = vpop.permute.xlu0 %3148   ;;  %v3166_v16 = vpop.permute.xlu1 %3165  }
 0x241   :  { %5184 = vst.msk [vmem:[%s9846_s1 + $0x381] ss:$-440 sm:$0x7] %vm361_vm1, %v3149_v15   ;;  %5185 = vst.msk [vmem:[%s9846_s1 + $0x8e1] ss:$-312 sm:$0x18] %vm361_vm1, %v3149_v15  }
 0x242   :  { %5186 = vst.msk [vmem:[%s9846_s1 + $0xae1] ss:$-440 sm:$0x60] %vm361_vm1, %v3149_v15   ;;  %5187 = vst.msk [vmem:[%s9846_s1 + $0x5b2] sm:$0x80] %vm361_vm1, %v3149_v15  }
 0x243   :  { %5188 = vst.msk [vmem:[%s9846_s1 + $0x481] ss:$-440 sm:$0x7] %vm361_vm1, %v3166_v16   ;;  %5189 = vst.msk [vmem:[%s9846_s1 + $0x9e1] ss:$-312 sm:$0x18] %vm361_vm1, %v3166_v16  }
 0x244   :  { %5190 = vst.msk [vmem:[%s9846_s1 + $0xbe1] ss:$-440 sm:$0x60] %vm361_vm1, %v3166_v16   ;;  %5191 = vst.msk [vmem:[%s9846_s1 + $0x6b2] sm:$0x80] %vm361_vm1, %v3166_v16   ;;  %v3183_v30 = vpop.permute.xlu0 %3182   ;;  %v3196_v55 = vpop.permute.xlu1 %3195  }
 0x245   :  { %5192 = vst.msk [vmem:[%s9846_s1 + $0x206] ss:$-440 sm:$0x3] %vm361_vm1, %v3183_v30   ;;  %5193 = vst.msk [vmem:[%s9846_s1 + $0x8e6] ss:$-440 sm:$0xc] %vm361_vm1, %v3183_v30  }
 0x246   :  { %5194 = vst.msk [vmem:[%s9846_s1 + $0x966] ss:$-440 sm:$0x30] %vm361_vm1, %v3183_v30   ;;  %5195 = vst.msk [vmem:[%s9846_s1 + $0x1046] ss:$-440 sm:$0xc0] %vm361_vm1, %v3183_v30  }
 0x247   :  { %5196 = vst.msk [vmem:[%s9846_s1 + $0x306] ss:$-440 sm:$0x3] %vm361_vm1, %v3196_v55   ;;  %5197 = vst.msk [vmem:[%s9846_s1 + $0x9e6] ss:$-440 sm:$0xc] %vm361_vm1, %v3196_v55  }
 0x248   :  { %v3209_v54 = vpop.permute.xlu0 %3208   ;;  %v3226_v57 = vpop.permute.xlu1 %3225  }
 0x249   :  { %5198 = vst.msk [vmem:[%s9846_s1 + $0x1c3] ss:$-440 sm:$0x3] %vm361_vm1, %v3209_v54   ;;  %5199 = vst.msk [vmem:[%s9846_s1 + $0x8a3] ss:$-440 sm:$0xc] %vm361_vm1, %v3209_v54  }
 0x24a   :  { %5200 = vst.msk [vmem:[%s9846_s1 + $0x923] ss:$-440 sm:$0x30] %vm361_vm1, %v3209_v54   ;;  %5201 = vst.msk [vmem:[%s9846_s1 + $0x1003] ss:$-440 sm:$0xc0] %vm361_vm1, %v3209_v54  }
 0x24b   :  { %5202 = vst.msk [vmem:[%s9846_s1 + $0x2c3] ss:$-440 sm:$0x3] %vm361_vm1, %v3226_v57   ;;  %5203 = vst.msk [vmem:[%s9846_s1 + $0x9a3] ss:$-440 sm:$0xc] %vm361_vm1, %v3226_v57  }
 0x24c   :  { %5204 = vst.msk [vmem:[%s9846_s1 + $0xa23] ss:$-440 sm:$0x30] %vm361_vm1, %v3226_v57   ;;  %5205 = vst.msk [vmem:[%s9846_s1 + $0x1103] ss:$-440 sm:$0xc0] %vm361_vm1, %v3226_v57   ;;  %v3243_v58 = vpop.permute.xlu0 %3242   ;;  %v3256_v42 = vpop.permute.xlu1 %3255  }
 0x24d   :  { %5206 = vst.msk [vmem:[%s9846_s1 + $0x200] ss:$-440 sm:$0x3] %vm361_vm1, %v3243_v58   ;;  %5207 = vst.msk [vmem:[%s9846_s1 + $0x8e0] ss:$-440 sm:$0xc] %vm361_vm1, %v3243_v58  }
 0x24e   :  { %5208 = vst.msk [vmem:[%s9846_s1 + $0x960] ss:$-440 sm:$0x30] %vm361_vm1, %v3243_v58   ;;  %5209 = vst.msk [vmem:[%s9846_s1 + $0x1040] ss:$-440 sm:$0xc0] %vm361_vm1, %v3243_v58  }
 0x24f   :  { %5210 = vst.msk [vmem:[%s9846_s1 + $0x300] ss:$-440 sm:$0x3] %vm361_vm1, %v3256_v42   ;;  %5211 = vst.msk [vmem:[%s9846_s1 + $0x9e0] ss:$-440 sm:$0xc] %vm361_vm1, %v3256_v42  }
 0x250   :  { %v3268_v32 = vpop.permute.xlu0 %3267   ;;  %v3285_v33 = vpop.permute.xlu1 %3284  }
 0x251   :  { %5212 = vst.msk [vmem:[%s9846_s1 + $0x5] ss:$1320 sm:$0x3] %vm361_vm1, %v3268_v32   ;;  %5213 = vst.msk [vmem:[%s9846_s1 + $0x6e5] ss:$-440 sm:$0xc] %vm361_vm1, %v3268_v32  }
 0x252   :  { %5214 = vst.msk [vmem:[%s9846_s1 - $0x141b] ss:$1320 sm:$0x30] %vm361_vm1, %v3268_v32   ;;  %5215 = vst.msk [vmem:[%s9846_s1 + $0xe45] ss:$-440 sm:$0xc0] %vm361_vm1, %v3268_v32  }
 0x253   :  { %5216 = vst.msk [vmem:[%s9846_s1 + $0x105] ss:$1320 sm:$0x3] %vm361_vm1, %v3285_v33   ;;  %5217 = vst.msk [vmem:[%s9846_s1 + $0x7e5] ss:$-440 sm:$0xc] %vm361_vm1, %v3285_v33  }
 0x254   :  { %5218 = vst.msk [vmem:[%s9846_s1 - $0x131b] ss:$1320 sm:$0x30] %vm361_vm1, %v3285_v33   ;;  %5219 = vst.msk [vmem:[%s9846_s1 + $0xf45] ss:$-440 sm:$0xc0] %vm361_vm1, %v3285_v33   ;;  %v3302_v36 = vpop.permute.xlu0 %3301   ;;  %v3315_v37 = vpop.permute.xlu1 %3314  }
 0x255   :  { %5220 = vst.msk [vmem:[%s9846_s1 + $0x42] ss:$1320 sm:$0x3] %vm361_vm1, %v3302_v36   ;;  %5221 = vst.msk [vmem:[%s9846_s1 + $0x722] ss:$-440 sm:$0xc] %vm361_vm1, %v3302_v36  }
 0x256   :  { %5222 = vst.msk [vmem:[%s9846_s1 - $0x13de] ss:$1320 sm:$0x30] %vm361_vm1, %v3302_v36   ;;  %5223 = vst.msk [vmem:[%s9846_s1 + $0xe82] ss:$-440 sm:$0xc0] %vm361_vm1, %v3302_v36  }
 0x257   :  { %5224 = vst.msk [vmem:[%s9846_s1 + $0x142] ss:$1320 sm:$0x3] %vm361_vm1, %v3315_v37   ;;  %5225 = vst.msk [vmem:[%s9846_s1 + $0x822] ss:$-440 sm:$0xc] %vm361_vm1, %v3315_v37  }
 0x258   :  { %v3328_v49 = vpop.permute.xlu0 %3327   ;;  %v3337_v50 = vpop.permute.xlu1 %3336  }
 0x259   :  { %5226 = vst.msk [vmem:[%s9846_s1 + $0x5a7] ss:$-440 sm:$0xf] %vm361_vm1, %v3328_v49   ;;  %5227 = vst.msk [vmem:[%s9846_s1 + $0xd07] ss:$-440 sm:$0xf0] %vm361_vm1, %v3328_v49  }
 0x25a   :  { %5228 = vst.msk [vmem:[%s9846_s1 + $0x6a7] ss:$-440 sm:$0xf] %vm361_vm1, %v3337_v50   ;;  %vm3357_vm1 = vcmask 162816  }
 0x25c   :  { %v3356_v51 = vpop.permute.xlu0 %3355   ;;  %v3374_v41 = vpop.permute.xlu1 %3373  }
 0x25d   :  { %5229 = vst.msk [vmem:[%s9846_s1 + $0x564] ss:$-440 sm:$0xf] %vm3357_vm1, %v3356_v51   ;;  %5230 = vst.msk [vmem:[%s9846_s1 + $0xcc4] ss:$-440 sm:$0xf0] %vm3357_vm1, %v3356_v51  }
 0x25e   :  { %5233 = vst.msk [vmem:[%s9846_s1 + $0x664] ss:$-440 sm:$0xf] %vm3357_vm1, %v3374_v41   ;;  %vm3781_vm1 = vcmask 97280  }
 0x25f   :  { %5231 = vst.msk [vmem:[%s9846_s1 + $0x564] ss:$-440 sm:$0xf] %vm3362_vm7, %v3356_v51   ;;  %5232 = vst.msk [vmem:[%s9846_s1 + $0xcc4] ss:$-440 sm:$0xf0] %vm3362_vm7, %v3356_v51  }
 0x260   :  { %5234 = vst.msk [vmem:[%s9846_s1 + $0x664] ss:$-440 sm:$0xf] %vm3362_vm7, %v3374_v41   ;;  %v3396_v2 = vpop.permute.xlu0 %3395   ;;  %v3414_v28 = vpop.permute.xlu1 %3413   ;;  %vm3790_vm7 = vcmask 171104  }
 0x261   :  { %5235 = vst.msk [vmem:[%s9846_s1 + $0x5a1] ss:$-440 sm:$0xf] %vm3397_vm8, %v3396_v2   ;;  %5236 = vst.msk [vmem:[%s9846_s1 + $0xd01] ss:$-440 sm:$0xf0] %vm3397_vm8, %v3396_v2  }
 0x262   :  { %5239 = vst.msk [vmem:[%s9846_s1 + $0x6a1] ss:$-440 sm:$0xf] %vm3397_vm8, %v3414_v28   ;;  %vm3849_vm8 = vcmask 89088  }
 0x263   :  { %5237 = vst.msk [vmem:[%s9846_s1 + $0x5a1] ss:$-440 sm:$0xf] %vm3402_vm9, %v3396_v2   ;;  %5238 = vst.msk [vmem:[%s9846_s1 + $0xd01] ss:$-440 sm:$0xf0] %vm3402_vm9, %v3396_v2  }
 0x264   :  { %5240 = vst.msk [vmem:[%s9846_s1 + $0x6a1] ss:$-440 sm:$0xf] %vm3402_vm9, %v3414_v28   ;;  %v3436_v45 = vpop.permute.xlu0 %3435   ;;  %v3462_v31 = vpop.permute.xlu1 %3461   ;;  %vm3858_vm9 = vcmask 171096  }
 0x265   :  { %5241 = vst.msk [vmem:[%s9846_s1 + $0x3a6] ss:$-440 sm:$0x7] %vm3437_vm10, %v3436_v45   ;;  %5242 = vst.msk [vmem:[%s9846_s1 + $0x906] ss:$-312 sm:$0x18] %vm3437_vm10, %v3436_v45  }
 0x266   :  { %5243 = vst.msk [vmem:[%s9846_s1 + $0xb06] ss:$-440 sm:$0x60] %vm3437_vm10, %v3436_v45   ;;  %5244 = vst.msk [vmem:[%s9846_s1 + $0x5d7] sm:$0x80] %vm3437_vm10, %v3436_v45  }
 0x267   :  { %5249 = vst.msk [vmem:[%s9846_s1 + $0x4a6] ss:$-440 sm:$0x7] %vm3437_vm10, %v3462_v31   ;;  %5250 = vst.msk [vmem:[%s9846_s1 + $0x65b] sm:$0x8] %vm3437_vm10, %v3462_v31   ;;  %vm3901_vm10 = vcmask 80896  }
 0x268   :  { %5245 = vst.msk [vmem:[%s9846_s1 + $0x3a6] ss:$-440 sm:$0x7] %vm3446_vm11, %v3436_v45   ;;  %5246 = vst.msk [vmem:[%s9846_s1 + $0x906] ss:$-312 sm:$0x18] %vm3446_vm11, %v3436_v45   ;;  %v3488_v35 = vpop.permute.xlu0 %3487   ;;  %v3514_v60 = vpop.permute.xlu1 %3513  }
 0x269   :  { %5247 = vst.msk [vmem:[%s9846_s1 + $0xb06] ss:$-440 sm:$0x60] %vm3446_vm11, %v3436_v45   ;;  %5248 = vst.msk [vmem:[%s9846_s1 + $0x5d7] sm:$0x80] %vm3446_vm11, %v3436_v45  }
 0x26a   :  { %5251 = vst.msk [vmem:[%s9846_s1 + $0x4a6] ss:$-440 sm:$0x7] %vm3446_vm11, %v3462_v31   ;;  %5252 = vst.msk [vmem:[%s9846_s1 + $0x65b] sm:$0x8] %vm3446_vm11, %v3462_v31   ;;  %vm3906_vm11 = vcmask 171088  }
 0x26b   :  { %5253 = vst.msk [vmem:[%s9846_s1 + $0x3e3] ss:$-440 sm:$0x7] %vm3489_vm12, %v3488_v35   ;;  %5254 = vst.msk [vmem:[%s9846_s1 + $0x943] ss:$-312 sm:$0x18] %vm3489_vm12, %v3488_v35  }
 0x26c   :  { %5255 = vst.msk [vmem:[%s9846_s1 + $0xb43] ss:$-440 sm:$0x60] %vm3489_vm12, %v3488_v35   ;;  %5256 = vst.msk [vmem:[%s9846_s1 + $0x614] sm:$0x80] %vm3489_vm12, %v3488_v35   ;;  %v3540_v29 = vpop.permute.xlu0 %3539   ;;  %v3574_v38 = vpop.permute.xlu1 %3573  }
 0x26d   :  { %5261 = vst.msk [vmem:[%s9846_s1 + $0x4e3] ss:$-440 sm:$0x7] %vm3489_vm12, %v3514_v60   ;;  %5262 = vst.msk [vmem:[%s9846_s1 + $0x698] sm:$0x8] %vm3489_vm12, %v3514_v60   ;;  %vm3953_vm12 = vcmask 72704  }
 0x26e   :  { %5257 = vst.msk [vmem:[%s9846_s1 + $0x3e3] ss:$-440 sm:$0x7] %vm3498_vm13, %v3488_v35   ;;  %5258 = vst.msk [vmem:[%s9846_s1 + $0x943] ss:$-312 sm:$0x18] %vm3498_vm13, %v3488_v35  }
 0x26f   :  { %5259 = vst.msk [vmem:[%s9846_s1 + $0xb43] ss:$-440 sm:$0x60] %vm3498_vm13, %v3488_v35   ;;  %5260 = vst.msk [vmem:[%s9846_s1 + $0x614] sm:$0x80] %vm3498_vm13, %v3488_v35  }
 0x270   :  { %5263 = vst.msk [vmem:[%s9846_s1 + $0x4e3] ss:$-440 sm:$0x7] %vm3498_vm13, %v3514_v60   ;;  %5264 = vst.msk [vmem:[%s9846_s1 + $0x698] sm:$0x8] %vm3498_vm13, %v3514_v60   ;;  %v3608_v40 = vpop.permute.xlu0 %3607   ;;  %v3634_v47 = vpop.permute.xlu1 %3633   ;;  %vm3958_vm13 = vcmask 171080  }
 0x271   :  { %5265 = vst.msk [vmem:[%s9846_s1 + $0x3a0] ss:$-440 sm:$0x7] %vm3541_vm14, %v3540_v29   ;;  %5266 = vst.msk [vmem:[%s9846_s1 + $0x900] ss:$-312 sm:$0x18] %vm3541_vm14, %v3540_v29  }
 0x272   :  { %5267 = vst.msk [vmem:[%s9846_s1 + $0xb00] ss:$-440 sm:$0x60] %vm3541_vm14, %v3540_v29   ;;  %5268 = vst.msk [vmem:[%s9846_s1 + $0x5d1] sm:$0x80] %vm3541_vm14, %v3540_v29  }
 0x273   :  { %5273 = vst.msk [vmem:[%s9846_s1 + $0x4a0] ss:$-440 sm:$0x7] %vm3541_vm14, %v3574_v38   ;;  %5274 = vst.msk [vmem:[%s9846_s1 + $0xa00] ss:$-312 sm:$0x18] %vm3541_vm14, %v3574_v38  }
 0x274   :  { %5275 = vst.msk [vmem:[%s9846_s1 + $0xc00] ss:$-440 sm:$0x60] %vm3541_vm14, %v3574_v38   ;;  %5276 = vst.msk [vmem:[%s9846_s1 + $0x6d1] sm:$0x80] %vm3541_vm14, %v3574_v38   ;;  %v3660_v11 = vpop.permute.xlu0 %3659   ;;  %v3694_v8 = vpop.permute.xlu1 %3693   ;;  %vm3993_vm14 = vcmask 64512  }
 0x275   :  { %5269 = vst.msk [vmem:[%s9846_s1 + $0x3a0] ss:$-440 sm:$0x7] %vm3550_vm15, %v3540_v29   ;;  %5270 = vst.msk [vmem:[%s9846_s1 + $0x900] ss:$-312 sm:$0x18] %vm3550_vm15, %v3540_v29  }
 0x276   :  { %5271 = vst.msk [vmem:[%s9846_s1 + $0xb00] ss:$-440 sm:$0x60] %vm3550_vm15, %v3540_v29   ;;  %5272 = vst.msk [vmem:[%s9846_s1 + $0x5d1] sm:$0x80] %vm3550_vm15, %v3540_v29  }
 0x277   :  { %5277 = vst.msk [vmem:[%s9846_s1 + $0x4a0] ss:$-440 sm:$0x7] %vm3550_vm15, %v3574_v38   ;;  %5278 = vst.msk [vmem:[%s9846_s1 + $0xa00] ss:$-312 sm:$0x18] %vm3550_vm15, %v3574_v38  }
 0x278   :  { %5279 = vst.msk [vmem:[%s9846_s1 + $0xc00] ss:$-440 sm:$0x60] %vm3550_vm15, %v3574_v38   ;;  %5280 = vst.msk [vmem:[%s9846_s1 + $0x6d1] sm:$0x80] %vm3550_vm15, %v3574_v38   ;;  %v3728_v12 = vpop.permute.xlu0 %3727   ;;  %v3754_v48 = vpop.permute.xlu1 %3753   ;;  %vm3998_vm15 = vcmask 171072  }
 0x279   :  { %5281 = vst.msk [vmem:[%s9846_s1 + $0x225] ss:$-440 sm:$0x3] %vm3609_vm2, %v3608_v40   ;;  %5282 = vst.msk [vmem:[%s9846_s1 + $0x905] ss:$-440 sm:$0xc] %vm3609_vm2, %v3608_v40  }
 0x27a   :  { %5283 = vst.msk [vmem:[%s9846_s1 + $0x985] ss:$-440 sm:$0x30] %vm3609_vm2, %v3608_v40   ;;  %5284 = vst.msk [vmem:[%s9846_s1 + $0x1065] ss:$-440 sm:$0xc0] %vm3609_vm2, %v3608_v40  }
 0x27b   :  { %5289 = vst.msk [vmem:[%s9846_s1 + $0x325] ss:$-440 sm:$0x3] %vm3609_vm2, %v3634_v47   ;;  %5290 = vst.msk [vmem:[%s9846_s1 + $0xa05] ss:$-440 sm:$0xc] %vm3609_vm2, %v3634_v47  }
 0x27c   :  { %5285 = vst.msk [vmem:[%s9846_s1 + $0x225] ss:$-440 sm:$0x3] %vm3618_vm3, %v3608_v40   ;;  %5286 = vst.msk [vmem:[%s9846_s1 + $0x905] ss:$-440 sm:$0xc] %vm3618_vm3, %v3608_v40   ;;  %v3780_v56 = vpop.permute.xlu0 %3779   ;;  %v3814_v61 = vpop.permute.xlu1 %3813  }
 0x27d   :  { %5287 = vst.msk [vmem:[%s9846_s1 + $0x985] ss:$-440 sm:$0x30] %vm3618_vm3, %v3608_v40   ;;  %5288 = vst.msk [vmem:[%s9846_s1 + $0x1065] ss:$-440 sm:$0xc0] %vm3618_vm3, %v3608_v40  }
 0x27e   :  { %5291 = vst.msk [vmem:[%s9846_s1 + $0x325] ss:$-440 sm:$0x3] %vm3618_vm3, %v3634_v47   ;;  %5292 = vst.msk [vmem:[%s9846_s1 + $0xa05] ss:$-440 sm:$0xc] %vm3618_vm3, %v3634_v47  }
 0x27f   :  { %5293 = vst.msk [vmem:[%s9846_s1 + $0x1e2] ss:$-440 sm:$0x3] %vm3661_vm4, %v3660_v11   ;;  %5294 = vst.msk [vmem:[%s9846_s1 + $0x8c2] ss:$-440 sm:$0xc] %vm3661_vm4, %v3660_v11  }
 0x280   :  { %5295 = vst.msk [vmem:[%s9846_s1 + $0x942] ss:$-440 sm:$0x30] %vm3661_vm4, %v3660_v11   ;;  %5296 = vst.msk [vmem:[%s9846_s1 + $0x1022] ss:$-440 sm:$0xc0] %vm3661_vm4, %v3660_v11   ;;  %v3848_v63 = vpop.permute.xlu0 %3847   ;;  %v3874_v0 = vpop.permute.xlu1 %3873  }
 0x281   :  { %5301 = vst.msk [vmem:[%s9846_s1 + $0x2e2] ss:$-440 sm:$0x3] %vm3661_vm4, %v3694_v8   ;;  %5302 = vst.msk [vmem:[%s9846_s1 + $0x9c2] ss:$-440 sm:$0xc] %vm3661_vm4, %v3694_v8  }
 0x282   :  { %5303 = vst.msk [vmem:[%s9846_s1 + $0xa42] ss:$-440 sm:$0x30] %vm3661_vm4, %v3694_v8   ;;  %5304 = vst.msk [vmem:[%s9846_s1 + $0x1122] ss:$-440 sm:$0xc0] %vm3661_vm4, %v3694_v8  }
 0x283   :  { %5297 = vst.msk [vmem:[%s9846_s1 + $0x1e2] ss:$-440 sm:$0x3] %vm3670_vm5, %v3660_v11   ;;  %5298 = vst.msk [vmem:[%s9846_s1 + $0x8c2] ss:$-440 sm:$0xc] %vm3670_vm5, %v3660_v11  }
 0x284   :  { %5299 = vst.msk [vmem:[%s9846_s1 + $0x942] ss:$-440 sm:$0x30] %vm3670_vm5, %v3660_v11   ;;  %5300 = vst.msk [vmem:[%s9846_s1 + $0x1022] ss:$-440 sm:$0xc0] %vm3670_vm5, %v3660_v11   ;;  %v3900_v59 = vpop.permute.xlu0 %3899   ;;  %v3926_v26 = vpop.permute.xlu1 %3925  }
 0x285   :  { %5305 = vst.msk [vmem:[%s9846_s1 + $0x2e2] ss:$-440 sm:$0x3] %vm3670_vm5, %v3694_v8   ;;  %5306 = vst.msk [vmem:[%s9846_s1 + $0x9c2] ss:$-440 sm:$0xc] %vm3670_vm5, %v3694_v8  }
 0x286   :  { %5307 = vst.msk [vmem:[%s9846_s1 + $0xa42] ss:$-440 sm:$0x30] %vm3670_vm5, %v3694_v8   ;;  %5308 = vst.msk [vmem:[%s9846_s1 + $0x1122] ss:$-440 sm:$0xc0] %vm3670_vm5, %v3694_v8  }
 0x287   :  { %5309 = vst.msk [vmem:[%s9846_s1 + $0x67] ss:$1320 sm:$0x3] %vm3729_vm6, %v3728_v12   ;;  %5310 = vst.msk [vmem:[%s9846_s1 + $0x747] ss:$-440 sm:$0xc] %vm3729_vm6, %v3728_v12  }
 0x288   :  { %5311 = vst.msk [vmem:[%s9846_s1 - $0x13b9] ss:$1320 sm:$0x30] %vm3729_vm6, %v3728_v12   ;;  %5312 = vst.msk [vmem:[%s9846_s1 + $0xea7] ss:$-440 sm:$0xc0] %vm3729_vm6, %v3728_v12   ;;  %v3952_v27 = vpop.permute.xlu0 %3951   ;;  %v3970_v62 = vpop.permute.xlu1 %3969  }
 0x289   :  { %5317 = vst.msk [vmem:[%s9846_s1 + $0x167] ss:$1320 sm:$0x3] %vm3729_vm6, %v3754_v48   ;;  %5318 = vst.msk [vmem:[%s9846_s1 + $0x847] ss:$-440 sm:$0xc] %vm3729_vm6, %v3754_v48  }
 0x28a   :  { %5313 = vst.msk [vmem:[%s9846_s1 + $0x67] ss:$1320 sm:$0x3] %vm3738_vm0, %v3728_v12   ;;  %5314 = vst.msk [vmem:[%s9846_s1 + $0x747] ss:$-440 sm:$0xc] %vm3738_vm0, %v3728_v12  }
 0x28b   :  { %5315 = vst.msk [vmem:[%s9846_s1 - $0x13b9] ss:$1320 sm:$0x30] %vm3738_vm0, %v3728_v12   ;;  %5316 = vst.msk [vmem:[%s9846_s1 + $0xea7] ss:$-440 sm:$0xc0] %vm3738_vm0, %v3728_v12  }
 0x28c   :  { %5319 = vst.msk [vmem:[%s9846_s1 + $0x167] ss:$1320 sm:$0x3] %vm3738_vm0, %v3754_v48   ;;  %5320 = vst.msk [vmem:[%s9846_s1 + $0x847] ss:$-440 sm:$0xc] %vm3738_vm0, %v3754_v48   ;;  %v3992_v24 = vpop.permute.xlu0 %3991   ;;  %v4018_v6 = vpop.permute.xlu1 %4017  }
 0x28d   :  { %5321 = vst.msk [vmem:[%s9846_s1 + $0x24] ss:$1320 sm:$0x3] %vm3781_vm1, %v3780_v56   ;;  %5322 = vst.msk [vmem:[%s9846_s1 + $0x704] ss:$-440 sm:$0xc] %vm3781_vm1, %v3780_v56  }
 0x28e   :  { %5323 = vst.msk [vmem:[%s9846_s1 - $0x13fc] ss:$1320 sm:$0x30] %vm3781_vm1, %v3780_v56   ;;  %5324 = vst.msk [vmem:[%s9846_s1 + $0xe64] ss:$-440 sm:$0xc0] %vm3781_vm1, %v3780_v56  }
 0x28f   :  { %5329 = vst.msk [vmem:[%s9846_s1 + $0x124] ss:$1320 sm:$0x3] %vm3781_vm1, %v3814_v61   ;;  %5330 = vst.msk [vmem:[%s9846_s1 + $0x804] ss:$-440 sm:$0xc] %vm3781_vm1, %v3814_v61  }
 0x290   :  { %5331 = vst.msk [vmem:[%s9846_s1 - $0x12fc] ss:$1320 sm:$0x30] %vm3781_vm1, %v3814_v61   ;;  %5332 = vst.msk [vmem:[%s9846_s1 + $0xf64] ss:$-440 sm:$0xc0] %vm3781_vm1, %v3814_v61   ;;  %v4044_v18 = vpop.permute.xlu0 %4043   ;;  %v4070_v1 = vpop.permute.xlu1 %4069  }
 0x291   :  { %5325 = vst.msk [vmem:[%s9846_s1 + $0x24] ss:$1320 sm:$0x3] %vm3790_vm7, %v3780_v56   ;;  %5326 = vst.msk [vmem:[%s9846_s1 + $0x704] ss:$-440 sm:$0xc] %vm3790_vm7, %v3780_v56  }
 0x292   :  { %5327 = vst.msk [vmem:[%s9846_s1 - $0x13fc] ss:$1320 sm:$0x30] %vm3790_vm7, %v3780_v56   ;;  %5328 = vst.msk [vmem:[%s9846_s1 + $0xe64] ss:$-440 sm:$0xc0] %vm3790_vm7, %v3780_v56  }
 0x293   :  { %5333 = vst.msk [vmem:[%s9846_s1 + $0x124] ss:$1320 sm:$0x3] %vm3790_vm7, %v3814_v61   ;;  %5334 = vst.msk [vmem:[%s9846_s1 + $0x804] ss:$-440 sm:$0xc] %vm3790_vm7, %v3814_v61  }
 0x294   :  { %5335 = vst.msk [vmem:[%s9846_s1 - $0x12fc] ss:$1320 sm:$0x30] %vm3790_vm7, %v3814_v61   ;;  %5336 = vst.msk [vmem:[%s9846_s1 + $0xf64] ss:$-440 sm:$0xc0] %vm3790_vm7, %v3814_v61   ;;  %v4096_v3 = vpop.permute.xlu0 %4095   ;;  %v4130_v25 = vpop.permute.xlu1 %4129  }
 0x295   :  { %5337 = vst.msk [vmem:[%s9846_s1 + $0x61] ss:$1320 sm:$0x3] %vm3849_vm8, %v3848_v63   ;;  %5338 = vst.msk [vmem:[%s9846_s1 + $0x741] ss:$-440 sm:$0xc] %vm3849_vm8, %v3848_v63  }
 0x296   :  { %5339 = vst.msk [vmem:[%s9846_s1 - $0x13bf] ss:$1320 sm:$0x30] %vm3849_vm8, %v3848_v63   ;;  %5340 = vst.msk [vmem:[%s9846_s1 + $0xea1] ss:$-440 sm:$0xc0] %vm3849_vm8, %v3848_v63  }
 0x297   :  { %5345 = vst.msk [vmem:[%s9846_s1 + $0x161] ss:$1320 sm:$0x3] %vm3849_vm8, %v3874_v0   ;;  %5346 = vst.msk [vmem:[%s9846_s1 + $0x841] ss:$-440 sm:$0xc] %vm3849_vm8, %v3874_v0  }
 0x298   :  { %5341 = vst.msk [vmem:[%s9846_s1 + $0x61] ss:$1320 sm:$0x3] %vm3858_vm9, %v3848_v63   ;;  %5342 = vst.msk [vmem:[%s9846_s1 + $0x741] ss:$-440 sm:$0xc] %vm3858_vm9, %v3848_v63   ;;  %v4164_v10 = vpop.permute.xlu0 %4163   ;;  %v4190_v13 = vpop.permute.xlu1 %4189  }
 0x299   :  { %5343 = vst.msk [vmem:[%s9846_s1 - $0x13bf] ss:$1320 sm:$0x30] %vm3858_vm9, %v3848_v63   ;;  %5344 = vst.msk [vmem:[%s9846_s1 + $0xea1] ss:$-440 sm:$0xc0] %vm3858_vm9, %v3848_v63  }
 0x29a   :  { %5347 = vst.msk [vmem:[%s9846_s1 + $0x161] ss:$1320 sm:$0x3] %vm3858_vm9, %v3874_v0   ;;  %5348 = vst.msk [vmem:[%s9846_s1 + $0x841] ss:$-440 sm:$0xc] %vm3858_vm9, %v3874_v0  }
 0x29b   :  { %5349 = vst.msk [vmem:[%s9846_s1 + $0x546] ss:$-440 sm:$0xf] %vm3901_vm10, %v3900_v59   ;;  %5350 = vst.msk [vmem:[%s9846_s1 + $0xca6] ss:$-440 sm:$0xf0] %vm3901_vm10, %v3900_v59  }
 0x29c   :  { %5353 = vst.msk [vmem:[%s9846_s1 + $0x646] ss:$-440 sm:$0xf] %vm3901_vm10, %v3926_v26   ;;  %5354 = vst.msk [vmem:[%s9846_s1 + $0xda6] ss:$-440 sm:$0xf0] %vm3901_vm10, %v3926_v26  }
 0x29d   :  { %5351 = vst.msk [vmem:[%s9846_s1 + $0x546] ss:$-440 sm:$0xf] %vm3906_vm11, %v3900_v59   ;;  %5352 = vst.msk [vmem:[%s9846_s1 + $0xca6] ss:$-440 sm:$0xf0] %vm3906_vm11, %v3900_v59  }
 0x29e   :  { %5355 = vst.msk [vmem:[%s9846_s1 + $0x646] ss:$-440 sm:$0xf] %vm3906_vm11, %v3926_v26   ;;  %5356 = vst.msk [vmem:[%s9846_s1 + $0xda6] ss:$-440 sm:$0xf0] %vm3906_vm11, %v3926_v26   ;;  %v4216_v7 = vpop.permute.xlu0 %4215   ;;  %v4250_v43 = vpop.permute.xlu1 %4249  }
 0x29f   :  { %5357 = vst.msk [vmem:[%s9846_s1 + $0x583] ss:$-440 sm:$0xf] %vm3953_vm12, %v3952_v27   ;;  %5358 = vst.msk [vmem:[%s9846_s1 + $0xce3] ss:$-440 sm:$0xf0] %vm3953_vm12, %v3952_v27  }
 0x2a0   :  { %5361 = vst.msk [vmem:[%s9846_s1 + $0x683] ss:$-440 sm:$0xf] %vm3953_vm12, %v3970_v62   ;;  %vm4045_vm2 = vcmask 56320   ;;  %vm4054_vm3 = vcmask 171064   ;;  %vm4097_vm4 = vcmask 48128  }
 0x2a1   :  { %5359 = vst.msk [vmem:[%s9846_s1 + $0x583] ss:$-440 sm:$0xf] %vm3958_vm13, %v3952_v27   ;;  %5360 = vst.msk [vmem:[%s9846_s1 + $0xce3] ss:$-440 sm:$0xf0] %vm3958_vm13, %v3952_v27  }
 0x2a2   :  { %5362 = vst.msk [vmem:[%s9846_s1 + $0x683] ss:$-440 sm:$0xf] %vm3958_vm13, %v3970_v62   ;;  %vm4106_vm5 = vcmask 171056   ;;  %vm4165_vm6 = vcmask 39936   ;;  %vm4174_vm0 = vcmask 171048   ;;  %v4284_v44 = vpop.permute.xlu0 %4283   ;;  %v4310_v34 = vpop.permute.xlu1 %4309  }
 0x2a3   :  { %5363 = vst.msk [vmem:[%s9846_s1 + $0x540] ss:$-440 sm:$0xf] %vm3993_vm14, %v3992_v24   ;;  %5364 = vst.msk [vmem:[%s9846_s1 + $0xca0] ss:$-440 sm:$0xf0] %vm3993_vm14, %v3992_v24  }
 0x2a4   :  { %5367 = vst.msk [vmem:[%s9846_s1 + $0x640] ss:$-440 sm:$0xf] %vm3993_vm14, %v4018_v6   ;;  %5368 = vst.msk [vmem:[%s9846_s1 + $0xda0] ss:$-440 sm:$0xf0] %vm3993_vm14, %v4018_v6  }
 0x2a5   :  { %5365 = vst.msk [vmem:[%s9846_s1 + $0x540] ss:$-440 sm:$0xf] %vm3998_vm15, %v3992_v24   ;;  %5366 = vst.msk [vmem:[%s9846_s1 + $0xca0] ss:$-440 sm:$0xf0] %vm3998_vm15, %v3992_v24  }
 0x2a6   :  { %5369 = vst.msk [vmem:[%s9846_s1 + $0x640] ss:$-440 sm:$0xf] %vm3998_vm15, %v4018_v6   ;;  %5370 = vst.msk [vmem:[%s9846_s1 + $0xda0] ss:$-440 sm:$0xf0] %vm3998_vm15, %v4018_v6   ;;  %v4335_v20 = vpop.permute.xlu0 %4334   ;;  %v4369_v21 = vpop.permute.xlu1 %4368  }
 0x2a7   :  { %5371 = vst.msk [vmem:[%s9846_s1 + $0x3c5] ss:$-440 sm:$0x7] %vm4045_vm2, %v4044_v18   ;;  %5372 = vst.msk [vmem:[%s9846_s1 + $0x925] ss:$-312 sm:$0x18] %vm4045_vm2, %v4044_v18  }
 0x2a8   :  { %5373 = vst.msk [vmem:[%s9846_s1 + $0xb25] ss:$-440 sm:$0x60] %vm4045_vm2, %v4044_v18   ;;  %5374 = vst.msk [vmem:[%s9846_s1 + $0x5f6] sm:$0x80] %vm4045_vm2, %v4044_v18   ;;  %vm4217_vm1 = vcmask 31744  }
 0x2a9   :  { %5379 = vst.msk [vmem:[%s9846_s1 + $0x4c5] ss:$-440 sm:$0x7] %vm4045_vm2, %v4070_v1   ;;  %5380 = vst.msk [vmem:[%s9846_s1 + $0x67a] sm:$0x8] %vm4045_vm2, %v4070_v1   ;;  %vm4226_vm7 = vcmask 171040  }
 0x2aa   :  { %5375 = vst.msk [vmem:[%s9846_s1 + $0x3c5] ss:$-440 sm:$0x7] %vm4054_vm3, %v4044_v18   ;;  %5376 = vst.msk [vmem:[%s9846_s1 + $0x925] ss:$-312 sm:$0x18] %vm4054_vm3, %v4044_v18   ;;  %v4403_v17 = vpop.permute.xlu0 %4402   ;;  %v4429_v19 = vpop.permute.xlu1 %4428  }
 0x2ab   :  { %5377 = vst.msk [vmem:[%s9846_s1 + $0xb25] ss:$-440 sm:$0x60] %vm4054_vm3, %v4044_v18   ;;  %5378 = vst.msk [vmem:[%s9846_s1 + $0x5f6] sm:$0x80] %vm4054_vm3, %v4044_v18   ;;  %vm4285_vm8 = vcmask 23552  }
 0x2ac   :  { %5381 = vst.msk [vmem:[%s9846_s1 + $0x4c5] ss:$-440 sm:$0x7] %vm4054_vm3, %v4070_v1   ;;  %5382 = vst.msk [vmem:[%s9846_s1 + $0x67a] sm:$0x8] %vm4054_vm3, %v4070_v1   ;;  %vm4294_vm9 = vcmask 171032  }
 0x2ad   :  { %5383 = vst.msk [vmem:[%s9846_s1 + $0x382] ss:$-440 sm:$0x7] %vm4097_vm4, %v4096_v3   ;;  %5384 = vst.msk [vmem:[%s9846_s1 + $0x8e2] ss:$-312 sm:$0x18] %vm4097_vm4, %v4096_v3  }
 0x2ae   :  { %5385 = vst.msk [vmem:[%s9846_s1 + $0xae2] ss:$-440 sm:$0x60] %vm4097_vm4, %v4096_v3   ;;  %5386 = vst.msk [vmem:[%s9846_s1 + $0x5b3] sm:$0x80] %vm4097_vm4, %v4096_v3   ;;  %vm4336_vm10 = vcmask 15360  }
 0x2af   :  { %5391 = vst.msk [vmem:[%s9846_s1 + $0x482] ss:$-440 sm:$0x7] %vm4097_vm4, %v4130_v25   ;;  %5392 = vst.msk [vmem:[%s9846_s1 + $0x9e2] ss:$-312 sm:$0x18] %vm4097_vm4, %v4130_v25  }
 0x2b0   :  { %5393 = vst.msk [vmem:[%s9846_s1 + $0xbe2] ss:$-440 sm:$0x60] %vm4097_vm4, %v4130_v25   ;;  %5394 = vst.msk [vmem:[%s9846_s1 + $0x6b3] sm:$0x80] %vm4097_vm4, %v4130_v25   ;;  %vm4345_vm11 = vcmask 171024  }
 0x2b1   :  { %5387 = vst.msk [vmem:[%s9846_s1 + $0x382] ss:$-440 sm:$0x7] %vm4106_vm5, %v4096_v3   ;;  %5388 = vst.msk [vmem:[%s9846_s1 + $0x8e2] ss:$-312 sm:$0x18] %vm4106_vm5, %v4096_v3  }
 0x2b2   :  { %5389 = vst.msk [vmem:[%s9846_s1 + $0xae2] ss:$-440 sm:$0x60] %vm4106_vm5, %v4096_v3   ;;  %5390 = vst.msk [vmem:[%s9846_s1 + $0x5b3] sm:$0x80] %vm4106_vm5, %v4096_v3   ;;  %vm4404_vm12 = vcmask 7168  }
 0x2b3   :  { %5395 = vst.msk [vmem:[%s9846_s1 + $0x482] ss:$-440 sm:$0x7] %vm4106_vm5, %v4130_v25   ;;  %5396 = vst.msk [vmem:[%s9846_s1 + $0x9e2] ss:$-312 sm:$0x18] %vm4106_vm5, %v4130_v25  }
 0x2b4   :  { %5397 = vst.msk [vmem:[%s9846_s1 + $0xbe2] ss:$-440 sm:$0x60] %vm4106_vm5, %v4130_v25   ;;  %5398 = vst.msk [vmem:[%s9846_s1 + $0x6b3] sm:$0x80] %vm4106_vm5, %v4130_v25   ;;  %vm4413_vm13 = vcmask 171016  }
 0x2b5   :  { %5399 = vst.msk [vmem:[%s9846_s1 + $0x207] ss:$-440 sm:$0x3] %vm4165_vm6, %v4164_v10   ;;  %5400 = vst.msk [vmem:[%s9846_s1 + $0x8e7] ss:$-440 sm:$0xc] %vm4165_vm6, %v4164_v10  }
 0x2b6   :  { %5401 = vst.msk [vmem:[%s9846_s1 + $0x967] ss:$-440 sm:$0x30] %vm4165_vm6, %v4164_v10   ;;  %5402 = vst.msk [vmem:[%s9846_s1 + $0x1047] ss:$-440 sm:$0xc0] %vm4165_vm6, %v4164_v10  }
 0x2b7   :  { %5407 = vst.msk [vmem:[%s9846_s1 + $0x307] ss:$-440 sm:$0x3] %vm4165_vm6, %v4190_v13   ;;  %5408 = vst.msk [vmem:[%s9846_s1 + $0x9e7] ss:$-440 sm:$0xc] %vm4165_vm6, %v4190_v13  }
 0x2b8   :  { %5403 = vst.msk [vmem:[%s9846_s1 + $0x207] ss:$-440 sm:$0x3] %vm4174_vm0, %v4164_v10   ;;  %5404 = vst.msk [vmem:[%s9846_s1 + $0x8e7] ss:$-440 sm:$0xc] %vm4174_vm0, %v4164_v10  }
 0x2b9   :  { %5405 = vst.msk [vmem:[%s9846_s1 + $0x967] ss:$-440 sm:$0x30] %vm4174_vm0, %v4164_v10   ;;  %5406 = vst.msk [vmem:[%s9846_s1 + $0x1047] ss:$-440 sm:$0xc0] %vm4174_vm0, %v4164_v10  }
 0x2ba   :  { %5409 = vst.msk [vmem:[%s9846_s1 + $0x307] ss:$-440 sm:$0x3] %vm4174_vm0, %v4190_v13   ;;  %5410 = vst.msk [vmem:[%s9846_s1 + $0x9e7] ss:$-440 sm:$0xc] %vm4174_vm0, %v4190_v13  }
 0x2bb   :  { %5411 = vst.msk [vmem:[%s9846_s1 + $0x1c4] ss:$-440 sm:$0x3] %vm4217_vm1, %v4216_v7   ;;  %5412 = vst.msk [vmem:[%s9846_s1 + $0x8a4] ss:$-440 sm:$0xc] %vm4217_vm1, %v4216_v7  }
 0x2bc   :  { %5413 = vst.msk [vmem:[%s9846_s1 + $0x924] ss:$-440 sm:$0x30] %vm4217_vm1, %v4216_v7   ;;  %5414 = vst.msk [vmem:[%s9846_s1 + $0x1004] ss:$-440 sm:$0xc0] %vm4217_vm1, %v4216_v7  }
 0x2bd   :  { %5419 = vst.msk [vmem:[%s9846_s1 + $0x2c4] ss:$-440 sm:$0x3] %vm4217_vm1, %v4250_v43   ;;  %5420 = vst.msk [vmem:[%s9846_s1 + $0x9a4] ss:$-440 sm:$0xc] %vm4217_vm1, %v4250_v43  }
 0x2be   :  { %5421 = vst.msk [vmem:[%s9846_s1 + $0xa24] ss:$-440 sm:$0x30] %vm4217_vm1, %v4250_v43   ;;  %5422 = vst.msk [vmem:[%s9846_s1 + $0x1104] ss:$-440 sm:$0xc0] %vm4217_vm1, %v4250_v43  }
 0x2bf   :  { %5415 = vst.msk [vmem:[%s9846_s1 + $0x1c4] ss:$-440 sm:$0x3] %vm4226_vm7, %v4216_v7   ;;  %5416 = vst.msk [vmem:[%s9846_s1 + $0x8a4] ss:$-440 sm:$0xc] %vm4226_vm7, %v4216_v7  }
 0x2c0   :  { %5417 = vst.msk [vmem:[%s9846_s1 + $0x924] ss:$-440 sm:$0x30] %vm4226_vm7, %v4216_v7   ;;  %5418 = vst.msk [vmem:[%s9846_s1 + $0x1004] ss:$-440 sm:$0xc0] %vm4226_vm7, %v4216_v7  }
 0x2c1   :  { %5423 = vst.msk [vmem:[%s9846_s1 + $0x2c4] ss:$-440 sm:$0x3] %vm4226_vm7, %v4250_v43   ;;  %5424 = vst.msk [vmem:[%s9846_s1 + $0x9a4] ss:$-440 sm:$0xc] %vm4226_vm7, %v4250_v43  }
 0x2c2   :  { %5425 = vst.msk [vmem:[%s9846_s1 + $0xa24] ss:$-440 sm:$0x30] %vm4226_vm7, %v4250_v43   ;;  %5426 = vst.msk [vmem:[%s9846_s1 + $0x1104] ss:$-440 sm:$0xc0] %vm4226_vm7, %v4250_v43  }
 0x2c3   :  { %5427 = vst.msk [vmem:[%s9846_s1 + $0x201] ss:$-440 sm:$0x3] %vm4285_vm8, %v4284_v44   ;;  %5428 = vst.msk [vmem:[%s9846_s1 + $0x8e1] ss:$-440 sm:$0xc] %vm4285_vm8, %v4284_v44  }
 0x2c4   :  { %5429 = vst.msk [vmem:[%s9846_s1 + $0x961] ss:$-440 sm:$0x30] %vm4285_vm8, %v4284_v44   ;;  %5430 = vst.msk [vmem:[%s9846_s1 + $0x1041] ss:$-440 sm:$0xc0] %vm4285_vm8, %v4284_v44  }
 0x2c5   :  { %5435 = vst.msk [vmem:[%s9846_s1 + $0x301] ss:$-440 sm:$0x3] %vm4285_vm8, %v4310_v34   ;;  %5436 = vst.msk [vmem:[%s9846_s1 + $0x9e1] ss:$-440 sm:$0xc] %vm4285_vm8, %v4310_v34  }
 0x2c6   :  { %5431 = vst.msk [vmem:[%s9846_s1 + $0x201] ss:$-440 sm:$0x3] %vm4294_vm9, %v4284_v44   ;;  %5432 = vst.msk [vmem:[%s9846_s1 + $0x8e1] ss:$-440 sm:$0xc] %vm4294_vm9, %v4284_v44  }
 0x2c7   :  { %5433 = vst.msk [vmem:[%s9846_s1 + $0x961] ss:$-440 sm:$0x30] %vm4294_vm9, %v4284_v44   ;;  %5434 = vst.msk [vmem:[%s9846_s1 + $0x1041] ss:$-440 sm:$0xc0] %vm4294_vm9, %v4284_v44  }
 0x2c8   :  { %5437 = vst.msk [vmem:[%s9846_s1 + $0x301] ss:$-440 sm:$0x3] %vm4294_vm9, %v4310_v34   ;;  %5438 = vst.msk [vmem:[%s9846_s1 + $0x9e1] ss:$-440 sm:$0xc] %vm4294_vm9, %v4310_v34  }
 0x2c9   :  { %5439 = vst.msk [vmem:[%s9846_s1 + $0x6] ss:$1320 sm:$0x3] %vm4336_vm10, %v4335_v20   ;;  %5440 = vst.msk [vmem:[%s9846_s1 + $0x6e6] ss:$-440 sm:$0xc] %vm4336_vm10, %v4335_v20  }
 0x2ca   :  { %5441 = vst.msk [vmem:[%s9846_s1 - $0x141a] ss:$1320 sm:$0x30] %vm4336_vm10, %v4335_v20   ;;  %5442 = vst.msk [vmem:[%s9846_s1 + $0xe46] ss:$-440 sm:$0xc0] %vm4336_vm10, %v4335_v20  }
 0x2cb   :  { %5447 = vst.msk [vmem:[%s9846_s1 + $0x106] ss:$1320 sm:$0x3] %vm4336_vm10, %v4369_v21   ;;  %5448 = vst.msk [vmem:[%s9846_s1 + $0x7e6] ss:$-440 sm:$0xc] %vm4336_vm10, %v4369_v21  }
 0x2cc   :  { %5449 = vst.msk [vmem:[%s9846_s1 - $0x131a] ss:$1320 sm:$0x30] %vm4336_vm10, %v4369_v21   ;;  %5450 = vst.msk [vmem:[%s9846_s1 + $0xf46] ss:$-440 sm:$0xc0] %vm4336_vm10, %v4369_v21  }
 0x2cd   :  { %5443 = vst.msk [vmem:[%s9846_s1 + $0x6] ss:$1320 sm:$0x3] %vm4345_vm11, %v4335_v20   ;;  %5444 = vst.msk [vmem:[%s9846_s1 + $0x6e6] ss:$-440 sm:$0xc] %vm4345_vm11, %v4335_v20  }
 0x2ce   :  { %5445 = vst.msk [vmem:[%s9846_s1 - $0x141a] ss:$1320 sm:$0x30] %vm4345_vm11, %v4335_v20   ;;  %5446 = vst.msk [vmem:[%s9846_s1 + $0xe46] ss:$-440 sm:$0xc0] %vm4345_vm11, %v4335_v20  }
 0x2cf   :  { %5451 = vst.msk [vmem:[%s9846_s1 + $0x106] ss:$1320 sm:$0x3] %vm4345_vm11, %v4369_v21   ;;  %5452 = vst.msk [vmem:[%s9846_s1 + $0x7e6] ss:$-440 sm:$0xc] %vm4345_vm11, %v4369_v21  }
 0x2d0   :  { %5453 = vst.msk [vmem:[%s9846_s1 - $0x131a] ss:$1320 sm:$0x30] %vm4345_vm11, %v4369_v21   ;;  %5454 = vst.msk [vmem:[%s9846_s1 + $0xf46] ss:$-440 sm:$0xc0] %vm4345_vm11, %v4369_v21  }
 0x2d1   :  { %5455 = vst.msk [vmem:[%s9846_s1 + $0x43] ss:$1320 sm:$0x3] %vm4404_vm12, %v4403_v17   ;;  %5456 = vst.msk [vmem:[%s9846_s1 + $0x723] ss:$-440 sm:$0xc] %vm4404_vm12, %v4403_v17  }
 0x2d2   :  { %5457 = vst.msk [vmem:[%s9846_s1 - $0x13dd] ss:$1320 sm:$0x30] %vm4404_vm12, %v4403_v17   ;;  %5458 = vst.msk [vmem:[%s9846_s1 + $0xe83] ss:$-440 sm:$0xc0] %vm4404_vm12, %v4403_v17  }
 0x2d3   :  { %5463 = vst.msk [vmem:[%s9846_s1 + $0x143] ss:$1320 sm:$0x3] %vm4404_vm12, %v4429_v19   ;;  %5464 = vst.msk [vmem:[%s9846_s1 + $0x823] ss:$-440 sm:$0xc] %vm4404_vm12, %v4429_v19  }
 0x2d4   :  { %5459 = vst.msk [vmem:[%s9846_s1 + $0x43] ss:$1320 sm:$0x3] %vm4413_vm13, %v4403_v17   ;;  %5460 = vst.msk [vmem:[%s9846_s1 + $0x723] ss:$-440 sm:$0xc] %vm4413_vm13, %v4403_v17  }
 0x2d5   :  { %5461 = vst.msk [vmem:[%s9846_s1 - $0x13dd] ss:$1320 sm:$0x30] %vm4413_vm13, %v4403_v17   ;;  %5462 = vst.msk [vmem:[%s9846_s1 + $0xe83] ss:$-440 sm:$0xc0] %vm4413_vm13, %v4403_v17  }
 0x2d6   :  { %5465 = vst.msk [vmem:[%s9846_s1 + $0x143] ss:$1320 sm:$0x3] %vm4413_vm13, %v4429_v19   ;;  %5466 = vst.msk [vmem:[%s9846_s1 + $0x823] ss:$-440 sm:$0xc] %vm4413_vm13, %v4429_v19  }

// kernel: _cnn_forward.1
= control target key start
LH: loop header
LB: loop body
LE: loop exit
PB: predicated region body
PF: predicated region fallthrough
CT: control target
= control target key end

     0   :  { %s11283_s0 = inlined_call_operand.vmem [shape: f32[21,876], index: 0, kind: input, shape index: {}]   ;;  %s11284_s1 = inlined_call_operand.vmem [shape: f32[21,876], index: 1, kind: input, shape index: {}]   ;;  %s11285_s2 = inlined_call_operand.vmem [shape: f32[6,21], index: 2, kind: input, shape index: {}]   ;;  %s11286_s3 = inlined_call_operand.vmem [shape: f32[6,1], index: 3, kind: input, shape index: {}]   ;;  %s11287_s4 = inlined_call_operand.vmem [shape: f32[6,1], index: 4, kind: input, shape index: {}]   ;;  %s11288_s5 = inlined_call_operand.vmem [shape: f32[6,1], index: 5, kind: input, shape index: {}]   ;;  %s11289_s6 = inlined_call_operand.vmem [shape: f32[16,66], index: 6, kind: input, shape index: {}]   ;;  %s11290_s7 = inlined_call_operand.vmem [shape: f32[16,1], index: 7, kind: input, shape index: {}]   ;;  %s11291_s8 = inlined_call_operand.vmem [shape: f32[16,1], index: 8, kind: input, shape index: {}]   ;;  %s11292_s9 = inlined_call_operand.vmem [shape: f32[16,1], index: 9, kind: input, shape index: {}]   ;;  %s11293_s10 = inlined_call_operand.vmem [shape: f32[176,256], index: 10, kind: input, shape index: {}]   ;;  %s11294_s11 = inlined_call_operand.vmem [shape: f32[1,256], index: 11, kind: input, shape index: {}]   ;;  %s11295_s12 = inlined_call_operand.vmem [shape: f32[1,256], index: 12, kind: input, shape index: {}]   ;;  %s11296_s13 = inlined_call_operand.vmem [shape: f32[1,256], index: 13, kind: input, shape index: {}]   ;;  %s11297_s14 = inlined_call_operand.vmem [shape: f32[256,120], index: 14, kind: input, shape index: {}]   ;;  %s11298_s15 = inlined_call_operand.vmem [shape: f32[1,120], index: 15, kind: input, shape index: {}]   ;;  %s11299_s16 = inlined_call_operand.vmem [shape: f32[120,84], index: 16, kind: input, shape index: {}]   ;;  %s11300_s17 = inlined_call_operand.vmem [shape: f32[1,84], index: 17, kind: input, shape index: {}]   ;;  %s11301_s18 = inlined_call_operand.vmem [shape: f32[84,5], index: 18, kind: input, shape index: {}]   ;;  %s11302_s19 = inlined_call_operand.vmem [shape: f32[1,5], index: 19, kind: input, shape index: {}]   ;;  %s11303_s20 = inlined_call_operand.hbm [shape: f32[4,5], index: 20, kind: output, shape index: {}]  }
   0x1   :  { %11405 = sst [smem:[#allocation23_spill]] %s11283_s0 }
   0x2   :  { %11406 = sst [smem:[#allocation24_spill]] %s11284_s1 }
   0x3   :  { %11407 = sst [smem:[#allocation25_spill]] %s11285_s2 }
   0x4   :  { %11408 = sst [smem:[#allocation26_spill]] %s11286_s3 }
   0x5   :  { %11409 = sst [smem:[#allocation27_spill]] %s11287_s4 }
   0x6   :  { %s11410_s23 = sld [smem:[#allocation23_spill]]  ;;  %v11338_v7 = vmov 0.0   ;;  %vm98_vm0 = vcmask 1044480   ;;  %v8367_v13 = vmov 0   ;;  %s11411_s28 = sld [smem:[#allocation25_spill]]  ;;  %vm94_vm1 = vcmask 171008  }
   0x7   :  { %184 = vmatprep.mubr.f32.mxu0 %v11338_v7  ;;  %255 = vmatprep.mubr.f32.mxu1 %v11338_v7  ;;  %s11412_s22 = sld [smem:[#allocation24_spill]]  ;;  %v11336_v30 = vmov 0.0|0.0   ;;  %vm11306_vm2 = vmmov 0   ;;  %s11413_s4 = sld [smem:[#allocation26_spill]] }
   0x8   :  { %8324 = vset.pattern.permute.xlu0 %v8367_v13  ;;  %8325 = vset.pattern.permute.xlu1 %v8367_v13 }
   0xc   :  { %v68_v0 = vld [vmem:[%s11410_s23 + $0x8] sm:$0xff]  ;;  %v75_v1 = vld [vmem:[%s11410_s23 + $0x40] sm:$0xff]  ;;  %v70_v2 = vld [vmem:[%s11410_s23 + $0x18] sm:$0xff] }
   0xd   :  { %v7812_v3 = vpack.c.bf16 %v75_v1, %v68_v0  ;;  %v77_v4 = vld [vmem:[%s11410_s23 + $0x50] sm:$0xff]  ;;  %v67_v5 = vld [vmem:[%s11410_s23] sm:$0xff]  ;;  %v74_v6 = vld [vmem:[%s11410_s23 + $0x38] sm:$0xff] }
   0xe   :  { %v7816_v8 = vpack.c.bf16 %v77_v4, %v70_v2  ;;  %v7814_v9 = vpack.c.bf16 %v74_v6, %v67_v5  ;;  %v69_v10 = vld [vmem:[%s11410_s23 + $0x10] sm:$0xff]  ;;  %v76_v11 = vld [vmem:[%s11410_s23 + $0x48] sm:$0xff]  ;;  %v82_v12 = vld [vmem:[%s11410_s23 + $0x78] sm:$0x1f] }
   0xf   :  { %7813 = vmatprep.subr.bf16.mxu0 %v7812_v3  ;;  %v7818_v14 = vpack.c.bf16 %v76_v11, %v69_v10  ;;  %v84_v15 = vld [vmem:[%s11410_s23 + $0x88] sm:$0x1f]  ;;  %v81_v16 = vld [vmem:[%s11410_s23 + $0x70] sm:$0x1f]  ;;  %v79_v18 = vld [vmem:[%s11410_s23 + $0x60] sm:$0xff] }
  0x10   :  { %7817 = vmatprep.subr.bf16.mxu1 %v7816_v8  ;;  %7815 = vmatpush1.bf16.msra.mxu0 %v7814_v9  ;;  %v72_v17 = vld [vmem:[%s11410_s23 + $0x28] sm:$0xff]  ;;  %v71_v19 = vld [vmem:[%s11410_s23 + $0x20] sm:$0xff]  ;;  %v78_v20 = vld [vmem:[%s11410_s23 + $0x58] sm:$0xff] }
  0x11   :  { %7819 = vmatpush1.bf16.msra.mxu1 %v7818_v14  ;;  %6876 = vmatprep.subr.msk.mxu0 %vm98_vm0, %v82_v12  ;;  %v73_v21 = vld [vmem:[%s11410_s23 + $0x30] sm:$0xff]  ;;  %v83_v22 = vld [vmem:[%s11410_s23 + $0x80] sm:$0x1f]  ;;  %v7820_v24 = vpack.c.bf16 %v79_v18, %v72_v17  ;;  %v80_v25 = vld [vmem:[%s11410_s23 + $0x68] sm:$0xff]  ;;  %v7822_v26 = vpack.c.bf16 %v78_v20, %v71_v19 }
  0x12   :  { %6879 = vmatprep.subr.msk.mxu1 %vm98_vm0, %v84_v15  ;;  %v8579_v23 = vld [vmem:[%s11411_s28] sm:$0x3f]  ;;  %v7825_v27 = vpack.c.bf16 %v80_v25, %v73_v21  ;;  %v86_v28 = vld [vmem:[%s11410_s23 + $0x98] sm:$0x1f]  ;;  %v404_v29 = vld [vmem:[%s11412_s22 + $0x8] sm:$0xff] }
  0x13   :  { %v411_v31 = vld [vmem:[%s11412_s22 + $0x40] sm:$0xff]  ;;  %v406_v32 = vld [vmem:[%s11412_s22 + $0x18] sm:$0xff]  ;;  %v413_v33 = vld [vmem:[%s11412_s22 + $0x50] sm:$0xff] }
  0x14   :  { %6877 = vmatpush1.msk.msra.mxu0 %vm98_vm0, %v81_v16  ;;  %v403_v34 = vld [vmem:[%s11412_s22] sm:$0xff]  ;;  %v410_v35 = vld [vmem:[%s11412_s22 + $0x38] sm:$0xff]  ;;  %v85_v36 = vld [vmem:[%s11410_s23 + $0x90] sm:$0x1f]  ;;  %v7827_v40 = vpack.c.bf16 %v411_v31, %v404_v29  ;;  %v7831_v41 = vpack.c.bf16 %v413_v33, %v406_v32 }
  0x15   :  { %6880 = vmatpush1.msk.msra.mxu1 %vm98_vm0, %v83_v22  ;;  %6878 = vmatmul.mubr.msk.f32.vlgmr.msra.gmra.mrb[0].mxu0 %vm94_vm1, %v8579_v23  ;;  %v405_v37 = vld [vmem:[%s11412_s22 + $0x10] sm:$0xff]  ;;  %v412_v38 = vld [vmem:[%s11412_s22 + $0x48] sm:$0xff]  ;;  %v87_v39 = vld [vmem:[%s11410_s23 + $0xa0] sm:$0x1f]  ;;  %v7829_v42 = vpack.c.bf16 %v410_v35, %v403_v34 }
  0x16   :  { %7821 = vmatprep.subr.bf16.mxu0 %v7820_v24  ;;  %7824 = vmatprep.subr.bf16.mxu1 %v11336_v30  ;;  %v88_v43 = vld [vmem:[%s11413_s4] sm:$0x3f] }
  0x17   :  { %6881 = vmatmul.mubr.msk.f32.vlgmr.msra.gmra.mrb[0].mxu1 %vm94_vm1, %v8579_v23  ;;  %7823 = vmatpush1.bf16.msra.mxu0 %v7822_v26 }
  0x18   :  { %7826 = vmatpush3.bf16.msra.mxu1 %v7825_v27  ;;  %6882 = vmatprep.subr.msk.mxu0 %vm98_vm0, %v86_v28 }
  0x19   :  { %7520 = vmatprep.subr.mxu1 %v11338_v7  ;;  %326 = vmatprep.mubr.f32.mxu0 %v11338_v7 }
  0x1a   :  { %7522 = vmatprep.mubr.msk.f32.mxu1 %vm11306_vm2, %v11338_v7 }
  0x1b   :  { %25 = vsyncpa [#allocation6], 0  ;;  %6883 = vmatpush1.msk.msra.mxu0 %vm98_vm0, %v85_v36  ;;  %v7833_v44 = vpack.c.bf16 %v412_v38, %v405_v37  ;;  %91 = vperm.xlu0 %8324, %v88_v43   ;;  %v418_v45 = vld [vmem:[%s11412_s22 + $0x78] sm:$0x1f]  ;;  %v420_v46 = vld [vmem:[%s11412_s22 + $0x88] sm:$0x1f] }
  0x1c   :  { %7521 = vmatpush3.msk.msra.mxu1 %vm98_vm0, %v87_v39  ;;  %6884 = vmatmul.mubr.msk.f32.vlgmr.msra.gmra.mrb[2].mxu0 %vm94_vm1, %v8579_v23  ;;  %v408_v47 = vld [vmem:[%s11412_s22 + $0x28] sm:$0xff]  ;;  %v415_v48 = vld [vmem:[%s11412_s22 + $0x60] sm:$0xff]  ;;  %v414_v50 = vld [vmem:[%s11412_s22 + $0x58] sm:$0xff]  ;;  %vm11309_vm3 = vcmask 1045504   ;;  %vm740_vm4 = vcmask 881664   ;;  %s11416_s4 = sld [smem:[#allocation27_spill]] }
  0x1d   :  { %7828 = vmatprep.subr.bf16.mxu0 %v7827_v40  ;;  %7832 = vmatprep.subr.bf16.mxu1 %v7831_v41  ;;  %v407_v49 = vld [vmem:[%s11412_s22 + $0x20] sm:$0xff]  ;;  %v417_v51 = vld [vmem:[%s11412_s22 + $0x70] sm:$0x1f]  ;;  %v416_v53 = vld [vmem:[%s11412_s22 + $0x68] sm:$0xff]  ;;  %v7835_v55 = vpack.c.bf16 %v415_v48, %v408_v47  ;;  %vm11308_vm5 = vcmask 5120   ;;  %s8372_s30 = smov 1  }
  0x1e   :  { %7523 = vmatmul.mubr.msk.f32.vlgmr.msra.gmra.mrb[2].mxu1 %vm94_vm1, %v8579_v23  ;;  %7830 = vmatpush1.bf16.msra.mxu0 %v7829_v42  ;;  %v409_v52 = vld [vmem:[%s11412_s22 + $0x30] sm:$0xff]  ;;  %v419_v54 = vld [vmem:[%s11412_s22 + $0x80] sm:$0x1f]  ;;  %v7837_v56 = vpack.c.bf16 %v414_v50, %v407_v49  ;;  %v422_v58 = vld [vmem:[%s11412_s22 + $0x98] sm:$0x1f]  ;;  %s8373_s1 = smov 122  }
  0x1f   :  { %7834 = vmatpush1.bf16.msra.mxu1 %v7833_v44  ;;  %6887 = vmatprep.subr.msk.mxu0 %vm98_vm0, %v418_v45  ;;  %v7840_v57 = vpack.c.bf16 %v416_v53, %v409_v52  ;;  %v421_v59 = vld [vmem:[%s11412_s22 + $0x90] sm:$0x1f]  ;;  %v423_v60 = vld [vmem:[%s11412_s22 + $0xa0] sm:$0x1f]  ;;  %s8374_s25 = smov 116   ;;  %s8376_s3 = smov 68  }
  0x20   :  { %6890 = vmatprep.subr.msk.mxu1 %vm98_vm0, %v420_v46  ;;  %509 = vmatprep.mubr.f32.mxu0 %v11338_v7  ;;  %s8377_s26 = smov 108   ;;  %s8378_s27 = smov 110  }
  0x21   :  { %580 = vmatprep.mubr.f32.mxu1 %v11338_v7  ;;  %s8379_s22 = smov 104   ;;  %s8380_s28 = smov 88  }
  0x22   :  { %6888 = vmatpush1.msk.msra.mxu0 %vm98_vm0, %v417_v51  ;;  %s8382_s23 = smov 98   ;;  %s8383_s29 = smov 48  }
  0x23   :  { %6891 = vmatpush1.msk.msra.mxu1 %vm98_vm0, %v419_v54  ;;  %6889 = vmatmul.mubr.msk.f32.vlgmr.msra.gmra.mrb[4].mxu0 %vm94_vm1, %v8579_v23  ;;  %s8385_s0 = smov 92   ;;  %s8386_s21 = smov 86  }
  0x24   :  { %6892 = vmatmul.mubr.msk.f32.vlgmr.msra.gmra.mrb[4].mxu1 %vm94_vm1, %v8579_v23  ;;  %7836 = vmatprep.subr.bf16.mxu0 %v7835_v55  ;;  %s8387_s24 = smov 96   ;;  %s8388_s2 = smov 80  }
  0x25   :  { %7839 = vmatprep.subr.bf16.mxu1 %v11336_v30  ;;  %7838 = vmatpush1.bf16.msra.mxu0 %v7837_v56 }
  0x26   :  { %7841 = vmatpush3.bf16.msra.mxu1 %v7840_v57  ;;  %6893 = vmatprep.subr.msk.mxu0 %vm98_vm0, %v422_v58 }
  0x27   :  { %7529 = vmatprep.subr.mxu1 %v11338_v7  ;;  %651 = vmatprep.mubr.f32.mxu0 %v11338_v7 }
  0x28   :  { %7531 = vmatprep.mubr.msk.f32.mxu1 %vm11306_vm2, %v11338_v7 }
  0x29   :  { %6894 = vmatpush1.msk.msra.mxu0 %vm98_vm0, %v421_v59 }
  0x2a   :  { %7530 = vmatpush3.msk.msra.mxu1 %vm98_vm0, %v423_v60  ;;  %6895 = vmatmul.mubr.msk.f32.vlgmr.msra.gmra.mrb[6].mxu0 %vm94_vm1, %v8579_v23 }
  0x2b   :  { %7532 = vmatmul.mubr.msk.f32.vlgmr.msra.gmra.mrb[6].mxu1 %vm94_vm1, %v8579_v23 }
  0x9a   :  { %v8699_v61 = vpop.permute.xlu0 %91 }
  0xe8   :  { %v186_v62 = vpop.f32.mrb[0].mxu0 }
  0xe9   :  { %v8702_v63 = vadd.f32 %v186_v62, %v8699_v61  ;;  %v188_v0 = vpop.f32.mrb[1].mxu0 }
  0xea   :  { %v8705_v1 = vadd.f32 %v188_v0, %v8699_v61  ;;  %v257_v2 = vpop.f32.mrb[0].mxu1 }
  0xeb   :  { %v729_v3 = vsel %vm11309_vm3, %v8702_v63, 0.0  ;;  %v761_v4 = vmul.f32 %v8702_v63, %v8702_v63  ;;  %v8712_v5 = vadd.f32 %v257_v2, %v8699_v61  ;;  %v259_v6 = vpop.f32.mrb[1].mxu1 }
  0xec   :  { %v730_v8 = vsel %vm11309_vm3, %v8705_v1, 0.0  ;;  %v762_v9 = vmul.f32 %v8705_v1, %v8705_v1  ;;  %v8719_v10 = vadd.f32 %v259_v6, %v8699_v61 }
  0xed   :  { %v731_v11 = vadd.f32 %v730_v8, %v729_v3  ;;  %v768_v12 = vsel %vm11309_vm3, %v761_v4, 0.0  ;;  %v732_v13 = vsel %vm11309_vm3, %v8712_v5, 0.0  ;;  %v763_v14 = vmul.f32 %v8712_v5, %v8712_v5 }
  0xee   :  { %v769_v15 = vsel %vm11309_vm3, %v762_v9, 0.0  ;;  %v734_v16 = vsel %vm11309_vm3, %v8719_v10, 0.0  ;;  %v764_v17 = vmul.f32 %v8719_v10, %v8719_v10 }
  0xef   :  { %v770_v18 = vadd.f32 %v769_v15, %v768_v12  ;;  %v733_v19 = vadd.f32 %v732_v13, %v731_v11  ;;  %v771_v20 = vsel %vm11309_vm3, %v763_v14, 0.0  ;;  %v328_v21 = vpop.f32.mrb[2].mxu0 }
  0xf0   :  { %v8733_v22 = vadd.f32 %v328_v21, %v8699_v61  ;;  %v330_v23 = vpop.f32.mrb[3].mxu0  ;;  %v773_v24 = vsel %vm11309_vm3, %v764_v17, 0.0 }
  0xf1   :  { %v735_v25 = vadd.f32 %v734_v16, %v733_v19  ;;  %v8737_v26 = vadd.f32 %v330_v23, %v8699_v61  ;;  %v399_v27 = vpop.f32.mrb[2].mxu1  ;;  %v772_v28 = vadd.f32 %v771_v20, %v770_v18 }
  0xf2   :  { %v736_v29 = vsel %vm11309_vm3, %v8733_v22, 0.0  ;;  %v765_v31 = vmul.f32 %v8733_v22, %v8733_v22  ;;  %v8744_v32 = vadd.f32 %v399_v27, %v8699_v61  ;;  %v7524_v33 = vpop.f32.mrb[3].mxu1 }
  0xf3   :  { %v737_v34 = vadd.f32 %v736_v29, %v735_v25  ;;  %v766_v35 = vmul.f32 %v8737_v26, %v8737_v26  ;;  %v774_v36 = vadd.f32 %v773_v24, %v772_v28  ;;  %v738_v37 = vsel %vm11309_vm3, %v8737_v26, 0.0 }
  0xf4   :  { %11414 = vst [vmem:[#allocation8_spill] sm:$0xff] %v8744_v32  ;;  %v767_v38 = vmul.f32 %v8744_v32, %v8744_v32  ;;  %v775_v39 = vsel %vm11309_vm3, %v765_v31, 0.0  ;;  %v741_v43 = vsel %vm740_vm4, %v8744_v32, 0.0 }
  0xf5   :  { %v739_v40 = vadd.f32 %v738_v37, %v737_v34  ;;  %v776_v41 = vadd.f32 %v775_v39, %v774_v36  ;;  %v777_v44 = vsel %vm11309_vm3, %v766_v35, 0.0 }
  0xf6   :  { %v511_v42 = vpop.f32.mrb[4].mxu0  ;;  %v779_v53 = vsel %vm740_vm4, %v767_v38, 0.0 }
  0xf7   :  { %v8757_v45 = vadd.f32 %v511_v42, %v8699_v61  ;;  %v582_v46 = vpop.f32.mrb[4].mxu1  ;;  %v513_v47 = vpop.f32.mrb[5].mxu0  ;;  %v742_v48 = vadd.f32 %v741_v43, %v739_v40  ;;  %v778_v49 = vadd.f32 %v777_v44, %v776_v41 }
  0xf8   :  { %v8760_v50 = vadd.f32 %v582_v46, %v8699_v61  ;;  %v8763_v51 = vadd.f32 %v513_v47, %v8699_v61  ;;  %v584_v52 = vpop.f32.mrb[5].mxu1 }
  0xf9   :  { %v745_v54 = vsel %vm11309_vm3, %v8757_v45, 0.0  ;;  %v783_v55 = vmul.f32 %v8757_v45, %v8757_v45  ;;  %v8771_v56 = vadd.f32 %v584_v52, %v8699_v61  ;;  %743 = vadd.xlane.f32.xlu0 %v742_v48  ;;  %v780_v57 = vadd.f32 %v779_v53, %v778_v49 }
  0xfa   :  { %v785_v58 = vmul.f32 %v8760_v50, %v8760_v50  ;;  %v746_v59 = vsel %vm11309_vm3, %v8763_v51, 0.0  ;;  %v784_v60 = vmul.f32 %v8763_v51, %v8763_v51  ;;  %v748_v2 = vsel %vm11309_vm3, %v8760_v50, 0.0 }
  0xfb   :  { %v790_v62 = vsel %vm11309_vm3, %v783_v55, 0.0  ;;  %v747_v0 = vadd.f32 %v746_v59, %v745_v54  ;;  %781 = vadd.xlane.f32.xlu1 %v780_v57  ;;  %v786_v8 = vmul.f32 %v8771_v56, %v8771_v56  ;;  %v750_v12 = vsel %vm11309_vm3, %v8771_v56, 0.0  ;;  %v813_v55 = vld [vmem:[%s11416_s4] sm:$0x3f]  ;;  %s8381_s4 = smov 28  }
  0xfc   :  { %v791_v3 = vsel %vm11309_vm3, %v784_v60, 0.0  ;;  %v793_v11 = vsel %vm11309_vm3, %v785_v58, 0.0  ;;  %v815_v59 = vld [vmem:[%s11288_s5] sm:$0x3f]  ;;  %s8370_s5 = smov 127  }
  0xfd   :  { %v792_v4 = vadd.f32 %v791_v3, %v790_v62  ;;  %v749_v6 = vadd.f32 %v748_v2, %v747_v0  ;;  %v653_v9 = vpop.f32.mrb[6].mxu0  ;;  %v795_v24 = vsel %vm11309_vm3, %v786_v8, 0.0 }
  0xfe   :  { %v8789_v13 = vadd.f32 %v653_v9, %v8699_v61  ;;  %v724_v14 = vpop.f32.mrb[6].mxu1  ;;  %v655_v15 = vpop.f32.mrb[7].mxu0 }
  0xff   :  { %v751_v16 = vadd.f32 %v750_v12, %v749_v6  ;;  %v8792_v17 = vadd.f32 %v655_v15, %v8699_v61  ;;  %v7533_v18 = vpop.f32.mrb[7].mxu1  ;;  %v794_v19 = vadd.f32 %v793_v11, %v792_v4  ;;  %v8799_v23 = vadd.f32 %v724_v14, %v8699_v61 }
 0x100   :  { %v752_v20 = vsel %vm11309_vm3, %v8789_v13, 0.0  ;;  %v787_v21 = vmul.f32 %v8789_v13, %v8789_v13  ;;  %v856_v6 = vlaneseq }
 0x101   :  { %11415 = vst [vmem:[#allocation9_spill] sm:$0xff] %v8799_v23  ;;  %v788_v25 = vmul.f32 %v8792_v17, %v8792_v17  ;;  %v753_v27 = vadd.f32 %v752_v20, %v751_v16  ;;  %v754_v28 = vsel %vm11309_vm3, %v8792_v17, 0.0  ;;  %v796_v29 = vadd.f32 %v795_v24, %v794_v19 }
 0x102   :  { %v797_v31 = vsel %vm11309_vm3, %v787_v21, 0.0  ;;  %v756_v34 = vsel %vm740_vm4, %v8799_v23, 0.0  ;;  %v789_v61 = vmul.f32 %v8799_v23, %v8799_v23  ;;  %v8831_v11 = vshrl.u32 %v856_v6, 7 }
 0x103   :  { %v755_v33 = vadd.f32 %v754_v28, %v753_v27  ;;  %v798_v35 = vadd.f32 %v797_v31, %v796_v29  ;;  %v799_v37 = vsel %vm11309_vm3, %v788_v25, 0.0  ;;  %v914_v19 = vand.u32 127, %v856_v6 }
 0x104   :  { %v801_v39 = vsel %vm740_vm4, %v789_v61, 0.0  ;;  %11417 = vst [vmem:[#allocation10_spill] sm:$0xff] %v8831_v11  ;;  %v859_v12 = vadd.s32 16, %v8831_v11  ;;  %v860_v14 = vadd.s32 24, %v8831_v11  ;;  %v861_v15 = vadd.s32 32, %v8831_v11 }
 0x105   :  { %v757_v36 = vadd.f32 %v756_v34, %v755_v33  ;;  %v800_v38 = vadd.f32 %v799_v37, %v798_v35  ;;  %v862_v16 = vadd.s32 40, %v8831_v11  ;;  %v8844_v21 = vadd.s32 48, %v8831_v11 }
 0x106   :  { %v887_v24 = vcvt.s32.f32 %v859_v12  ;;  %v888_v25 = vcvt.s32.f32 %v860_v14  ;;  %v889_v27 = vcvt.s32.f32 %v861_v15  ;;  %v8847_v33 = vadd.s32 56, %v8831_v11 }
 0x107   :  { %758 = vadd.xlane.f32.xlu1 %v757_v36  ;;  %v802_v40 = vadd.f32 %v801_v39, %v800_v38  ;;  %v890_v28 = vcvt.s32.f32 %v862_v16  ;;  %v915_v37 = vadd.s32 128, %v914_v19 }
 0x108   :  { %v920_v34 = vadd.f32 0.5, %v887_v24  ;;  %v921_v61 = vadd.f32 0.5, %v888_v25  ;;  %v922_v35 = vadd.f32 0.5, %v889_v27 }
 0x109   :  { %v923_v36 = vadd.f32 0.5, %v890_v28 }
 0x10b   :  { %803 = vadd.xlane.f32.xlu1 %v802_v40  ;;  %v891_v40 = vcvt.s32.f32 %v8844_v21 }
 0x186   :  { %v744_v42 = vpop.xlane.xlu0 %743 }
 0x188   :  { %v782_v41 = vpop.xlane.xlu1 %781 }
 0x194   :  { %v759_v43 = vpop.xlane.xlu1 %758 }
 0x195   :  { %v760_v44 = vadd.f32 %v759_v43, %v744_v42  ;;  %v949_v42 = vmul.f32 0.09090909, %v921_v61  ;;  %v950_v43 = vmul.f32 0.09090909, %v922_v35 }
 0x197   :  { %v807_v46 = vmul.f32 0.00057077623, %v760_v44  ;;  %v892_v44 = vcvt.s32.f32 %v8847_v33  ;;  %v8956_v33 = vadd.s32 96, %v8831_v11 }
 0x198   :  { %v804_v47 = vpop.xlane.xlu1 %803 }
 0x199   :  { %v805_v48 = vadd.f32 %v804_v47, %v782_v41  ;;  %v809_v49 = vmul.f32 %v807_v46, %v807_v46  ;;  %v948_v41 = vmul.f32 0.09090909, %v920_v34 }
 0x19b   :  { %v808_v52 = vmul.f32 0.00057077623, %v805_v48  ;;  %v951_v48 = vmul.f32 0.09090909, %v923_v36 }
 0x19d   :  { %v810_v53 = vsub.f32 %v808_v52, %v809_v49  ;;  %v8851_v49 = vcvt.s32.f32 %v914_v19  ;;  %v8853_v52 = vfloor.f32 %v948_v41 }
 0x19f   :  { %v811_v54 = vadd.f32 1e-05, %v810_v53  ;;  %v8855_v53 = vfloor.f32 %v949_v42  ;;  %vm1172_vm15 = vcmp.lt.f32.partialorder %v8853_v52, 20.0 }
 0x1a1   :  { %8327 = vrsqrt.f32 %v811_v54  ;;  %v8857_v54 = vfloor.f32 %v950_v43  ;;  %vm1173_vm0 = vcmp.lt.f32.partialorder %v8855_v53, 20.0 }
 0x1a3   :  { %vm1174_vm1 = vcmp.lt.f32.partialorder %v8857_v54, 20.0 }
 0x1ab   :  { %v8328_v57 = vpop.eup %8327 }
 0x1ac   :  { %v814_v58 = vmul.f32 %v8328_v57, %v813_v55  ;;  %v8859_v55 = vcvt.s32.f32 %v915_v37 }
 0x1ae   :  { %820 = vperm.xlu1 %8325, %v814_v58   ;;  %v816_v60 = vmul.f32 %v814_v58, %v807_v46 }
 0x1b0   :  { %v817_v62 = vsub.f32 %v815_v59, %v816_v60  ;;  %v8861_v59 = vfloor.f32 %v951_v48  ;;  %v1004_v60 = vmul.f32 11.0, %v8853_v52 }
 0x1b2   :  { %832 = vperm.xlu1 %8325, %v817_v62   ;;  %v1005_v62 = vmul.f32 11.0, %v8855_v53  ;;  %v1007_v12 = vmul.f32 11.0, %v8861_v59 }
 0x1b4   :  { %v1033_v14 = vsub.f32 %v888_v25, %v1005_v62 }
 0x22d   :  { %v8819_v0 = vpop.permute.xlu1 %820 }
 0x22e   :  { %v824_v2 = vmul.f32 %v8819_v0, %v8705_v1  ;;  %v823_v3 = vmul.f32 %v8819_v0, %v8702_v63  ;;  %v858_v63 = vadd.s32 8, %v8831_v11  ;;  %v885_v1 = vcvt.s32.f32 %v8831_v11 }
 0x230   :  { %v886_v18 = vcvt.s32.f32 %v858_v63  ;;  %v918_v20 = vadd.f32 0.5, %v885_v1  ;;  %v1006_v63 = vmul.f32 11.0, %v8857_v54 }
 0x231   :  { %v8825_v4 = vpop.permute.xlu1 %832 }
 0x232   :  { %v8828_v8 = vadd.f32 %v8825_v4, %v824_v2  ;;  %v835_v9 = vadd.f32 %v8825_v4, %v823_v3  ;;  %v919_v29 = vadd.f32 0.5, %v886_v18  ;;  %v946_v31 = vmul.f32 0.09090909, %v918_v20 }
 0x233   :  { %v924_v2 = vadd.f32 0.5, %v891_v40  ;;  %v925_v3 = vadd.f32 0.5, %v892_v44  ;;  %v1034_v19 = vsub.f32 %v889_v27, %v1006_v63  ;;  %v1035_v20 = vsub.f32 %v890_v28, %v1007_v12 }
 0x234   :  { %1320 = vrot.lane.b32.xlu0 %v8828_v8, %s8370_s5  ;;  %1318 = vrot.lane.b32.xlu1 %v835_v9, %s8370_s5  ;;  %1315 = vst.msk [vmem:[#allocation2] sm:$0x3f] %vm11308_vm5, %v835_v9  ;;  %v947_v38 = vmul.f32 0.09090909, %v919_v29  ;;  %v974_v39 = vfloor.f32 %v946_v31  ;;  %v1061_v31 = vmul.f32 20.0, %v1033_v14 }
 0x235   :  { %v952_v34 = vmul.f32 0.09090909, %v924_v2  ;;  %v953_v61 = vmul.f32 0.09090909, %v925_v3  ;;  %v1063_v27 = vmul.f32 20.0, %v1035_v20  ;;  %v8945_v3 = vadd.s32 88, %v8831_v11 }
 0x236   :  { %v975_v46 = vfloor.f32 %v947_v38  ;;  %v1002_v47 = vmul.f32 11.0, %v974_v39  ;;  %vm1170_vm6 = vcmp.lt.f32.partialorder %v974_v39, 20.0  ;;  %v1089_v25 = vadd.f32 %v1061_v31, %v8855_v53 }
 0x237   :  { %v8880_v28 = vfloor.f32 %v952_v34  ;;  %v8886_v38 = vfloor.f32 %v953_v61 }
 0x238   :  { %v1003_v57 = vmul.f32 11.0, %v975_v46  ;;  %v1030_v58 = vsub.f32 %v885_v1, %v1002_v47  ;;  %vm1171_vm7 = vcmp.lt.f32.partialorder %v975_v46, 20.0  ;;  %v1032_v1 = vsub.f32 %v887_v24, %v1004_v60 }
 0x239   :  { %vm1120_vm2 = vcmp.eq.f32.partialorder %v8851_v49, %v1089_v25  ;;  %vm1121_vm5 = vcmp.eq.f32.partialorder %v8859_v55, %v1089_v25  ;;  %v1009_v43 = vmul.f32 11.0, %v8886_v38  ;;  %v11362_v47 = vmov 1.0|1.0  }
 0x23a   :  { %v1031_v6 = vsub.f32 %v886_v18, %v1003_v57  ;;  %v1058_v9 = vmul.f32 20.0, %v1030_v58  ;;  %v1060_v29 = vmul.f32 20.0, %v1032_v1  ;;  %v1062_v18 = vmul.f32 20.0, %v1034_v19 }
 0x23b   :  { %v1091_v57 = vadd.f32 %v1063_v27, %v8861_v59  ;;  %v866_v60 = vadd.s32 72, %v8831_v11  ;;  %v1037_v2 = vsub.f32 %v892_v44, %v1009_v43  ;;  %v8959_v44 = vadd.s32 104, %v8831_v11 }
 0x23c   :  { %v1059_v15 = vmul.f32 20.0, %v1031_v6  ;;  %v1086_v16 = vadd.f32 %v1058_v9, %v974_v39  ;;  %v1088_v24 = vadd.f32 %v1060_v29, %v8853_v52  ;;  %v1090_v37 = vadd.f32 %v1062_v18, %v8857_v54 }
 0x23d   :  { %v1008_v39 = vmul.f32 11.0, %v8880_v28  ;;  %v894_v63 = vcvt.s32.f32 %v866_v60  ;;  %v1065_v12 = vmul.f32 20.0, %v1037_v2  ;;  %v897_v19 = vcvt.s32.f32 %v8956_v33 }
 0x23e   :  { %v1087_v35 = vadd.f32 %v1059_v15, %v975_v46  ;;  %vm1114_vm8 = vcmp.eq.f32.partialorder %v8851_v49, %v1086_v16  ;;  %vm1115_vm9 = vcmp.eq.f32.partialorder %v8859_v55, %v1086_v16  ;;  %v8909_v46 = vadd.s32 64, %v8831_v11 }
 0x23f   :  { %vm8874_vm10 = vmand %vm1114_vm8, %vm1170_vm6  ;;  %vm1118_vm8 = vcmp.eq.f32.partialorder %v8851_v49, %v1088_v24  ;;  %v1036_v58 = vsub.f32 %v891_v40, %v1008_v39  ;;  %v8942_v40 = vadd.s32 80, %v8831_v11  ;;  %v896_v15 = vcvt.s32.f32 %v8945_v3 }
 0x240   :  { %vm1116_vm11 = vcmp.eq.f32.partialorder %v8851_v49, %v1087_v35  ;;  %vm1117_vm12 = vcmp.eq.f32.partialorder %v8859_v55, %v1087_v35  ;;  %vm1199_vm13 = vmand %vm1115_vm9, %vm1170_vm6  ;;  %vm1119_vm6 = vcmp.eq.f32.partialorder %v8859_v55, %v1088_v24  ;;  %vm1175_vm9 = vcmp.lt.f32.partialorder %v8861_v59, 20.0 }
 0x241   :  { %vm8889_vm14 = vmand %vm1116_vm11, %vm1171_vm7  ;;  %v893_v21 = vcvt.s32.f32 %v8909_v46  ;;  %v1064_v9 = vmul.f32 20.0, %v1036_v58  ;;  %v895_v14 = vcvt.s32.f32 %v8942_v40  ;;  %v927_v16 = vadd.f32 0.5, %v894_v63 }
 0x242   :  { %vm1201_vm4 = vmand %vm1117_vm12, %vm1171_vm7  ;;  %vm1122_vm12 = vcmp.eq.f32.partialorder %v8851_v49, %v1090_v37  ;;  %v898_v20 = vcvt.s32.f32 %v8959_v44  ;;  %v11432_v29 = vmov 0  ;;  %v929_v61 = vadd.f32 0.5, %v896_v15 }
 0x243   :  { %vm8901_vm11 = vmpackc.low %vm1201_vm4, %vm1199_vm13  ;;  %v926_v1 = vadd.f32 0.5, %v893_v21  ;;  %vm1123_vm4 = vcmp.eq.f32.partialorder %v8859_v55, %v1090_v37  ;;  %v1092_v31 = vadd.f32 %v1064_v9, %v8880_v28  ;;  %v928_v53 = vadd.f32 0.5, %v895_v14 }
 0x244   :  { %7843 = vmatprep.subr.msk.bf16.mxu0 %vm8901_vm11, %v11362_v47  ;;  %vm8918_vm7 = vmpackc.low %vm8889_vm14, %vm8874_vm10  ;;  %v11434_v35 = vmov 0  ;;  %v955_v18 = vmul.f32 0.09090909, %v927_v16  ;;  %v930_v36 = vadd.f32 0.5, %v897_v19  ;;  %v1093_v25 = vadd.f32 %v1065_v12, %v8886_v38 }
 0x245   :  { %7845 = vmatpush1.bf16.msk.msra.mxu0 %vm8918_vm7, %v11362_v47  ;;  %vm8934_vm10 = vmand %vm1118_vm8, %vm1172_vm15  ;;  %v954_v34 = vmul.f32 0.09090909, %v926_v1  ;;  %vm1176_vm8 = vcmp.lt.f32.partialorder %v8880_v28, 20.0  ;;  %v956_v41 = vmul.f32 0.09090909, %v928_v53  ;;  %v931_v58 = vadd.f32 0.5, %v898_v20 }
 0x246   :  { %vm8951_vm13 = vmand %vm1119_vm6, %vm1172_vm15  ;;  %vm1125_vm6 = vcmp.eq.f32.partialorder %v8859_v55, %v1091_v57  ;;  %v9019_v43 = vfloor.f32 %v955_v18  ;;  %v957_v46 = vmul.f32 0.09090909, %v929_v61  ;;  %v958_v60 = vmul.f32 0.09090909, %v930_v36 }
 0x247   :  { %vm8965_vm14 = vmand %vm1120_vm2, %vm1173_vm0  ;;  %v982_v27 = vfloor.f32 %v954_v34  ;;  %v9033_v37 = vfloor.f32 %v956_v41  ;;  %v959_v3 = vmul.f32 0.09090909, %v931_v58  ;;  %v11442_v6 = vmov 0 }
 0x248   :  { %vm1205_vm15 = vmand %vm1121_vm5, %vm1173_vm0  ;;  %vm1124_vm0 = vcmp.eq.f32.partialorder %v8851_v49, %v1091_v57  ;;  %v1011_v2 = vmul.f32 11.0, %v9019_v43  ;;  %v9041_v40 = vfloor.f32 %v957_v46  ;;  %vm1128_vm3 = vcmp.eq.f32.partialorder %v8851_v49, %v1093_v25 }
 0x249   :  { %vm8980_vm2 = vmpackc.low %vm1205_vm15, %vm8951_vm13  ;;  %v1010_v54 = vmul.f32 11.0, %v982_v27  ;;  %v1012_v59 = vmul.f32 11.0, %v9033_v37  ;;  %v9051_v57 = vfloor.f32 %v958_v60  ;;  %v11444_v33 = vmov 0 }
 0x24a   :  { %v11433_v29 = vsel %vm8980_vm2, 4294967295, %v11432_v29  ;;  %7847 = vmatprep.subr.msk.bf16.mxu0 %vm8980_vm2, %v11362_v47  ;;  %vm8992_vm5 = vmpackc.low %vm8965_vm14, %vm8934_vm10  ;;  %vm1177_vm14 = vcmp.lt.f32.partialorder %v8886_v38, 20.0  ;;  %v1039_v52 = vsub.f32 %v894_v63, %v1011_v2  ;;  %v1013_v12 = vmul.f32 11.0, %v9041_v40 }
 0x24b   :  { %v11435_v35 = vsel %vm8992_vm5, 4294967295, %v11434_v35  ;;  %7849 = vmatpush1.bf16.msk.msra.mxu0 %vm8992_vm5, %v11362_v47  ;;  %vm9006_vm10 = vmand %vm1122_vm12, %vm1174_vm1  ;;  %v1038_v9 = vsub.f32 %v893_v21, %v1010_v54  ;;  %v9065_v21 = vfloor.f32 %v959_v3  ;;  %v9068_v1 = vadd.s32 112, %v8831_v11 }
 0x24c   :  { %vm9015_vm13 = vmand %vm1123_vm4, %vm1174_vm1  ;;  %vm1126_vm1 = vcmp.eq.f32.partialorder %v8851_v49, %v1092_v31  ;;  %vm1127_vm4 = vcmp.eq.f32.partialorder %v8859_v55, %v1092_v31  ;;  %v1040_v34 = vsub.f32 %v895_v14, %v1012_v59  ;;  %v1014_v53 = vmul.f32 11.0, %v9051_v57 }
 0x24d   :  { %vm9027_vm12 = vmand %vm1124_vm0, %vm1175_vm9  ;;  %v1066_v63 = vmul.f32 20.0, %v1038_v9  ;;  %v1067_v61 = vmul.f32 20.0, %v1039_v52  ;;  %v1041_v18 = vsub.f32 %v896_v15, %v1013_v12  ;;  %v1015_v36 = vmul.f32 11.0, %v9065_v21 }
 0x24e   :  { %vm1209_vm15 = vmand %vm1125_vm6, %vm1175_vm9  ;;  %vm1129_vm6 = vcmp.eq.f32.partialorder %v8859_v55, %v1093_v25  ;;  %v1068_v41 = vmul.f32 20.0, %v1040_v34  ;;  %v1042_v39 = vsub.f32 %v897_v19, %v1014_v53  ;;  %v9097_v28 = vadd.s32 120, %v8831_v11 }
 0x24f   :  { %vm9045_vm0 = vmpackc.low %vm1209_vm15, %vm9015_vm13  ;;  %v1094_v14 = vadd.f32 %v1066_v63, %v982_v27  ;;  %v1095_v15 = vadd.f32 %v1067_v61, %v9019_v43  ;;  %v1069_v31 = vmul.f32 20.0, %v1041_v18  ;;  %v899_v46 = vcvt.s32.f32 %v9068_v1 }
 0x250   :  { %v11443_v6 = vsel %vm9045_vm0, 4294967295, %v11442_v6  ;;  %7851 = vmatprep.subr.msk.bf16.mxu0 %vm9045_vm0, %v11362_v47  ;;  %vm9060_vm9 = vmpackc.low %vm9027_vm12, %vm9006_vm10  ;;  %v11450_v25 = vmov 0  ;;  %v1096_v19 = vadd.f32 %v1068_v41, %v9033_v37  ;;  %v1043_v38 = vsub.f32 %v898_v20, %v1015_v36 }
 0x251   :  { %v11445_v33 = vsel %vm9060_vm9, 4294967295, %v11444_v33  ;;  %7853 = vmatpush1.bf16.msk.msra.mxu0 %vm9060_vm9, %v11362_v47  ;;  %vm9078_vm10 = vmand %vm1126_vm1, %vm1176_vm8  ;;  %vm1178_vm1 = vcmp.lt.f32.partialorder %v982_v27, 20.0  ;;  %v11452_v58 = vmov 0  ;;  %v1070_v60 = vmul.f32 20.0, %v1042_v39 }
 0x252   :  { %vm1211_vm13 = vmand %vm1127_vm4, %vm1176_vm8  ;;  %vm1131_vm4 = vcmp.eq.f32.partialorder %v8859_v55, %v1094_v14  ;;  %v900_v20 = vcvt.s32.f32 %v9097_v28  ;;  %v1097_v54 = vadd.f32 %v1069_v31, %v9041_v40  ;;  %v932_v2 = vadd.f32 0.5, %v899_v46 }
 0x253   :  { %vm9092_vm12 = vmand %vm1128_vm3, %vm1177_vm14  ;;  %vm1130_vm3 = vcmp.eq.f32.partialorder %v8851_v49, %v1094_v14  ;;  %vm1134_vm9 = vcmp.eq.f32.partialorder %v8851_v49, %v1096_v19  ;;  %v1071_v27 = vmul.f32 20.0, %v1043_v38  ;;  %v873_v59 = vadd.s32 128, %v8831_v11 }
 0x254   :  { %vm1213_vm8 = vmand %vm1129_vm6, %vm1177_vm14  ;;  %vm1132_vm6 = vcmp.eq.f32.partialorder %v8851_v49, %v1095_v15  ;;  %v933_v9 = vadd.f32 0.5, %v900_v20  ;;  %v1098_v52 = vadd.f32 %v1070_v60, %v9051_v57  ;;  %v960_v12 = vmul.f32 0.09090909, %v932_v2 }
 0x255   :  { %vm9103_vm15 = vmpackc.low %vm1213_vm8, %vm1211_vm13  ;;  %vm1133_vm8 = vcmp.eq.f32.partialorder %v8859_v55, %v1095_v15  ;;  %vm1181_vm13 = vcmp.lt.f32.partialorder %v9041_v40, 20.0  ;;  %v874_v1 = vadd.s32 136, %v8831_v11  ;;  %v11462_v16 = vmov 0 }
 0x256   :  { %v11451_v25 = vsel %vm9103_vm15, 4294967295, %v11450_v25  ;;  %7855 = vmatprep.subr.msk.bf16.mxu0 %vm9103_vm15, %v11362_v47  ;;  %vm9119_vm14 = vmpackc.low %vm9092_vm12, %vm9078_vm10  ;;  %vm1135_vm12 = vcmp.eq.f32.partialorder %v8859_v55, %v1096_v19  ;;  %v961_v63 = vmul.f32 0.09090909, %v933_v9  ;;  %v901_v34 = vcvt.s32.f32 %v873_v59 }
 0x257   :  { %v11453_v58 = vsel %vm9119_vm14, 4294967295, %v11452_v58  ;;  %7857 = vmatpush1.bf16.msk.msra.mxu0 %vm9119_vm14, %v11362_v47  ;;  %vm9130_vm15 = vmand %vm1130_vm3, %vm1178_vm1  ;;  %vm11458_vm14 = vcmp.lt.f32.partialorder %v9019_v43, 20.0  ;;  %v9163_v53 = vadd.s32 144, %v8831_v11  ;;  %v9166_v43 = vadd.s32 152, %v8831_v11 }
 0x258   :  { %vm9136_vm10 = vmand %vm1131_vm4, %vm1178_vm1  ;;  %v11464_v61 = vmov 0  ;;  %v9181_v18 = vfloor.f32 %v960_v12  ;;  %v902_v36 = vcvt.s32.f32 %v874_v1  ;;  %v9194_v14 = vfloor.f32 %v961_v63 }
 0x259   :  { %vm9145_vm3 = vmand %vm1132_vm6, %vm11458_vm14  ;;  %v934_v41 = vadd.f32 0.5, %v901_v34  ;;  %v903_v39 = vcvt.s32.f32 %v9163_v53  ;;  %v904_v28 = vcvt.s32.f32 %v9166_v43  ;;  %v1099_v31 = vadd.f32 %v1071_v27, %v9065_v21 }
 0x25a   :  { %vm11461_vm1 = vmmov %vm11458_vm14  ;;  %v1016_v38 = vmul.f32 11.0, %v9181_v18  ;;  %v935_v60 = vadd.f32 0.5, %v902_v36  ;;  %v11474_v9 = vmov 0  ;;  %v11476_v40 = vmov 0 }
 0x25b   :  { %vm1217_vm4 = vmand %vm1133_vm8, %vm11461_vm1  ;;  %vm1136_vm8 = vcmp.eq.f32.partialorder %v8851_v49, %v1097_v54  ;;  %vm11466_vm1 = vcmp.lt.f32.partialorder %v9033_v37, 20.0  ;;  %v1017_v37 = vmul.f32 11.0, %v9194_v14  ;;  %v962_v19 = vmul.f32 0.09090909, %v934_v41 }
 0x25c   :  { %vm9158_vm14 = vmpackc.low %vm1217_vm4, %vm9136_vm10  ;;  %vm1137_vm10 = vcmp.eq.f32.partialorder %v8859_v55, %v1097_v54  ;;  %v936_v62 = vadd.f32 0.5, %v903_v39  ;;  %v1044_v2 = vsub.f32 %v899_v46, %v1016_v38  ;;  %v963_v3 = vmul.f32 0.09090909, %v935_v60 }
 0x25d   :  { %v11463_v16 = vsel %vm9158_vm14, 4294967295, %v11462_v16  ;;  %7859 = vmatprep.subr.msk.bf16.mxu0 %vm9158_vm14, %v11362_v47  ;;  %vm9175_vm6 = vmpackc.low %vm9145_vm3, %vm9130_vm15  ;;  %v937_v27 = vadd.f32 0.5, %v904_v28  ;;  %v1045_v59 = vsub.f32 %v900_v20, %v1017_v37  ;;  %v990_v12 = vfloor.f32 %v962_v19 }
 0x25e   :  { %v11465_v61 = vsel %vm9175_vm6, 4294967295, %v11464_v61  ;;  %7861 = vmatpush1.bf16.msk.msra.mxu0 %vm9175_vm6, %v11362_v47  ;;  %vm9190_vm4 = vmand %vm1134_vm9, %vm11466_vm1  ;;  %vm1138_vm9 = vcmp.eq.f32.partialorder %v8851_v49, %v1098_v52  ;;  %v964_v1 = vmul.f32 0.09090909, %v936_v62  ;;  %v1072_v46 = vmul.f32 20.0, %v1044_v2 }
 0x25f   :  { %vm11469_vm15 = vmmov %vm11466_vm1  ;;  %v991_v54 = vfloor.f32 %v963_v3  ;;  %v965_v63 = vmul.f32 0.09090909, %v937_v27  ;;  %v1073_v53 = vmul.f32 20.0, %v1045_v59  ;;  %v1018_v43 = vmul.f32 11.0, %v990_v12 }
 0x260   :  { %vm9202_vm3 = vmand %vm1135_vm12, %vm11469_vm15  ;;  %v9255_v24 = vfloor.f32 %v964_v1  ;;  %v1100_v41 = vadd.f32 %v1072_v46, %v9181_v18  ;;  %v11485_v37 = vmov 0  ;;  %vm1186_vm5 = vcmp.lt.f32.partialorder %v990_v12, 20.0 }
 0x261   :  { %vm9213_vm1 = vmand %vm1136_vm8, %vm1181_vm13  ;;  %v1019_v15 = vmul.f32 11.0, %v991_v54  ;;  %v1101_v38 = vadd.f32 %v1073_v53, %v9194_v14  ;;  %v1046_v60 = vsub.f32 %v901_v34, %v1018_v43  ;;  %v11489_v3 = vmov 0 }
 0x262   :  { %vm1221_vm15 = vmand %vm1137_vm10, %vm1181_vm13  ;;  %vm1140_vm10 = vcmp.eq.f32.partialorder %v8851_v49, %v1099_v31  ;;  %v1020_v44 = vmul.f32 11.0, %v9255_v24  ;;  %vm1142_vm14 = vcmp.eq.f32.partialorder %v8851_v49, %v1100_v41  ;;  %v11495_v1 = vmov 0 }
 0x263   :  { %vm9226_vm8 = vmpackc.low %vm1221_vm15, %vm9202_vm3  ;;  %vm1141_vm3 = vcmp.eq.f32.partialorder %v8859_v55, %v1099_v31  ;;  %vm11478_vm15 = vcmp.lt.f32.partialorder %v9051_v57, 20.0  ;;  %v9262_v31 = vfloor.f32 %v965_v63  ;;  %v1047_v57 = vsub.f32 %v902_v36, %v1019_v15 }
 0x264   :  { %v11475_v9 = vsel %vm9226_vm8, 4294967295, %v11474_v9  ;;  %7863 = vmatprep.subr.msk.bf16.mxu0 %vm9226_vm8, %v11362_v47  ;;  %vm9238_vm13 = vmpackc.low %vm9213_vm1, %vm9190_vm4  ;;  %vm11482_vm1 = vcmp.eq.f32.partialorder %v8859_v55, %v1098_v52  ;;  %v1074_v19 = vmul.f32 20.0, %v1046_v60  ;;  %v1048_v34 = vsub.f32 %v903_v39, %v1020_v44 }
 0x265   :  { %v11477_v40 = vsel %vm9238_vm13, 4294967295, %v11476_v40  ;;  %7865 = vmatpush1.bf16.msk.msra.mxu0 %vm9238_vm13, %v11362_v47  ;;  %vm9251_vm12 = vmand %vm1138_vm9, %vm11478_vm15  ;;  %vm11483_vm13 = vcmp.lt.f32.partialorder %v9065_v21, 20.0  ;;  %v1021_v52 = vmul.f32 11.0, %v9262_v31  ;;  %v11487_v21 = vmov 0 }
 0x266   :  { %vm11481_vm4 = vmmov %vm11478_vm15  ;;  %v1075_v36 = vmul.f32 20.0, %v1047_v57  ;;  %v1102_v39 = vadd.f32 %v1074_v19, %v990_v12  ;;  %v11493_v12 = vmov 0  ;;  %v11497_v46 = vmov 0 }
 0x267   :  { %vm1223_vm8 = vmand %vm11482_vm1, %vm11481_vm4  ;;  %vm1184_vm4 = vcmp.lt.f32.partialorder %v9181_v18, 20.0  ;;  %v1049_v62 = vsub.f32 %v904_v28, %v1021_v52  ;;  %v11491_v18 = vmov 0  ;;  %v878_v63 = vadd.s32 168, %v8831_v11 }
 0x268   :  { %vm1224_vm9 = vmand %vm1140_vm10, %vm11483_vm13  ;;  %v1103_v2 = vadd.f32 %v1075_v36, %v991_v54  ;;  %vm1146_vm0 = vcmp.eq.f32.partialorder %v8851_v49, %v1102_v39  ;;  %vm1147_vm2 = vcmp.eq.f32.partialorder %v8859_v55, %v1102_v39  ;;  %v879_v15 = vadd.s32 176, %v8831_v11 }
 0x269   :  { %vm11484_vm15 = vmmov %vm11483_vm13  ;;  %vm1143_vm13 = vcmp.eq.f32.partialorder %v8859_v55, %v1100_v41  ;;  %v1077_v27 = vmul.f32 20.0, %v1049_v62  ;;  %v906_v53 = vcvt.s32.f32 %v878_v63  ;;  %v9355_v62 = vadd.s32 192, %v8831_v11 }
 0x26a   :  { %vm1225_vm6 = vmand %vm1141_vm3, %vm11484_vm15  ;;  %vm1144_vm3 = vcmp.eq.f32.partialorder %v8851_v49, %v1101_v38  ;;  %v907_v57 = vcvt.s32.f32 %v879_v15 }
 0x26b   :  { %vm9273_vm1 = vmpackc.low %vm1225_vm6, %vm1223_vm8  ;;  %vm1185_vm6 = vcmp.lt.f32.partialorder %v9194_v14, 20.0  ;;  %vm1145_vm8 = vcmp.eq.f32.partialorder %v8859_v55, %v1101_v38  ;;  %v1076_v14 = vmul.f32 20.0, %v1048_v34  ;;  %v1105_v59 = vadd.f32 %v1077_v27, %v9262_v31 }
 0x26c   :  { %v11486_v37 = vsel %vm9273_vm1, 4294967295, %v11485_v37  ;;  %7867 = vmatprep.subr.msk.bf16.mxu0 %vm9273_vm1, %v11362_v47  ;;  %vm9283_vm10 = vmpackc.low %vm1224_vm9, %vm9251_vm12  ;;  %v939_v41 = vadd.f32 0.5, %v906_v53  ;;  %v880_v38 = vadd.s32 184, %v8831_v11  ;;  %v940_v36 = vadd.f32 0.5, %v907_v57 }
 0x26d   :  { %v11488_v21 = vsel %vm9283_vm10, 4294967295, %v11487_v21  ;;  %7869 = vmatpush1.bf16.msk.msra.mxu0 %vm9283_vm10, %v11362_v47  ;;  %vm1226_vm15 = vmand %vm1142_vm14, %vm1184_vm4  ;;  %v1104_v28 = vadd.f32 %v1076_v14, %v9255_v24  ;;  %v909_v63 = vcvt.s32.f32 %v9355_v62 }
 0x26e   :  { %vm1227_vm12 = vmand %vm1143_vm13, %vm1184_vm4  ;;  %vm1148_vm4 = vcmp.eq.f32.partialorder %v8851_v49, %v1103_v2  ;;  %vm1187_vm13 = vcmp.lt.f32.partialorder %v991_v54, 20.0  ;;  %v877_v54 = vadd.s32 160, %v8831_v11  ;;  %v967_v44 = vmul.f32 0.09090909, %v939_v41 }
 0x26f   :  { %vm1228_vm9 = vmand %vm1144_vm3, %vm1185_vm6  ;;  %v908_v52 = vcvt.s32.f32 %v880_v38  ;;  %v9371_v41 = vadd.s32 216, %v8831_v11 }
 0x270   :  { %vm1229_vm1 = vmand %vm1145_vm8, %vm1185_vm6  ;;  %v905_v20 = vcvt.s32.f32 %v877_v54  ;;  %v995_v34 = vfloor.f32 %v967_v44  ;;  %v968_v54 = vmul.f32 0.09090909, %v940_v36  ;;  %v942_v44 = vadd.f32 0.5, %v909_v63 }
 0x271   :  { %vm9300_vm10 = vmpackc.low %vm1229_vm1, %vm1227_vm12  ;;  %vm1149_vm1 = vcmp.eq.f32.partialorder %v8859_v55, %v1103_v2  ;;  %v941_v39 = vadd.f32 0.5, %v908_v52  ;;  %v9358_v2 = vadd.s32 200, %v8831_v11  ;;  %v9376_v36 = vadd.s32 208, %v8831_v11 }
 0x272   :  { %v11490_v3 = vsel %vm9300_vm10, 4294967295, %v11489_v3  ;;  %7871 = vmatprep.subr.msk.bf16.mxu0 %vm9300_vm10, %v11362_v47  ;;  %vm9308_vm14 = vmpackc.low %vm1228_vm9, %vm1226_vm15  ;;  %vm1151_vm9 = vcmp.eq.f32.partialorder %v8859_v55, %v1104_v28  ;;  %vm1188_vm10 = vcmp.lt.f32.partialorder %v9255_v24, 20.0  ;;  %v938_v43 = vadd.f32 0.5, %v905_v20 }
 0x273   :  { %v11492_v18 = vsel %vm9308_vm14, 4294967295, %v11491_v18  ;;  %7873 = vmatpush1.bf16.msk.msra.mxu0 %vm9308_vm14, %v11362_v47  ;;  %vm1230_vm3 = vmand %vm1146_vm0, %vm1186_vm5  ;;  %v996_v38 = vfloor.f32 %v968_v54  ;;  %v970_v54 = vmul.f32 0.09090909, %v942_v44  ;;  %v11503_v11 = vcvt.s32.f32 %v9371_v41 }
 0x274   :  { %vm1231_vm6 = vmand %vm1147_vm2, %vm1186_vm5  ;;  %vm1153_vm2 = vcmp.eq.f32.partialorder %v8859_v55, %v1105_v59  ;;  %vm1189_vm5 = vcmp.lt.f32.partialorder %v9262_v31, 20.0  ;;  %v966_v60 = vmul.f32 0.09090909, %v938_v43  ;;  %v910_v43 = vcvt.s32.f32 %v9358_v2 }
 0x275   :  { %vm1232_vm8 = vmand %vm1148_vm4, %vm1187_vm13  ;;  %v911_v31 = vcvt.s32.f32 %v9376_v36  ;;  %v11525_v36 = vmov 0 }
 0x276   :  { %vm1233_vm15 = vmand %vm1149_vm1, %vm1187_vm13  ;;  %v994_v19 = vfloor.f32 %v966_v60  ;;  %v943_v30 = vadd.f32 0.5, %v910_v43 }
 0x277   :  { %vm9319_vm12 = vmpackc.low %vm1233_vm15, %vm1231_vm6  ;;  %vm1152_vm6 = vcmp.eq.f32.partialorder %v8851_v49, %v1105_v59  ;;  %v969_v59 = vmul.f32 0.09090909, %v941_v39  ;;  %v11501_v39 = vmov 0 }
 0x278   :  { %v11494_v12 = vsel %vm9319_vm12, 4294967295, %v11493_v12  ;;  %7875 = vmatprep.subr.msk.bf16.mxu0 %vm9319_vm12, %v11362_v47  ;;  %vm9328_vm0 = vmpackc.low %vm1232_vm8, %vm1230_vm3  ;;  %vm1150_vm3 = vcmp.eq.f32.partialorder %v8851_v49, %v1104_v28  ;;  %v1022_v27 = vmul.f32 11.0, %v994_v19  ;;  %v1023_v28 = vmul.f32 11.0, %v995_v34 }
 0x279   :  { %v11496_v1 = vsel %vm9328_vm0, 4294967295, %v11495_v1  ;;  %7877 = vmatpush1.bf16.msk.msra.mxu0 %vm9328_vm0, %v11362_v47  ;;  %vm1235_vm4 = vmand %vm1151_vm9, %vm1188_vm10  ;;  %v9373_v60 = vfloor.f32 %v969_v59  ;;  %vm1190_vm9 = vcmp.lt.f32.partialorder %v994_v19, 20.0  ;;  %v971_v59 = vmul.f32 0.09090909, %v943_v30 }
 0x27a   :  { %vm1237_vm13 = vmand %vm1153_vm2, %vm1189_vm5  ;;  %v1050_v15 = vsub.f32 %v905_v20, %v1022_v27  ;;  %v1051_v24 = vsub.f32 %v906_v53, %v1023_v28  ;;  %v1024_v20 = vmul.f32 11.0, %v996_v38 }
 0x27b   :  { %vm9341_vm1 = vmpackc.low %vm1237_vm13, %vm1235_vm4  ;;  %v1025_v53 = vmul.f32 11.0, %v9373_v60  ;;  %vm1191_vm13 = vcmp.lt.f32.partialorder %v995_v34, 20.0  ;;  %v9404_v44 = vfloor.f32 %v971_v59 }
 0x27c   :  { %v11498_v46 = vsel %vm9341_vm1, 4294967295, %v11497_v46  ;;  %7879 = vmatprep.subr.msk.bf16.mxu0 %vm9341_vm1, %v11362_v47  ;;  %vm9362_vm8 = vmand %vm1150_vm3, %vm1188_vm10  ;;  %v1078_v62 = vmul.f32 20.0, %v1050_v15  ;;  %v1079_v2 = vmul.f32 20.0, %v1051_v24  ;;  %v1052_v7 = vsub.f32 %v907_v57, %v1024_v20 }
 0x27d   :  { %vm1236_vm15 = vmand %vm1152_vm6, %vm1189_vm5  ;;  %v1053_v14 = vsub.f32 %v908_v52, %v1025_v53  ;;  %v945_v15 = vadd.f32 0.5, %v11503_v11  ;;  %v843_v52 = vmul.f32 %v8819_v0, %v8763_v51  ;;  %v998_v11 = vfloor.f32 %v970_v54 }
 0x27e   :  { %vm9381_vm10 = vmpackc.low %vm1236_vm15, %vm9362_vm8  ;;  %v1106_v27 = vadd.f32 %v1078_v62, %v994_v19  ;;  %v1107_v28 = vadd.f32 %v1079_v2, %v995_v34  ;;  %v1080_v30 = vmul.f32 20.0, %v1052_v7  ;;  %v944_v20 = vadd.f32 0.5, %v911_v31 }
 0x27f   :  { %v11502_v39 = vsel %vm9381_vm10, 4294967295, %v11501_v39  ;;  %7881 = vmatpush1.bf16.msk.msra.mxu0 %vm9381_vm10, %v11362_v47  ;;  %v1081_v57 = vmul.f32 20.0, %v1053_v14  ;;  %v973_v7 = vmul.f32 0.09090909, %v945_v15  ;;  %vm1192_vm10 = vcmp.lt.f32.partialorder %v996_v38, 20.0 }
 0x280   :  { %vm1154_vm2 = vcmp.eq.f32.partialorder %v8851_v49, %v1106_v27  ;;  %vm1155_vm5 = vcmp.eq.f32.partialorder %v8859_v55, %v1106_v27  ;;  %vm1156_vm4 = vcmp.eq.f32.partialorder %v8851_v49, %v1107_v28  ;;  %vm1157_vm3 = vcmp.eq.f32.partialorder %v8859_v55, %v1107_v28 }
 0x281   :  { %vm9397_vm6 = vmand %vm1154_vm2, %vm1190_vm9  ;;  %v1108_v34 = vadd.f32 %v1080_v30, %v996_v38  ;;  %v1109_v2 = vadd.f32 %v1081_v57, %v9373_v60  ;;  %v1026_v53 = vmul.f32 11.0, %v998_v11  ;;  %v1027_v51 = vmul.f32 11.0, %v9404_v44 }
 0x282   :  { %vm1239_vm8 = vmand %vm1155_vm5, %vm1190_vm9  ;;  %vm11346_vm9 = vcmask 1039360   ;;  %v9415_v19 = vadd.f32 %v843_v52, %v8825_v4  ;;  %v11508_v27 = vmov 0  ;;  %v11510_v28 = vmov 0 }
 0x283   :  { %vm9406_vm15 = vmand %vm1156_vm4, %vm1191_vm13  ;;  %vm1158_vm4 = vcmp.eq.f32.partialorder %v8851_v49, %v1108_v34  ;;  %vm1159_vm1 = vcmp.eq.f32.partialorder %v8859_v55, %v1108_v34  ;;  %v1054_v54 = vsub.f32 %v909_v63, %v1026_v53  ;;  %v1055_v59 = vsub.f32 %v910_v43, %v1027_v51 }
 0x284   :  { %vm1241_vm2 = vmand %vm1157_vm3, %vm1191_vm13  ;;  %vm1160_vm3 = vcmp.eq.f32.partialorder %v8851_v49, %v1109_v2  ;;  %v972_v30 = vmul.f32 0.09090909, %v944_v20  ;;  %v1001_v57 = vfloor.f32 %v973_v7  ;;  %v842_v63 = vmul.f32 %v8819_v0, %v8757_v45 }
 0x285   :  { %vm9417_vm5 = vmpackc.low %vm1241_vm2, %vm1239_vm8  ;;  %vm1193_vm8 = vcmp.lt.f32.partialorder %v9373_v60, 20.0  ;;  %vm1161_vm2 = vcmp.eq.f32.partialorder %v8859_v55, %v1109_v2  ;;  %v1082_v52 = vmul.f32 20.0, %v1054_v54  ;;  %v1083_v62 = vmul.f32 20.0, %v1055_v59 }
 0x286   :  { %v11509_v27 = vsel %vm9417_vm5, 4294967295, %v11508_v27  ;;  %7883 = vmatprep.subr.msk.bf16.mxu0 %vm9417_vm5, %v11362_v47  ;;  %vm9430_vm13 = vmpackc.low %vm9406_vm15, %vm9397_vm6  ;;  %v1000_v45 = vfloor.f32 %v972_v30  ;;  %v1029_v7 = vmul.f32 11.0, %v1001_v57  ;;  %v849_v38 = vadd.f32 %v842_v63, %v8825_v4 }
 0x287   :  { %v11511_v28 = vsel %vm9430_vm13, 4294967295, %v11510_v28  ;;  %7885 = vmatpush1.bf16.msk.msra.mxu0 %vm9430_vm13, %v11362_v47  ;;  %vm9443_vm6 = vmand %vm1158_vm4, %vm1192_vm10  ;;  %v1110_v34 = vadd.f32 %v1082_v52, %v998_v11  ;;  %v1111_v51 = vadd.f32 %v1083_v62, %v9404_v44  ;;  %v11516_v54 = vmov 0  ;;  %v9512_v62 = vld [vmem:[%s11289_s6 + $0x8] sm:$0xff] }
 0x288   :  { %vm1243_vm15 = vmand %vm1159_vm1, %vm1192_vm10  ;;  %vm1194_vm10 = vcmp.lt.f32.partialorder %v998_v11, 20.0  ;;  %v1028_v59 = vmul.f32 11.0, %v1000_v45  ;;  %v11519_v60 = vmov 0  ;;  %1533 = vrot.lane.b32.xlu0 %v9512_v62, %s8373_s1  ;;  %v11527_v11 = vmov 0 }
 0x289   :  { %vm9460_vm4 = vmand %vm1160_vm3, %vm1193_vm8 }
 0x28a   :  { %vm1245_vm1 = vmand %vm1161_vm2, %vm1193_vm8  ;;  %vm1162_vm2 = vcmp.eq.f32.partialorder %v8851_v49, %v1110_v34  ;;  %v1056_v2 = vsub.f32 %v911_v31, %v1028_v59 }
 0x28b   :  { %vm9471_vm3 = vmpackc.low %vm1245_vm1, %vm1243_vm15  ;;  %vm1163_vm15 = vcmp.eq.f32.partialorder %v8859_v55, %v1110_v34  ;;  %vm1164_vm1 = vcmp.eq.f32.partialorder %v8851_v49, %v1111_v51 }
 0x28c   :  { %v11517_v54 = vsel %vm9471_vm3, 4294967295, %v11516_v54  ;;  %7887 = vmatprep.subr.msk.bf16.mxu0 %vm9471_vm3, %v11362_v47  ;;  %vm9485_vm8 = vmpackc.low %vm9460_vm4, %vm9443_vm6  ;;  %vm11523_vm4 = vcmp.lt.f32.partialorder %v9404_v44, 20.0  ;;  %v9535_v44 = vld [vmem:[%s11289_s6] sm:$0xff] }
 0x28d   :  { %v11520_v60 = vsel %vm9485_vm8, 4294967295, %v11519_v60  ;;  %7889 = vmatpush1.bf16.msk.msra.mxu0 %vm9485_vm8, %v11362_v47  ;;  %vm9497_vm3 = vmand %vm1162_vm2, %vm1194_vm10  ;;  %vm1197_vm2 = vcmp.lt.f32.partialorder %v1001_v57, 20.0  ;;  %1620 = vrot.lane.b32.xlu0 %v9535_v44, %s8374_s25 }
 0x28e   :  { %vm1247_vm6 = vmand %vm1163_vm15, %vm1194_vm10  ;;  %vm1196_vm15 = vcmp.lt.f32.partialorder %v1000_v45, 20.0 }
 0x28f   :  { %vm1248_vm13 = vmand %vm1164_vm1, %vm11523_vm4 }
 0x290   :  { %vm11524_vm8 = vmmov %vm11523_vm4 }
 0x2a6   :  { %v9436_v14 = vpop.permute.xlu0 %1320  ;;  %v1319_v15 = vpop.permute.xlu1 %1318 }
 0x2a7   :  { %v1327_v43 = vmax.f32 %v9415_v19, %v9436_v14  ;;  %v1323_v53 = vsel %vm11346_vm9, %v1319_v15, %v9436_v14  ;;  %v11518_v15 = vcvt.s32.f32 %v9371_v41  ;;  %vm1165_vm9 = vcmp.eq.f32.partialorder %v8859_v55, %v1111_v51 }
 0x2a8   :  { %v1326_v63 = vmax.f32 %v849_v38, %v1323_v53  ;;  %vm1249_vm5 = vmand %vm1165_vm9, %vm11524_vm8  ;;  %v11529_v53 = vmov 0.0  }
 0x2a9   :  { %1332 = vrot.lane.b32.xlu1 %v1327_v43, %s8372_s30  ;;  %v1057_v30 = vsub.f32 %v11518_v15, %v1029_v7  ;;  %v1084_v43 = vmul.f32 20.0, %v1056_v2  ;;  %vm9514_vm0 = vmpackc.low %vm1249_vm5, %vm1247_vm6  ;;  %vm11361_vm6 = vcmask 1043456   ;;  %v8375_v7 = vmov 1.0  }
 0x2aa   :  { %v11526_v36 = vsel %vm9514_vm0, 4294967295, %v11525_v36  ;;  %7891 = vmatprep.subr.msk.bf16.mxu0 %vm9514_vm0, %v11362_v47  ;;  %vm9528_vm9 = vmpackc.low %vm1248_vm13, %vm9497_vm3 }
 0x2ab   :  { %v1085_v24 = vmul.f32 20.0, %v1057_v30  ;;  %v1112_v31 = vadd.f32 %v1084_v43, %v1000_v45  ;;  %v11528_v11 = vsel %vm9528_vm9, 4294967295, %v11527_v11  ;;  %7893 = vmatpush1.bf16.msk.msra.mxu0 %vm9528_vm9, %v11362_v47  ;;  %v11535_v45 = vmov 0 }
 0x2ad   :  { %1330 = vrot.lane.b32.xlu1 %v1326_v63, %s8372_s30  ;;  %v1113_v52 = vadd.f32 %v1085_v24, %v1001_v57  ;;  %vm1166_vm5 = vcmp.eq.f32.partialorder %v8851_v49, %v1112_v31  ;;  %vm1167_vm8 = vcmp.eq.f32.partialorder %v8859_v55, %v1112_v31 }
 0x2ae   :  { %vm1250_vm3 = vmand %vm1166_vm5, %vm1196_vm15  ;;  %vm11381_vm5 = vcmask 751320  }
 0x2af   :  { %vm1168_vm10 = vcmp.eq.f32.partialorder %v8851_v49, %v1113_v52  ;;  %vm1169_vm1 = vcmp.eq.f32.partialorder %v8859_v55, %v1113_v52  ;;  %vm1251_vm4 = vmand %vm1167_vm8, %vm1196_vm15  ;;  %v11530_v55 = vmov 0  ;;  %vm11382_vm15 = vcmask 1045512  }
 0x2b0   :  { %vm1252_vm13 = vmand %vm1168_vm10, %vm1197_vm2  ;;  %vm11380_vm8 = vcmask 752640   ;;  %v825_v52 = vmul.f32 %v8819_v0, %v8712_v5  ;;  %v826_v5 = vmul.f32 %v8819_v0, %v8719_v10 }
 0x2b1   :  { %1343 = vrot.lane.b32.xlu1 %v9415_v19, %s8372_s30  ;;  %v1308_v20 = vsel %vm1252_vm13, 1.0, %v11529_v53  ;;  %vm1253_vm9 = vmand %vm1169_vm1, %vm1197_vm2  ;;  %vm11377_vm2 = vcmask 7168   ;;  %vm11379_vm1 = vcmask 48128   ;;  %vm11538_vm13 = vcmask 1045504   ;;  %s8384_s30 = smov 8  }
 0x2b2   :  { %v1309_v49 = vsel %vm1253_vm9, 1.0, %v11529_v53  ;;  %vm9552_vm0 = vmpackc.low %vm11361_vm6, %vm1251_vm4  ;;  %v9556_v38 = vpack.c.bf16 %v1308_v20, %v8375_v7  ;;  %vm11383_vm9 = vcmask 742400   ;;  %7536 = vmatprep.mubr.msk.f32.mxu1 %vm11379_vm1, %v9535_v44  ;;  %v837_v31 = vadd.f32 %v8825_v4, %v825_v52 }
 0x2b3   :  { %v11531_v55 = vsel %vm9552_vm0, 4294967295, %v11530_v55  ;;  %v9558_v34 = vpack.c.bf16 %v1309_v49, %v8375_v7  ;;  %vm9561_vm10 = vmpackc.low %vm11361_vm6, %vm1250_vm3  ;;  %v9619_v20 = vadd.f32 %v8825_v4, %v826_v5 }
 0x2b4   :  { %11532 = vst [vmem:[#allocation11_spill] sm:$0xff] %v11531_v55  ;;  %11533 = vst [vmem:[#allocation12_spill] sm:$0xff] %v9556_v38  ;;  %v11536_v45 = vsel %vm9561_vm10, 4294967295, %v11535_v45 }
 0x2b5   :  { %11534 = vst [vmem:[#allocation13_spill] sm:$0xff] %v9558_v34  ;;  %11537 = vst [vmem:[#allocation14_spill] sm:$0xff] %v11536_v45  ;;  %7896 = vmatprep.subr.msk.bf16.mxu0 %vm9552_vm0, %v9558_v34 }
 0x2b6   :  { %7899 = vmatpush1.bf16.msk.msra.mxu0 %vm9561_vm10, %v9556_v38  ;;  %vm11539_vm3 = vmmov %vm11538_vm13 }
 0x2b7   :  { %vm11540_vm4 = vmmov %vm11539_vm3 }
 0x2b8   :  { %vm11544_vm6 = vmmov %vm11539_vm3 }
 0x2bb   :  { %v11731_v48 = vld [vmem:[#allocation11_spill] sm:$0xff] }
 0x2bc   :  { %v11730_v42 = vld [vmem:[#allocation13_spill] sm:$0xff] }
 0x2fa   :  { %v9632_v10 = vpop.permute.xlu0 %1533 }
 0x2ff   :  { %v9634_v49 = vpop.permute.xlu0 %1620 }
 0x31b   :  { %v1333_v57 = vpop.permute.xlu1 %1332 }
 0x31f   :  { %v1331_v51 = vpop.permute.xlu1 %1330 }
 0x320   :  { %v1335_v59 = vsel %vm11377_vm2, %v1331_v51, %v1333_v57  ;;  %1339 = vst.msk [vmem:[#allocation2] sm:$0x3f] %vm11382_vm15, %v1331_v51  ;;  %vm11566_vm2 = vnez %v11445_v33  ;;  %vm11571_vm15 = vnez %v11475_v9 }
 0x321   :  { %1341 = vst.msk [vmem:[#allocation2 + $0x8] sm:$0x3f] %vm11383_vm9, %v1335_v59  ;;  %vm11572_vm9 = vnez %v11477_v40 }
 0x323   :  { %v1344_v15 = vpop.permute.xlu1 %1343 }
 0x324   :  { %1347 = vst.msk [vmem:[#allocation2 + $0x8] sm:$0x3f] %vm11381_vm5, %v1344_v15  ;;  %vm11570_vm5 = vnez %v11465_v61 }
 0x327   :  { %v1348_v30 = vld [vmem:[#allocation2] sm:$0x3f] }
 0x328   :  { %v1350_v2 = vmax.f32 %v1348_v30, 0.0 }
 0x32b   :  { %v1349_v63 = vld [vmem:[#allocation2 + $0x8] sm:$0x3f] }
 0x32c   :  { %v1351_v41 = vmax.f32 %v1349_v63, 0.0 }
 0x32e   :  { %6954 = vmatprep.mubr.msk.f32.mxu0 %vm11380_vm8, %v1351_v41  ;;  %vm11569_vm8 = vnez %v11463_v16 }
 0x32f   :  { %1428 = vmatmul.mubr.f32.vlgmr.msra.gmra.mrb[8].mxu0 %v1350_v2 }
 0x330   :  { %7591 = vmatprep.mubr.msk.f32.mxu0 %vm11379_vm1, %v9535_v44 }
 0x402   :  { %v1429_v24 = vpop.f32.mrb[8].mxu0 }
 0x403   :  { %1713 = vrot.lane.b32.xlu0 %v1429_v24, %s8376_s3  ;;  %1535 = vrot.lane.b32.xlu1 %v1429_v24, %s8377_s26  ;;  %v1431_v43 = vpop.f32.mrb[9].mxu0 }
 0x404   :  { %7534 = vmatprep.subr.msk.mxu1 %vm11538_vm13, %v1429_v24  ;;  %vm11541_vm13 = vmmov %vm11539_vm3 }
 0x405   :  { %7535 = vmatpush3.msk.msra.mxu1 %vm11539_vm3, %v1429_v24 }
 0x406   :  { %7537 = vmatmul.mubr.msk.f32.vlgmr.msra.gmra.mrb[8].mxu1 %vm11379_vm1, %v9512_v62 }
 0x407   :  { %1711 = vrot.lane.b32.xlu0 %v9512_v62, %s8378_s27  ;;  %1531 = vrot.lane.b32.xlu1 %v9535_v44, %s8373_s1 }
 0x40b   :  { %1798 = vrot.lane.b32.xlu0 %v9535_v44, %s8379_s22  ;;  %1624 = vrot.lane.b32.xlu1 %v1429_v24, %s8380_s28 }
 0x40f   :  { %1891 = vrot.lane.b32.xlu0 %v1429_v24, %s8381_s4  ;;  %1622 = vrot.lane.b32.xlu1 %v9512_v62, %s8374_s25 }
 0x413   :  { %1889 = vrot.lane.b32.xlu0 %v9512_v62, %s8382_s23  ;;  %1709 = vrot.lane.b32.xlu1 %v9535_v44, %s8378_s27 }
 0x417   :  { %1802 = vrot.lane.b32.xlu1 %v1429_v24, %s8383_s29  ;;  %1983 = vrot.lane.b32.xlu0 %v1431_v43, %s8384_s30 }
 0x41b   :  { %1800 = vrot.lane.b32.xlu1 %v9512_v62, %s8379_s22  ;;  %1978 = vrot.lane.b32.xlu0 %v9512_v62, %s8385_s0  ;;  %s8389_s22 = smov 74  }
 0x41f   :  { %1887 = vrot.lane.b32.xlu1 %v9535_v44, %s8382_s23  ;;  %2070 = vrot.lane.b32.xlu0 %v9535_v44, %s8386_s21  ;;  %s8390_s23 = smov 56  }
 0x423   :  { %1981 = vrot.lane.b32.xlu1 %v1429_v24, %s8384_s30  ;;  %2432 = vrot.lane.b32.xlu0 %v837_v31, %s8370_s5 }
 0x427   :  { %1976 = vrot.lane.b32.xlu1 %v9535_v44, %s8385_s0  ;;  %2163 = vrot.lane.b32.xlu0 %v1431_v43, %s8387_s24  ;;  %s8391_s0 = smov 76  }
 0x42b   :  { %2074 = vrot.lane.b32.xlu1 %v1431_v43, %s8374_s25  ;;  %2161 = vrot.lane.b32.xlu0 %v9512_v62, %s8388_s2 }
 0x42f   :  { %2072 = vrot.lane.b32.xlu1 %v9512_v62, %s8386_s21  ;;  %2248 = vrot.lane.b32.xlu0 %v9535_v44, %s8389_s22  ;;  %s8392_s21 = smov 38  }
 0x433   :  { %2434 = vrot.lane.b32.xlu1 %v9619_v20, %s8370_s5  ;;  %2341 = vrot.lane.b32.xlu0 %v1431_v43, %s8390_s23 }
 0x437   :  { %2159 = vrot.lane.b32.xlu1 %v9535_v44, %s8388_s2  ;;  %2339 = vrot.lane.b32.xlu0 %v9512_v62, %s8376_s3  ;;  %s8393_s2 = smov 37  }
 0x43b   :  { %2252 = vrot.lane.b32.xlu1 %v1431_v43, %s8391_s0 }
 0x43f   :  { %2250 = vrot.lane.b32.xlu1 %v9512_v62, %s8389_s22 }
 0x443   :  { %2337 = vrot.lane.b32.xlu1 %v9535_v44, %s8376_s3 }
 0x475   :  { %v1714_v7 = vpop.permute.xlu0 %1713  ;;  %v1536_v57 = vpop.permute.xlu1 %1535 }
 0x476   :  { %7539 = vmatprep.subr.msk.mxu1 %vm11540_vm4, %v1536_v57  ;;  %vm11542_vm4 = vmmov %vm11539_vm3 }
 0x477   :  { %7540 = vmatpush3.msk.msra.mxu1 %vm11541_vm13, %v1536_v57  ;;  %vm11543_vm13 = vmmov %vm11539_vm3 }
 0x479   :  { %v9638_v51 = vpop.permute.xlu0 %1711  ;;  %v9640_v59 = vpop.permute.xlu1 %1531 }
 0x47a   :  { %7541 = vmatprep.mubr.msk.f32.mxu1 %vm11379_vm1, %v9640_v59 }
 0x47b   :  { %7542 = vmatmul.mubr.msk.f32.vlgmr.msra.gmra.mrb[8].mxu1 %vm11379_vm1, %v9632_v10 }
 0x47c   :  { %7546 = vmatprep.mubr.msk.f32.mxu1 %vm11379_vm1, %v9634_v49 }
 0x47d   :  { %v9648_v15 = vpop.permute.xlu0 %1798  ;;  %v1625_v30 = vpop.permute.xlu1 %1624 }
 0x47e   :  { %7544 = vmatprep.subr.msk.mxu1 %vm11539_vm3, %v1625_v30 }
 0x47f   :  { %7545 = vmatpush3.msk.msra.mxu1 %vm11542_vm4, %v1625_v30  ;;  %vm11547_vm4 = vmmov %vm11539_vm3 }
 0x480   :  { %7549 = vmatprep.subr.msk.mxu1 %vm11543_vm13, %v1714_v7  ;;  %vm11378_vm13 = vcmask 64512  }
 0x481   :  { %v1892_v63 = vpop.permute.xlu0 %1891  ;;  %v9653_v41 = vpop.permute.xlu1 %1622 }
 0x483   :  { %7547 = vmatmul.mubr.msk.f32.vlgmr.msra.gmra.mrb[8].mxu1 %vm11379_vm1, %v9653_v41 }
 0x484   :  { %7550 = vmatpush3.msk.msra.mxu1 %vm11544_vm6, %v1714_v7  ;;  %vm11548_vm6 = vmmov %vm11539_vm3 }
 0x485   :  { %v9658_v2 = vpop.permute.xlu0 %1889  ;;  %v9660_v24 = vpop.permute.xlu1 %1709 }
 0x486   :  { %11545 = vst [vmem:[#allocation15_spill] sm:$0xff] %v9658_v2  ;;  %11546 = vst [vmem:[#allocation16_spill] sm:$0xff] %v9660_v24  ;;  %7551 = vmatprep.mubr.msk.f32.mxu1 %vm11379_vm1, %v9660_v24 }
 0x489   :  { %v1803_v43 = vpop.permute.xlu1 %1802  ;;  %v1984_v52 = vpop.permute.xlu0 %1983 }
 0x48a   :  { %7554 = vmatprep.subr.msk.mxu1 %vm11539_vm3, %v1803_v43 }
 0x48b   :  { %7552 = vmatmul.mubr.msk.f32.vlgmr.msra.gmra.mrb[8].mxu1 %vm11379_vm1, %v9638_v51 }
 0x48c   :  { %7555 = vmatpush3.msk.msra.mxu1 %vm11547_vm4, %v1803_v43  ;;  %7556 = vmatprep.mubr.msk.f32.mxu1 %vm11379_vm1, %v9648_v15  ;;  %vm11552_vm4 = vmmov %vm11539_vm3 }
 0x48d   :  { %7559 = vmatprep.subr.msk.mxu1 %vm11548_vm6, %v1892_v63  ;;  %v9671_v31 = vpop.permute.xlu1 %1800  ;;  %v9673_v5 = vpop.permute.xlu0 %1978  ;;  %vm11554_vm6 = vmmov %vm11539_vm3 }
 0x48e   :  { %11549 = vst [vmem:[#allocation17_spill] sm:$0xff] %v9673_v5 }
 0x491   :  { %v9675_v7 = vpop.permute.xlu1 %1887  ;;  %v9682_v30 = vpop.permute.xlu0 %2070 }
 0x492   :  { %11550 = vst [vmem:[#allocation18_spill] sm:$0xff] %v9675_v7  ;;  %11551 = vst [vmem:[#allocation19_spill] sm:$0xff] %v9682_v30 }
 0x493   :  { %7557 = vmatmul.mubr.msk.f32.vlgmr.msra.gmra.mrb[8].mxu1 %vm11379_vm1, %v9671_v31 }
 0x494   :  { %7560 = vmatpush3.msk.msra.mxu1 %vm11539_vm3, %v1892_v63  ;;  %7561 = vmatprep.mubr.msk.f32.mxu1 %vm11379_vm1, %v9675_v7 }
 0x495   :  { %v1982_v57 = vpop.permute.xlu1 %1981  ;;  %v2433_v53 = vpop.permute.xlu0 %2432 }
 0x496   :  { %v1986_v43 = vsel %vm11378_vm13, %v1982_v57, %v1984_v52  ;;  %v845_v52 = vmul.f32 %v8819_v0, %v8771_v56  ;;  %v844_v57 = vmul.f32 %v8819_v0, %v8760_v50  ;;  %vm11567_vm13 = vnez %v11451_v25 }
 0x497   :  { %7564 = vmatprep.subr.msk.mxu1 %vm11552_vm4, %v1986_v43  ;;  %vm11555_vm4 = vmmov %vm11539_vm3 }
 0x498   :  { %v851_v56 = vadd.f32 %v844_v57, %v8825_v4 }
 0x499   :  { %v9686_v47 = vpop.permute.xlu1 %1976  ;;  %v2164_v32 = vpop.permute.xlu0 %2163 }
 0x49a   :  { %11553 = vst [vmem:[#allocation20_spill] sm:$0xff] %v9686_v47 }
 0x49b   :  { %7562 = vmatmul.mubr.msk.f32.vlgmr.msra.gmra.mrb[8].mxu1 %vm11379_vm1, %v9658_v2 }
 0x49c   :  { %7565 = vmatpush3.msk.msra.mxu1 %vm11554_vm6, %v1986_v43  ;;  %7566 = vmatprep.mubr.msk.f32.mxu1 %vm11379_vm1, %v9686_v47  ;;  %v9706_v43 = vadd.f32 %v845_v52, %v8825_v4  ;;  %vm11556_vm6 = vmmov %vm11539_vm3 }
 0x49d   :  { %v2075_v63 = vpop.permute.xlu1 %2074 }
 0x49e   :  { %7569 = vmatprep.subr.msk.mxu1 %vm11539_vm3, %v2075_v63  ;;  %vm11557_vm3 = vcmask 1039360  }
 0x4a1   :  { %v9694_v23 = vpop.permute.xlu1 %2072 }
 0x4a3   :  { %7567 = vmatmul.mubr.msk.f32.vlgmr.msra.gmra.mrb[8].mxu1 %vm11379_vm1, %v9673_v5 }
 0x4a4   :  { %7570 = vmatpush3.msk.msra.mxu1 %vm11555_vm4, %v2075_v63  ;;  %7571 = vmatprep.mubr.msk.f32.mxu1 %vm11379_vm1, %v9682_v30  ;;  %vm11558_vm4 = vmmov %vm11557_vm3  ;;  %v9718_v30 = vpop.permute.xlu0 %2161 }
 0x4a5   :  { %7574 = vmatprep.subr.msk.mxu1 %vm11556_vm6, %v2164_v32  ;;  %v9709_v47 = vpop.permute.xlu1 %2434  ;;  %v2436_v63 = vsel %vm11558_vm4, %v9436_v14, %v2433_v53 }
 0x4a6   :  { %v2443_v5 = vmax.f32 %v9706_v43, %v9709_v47  ;;  %v2437_v50 = vsel %vm11557_vm3, %v2433_v53, %v9709_v47  ;;  %v2441_v7 = vmax.f32 %v9415_v19, %v2436_v63  ;;  %vm11559_vm3 = vmmov %vm11556_vm6  ;;  %v11562_v53 = vmov 1.0|1.0  }
 0x4a7   :  { %v2442_v2 = vmax.f32 %v851_v56, %v2437_v50  ;;  %vm11560_vm4 = vmmov %vm11559_vm3 }
 0x4a8   :  { %2451 = vrot.lane.b32.xlu0 %v2443_v5, %s8392_s21  ;;  %v9730_v14 = vpop.permute.xlu0 %2248 }
 0x4a9   :  { %v9720_v52 = vpop.permute.xlu1 %2159  ;;  %2449 = vrot.lane.b32.xlu1 %v2442_v2, %s8392_s21 }
 0x4ab   :  { %7572 = vmatmul.mubr.msk.f32.vlgmr.msra.gmra.mrb[8].mxu1 %vm11379_vm1, %v9694_v23 }
 0x4ac   :  { %7575 = vmatpush3.msk.msra.mxu1 %vm11556_vm6, %v2164_v32  ;;  %2447 = vrot.lane.b32.xlu0 %v2441_v7, %s8392_s21  ;;  %v2342_v19 = vpop.permute.xlu0 %2341  ;;  %vm11561_vm6 = vmmov %vm11559_vm3 }
 0x4ad   :  { %v2253_v57 = vpop.permute.xlu1 %2252  ;;  %2426 = vrot.lane.b32.xlu1 %v8828_v8, %s8393_s2  ;;  %7576 = vmatprep.mubr.msk.f32.mxu1 %vm11379_vm1, %v9720_v52 }
 0x4ae   :  { %7579 = vmatprep.subr.msk.mxu1 %vm11559_vm3, %v2253_v57 }
 0x4b0   :  { %v9752_v2 = vpop.permute.xlu0 %2339 }
 0x4b1   :  { %2461 = vrot.lane.b32.xlu1 %v9706_v43, %s8392_s21  ;;  %v9740_v32 = vpop.permute.xlu1 %2250  ;;  %s8394_s21 = smov 75  }
 0x4b3   :  { %7577 = vmatmul.mubr.msk.f32.vlgmr.msra.gmra.mrb[8].mxu1 %vm11379_vm1, %v9718_v30 }
 0x4b4   :  { %7580 = vmatpush3.msk.msra.mxu1 %vm11560_vm4, %v2253_v57  ;;  %7581 = vmatprep.mubr.msk.f32.mxu1 %vm11379_vm1, %v9730_v14  ;;  %vm11563_vm4 = vnez %v11433_v29  ;;  %v11733_v29 = vld [vmem:[#allocation12_spill] sm:$0xff] }
 0x4b5   :  { %7584 = vmatprep.subr.msk.mxu1 %vm11561_vm6, %v2342_v19  ;;  %v9742_v8 = vpop.permute.xlu1 %2337  ;;  %vm11564_vm6 = vnez %v11435_v35  ;;  %v11734_v35 = vld [vmem:[#allocation14_spill] sm:$0xff] }
 0x4bb   :  { %7582 = vmatmul.mubr.msk.f32.vlgmr.msra.gmra.mrb[8].mxu1 %vm11379_vm1, %v9740_v32 }
 0x4bc   :  { %7585 = vmatpush3.msk.msra.mxu1 %vm11559_vm3, %v2342_v19  ;;  %7586 = vmatprep.mubr.msk.f32.mxu1 %vm11379_vm1, %v9742_v8  ;;  %vm11565_vm3 = vnez %v11443_v6 }
 0x4bd   :  { %7901 = vmatprep.subr.msk.bf16.mxu1 %vm8901_vm11, %v11562_v53 }
 0x4c3   :  { %7587 = vmatmul.mubr.msk.f32.vlgmr.msra.gmra.mrb[8].mxu1 %vm11379_vm1, %v9752_v2  ;;  %vm11568_vm1 = vnez %v11453_v58 }
 0x4c4   :  { %7903 = vmatpush1.bf16.msk.msra.mxu1 %vm8918_vm7, %v11562_v53 }
 0x4c5   :  { %7905 = vmatprep.subr.msk.bf16.mxu1 %vm11563_vm4, %v11562_v53 }
 0x4c8   :  { %7907 = vmatpush1.bf16.msk.msra.mxu1 %vm11564_vm6, %v11562_v53 }
 0x4c9   :  { %7909 = vmatprep.subr.msk.bf16.mxu1 %vm11565_vm3, %v11562_v53 }
 0x4cc   :  { %7911 = vmatpush1.bf16.msk.msra.mxu1 %vm11566_vm2, %v11562_v53 }
 0x4cd   :  { %7913 = vmatprep.subr.msk.bf16.mxu1 %vm11567_vm13, %v11562_v53  ;;  %vm11573_vm13 = vnez %v11486_v37 }
 0x4d0   :  { %7915 = vmatpush1.bf16.msk.msra.mxu1 %vm11568_vm1, %v11562_v53  ;;  %vm11574_vm1 = vnez %v11488_v21 }
 0x4d1   :  { %7917 = vmatprep.subr.msk.bf16.mxu1 %vm11569_vm8, %v11562_v53  ;;  %vm11575_vm8 = vnez %v11490_v3 }
 0x4d4   :  { %7919 = vmatpush1.bf16.msk.msra.mxu1 %vm11570_vm5, %v11562_v53 }
 0x4d5   :  { %7921 = vmatprep.subr.msk.bf16.mxu1 %vm11571_vm15, %v11562_v53 }
 0x4d8   :  { %7923 = vmatpush1.bf16.msk.msra.mxu1 %vm11572_vm9, %v11562_v53  ;;  %vm11576_vm9 = vnez %v11496_v1 }
 0x4d9   :  { %7925 = vmatprep.subr.msk.bf16.mxu1 %vm11573_vm13, %v11562_v53  ;;  %vm11577_vm13 = vnez %v11498_v46 }
 0x4dc   :  { %7927 = vmatpush1.bf16.msk.msra.mxu1 %vm11574_vm1, %v11562_v53  ;;  %vm11578_vm1 = vnez %v11502_v39 }
 0x4dd   :  { %7929 = vmatprep.subr.msk.bf16.mxu1 %vm11575_vm8, %v11562_v53  ;;  %vm11579_vm8 = vnez %v11509_v27 }
 0x4e0   :  { %7931 = vmatpush1.bf16.msk.msra.mxu1 %vm9308_vm14, %v11562_v53  ;;  %vm11580_vm14 = vnez %v11511_v28 }
 0x4e1   :  { %7933 = vmatprep.subr.msk.bf16.mxu1 %vm9319_vm12, %v11562_v53  ;;  %vm11581_vm12 = vnez %v11517_v54 }
 0x4e4   :  { %7935 = vmatpush1.bf16.msk.msra.mxu1 %vm11576_vm9, %v11562_v53  ;;  %vm11582_vm9 = vnez %v11520_v60 }
 0x4e5   :  { %7937 = vmatprep.subr.msk.bf16.mxu1 %vm11577_vm13, %v11562_v53  ;;  %vm11583_vm13 = vnez %v11526_v36 }
 0x4e8   :  { %7939 = vmatpush1.bf16.msk.msra.mxu1 %vm11578_vm1, %v11562_v53  ;;  %vm11584_vm1 = vnez %v11528_v11 }
 0x4e9   :  { %7941 = vmatprep.subr.msk.bf16.mxu1 %vm11579_vm8, %v11562_v53 }
 0x4ec   :  { %7943 = vmatpush1.bf16.msk.msra.mxu1 %vm11580_vm14, %v11562_v53  ;;  %vm11588_vm14 = vcmask 751320  }
 0x4ed   :  { %7945 = vmatprep.subr.msk.bf16.mxu1 %vm11581_vm12, %v11562_v53  ;;  %vm2453_vm12 = vcmask 310272  }
 0x4f0   :  { %7947 = vmatpush1.bf16.msk.msra.mxu1 %vm11582_vm9, %v11562_v53  ;;  %vm11585_vm9 = vcmask 742400  }
 0x4f1   :  { %7949 = vmatprep.subr.msk.bf16.mxu1 %vm11583_vm13, %v11562_v53  ;;  %vm11586_vm13 = vcmask 5120  }
 0x4f4   :  { %7951 = vmatpush1.bf16.msk.msra.mxu1 %vm11584_vm1, %v11562_v53  ;;  %vm11587_vm1 = vcmask 1045512  }
 0x4f5   :  { %7954 = vmatprep.subr.msk.bf16.mxu1 %vm9552_vm0, %v9558_v34  ;;  %vm11590_vm0 = vcmask 48128  }
 0x4f8   :  { %7957 = vmatpush1.bf16.msk.msra.mxu1 %vm9561_vm10, %v9556_v38  ;;  %vm11589_vm10 = vcmask 752640  }
 0x51a   :  { %v2452_v5 = vpop.permute.xlu0 %2451 }
 0x51b   :  { %v2450_v7 = vpop.permute.xlu1 %2449 }
 0x51c   :  { %v2455_v56 = vsel %vm2453_vm12, %v2450_v7, %v2452_v5 }
 0x51d   :  { %2459 = vst.msk [vmem:[#allocation2 + $0x8] sm:$0x3f] %vm11585_vm9, %v2455_v56  ;;  %vm11596_vm9 = vmmov %vm11590_vm0 }
 0x51e   :  { %v2448_v50 = vpop.permute.xlu0 %2447 }
 0x51f   :  { %v2454_v63 = vsel %vm2453_vm12, %v2448_v50, %v2450_v7  ;;  %v2427_v57 = vpop.permute.xlu1 %2426 }
 0x520   :  { %2429 = vst.msk [vmem:[#allocation2] sm:$0x3f] %vm11586_vm13, %v2427_v57  ;;  %vm11599_vm13 = vmmov %vm11596_vm9 }
 0x521   :  { %2458 = vst.msk [vmem:[#allocation2] sm:$0x3f] %vm11587_vm1, %v2454_v63 }
 0x523   :  { %v2462_v19 = vpop.permute.xlu1 %2461 }
 0x524   :  { %2464 = vst.msk [vmem:[#allocation2 + $0x8] sm:$0x3f] %vm11588_vm14, %v2462_v19  ;;  %vm11593_vm14 = vcmask 1045504  }
 0x525   :  { %vm11594_vm12 = vmmov %vm11593_vm14 }
 0x528   :  { %v2465_v55 = vld [vmem:[#allocation2] sm:$0x3f] }
 0x529   :  { %v2467_v38 = vmax.f32 %v2465_v55, 0.0  ;;  %v828_v55 = vmul.f32 %v8819_v0, %v8737_v26 }
 0x52b   :  { %v2466_v34 = vld [vmem:[#allocation2 + $0x8] sm:$0x3f] }
 0x52c   :  { %v2468_v45 = vmax.f32 %v2466_v34, 0.0  ;;  %v9867_v34 = vadd.f32 %v8825_v4, %v828_v55 }
 0x52e   :  { %7044 = vmatprep.mubr.msk.f32.mxu1 %vm11589_vm10, %v2468_v45  ;;  %vm11595_vm10 = vmmov %vm11590_vm0 }
 0x52f   :  { %2537 = vmatmul.mubr.f32.vlgmr.msra.gmra.mrb[10].mxu1 %v2467_v38  ;;  %v827_v38 = vmul.f32 %v8819_v0, %v8733_v22 }
 0x530   :  { %7646 = vmatprep.mubr.msk.f32.mxu1 %vm11590_vm0, %v9535_v44  ;;  %vm11597_vm0 = vmmov %vm11594_vm12 }
 0x531   :  { %v839_v45 = vadd.f32 %v8825_v4, %v827_v38  ;;  %vm11598_vm1 = vmmov %vm11597_vm0  ;;  %v847_v38 = vmul.f32 %v8819_v0, %v8792_v17 }
 0x596   :  { %v9844_v5 = vpop.f32.mrb[8].mxu1 }
 0x597   :  { %11591 = vst [vmem:[#allocation21_spill] sm:$0xff] %v9844_v5  ;;  %v9846_v7 = vpop.f32.mrb[9].mxu1 }
 0x598   :  { %11592 = vst [vmem:[#allocation22_spill] sm:$0xff] %v9846_v7 }
 0x602   :  { %v2538_v56 = vpop.f32.mrb[10].mxu1 }
 0x603   :  { %2704 = vrot.lane.b32.xlu1 %v2538_v56, %s8380_s28  ;;  %2623 = vrot.lane.b32.xlu0 %v2538_v56, %s8377_s26  ;;  %v2540_v50 = vpop.f32.mrb[11].mxu1 }
 0x604   :  { %7589 = vmatprep.subr.msk.mxu0 %vm11593_vm14, %v2538_v56  ;;  %vm11600_vm14 = vmmov %vm11597_vm0 }
 0x605   :  { %7590 = vmatpush3.msk.msra.mxu0 %vm11594_vm12, %v2538_v56  ;;  %vm11601_vm12 = vmmov %vm11597_vm0 }
 0x606   :  { %7592 = vmatmul.mubr.msk.f32.vlgmr.msra.gmra.mrb[10].mxu0 %vm11595_vm10, %v9512_v62  ;;  %vm11602_vm10 = vmmov %vm11596_vm9 }
 0x607   :  { %7596 = vmatprep.mubr.msk.f32.mxu0 %vm11596_vm9, %v9640_v59  ;;  %2866 = vrot.lane.b32.xlu1 %v2538_v56, %s8383_s29  ;;  %vm11603_vm9 = vmmov %vm11597_vm0 }
 0x608   :  { %2785 = vrot.lane.b32.xlu0 %v2538_v56, %s8376_s3 }
 0x60b   :  { %3029 = vrot.lane.b32.xlu1 %v2538_v56, %s8384_s30 }
 0x60c   :  { %2947 = vrot.lane.b32.xlu0 %v2538_v56, %s8381_s4 }
 0x60f   :  { %3113 = vrot.lane.b32.xlu1 %v2540_v50, %s8374_s25 }
 0x610   :  { %3031 = vrot.lane.b32.xlu0 %v2540_v50, %s8384_s30 }
 0x613   :  { %3445 = vrot.lane.b32.xlu1 %v9867_v34, %s8370_s5 }
 0x614   :  { %3443 = vrot.lane.b32.xlu0 %v839_v45, %s8370_s5  ;;  %v9894_v45 = vadd.f32 %v847_v38, %v8825_v4 }
 0x617   :  { %3275 = vrot.lane.b32.xlu1 %v2540_v50, %s8391_s0 }
 0x618   :  { %3194 = vrot.lane.b32.xlu0 %v2540_v50, %s8387_s24 }
 0x61c   :  { %3356 = vrot.lane.b32.xlu0 %v2540_v50, %s8390_s23 }
 0x675   :  { %v2705_v26 = vpop.permute.xlu1 %2704  ;;  %v2624_v63 = vpop.permute.xlu0 %2623 }
 0x676   :  { %7594 = vmatprep.subr.msk.mxu0 %vm11597_vm0, %v2624_v63  ;;  %vm11604_vm0 = vmmov %vm11602_vm10 }
 0x677   :  { %7595 = vmatpush3.msk.msra.mxu0 %vm11598_vm1, %v2624_v63 }
 0x678   :  { %7597 = vmatmul.mubr.msk.f32.vlgmr.msra.gmra.mrb[10].mxu0 %vm11599_vm13, %v9632_v10  ;;  %7599 = vmatprep.subr.msk.mxu0 %vm11600_vm14, %v2705_v26  ;;  %vm11605_vm13 = vmmov %vm11604_vm0 }
 0x679   :  { %v2867_v22 = vpop.permute.xlu1 %2866  ;;  %7600 = vmatpush3.msk.msra.mxu0 %vm11601_vm12, %v2705_v26  ;;  %7601 = vmatprep.mubr.msk.f32.mxu0 %vm11602_vm10, %v9634_v49  ;;  %vm11606_vm14 = vmmov %vm11598_vm1  ;;  %v846_v26 = vmul.f32 %v8819_v0, %v8789_v13  ;;  %vm11607_vm12 = vcmask 1039360  }
 0x67a   :  { %v2786_v57 = vpop.permute.xlu0 %2785  ;;  %vm11608_vm10 = vmmov %vm11607_vm12 }
 0x67b   :  { %7604 = vmatprep.subr.msk.mxu0 %vm11603_vm9, %v2786_v57  ;;  %v853_v7 = vadd.f32 %v846_v26, %v8825_v4  ;;  %vm11609_vm9 = vmmov %vm11604_vm0  ;;  %v11658_v26 = vld [vmem:[#allocation12_spill] sm:$0xff] }
 0x67d   :  { %v3030_v19 = vpop.permute.xlu1 %3029 }
 0x67e   :  { %v2948_v56 = vpop.permute.xlu0 %2947 }
 0x680   :  { %7602 = vmatmul.mubr.msk.f32.vlgmr.msra.gmra.mrb[10].mxu0 %vm11604_vm0, %v9653_v41  ;;  %vm11610_vm0 = vmmov %vm11598_vm1 }
 0x681   :  { %7605 = vmatpush3.msk.msra.mxu0 %vm11598_vm1, %v2786_v57  ;;  %7606 = vmatprep.mubr.msk.f32.mxu0 %vm11605_vm13, %v9660_v24  ;;  %v3114_v50 = vpop.permute.xlu1 %3113  ;;  %vm11611_vm1 = vmmov %vm11609_vm9 }
 0x682   :  { %7609 = vmatprep.subr.msk.mxu0 %vm11606_vm14, %v2867_v22  ;;  %v3032_v55 = vpop.permute.xlu0 %3031  ;;  %vm11612_vm13 = vmmov %vm11610_vm0 }
 0x683   :  { %vm11613_vm14 = vmmov %vm11611_vm1 }
 0x684   :  { %vm11621_vm8 = vmmov %vm11611_vm1 }
 0x685   :  { %v9898_v63 = vpop.permute.xlu1 %3445 }
 0x686   :  { %v3444_v5 = vpop.permute.xlu0 %3443  ;;  %v3454_v57 = vmax.f32 %v9894_v45, %v9898_v63 }
 0x687   :  { %v3447_v24 = vsel %vm11607_vm12, %v9709_v47, %v3444_v5  ;;  %v3448_v17 = vsel %vm11608_vm10, %v3444_v5, %v9898_v63  ;;  %vm11614_vm12 = vcmask 64512   ;;  %vm11615_vm10 = vmmov %vm11610_vm0  ;;  %v11616_v5 = vld [vmem:[#allocation18_spill] sm:$0xff] }
 0x688   :  { %7607 = vmatmul.mubr.msk.f32.vlgmr.msra.gmra.mrb[10].mxu0 %vm11609_vm9, %v9638_v51  ;;  %3462 = vrot.lane.b32.xlu0 %v3454_v57, %s8394_s21  ;;  %v3453_v13 = vmax.f32 %v853_v7, %v3448_v17  ;;  %v3452_v38 = vmax.f32 %v9706_v43, %v3447_v24  ;;  %v3033_v47 = vsel %vm11614_vm12, %v3030_v19, %v3032_v55  ;;  %vm11617_vm9 = vmmov %vm11611_vm1  ;;  %v11618_v7 = vld [vmem:[#allocation15_spill] sm:$0xff]  ;;  %v11623_v24 = vld [vmem:[#allocation17_spill] sm:$0xff] }
 0x689   :  { %7610 = vmatpush3.msk.msra.mxu0 %vm11610_vm0, %v2867_v22  ;;  %7611 = vmatprep.mubr.msk.f32.mxu0 %vm11611_vm1, %v9648_v15  ;;  %vm11624_vm12 = vmmov %vm11611_vm1  ;;  %v11626_v22 = vld [vmem:[#allocation19_spill] sm:$0xff]  ;;  %v3276_v19 = vpop.permute.xlu1 %3275  ;;  %v11659_v57 = vld [vmem:[#allocation14_spill] sm:$0xff] }
 0x68a   :  { %7614 = vmatprep.subr.msk.mxu0 %vm11612_vm13, %v2948_v56  ;;  %3460 = vrot.lane.b32.xlu1 %v3453_v13, %s8394_s21  ;;  %vm11619_vm13 = vmmov %vm11610_vm0  ;;  %v3195_v43 = vpop.permute.xlu0 %3194  ;;  %v11656_v55 = vld [vmem:[#allocation11_spill] sm:$0xff] }
 0x68c   :  { %3458 = vrot.lane.b32.xlu0 %v3452_v38, %s8394_s21 }
 0x68e   :  { %3437 = vrot.lane.b32.xlu1 %v9619_v20, %s8389_s22  ;;  %v11620_v20 = vld [vmem:[#allocation20_spill] sm:$0xff]  ;;  %s8395_s22 = smov 111  }
 0x690   :  { %7612 = vmatmul.mubr.msk.f32.vlgmr.msra.gmra.mrb[10].mxu0 %vm11613_vm14, %v9671_v31  ;;  %vm11622_vm14 = vmmov %vm11610_vm0 }
 0x691   :  { %7615 = vmatpush3.msk.msra.mxu0 %vm11615_vm10, %v2948_v56  ;;  %7616 = vmatprep.mubr.msk.f32.mxu0 %vm11617_vm9, %v11616_v5  ;;  %vm11625_vm10 = vmmov %vm11610_vm0  ;;  %v3357_v56 = vpop.permute.xlu0 %3356 }
 0x692   :  { %7619 = vmatprep.subr.msk.mxu0 %vm11610_vm0, %v3033_v47  ;;  %3472 = vrot.lane.b32.xlu1 %v9894_v45, %s8394_s21  ;;  %vm11627_vm9 = vmmov %vm11611_vm1  ;;  %s8396_s21 = smov 112  }
 0x698   :  { %7617 = vmatmul.mubr.msk.f32.vlgmr.msra.gmra.mrb[10].mxu0 %vm11611_vm1, %v11618_v7 }
 0x699   :  { %7620 = vmatpush3.msk.msra.mxu0 %vm11619_vm13, %v3033_v47  ;;  %7621 = vmatprep.mubr.msk.f32.mxu0 %vm11621_vm8, %v11620_v20  ;;  %vm11628_vm13 = vmmov %vm11610_vm0 }
 0x69a   :  { %7624 = vmatprep.subr.msk.mxu0 %vm11622_vm14, %v3114_v50  ;;  %vm11629_vm8 = vmmov %vm11611_vm1 }
 0x69b   :  { %vm11630_vm14 = vmmov %vm11610_vm0 }
 0x6a0   :  { %7622 = vmatmul.mubr.msk.f32.vlgmr.msra.gmra.mrb[10].mxu0 %vm11624_vm12, %v11623_v24  ;;  %vm11631_vm12 = vmmov %vm11611_vm1 }
 0x6a1   :  { %7625 = vmatpush3.msk.msra.mxu0 %vm11625_vm10, %v3114_v50  ;;  %7626 = vmatprep.mubr.msk.f32.mxu0 %vm11627_vm9, %v11626_v22  ;;  %vm11632_vm10 = vmmov %vm11610_vm0  ;;  %v11655_v50 = vld [vmem:[#allocation13_spill] sm:$0xff] }
 0x6a2   :  { %7629 = vmatprep.subr.msk.mxu0 %vm11610_vm0, %v3195_v43  ;;  %vm11633_vm9 = vmmov %vm11611_vm1 }
 0x6a8   :  { %7627 = vmatmul.mubr.msk.f32.vlgmr.msra.gmra.mrb[10].mxu0 %vm11611_vm1, %v9694_v23 }
 0x6a9   :  { %7630 = vmatpush3.msk.msra.mxu0 %vm11628_vm13, %v3195_v43  ;;  %7631 = vmatprep.mubr.msk.f32.mxu0 %vm11629_vm8, %v9720_v52  ;;  %vm11634_vm13 = vmmov %vm11610_vm0 }
 0x6aa   :  { %7634 = vmatprep.subr.msk.mxu0 %vm11630_vm14, %v3276_v19  ;;  %vm11635_vm8 = vmmov %vm11611_vm1 }
 0x6ab   :  { %vm11636_vm14 = vmmov %vm11611_vm1 }
 0x6b0   :  { %7632 = vmatmul.mubr.msk.f32.vlgmr.msra.gmra.mrb[10].mxu0 %vm11631_vm12, %v9718_v30  ;;  %vm11637_vm12 = vnez %v11451_v25 }
 0x6b1   :  { %7635 = vmatpush3.msk.msra.mxu0 %vm11632_vm10, %v3276_v19  ;;  %7636 = vmatprep.mubr.msk.f32.mxu0 %vm11633_vm9, %v9730_v14  ;;  %vm11638_vm10 = vnez %v11453_v58  ;;  %vm11639_vm9 = vnez %v11463_v16 }
 0x6b2   :  { %7639 = vmatprep.subr.msk.mxu0 %vm11610_vm0, %v3357_v56  ;;  %vm11640_vm0 = vnez %v11477_v40 }
 0x6b8   :  { %7637 = vmatmul.mubr.msk.f32.vlgmr.msra.gmra.mrb[10].mxu0 %vm11611_vm1, %v9740_v32  ;;  %vm11641_vm1 = vnez %v11486_v37 }
 0x6b9   :  { %7640 = vmatpush3.msk.msra.mxu0 %vm11634_vm13, %v3357_v56  ;;  %7641 = vmatprep.mubr.msk.f32.mxu0 %vm11635_vm8, %v9742_v8  ;;  %vm11642_vm13 = vnez %v11488_v21  ;;  %vm11643_vm8 = vnez %v11490_v3 }
 0x6ba   :  { %7959 = vmatprep.subr.msk.bf16.mxu0 %vm8901_vm11, %v11562_v53 }
 0x6c0   :  { %7642 = vmatmul.mubr.msk.f32.vlgmr.msra.gmra.mrb[10].mxu0 %vm11636_vm14, %v9752_v2  ;;  %vm11644_vm14 = vnez %v11492_v18 }
 0x6c1   :  { %7961 = vmatpush1.bf16.msk.msra.mxu0 %vm8918_vm7, %v11562_v53 }
 0x6c2   :  { %7963 = vmatprep.subr.msk.bf16.mxu0 %vm11563_vm4, %v11562_v53 }
 0x6c5   :  { %7965 = vmatpush1.bf16.msk.msra.mxu0 %vm11564_vm6, %v11562_v53 }
 0x6c6   :  { %7967 = vmatprep.subr.msk.bf16.mxu0 %vm11565_vm3, %v11562_v53 }
 0x6c9   :  { %7969 = vmatpush1.bf16.msk.msra.mxu0 %vm11566_vm2, %v11562_v53 }
 0x6ca   :  { %7971 = vmatprep.subr.msk.bf16.mxu0 %vm11637_vm12, %v11562_v53 }
 0x6cd   :  { %7973 = vmatpush1.bf16.msk.msra.mxu0 %vm11638_vm10, %v11562_v53 }
 0x6ce   :  { %7975 = vmatprep.subr.msk.bf16.mxu0 %vm11639_vm9, %v11562_v53 }
 0x6d1   :  { %7977 = vmatpush1.bf16.msk.msra.mxu0 %vm11570_vm5, %v11562_v53  ;;  %vm11664_vm5 = vcmask 751320  }
 0x6d2   :  { %7979 = vmatprep.subr.msk.bf16.mxu0 %vm11571_vm15, %v11562_v53  ;;  %vm11645_vm15 = vnez %v11494_v12 }
 0x6d5   :  { %7981 = vmatpush1.bf16.msk.msra.mxu0 %vm11640_vm0, %v11562_v53  ;;  %vm11646_vm0 = vnez %v11496_v1 }
 0x6d6   :  { %7983 = vmatprep.subr.msk.bf16.mxu0 %vm11641_vm1, %v11562_v53  ;;  %vm11647_vm1 = vnez %v11498_v46 }
 0x6d9   :  { %7985 = vmatpush1.bf16.msk.msra.mxu0 %vm11642_vm13, %v11562_v53  ;;  %vm11648_vm13 = vnez %v11502_v39 }
 0x6da   :  { %7987 = vmatprep.subr.msk.bf16.mxu0 %vm11643_vm8, %v11562_v53  ;;  %vm11649_vm8 = vnez %v11509_v27 }
 0x6dd   :  { %7989 = vmatpush1.bf16.msk.msra.mxu0 %vm11644_vm14, %v11562_v53  ;;  %vm11650_vm14 = vnez %v11511_v28 }
 0x6de   :  { %7991 = vmatprep.subr.msk.bf16.mxu0 %vm11645_vm15, %v11562_v53  ;;  %vm11651_vm15 = vnez %v11517_v54 }
 0x6e1   :  { %7993 = vmatpush1.bf16.msk.msra.mxu0 %vm11646_vm0, %v11562_v53  ;;  %vm11652_vm0 = vnez %v11520_v60 }
 0x6e2   :  { %7995 = vmatprep.subr.msk.bf16.mxu0 %vm11647_vm1, %v11562_v53  ;;  %vm11653_vm1 = vnez %v11526_v36 }
 0x6e5   :  { %7997 = vmatpush1.bf16.msk.msra.mxu0 %vm11648_vm13, %v11562_v53  ;;  %vm11654_vm13 = vnez %v11528_v11 }
 0x6e6   :  { %7999 = vmatprep.subr.msk.bf16.mxu0 %vm11649_vm8, %v11562_v53  ;;  %vm11657_vm8 = vnez %v11656_v55 }
 0x6e9   :  { %8001 = vmatpush1.bf16.msk.msra.mxu0 %vm11650_vm14, %v11562_v53  ;;  %vm11660_vm14 = vnez %v11659_v57 }
 0x6ea   :  { %8003 = vmatprep.subr.msk.bf16.mxu0 %vm11651_vm15, %v11562_v53  ;;  %vm3464_vm15 = vcmask 613376  }
 0x6ed   :  { %8005 = vmatpush1.bf16.msk.msra.mxu0 %vm11652_vm0, %v11562_v53  ;;  %vm11661_vm0 = vcmask 742400  }
 0x6ee   :  { %8007 = vmatprep.subr.msk.bf16.mxu0 %vm11653_vm1, %v11562_v53  ;;  %vm11662_vm1 = vcmask 5120  }
 0x6f1   :  { %8009 = vmatpush1.bf16.msk.msra.mxu0 %vm11654_vm13, %v11562_v53  ;;  %vm11663_vm13 = vcmask 1045512  }
 0x6f2   :  { %8012 = vmatprep.subr.msk.bf16.mxu0 %vm11657_vm8, %v11655_v50  ;;  %vm11666_vm8 = vcmask 48128  }
 0x6f5   :  { %8015 = vmatpush1.bf16.msk.msra.mxu0 %vm11660_vm14, %v11658_v26  ;;  %vm11665_vm14 = vcmask 752640  }
 0x6fa   :  { %v3463_v17 = vpop.permute.xlu0 %3462 }
 0x6fc   :  { %v3461_v13 = vpop.permute.xlu1 %3460 }
 0x6fd   :  { %v3466_v38 = vsel %vm3464_vm15, %v3461_v13, %v3463_v17 }
 0x6fe   :  { %3470 = vst.msk [vmem:[#allocation2 + $0x8] sm:$0x3f] %vm11661_vm0, %v3466_v38  ;;  %v3459_v47 = vpop.permute.xlu0 %3458  ;;  %vm11669_vm0 = vmmov %vm11666_vm8 }
 0x6ff   :  { %v3465_v43 = vsel %vm3464_vm15, %v3459_v47, %v3461_v13  ;;  %vm11667_vm15 = vcmask 1045504   ;;  %vm11678_vm9 = vmmov %vm11669_vm0 }
 0x700   :  { %v3438_v19 = vpop.permute.xlu1 %3437 }
 0x701   :  { %3440 = vst.msk [vmem:[#allocation2] sm:$0x3f] %vm11662_vm1, %v3438_v19  ;;  %vm11670_vm1 = vmmov %vm11669_vm0 }
 0x702   :  { %3469 = vst.msk [vmem:[#allocation2] sm:$0x3f] %vm11663_vm13, %v3465_v43 }
 0x704   :  { %v3473_v56 = vpop.permute.xlu1 %3472 }
 0x705   :  { %3475 = vst.msk [vmem:[#allocation2 + $0x8] sm:$0x3f] %vm11664_vm5, %v3473_v56  ;;  %vm11668_vm5 = vmmov %vm11667_vm15 }
 0x706   :  { %vm11673_vm13 = vmmov %vm11668_vm5 }
 0x709   :  { %v3476_v55 = vld [vmem:[#allocation2] sm:$0x3f] }
 0x70a   :  { %v3478_v26 = vmax.f32 %v3476_v55, 0.0  ;;  %v11672_v55 = vld [vmem:[#allocation9_spill] sm:$0xff] }
 0x70c   :  { %v3477_v50 = vld [vmem:[#allocation2 + $0x8] sm:$0x3f] }
 0x70d   :  { %v3479_v57 = vmax.f32 %v3477_v50, 0.0 }
 0x70f   :  { %7134 = vmatprep.mubr.msk.f32.mxu0 %vm11665_vm14, %v3479_v57  ;;  %vm11675_vm14 = vmmov %vm11669_vm0 }
 0x710   :  { %3548 = vmatmul.mubr.f32.vlgmr.msra.gmra.mrb[12].mxu0 %v3478_v26  ;;  %v848_v26 = vmul.f32 %v8819_v0, %v11672_v55 }
 0x711   :  { %7701 = vmatprep.mubr.msk.f32.mxu0 %vm11666_vm8, %v9535_v44  ;;  %v11671_v44 = vld [vmem:[#allocation8_spill] sm:$0xff]  ;;  %vm11674_vm8 = vmmov %vm11668_vm5 }
 0x712   :  { %v829_v50 = vmul.f32 %v8819_v0, %v11671_v44  ;;  %v855_v57 = vadd.f32 %v848_v26, %v8825_v4 }
 0x793   :  { %v10046_v17 = vpop.f32.mrb[10].mxu0 }
 0x794   :  { %v10048_v13 = vpop.f32.mrb[11].mxu0 }
 0x7e3   :  { %v3549_v38 = vpop.f32.mrb[12].mxu0 }
 0x7e4   :  { %3715 = vrot.lane.b32.xlu1 %v3549_v38, %s8380_s28  ;;  %3634 = vrot.lane.b32.xlu0 %v3549_v38, %s8377_s26  ;;  %v3551_v47 = vpop.f32.mrb[13].mxu0 }
 0x7e5   :  { %7644 = vmatprep.subr.msk.mxu1 %vm11667_vm15, %v3549_v38  ;;  %vm11676_vm15 = vmmov %vm11668_vm5 }
 0x7e6   :  { %7645 = vmatpush3.msk.msra.mxu1 %vm11668_vm5, %v3549_v38 }
 0x7e7   :  { %7647 = vmatmul.mubr.msk.f32.vlgmr.msra.gmra.mrb[12].mxu1 %vm11669_vm0, %v9512_v62  ;;  %v841_v62 = vadd.f32 %v8825_v4, %v829_v50 }
 0x7e8   :  { %7651 = vmatprep.mubr.msk.f32.mxu1 %vm11670_vm1, %v9640_v59  ;;  %3877 = vrot.lane.b32.xlu1 %v3549_v38, %s8383_s29  ;;  %vm11677_vm1 = vmmov %vm11668_vm5 }
 0x7e9   :  { %3796 = vrot.lane.b32.xlu0 %v3549_v38, %s8376_s3 }
 0x7ec   :  { %4040 = vrot.lane.b32.xlu1 %v3549_v38, %s8384_s30 }
 0x7ed   :  { %3958 = vrot.lane.b32.xlu0 %v3549_v38, %s8381_s4 }
 0x7f0   :  { %4124 = vrot.lane.b32.xlu1 %v3551_v47, %s8374_s25 }
 0x7f1   :  { %4042 = vrot.lane.b32.xlu0 %v3551_v47, %s8384_s30 }
 0x7f4   :  { %4453 = vrot.lane.b32.xlu1 %v841_v62, %s8370_s5 }
 0x7f5   :  { %4205 = vrot.lane.b32.xlu0 %v3551_v47, %s8387_s24 }
 0x7f8   :  { %4367 = vrot.lane.b32.xlu1 %v3551_v47, %s8390_s23 }
 0x7f9   :  { %4286 = vrot.lane.b32.xlu0 %v3551_v47, %s8391_s0 }
 0x7fc   :  { %4448 = vrot.lane.b32.xlu1 %v9867_v34, %s8395_s22  ;;  %v11680_v34 = vld [vmem:[#allocation16_spill] sm:$0xff]  ;;  %s8413_s22 = smov 66  }
 0x800   :  { %4473 = vrot.lane.b32.xlu1 %v855_v57, %s8396_s21 }
 0x856   :  { %v3716_v43 = vpop.permute.xlu1 %3715  ;;  %v3635_v19 = vpop.permute.xlu0 %3634 }
 0x857   :  { %7649 = vmatprep.subr.msk.mxu1 %vm11673_vm13, %v3635_v19  ;;  %vm11679_vm13 = vmmov %vm11677_vm1 }
 0x858   :  { %7650 = vmatpush3.msk.msra.mxu1 %vm11674_vm8, %v3635_v19  ;;  %vm11681_vm8 = vmmov %vm11669_vm0 }
 0x859   :  { %7652 = vmatmul.mubr.msk.f32.vlgmr.msra.gmra.mrb[12].mxu1 %vm11675_vm14, %v9632_v10  ;;  %7654 = vmatprep.subr.msk.mxu1 %vm11676_vm15, %v3716_v43  ;;  %vm11682_vm14 = vmmov %vm11677_vm1  ;;  %vm11683_vm15 = vcmask 1039360  }
 0x85a   :  { %v3878_v56 = vpop.permute.xlu1 %3877  ;;  %7655 = vmatpush3.msk.msra.mxu1 %vm11668_vm5, %v3716_v43  ;;  %7656 = vmatprep.mubr.msk.f32.mxu1 %vm11669_vm0, %v9634_v49  ;;  %vm11684_vm5 = vmmov %vm11669_vm0 }
 0x85b   :  { %v3797_v0 = vpop.permute.xlu0 %3796  ;;  %vm11685_vm0 = vmmov %vm11677_vm1 }
 0x85c   :  { %7659 = vmatprep.subr.msk.mxu1 %vm11677_vm1, %v3797_v0  ;;  %vm11687_vm1 = vmmov %vm11685_vm0 }
 0x85d   :  { %vm11694_vm10 = vmmov %vm11684_vm5 }
 0x85e   :  { %v4041_v4 = vpop.permute.xlu1 %4040 }
 0x85f   :  { %v3959_v62 = vpop.permute.xlu0 %3958 }
 0x861   :  { %7657 = vmatmul.mubr.msk.f32.vlgmr.msra.gmra.mrb[12].mxu1 %vm11678_vm9, %v9653_v41  ;;  %vm11686_vm9 = vmmov %vm11684_vm5 }
 0x862   :  { %7660 = vmatpush3.msk.msra.mxu1 %vm11679_vm13, %v3797_v0  ;;  %7661 = vmatprep.mubr.msk.f32.mxu1 %vm11681_vm8, %v11680_v34  ;;  %v4125_v38 = vpop.permute.xlu1 %4124  ;;  %vm11688_vm13 = vcmask 5120   ;;  %vm11689_vm8 = vmmov %vm11684_vm5 }
 0x863   :  { %7664 = vmatprep.subr.msk.mxu1 %vm11682_vm14, %v3878_v56  ;;  %v4043_v43 = vpop.permute.xlu0 %4042  ;;  %vm11690_vm14 = vcmask 64512  }
 0x866   :  { %v4454_v47 = vpop.permute.xlu1 %4453 }
 0x867   :  { %v4459_v44 = vmax.f32 %v855_v57, %v4454_v47  ;;  %v4455_v50 = vsel %vm11683_vm15, %v9898_v63, %v4454_v47  ;;  %v4044_v63 = vsel %vm11690_vm14, %v4041_v4, %v4043_v43  ;;  %vm11691_vm15 = vmmov %vm11685_vm0 }
 0x868   :  { %v4458_v26 = vmax.f32 %v9894_v45, %v4455_v50  ;;  %v4206_v45 = vpop.permute.xlu0 %4205  ;;  %vm11697_vm14 = vmmov %vm11685_vm0 }
 0x869   :  { %7662 = vmatmul.mubr.msk.f32.vlgmr.msra.gmra.mrb[12].mxu1 %vm11684_vm5, %v9638_v51  ;;  %4464 = vrot.lane.b32.xlu0 %v4459_v44, %s8396_s21 }
 0x86a   :  { %7665 = vmatpush3.msk.msra.mxu1 %vm11685_vm0, %v3878_v56  ;;  %7666 = vmatprep.mubr.msk.f32.mxu1 %vm11686_vm9, %v9648_v15  ;;  %v4368_v55 = vpop.permute.xlu1 %4367  ;;  %vm11692_vm9 = vmmov %vm11684_vm5 }
 0x86b   :  { %7669 = vmatprep.subr.msk.mxu1 %vm11687_vm1, %v3959_v62  ;;  %vm11693_vm1 = vmmov %vm11685_vm0 }
 0x86c   :  { %v4287_v19 = vpop.permute.xlu0 %4286 }
 0x86d   :  { %4462 = vrot.lane.b32.xlu0 %v4458_v26, %s8396_s21  ;;  %s8399_s21 = smov 126  }
 0x86e   :  { %v4449_v57 = vpop.permute.xlu1 %4448 }
 0x86f   :  { %4451 = vst.msk [vmem:[#allocation2] sm:$0x3f] %vm11688_vm13, %v4449_v57  ;;  %vm11695_vm13 = vmmov %vm11685_vm0 }
 0x871   :  { %7667 = vmatmul.mubr.msk.f32.vlgmr.msra.gmra.mrb[12].mxu1 %vm11689_vm8, %v9671_v31  ;;  %vm11696_vm8 = vmmov %vm11684_vm5 }
 0x872   :  { %7670 = vmatpush3.msk.msra.mxu1 %vm11691_vm15, %v3959_v62  ;;  %7671 = vmatprep.mubr.msk.f32.mxu1 %vm11684_vm5, %v11616_v5  ;;  %vm11698_vm15 = vmmov %vm11684_vm5  ;;  %v4474_v33 = vpop.permute.xlu1 %4473 }
 0x873   :  { %7674 = vmatprep.subr.msk.mxu1 %vm11685_vm0, %v4044_v63  ;;  %vm11699_vm5 = vmmov %vm11685_vm0 }
 0x874   :  { %vm11700_vm0 = vmmov %vm11696_vm8 }
 0x879   :  { %7672 = vmatmul.mubr.msk.f32.vlgmr.msra.gmra.mrb[12].mxu1 %vm11692_vm9, %v11618_v7  ;;  %vm11701_vm9 = vmmov %vm11693_vm1 }
 0x87a   :  { %7675 = vmatpush3.msk.msra.mxu1 %vm11693_vm1, %v4044_v63  ;;  %7676 = vmatprep.mubr.msk.f32.mxu1 %vm11694_vm10, %v11620_v20  ;;  %vm11702_vm10 = vmmov %vm11700_vm0 }
 0x87b   :  { %7679 = vmatprep.subr.msk.mxu1 %vm11695_vm13, %v4125_v38  ;;  %vm11703_vm13 = vmmov %vm11700_vm0 }
 0x881   :  { %7677 = vmatmul.mubr.msk.f32.vlgmr.msra.gmra.mrb[12].mxu1 %vm11696_vm8, %v11623_v24  ;;  %vm11704_vm8 = vmmov %vm11693_vm1 }
 0x882   :  { %7680 = vmatpush3.msk.msra.mxu1 %vm11697_vm14, %v4125_v38  ;;  %7681 = vmatprep.mubr.msk.f32.mxu1 %vm11698_vm15, %v11626_v22  ;;  %vm11705_vm14 = vmmov %vm11700_vm0 }
 0x883   :  { %7684 = vmatprep.subr.msk.mxu1 %vm11699_vm5, %v4206_v45  ;;  %vm11706_vm15 = vmmov %vm11693_vm1 }
 0x884   :  { %vm11707_vm5 = vmmov %vm11700_vm0 }
 0x889   :  { %7682 = vmatmul.mubr.msk.f32.vlgmr.msra.gmra.mrb[12].mxu1 %vm11700_vm0, %v9694_v23  ;;  %vm11708_vm0 = vmmov %vm11693_vm1 }
 0x88a   :  { %7685 = vmatpush3.msk.msra.mxu1 %vm11701_vm9, %v4206_v45  ;;  %7686 = vmatprep.mubr.msk.f32.mxu1 %vm11702_vm10, %v9720_v52  ;;  %vm11709_vm9 = vmmov %vm11707_vm5 }
 0x88b   :  { %7689 = vmatprep.subr.msk.mxu1 %vm11693_vm1, %v4287_v19  ;;  %vm11710_vm10 = vmmov %vm11707_vm5  ;;  %vm11718_vm1 = vnez %v11490_v3 }
 0x891   :  { %7687 = vmatmul.mubr.msk.f32.vlgmr.msra.gmra.mrb[12].mxu1 %vm11703_vm13, %v9718_v30  ;;  %vm11719_vm13 = vnez %v11492_v18 }
 0x892   :  { %7690 = vmatpush3.msk.msra.mxu1 %vm11704_vm8, %v4287_v19  ;;  %7691 = vmatprep.mubr.msk.f32.mxu1 %vm11705_vm14, %v9730_v14  ;;  %vm11720_vm8 = vnez %v11494_v12  ;;  %vm11721_vm14 = vnez %v11496_v1  ;;  %v8341_v12 = vld [vmem:[%s11289_s6 + $0x8] sm:$0xff]  ;;  %v1312_v1 = vld [vmem:[%s11290_s7] sm:$0xff]  ;;  %s8400_s6 = smov 120  }
 0x893   :  { %7694 = vmatprep.subr.msk.mxu1 %vm11706_vm15, %v4368_v55  ;;  %vm11722_vm15 = vnez %v11498_v46  ;;  %v1313_v46 = vld [vmem:[%s11290_s7 + $0x8] sm:$0xff]  ;;  %s8406_s7 = smov 11  }
 0x899   :  { %7692 = vmatmul.mubr.msk.f32.vlgmr.msra.gmra.mrb[12].mxu1 %vm11707_vm5, %v9740_v32  ;;  %vm11723_vm5 = vnez %v11502_v39 }
 0x89a   :  { %7695 = vmatpush3.msk.msra.mxu1 %vm11708_vm0, %v4368_v55  ;;  %7696 = vmatprep.mubr.msk.f32.mxu1 %vm11709_vm9, %v9742_v8  ;;  %vm11724_vm0 = vnez %v11509_v27  ;;  %vm11725_vm9 = vnez %v11511_v28  ;;  %v11771_v55 = vld [vmem:[#allocation21_spill] sm:$0xff] }
 0x89b   :  { %8017 = vmatprep.subr.msk.bf16.mxu1 %vm8901_vm11, %v11562_v53  ;;  %vm11711_vm11 = vnez %v11453_v58 }
 0x8a1   :  { %7697 = vmatmul.mubr.msk.f32.vlgmr.msra.gmra.mrb[12].mxu1 %vm11710_vm10, %v9752_v2  ;;  %vm11726_vm10 = vnez %v11517_v54 }
 0x8a2   :  { %8019 = vmatpush1.bf16.msk.msra.mxu1 %vm8918_vm7, %v11562_v53  ;;  %vm11712_vm7 = vnez %v11463_v16 }
 0x8a3   :  { %8021 = vmatprep.subr.msk.bf16.mxu1 %vm11563_vm4, %v11562_v53  ;;  %vm11713_vm4 = vnez %v11465_v61 }
 0x8a6   :  { %8023 = vmatpush1.bf16.msk.msra.mxu1 %vm11564_vm6, %v11562_v53  ;;  %vm11714_vm6 = vnez %v11475_v9 }
 0x8a7   :  { %8025 = vmatprep.subr.msk.bf16.mxu1 %vm11565_vm3, %v11562_v53  ;;  %vm11716_vm3 = vnez %v11486_v37 }
 0x8aa   :  { %8027 = vmatpush1.bf16.msk.msra.mxu1 %vm11566_vm2, %v11562_v53  ;;  %vm11715_vm2 = vnez %v11477_v40 }
 0x8ab   :  { %8029 = vmatprep.subr.msk.bf16.mxu1 %vm11637_vm12, %v11562_v53  ;;  %vm11717_vm12 = vnez %v11488_v21 }
 0x8ae   :  { %8031 = vmatpush1.bf16.msk.msra.mxu1 %vm11711_vm11, %v11562_v53  ;;  %vm11727_vm11 = vnez %v11520_v60 }
 0x8af   :  { %8033 = vmatprep.subr.msk.bf16.mxu1 %vm11712_vm7, %v11562_v53  ;;  %vm11728_vm7 = vnez %v11526_v36 }
 0x8b2   :  { %8035 = vmatpush1.bf16.msk.msra.mxu1 %vm11713_vm4, %v11562_v53  ;;  %vm11729_vm4 = vnez %v11528_v11 }
 0x8b3   :  { %8037 = vmatprep.subr.msk.bf16.mxu1 %vm11714_vm6, %v11562_v53  ;;  %vm11732_vm6 = vnez %v11731_v48 }
 0x8b6   :  { %8039 = vmatpush1.bf16.msk.msra.mxu1 %vm11715_vm2, %v11562_v53  ;;  %vm11735_vm2 = vnez %v11734_v35 }
 0x8b7   :  { %8041 = vmatprep.subr.msk.bf16.mxu1 %vm11716_vm3, %v11562_v53  ;;  %vm11736_vm3 = vcmask 742400  }
 0x8ba   :  { %8043 = vmatpush1.bf16.msk.msra.mxu1 %vm11717_vm12, %v11562_v53  ;;  %vm11737_vm12 = vcmask 751320  }
 0x8bb   :  { %8045 = vmatprep.subr.msk.bf16.mxu1 %vm11718_vm1, %v11562_v53  ;;  %vm4466_vm1 = vcmask 916480  }
 0x8be   :  { %8047 = vmatpush1.bf16.msk.msra.mxu1 %vm11719_vm13, %v11562_v53  ;;  %vm11738_vm13 = vcmask 1045512  }
 0x8bf   :  { %8049 = vmatprep.subr.msk.bf16.mxu1 %vm11720_vm8, %v11562_v53  ;;  %vm11739_vm8 = vcmask 752640  }
 0x8c2   :  { %8051 = vmatpush1.bf16.msk.msra.mxu1 %vm11721_vm14, %v11562_v53  ;;  %vm11740_vm14 = vcmask 1045504  }
 0x8c3   :  { %8053 = vmatprep.subr.msk.bf16.mxu1 %vm11722_vm15, %v11562_v53  ;;  %vm11741_vm15 = vmmov %vm11740_vm14 }
 0x8c6   :  { %8055 = vmatpush1.bf16.msk.msra.mxu1 %vm11723_vm5, %v11562_v53  ;;  %vm11742_vm5 = vcmask 48128  }
 0x8c7   :  { %8057 = vmatprep.subr.msk.bf16.mxu1 %vm11724_vm0, %v11562_v53  ;;  %vm11743_vm0 = vmmov %vm11742_vm5 }
 0x8ca   :  { %8059 = vmatpush1.bf16.msk.msra.mxu1 %vm11725_vm9, %v11562_v53  ;;  %vm11744_vm9 = vmmov %vm11740_vm14 }
 0x8cb   :  { %8061 = vmatprep.subr.msk.bf16.mxu1 %vm11726_vm10, %v11562_v53  ;;  %vm11745_vm10 = vmmov %vm11744_vm9 }
 0x8ce   :  { %8063 = vmatpush1.bf16.msk.msra.mxu1 %vm11727_vm11, %v11562_v53  ;;  %vm11746_vm11 = vmmov %vm11743_vm0 }
 0x8cf   :  { %8065 = vmatprep.subr.msk.bf16.mxu1 %vm11728_vm7, %v11562_v53  ;;  %vm11747_vm7 = vmmov %vm11744_vm9 }
 0x8d2   :  { %8067 = vmatpush1.bf16.msk.msra.mxu1 %vm11729_vm4, %v11562_v53  ;;  %vm11748_vm4 = vmmov %vm11747_vm7 }
 0x8d3   :  { %8070 = vmatprep.subr.msk.bf16.mxu1 %vm11732_vm6, %v11730_v42  ;;  %vm11749_vm6 = vmmov %vm11743_vm0 }
 0x8d6   :  { %8073 = vmatpush1.bf16.msk.msra.mxu1 %vm11735_vm2, %v11733_v29  ;;  %vm11750_vm2 = vmmov %vm11748_vm4 }
 0x8db   :  { %v4465_v6 = vpop.permute.xlu0 %4464 }
 0x8dc   :  { %4471 = vst.msk [vmem:[#allocation2 + $0x8] sm:$0x3f] %vm11736_vm3, %v4465_v6  ;;  %vm11751_vm3 = vmmov %vm11743_vm0 }
 0x8dd   :  { %4476 = vst.msk [vmem:[#allocation2 + $0x8] sm:$0x3f] %vm11737_vm12, %v4474_v33  ;;  %vm11752_vm12 = vmmov %vm11750_vm2 }
 0x8df   :  { %v4463_v25 = vpop.permute.xlu0 %4462 }
 0x8e0   :  { %v4467_v58 = vsel %vm4466_vm1, %v4463_v25, %v4465_v6  ;;  %vm11753_vm1 = vmmov %vm11743_vm0 }
 0x8e1   :  { %4470 = vst.msk [vmem:[#allocation2] sm:$0x3f] %vm11738_vm13, %v4467_v58  ;;  %vm11754_vm13 = vmmov %vm11750_vm2 }
 0x8e4   :  { %v4478_v16 = vld [vmem:[#allocation2 + $0x8] sm:$0x3f] }
 0x8e5   :  { %v4480_v61 = vmax.f32 %v4478_v16, 0.0 }
 0x8e7   :  { %7224 = vmatprep.mubr.msk.f32.mxu1 %vm11739_vm8, %v4480_v61  ;;  %vm11755_vm8 = vmmov %vm11743_vm0 }
 0x8e8   :  { %v4477_v9 = vld [vmem:[#allocation2] sm:$0x3f] }
 0x8e9   :  { %v4479_v40 = vmax.f32 %v4477_v9, 0.0 }
 0x8eb   :  { %4549 = vmatmul.mubr.f32.vlgmr.msra.gmra.mrb[14].mxu1 %v4479_v40 }
 0x974   :  { %v10226_v37 = vpop.f32.mrb[12].mxu1 }
 0x975   :  { %v10228_v21 = vpop.f32.mrb[13].mxu1 }
 0x9be   :  { %v4550_v3 = vpop.f32.mrb[14].mxu1 }
 0x9bf   :  { %4716 = vrot.lane.b32.xlu1 %v4550_v3, %s8380_s28  ;;  %4635 = vrot.lane.b32.xlu0 %v4550_v3, %s8377_s26  ;;  %v4552_v18 = vpop.f32.mrb[15].mxu1  ;;  %s8401_s26 = smov 125  }
 0x9c0   :  { %7699 = vmatprep.subr.msk.mxu0 %vm11740_vm14, %v4550_v3  ;;  %vm11756_vm14 = vmmov %vm11750_vm2 }
 0x9c1   :  { %7700 = vmatpush3.msk.msra.mxu0 %vm11741_vm15, %v4550_v3  ;;  %vm11757_vm15 = vmmov %vm11743_vm0 }
 0x9c2   :  { %7702 = vmatmul.mubr.msk.f32.vlgmr.msra.gmra.mrb[14].mxu0 %vm11742_vm5, %v8341_v12  ;;  %vm11758_vm5 = vmmov %vm11750_vm2 }
 0x9c3   :  { %7706 = vmatprep.mubr.msk.f32.mxu0 %vm11743_vm0, %v9640_v59  ;;  %4878 = vrot.lane.b32.xlu1 %v4550_v3, %s8383_s29  ;;  %s8403_s29 = smov 121  }
 0x9c4   :  { %4797 = vrot.lane.b32.xlu0 %v4550_v3, %s8376_s3  ;;  %s8402_s3 = smov 123  }
 0x9c7   :  { %5041 = vrot.lane.b32.xlu1 %v4550_v3, %s8384_s30 }
 0x9c8   :  { %4959 = vrot.lane.b32.xlu0 %v4550_v3, %s8381_s4  ;;  %s8408_s4 = smov 33  }
 0x9cb   :  { %5125 = vrot.lane.b32.xlu1 %v4552_v18, %s8374_s25  ;;  %s8407_s25 = smov 22  }
 0x9cc   :  { %5043 = vrot.lane.b32.xlu0 %v4552_v18, %s8384_s30  ;;  %s8409_s30 = smov 44  }
 0x9cf   :  { %5287 = vrot.lane.b32.xlu1 %v4552_v18, %s8391_s0  ;;  %s8412_s0 = smov 55  }
 0x9d0   :  { %5206 = vrot.lane.b32.xlu0 %v4552_v18, %s8387_s24  ;;  %s8410_s24 = smov 15  }
 0x9d3   :  { %1521 = vperm.xlu1 %8325, %v1312_v1  }
 0x9d4   :  { %5368 = vrot.lane.b32.xlu0 %v4552_v18, %s8390_s23  ;;  %s8411_s23 = smov 26  }
 0x9d8   :  { %1526 = vperm.xlu0 %8324, %v1313_v46  }
 0xa31   :  { %v4636_v39 = vpop.permute.xlu0 %4635  ;;  %v4717_v27 = vpop.permute.xlu1 %4716 }
 0xa32   :  { %7704 = vmatprep.subr.msk.mxu0 %vm11744_vm9, %v4636_v39  ;;  %vm11759_vm9 = vcmask 64512  }
 0xa33   :  { %7705 = vmatpush3.msk.msra.mxu0 %vm11745_vm10, %v4636_v39  ;;  %vm11760_vm10 = vmmov %vm11750_vm2 }
 0xa34   :  { %7707 = vmatmul.mubr.msk.f32.vlgmr.msra.gmra.mrb[14].mxu0 %vm11746_vm11, %v9632_v10  ;;  %7709 = vmatprep.subr.msk.mxu0 %vm11747_vm7, %v4717_v27  ;;  %vm11761_vm11 = vmmov %vm11743_vm0 }
 0xa35   :  { %7710 = vmatpush3.msk.msra.mxu0 %vm11748_vm4, %v4717_v27  ;;  %7711 = vmatprep.mubr.msk.f32.mxu0 %vm11749_vm6, %v9634_v49  ;;  %v4879_v54 = vpop.permute.xlu1 %4878  ;;  %vm11762_vm7 = vmmov %vm11750_vm2  ;;  %vm5449_vm4 = vcmask 162816  }
 0xa36   :  { %v4798_v28 = vpop.permute.xlu0 %4797  ;;  %vm11764_vm6 = vmmov %vm11743_vm0 }
 0xa37   :  { %7714 = vmatprep.subr.msk.mxu0 %vm11750_vm2, %v4798_v28 }
 0xa39   :  { %v5042_v60 = vpop.permute.xlu1 %5041 }
 0xa3a   :  { %v4960_v36 = vpop.permute.xlu0 %4959 }
 0xa3c   :  { %7712 = vmatmul.mubr.msk.f32.vlgmr.msra.gmra.mrb[14].mxu0 %vm11751_vm3, %v9653_v41  ;;  %vm11765_vm3 = vmmov %vm11743_vm0 }
 0xa3d   :  { %7715 = vmatpush3.msk.msra.mxu0 %vm11752_vm12, %v4798_v28  ;;  %7716 = vmatprep.mubr.msk.f32.mxu0 %vm11753_vm1, %v11680_v34  ;;  %v5126_v11 = vpop.permute.xlu1 %5125  ;;  %vm11766_vm12 = vmmov %vm11750_vm2 }
 0xa3e   :  { %7719 = vmatprep.subr.msk.mxu0 %vm11754_vm13, %v4879_v54  ;;  %v5044_v10 = vpop.permute.xlu0 %5043  ;;  %vm11767_vm1 = vmmov %vm11743_vm0 }
 0xa3f   :  { %v5045_v49 = vsel %vm11759_vm9, %v5042_v60, %v5044_v10  ;;  %vm11768_vm13 = vmmov %vm11750_vm2 }
 0xa40   :  { %vm11774_vm9 = vmmov %vm11750_vm2 }
 0xa42   :  { %v5207_v59 = vpop.permute.xlu0 %5206 }
 0xa44   :  { %7717 = vmatmul.mubr.msk.f32.vlgmr.msra.gmra.mrb[14].mxu0 %vm11755_vm8, %v9638_v51  ;;  %v5288_v51 = vpop.permute.xlu1 %5287  ;;  %vm11769_vm8 = vmmov %vm11743_vm0 }
 0xa45   :  { %7720 = vmatpush3.msk.msra.mxu0 %vm11756_vm14, %v4879_v54  ;;  %7721 = vmatprep.mubr.msk.f32.mxu0 %vm11757_vm15, %v9648_v15  ;;  %v11763_v15 = vld [vmem:[#allocation22_spill] sm:$0xff]  ;;  %vm11770_vm14 = vmmov %vm11750_vm2 }
 0xa46   :  { %7724 = vmatprep.subr.msk.mxu0 %vm11758_vm5, %v4960_v36  ;;  %v5369_v4 = vpop.permute.xlu0 %5368  ;;  %vm11772_vm15 = vmmov %vm11743_vm0 }
 0xa47   :  { %vm11773_vm5 = vmmov %vm11750_vm2 }
 0xa4c   :  { %7722 = vmatmul.mubr.msk.f32.vlgmr.msra.gmra.mrb[14].mxu0 %vm11743_vm0, %v9671_v31 }
 0xa4d   :  { %7725 = vmatpush3.msk.msra.mxu0 %vm11760_vm10, %v4960_v36  ;;  %7726 = vmatprep.mubr.msk.f32.mxu0 %vm11761_vm11, %v11616_v5  ;;  %vm11775_vm10 = vmmov %vm11743_vm0 }
 0xa4e   :  { %7729 = vmatprep.subr.msk.mxu0 %vm11762_vm7, %v5045_v49  ;;  %vm11776_vm11 = vmmov %vm11750_vm2 }
 0xa4f   :  { %vm11777_vm7 = vmmov %vm11743_vm0 }
 0xa52   :  { %v1522_v41 = vpop.permute.xlu1 %1521 }
 0xa53   :  { %v10284_v53 = vadd.f32 %v11763_v15, %v1522_v41  ;;  %v10287_v56 = vadd.f32 %v10048_v13, %v1522_v41  ;;  %v10301_v13 = vadd.f32 %v10228_v21, %v1522_v41 }
 0xa54   :  { %7727 = vmatmul.mubr.msk.f32.vlgmr.msra.gmra.mrb[14].mxu0 %vm11764_vm6, %v11618_v7  ;;  %vm11778_vm6 = vmmov %vm11750_vm2 }
 0xa55   :  { %7730 = vmatpush3.msk.msra.mxu0 %vm11750_vm2, %v5045_v49  ;;  %7731 = vmatprep.mubr.msk.f32.mxu0 %vm11765_vm3, %v11620_v20  ;;  %v5450_v31 = vsel %vm5449_vm4, %v10284_v53, 0.0  ;;  %v5464_v5 = vsel %vm5449_vm4, %v10287_v56, 0.0  ;;  %v5472_v0 = vmul.f32 %v10287_v56, %v10287_v56  ;;  %v5456_v7 = vmul.f32 %v10284_v53, %v10284_v53  ;;  %vm11779_vm2 = vmmov %vm11743_vm0 }
 0xa56   :  { %7734 = vmatprep.subr.msk.mxu0 %vm11766_vm12, %v5126_v11  ;;  %5451 = vadd.xlane.f32.xlu1 %v5450_v31  ;;  %v5490_v34 = vmul.f32 %v10301_v13, %v10301_v13  ;;  %v5482_v62 = vsel %vm5449_vm4, %v10301_v13, 0.0  ;;  %vm11780_vm3 = vmmov %vm11773_vm5 }
 0xa57   :  { %5465 = vadd.xlane.f32.xlu0 %v5464_v5  ;;  %v5474_v20 = vsel %vm5449_vm4, %v5472_v0, 0.0  ;;  %v1527_v38 = vpop.permute.xlu0 %1526  ;;  %v5458_v47 = vsel %vm5449_vm4, %v5456_v7, 0.0  ;;  %vm11781_vm12 = vmmov %vm11743_vm0 }
 0xa58   :  { %v5492_v44 = vsel %vm5449_vm4, %v5490_v34, 0.0  ;;  %v10317_v50 = vadd.f32 %v10046_v17, %v1527_v38  ;;  %v10323_v26 = vadd.f32 %v11771_v55, %v1527_v38  ;;  %v10357_v45 = vadd.f32 %v10226_v37, %v1527_v38  ;;  %v5531_v55 = vld [vmem:[%s11291_s8] sm:$0xff] }
 0xa5a   :  { %5475 = vadd.xlane.f32.xlu1 %v5474_v20  ;;  %v5453_v17 = vsel %vm5449_vm4, %v10323_v26, 0.0  ;;  %v5457_v57 = vmul.f32 %v10323_v26, %v10323_v26  ;;  %v5485_v42 = vsel %vm5449_vm4, %v10357_v45, 0.0 }
 0xa5b   :  { %5459 = vadd.xlane.f32.xlu0 %v5458_v47 }
 0xa5c   :  { %7732 = vmatmul.mubr.msk.f32.vlgmr.msra.gmra.mrb[14].mxu0 %vm11767_vm1, %v11623_v24  ;;  %v5467_v24 = vsel %vm5449_vm4, %v10317_v50, 0.0  ;;  %v5461_v63 = vsel %vm5449_vm4, %v5457_v57, 0.0  ;;  %vm11782_vm1 = vmmov %vm11743_vm0 }
 0xa5d   :  { %7735 = vmatpush3.msk.msra.mxu0 %vm11768_vm13, %v5126_v11  ;;  %7736 = vmatprep.mubr.msk.f32.mxu0 %vm11769_vm8, %v11626_v22  ;;  %v5473_v22 = vmul.f32 %v10317_v50, %v10317_v50  ;;  %vm5577_vm8 = vcmask 15368  }
 0xa5e   :  { %7739 = vmatprep.subr.msk.mxu0 %vm11770_vm14, %v5207_v59  ;;  %5493 = vadd.xlane.f32.xlu1 %v5492_v44  ;;  %vm5588_vm14 = vcmask 23568  }
 0xa5f   :  { %5483 = vadd.xlane.f32.xlu0 %v5482_v62  ;;  %v5477_v43 = vsel %vm5449_vm4, %v5473_v22, 0.0 }
 0xa62   :  { %5468 = vadd.xlane.f32.xlu1 %v5467_v24 }
 0xa63   :  { %5454 = vadd.xlane.f32.xlu0 %v5453_v17  ;;  %v5532_v17 = vld [vmem:[%s11291_s8 + $0x8] sm:$0xff]  ;;  %s8397_s8 = smov 119  }
 0xa64   :  { %7737 = vmatmul.mubr.msk.f32.vlgmr.msra.gmra.mrb[14].mxu0 %vm11772_vm15, %v9694_v23  ;;  %vm5597_vm15 = vcmask 31768  }
 0xa65   :  { %7740 = vmatpush3.msk.msra.mxu0 %vm11773_vm5, %v5207_v59  ;;  %7741 = vmatprep.mubr.msk.f32.mxu0 %vm11743_vm0, %v9720_v52  ;;  %vm5606_vm5 = vcmask 39968   ;;  %vm5615_vm0 = vcmask 48168  }
 0xa66   :  { %7744 = vmatprep.subr.msk.mxu0 %vm11774_vm9, %v5288_v51  ;;  %5478 = vadd.xlane.f32.xlu1 %v5477_v43  ;;  %vm5624_vm9 = vcmask 56368  }
 0xa67   :  { %5462 = vadd.xlane.f32.xlu0 %v5461_v63 }
 0xa6c   :  { %7742 = vmatmul.mubr.msk.f32.vlgmr.msra.gmra.mrb[14].mxu0 %vm11775_vm10, %v9718_v30  ;;  %vm5633_vm10 = vcmask 64568  }
 0xa6d   :  { %7745 = vmatpush3.msk.msra.mxu0 %vm11776_vm11, %v5288_v51  ;;  %7746 = vmatprep.mubr.msk.f32.mxu0 %vm11777_vm7, %v9730_v14  ;;  %vm5642_vm11 = vcmask 72768   ;;  %vm5651_vm7 = vcmask 80968  }
 0xa6e   :  { %7749 = vmatprep.subr.msk.mxu0 %vm11778_vm6, %v5369_v4  ;;  %vm5660_vm6 = vcmask 89168  }
 0xa74   :  { %7747 = vmatmul.mubr.msk.f32.vlgmr.msra.gmra.mrb[14].mxu0 %vm11779_vm2, %v9740_v32 }
 0xa75   :  { %7750 = vmatpush3.msk.msra.mxu0 %vm11780_vm3, %v5369_v4  ;;  %7751 = vmatprep.mubr.msk.f32.mxu0 %vm11781_vm12, %v9742_v8 }
 0xa7c   :  { %7752 = vmatmul.mubr.msk.f32.vlgmr.msra.gmra.mrb[14].mxu0 %vm11782_vm1, %v9752_v2  ;;  %v5491_v2 = vmul.f32 %v10357_v45, %v10357_v45  ;;  %vm5667_vm1 = vcmask 81920  }
 0xa7e   :  { %v5495_v48 = vsel %vm5449_vm4, %v5491_v2, 0.0 }
 0xae3   :  { %v5452_v25 = vpop.xlane.xlu1 %5451 }
 0xae4   :  { %v5466_v33 = vpop.xlane.xlu0 %5465 }
 0xae5   :  { %v5470_v3 = vadd.f32 %v5466_v33, %v5452_v25 }
 0xae7   :  { %v5476_v16 = vpop.xlane.xlu1 %5475 }
 0xae8   :  { %v5460_v58 = vpop.xlane.xlu0 %5459 }
 0xae9   :  { %v5480_v12 = vadd.f32 %v5476_v16, %v5460_v58 }
 0xaeb   :  { %v5494_v9 = vpop.xlane.xlu1 %5493 }
 0xaec   :  { %v5484_v61 = vpop.xlane.xlu0 %5483  ;;  %v5498_v39 = vadd.f32 %v5494_v9, %v5480_v12 }
 0xaed   :  { %v5488_v1 = vadd.f32 %v5484_v61, %v5470_v3 }
 0xaef   :  { %v5469_v37 = vpop.xlane.xlu1 %5468 }
 0xaf0   :  { %v5455_v40 = vpop.xlane.xlu0 %5454 }
 0xaf1   :  { %v5471_v11 = vadd.f32 %v5469_v37, %v5455_v40 }
 0xaf3   :  { %v5479_v18 = vpop.xlane.xlu1 %5478 }
 0xaf4   :  { %v5463_v21 = vpop.xlane.xlu0 %5462 }
 0xaf5   :  { %v5481_v59 = vadd.f32 %v5479_v18, %v5463_v21 }
 0xb4f   :  { %v7753_v23 = vpop.f32.mrb[14].mxu0 }
 0xb50   :  { %v5438_v30 = vpop.f32.mrb[15].mxu0  ;;  %v10363_v19 = vadd.f32 %v7753_v23, %v1527_v38  ;;  %v5535_v23 = vld [vmem:[%s11292_s9] sm:$0xff] }
 0xb51   :  { %v10354_v52 = vadd.f32 %v5438_v30, %v1522_v41  ;;  %v5536_v30 = vld [vmem:[%s11292_s9 + $0x8] sm:$0xff]  ;;  %s8398_s9 = smov 124  }
 0xb52   :  { %v5509_v29 = vmul.f32 %v10363_v19, %v10363_v19  ;;  %v5503_v35 = vsel %vm5449_vm4, %v10363_v19, 0.0 }
 0xb53   :  { %v5500_v14 = vsel %vm5449_vm4, %v10354_v52, 0.0  ;;  %v5508_v32 = vmul.f32 %v10354_v52, %v10354_v52 }
 0xb54   :  { %5501 = vadd.xlane.f32.xlu0 %v5500_v14  ;;  %v5513_v6 = vsel %vm5449_vm4, %v5509_v29, 0.0 }
 0xb55   :  { %v5510_v8 = vsel %vm5449_vm4, %v5508_v32, 0.0  ;;  %vm11783_vm4 = vcmask 7168  }
 0xb56   :  { %5511 = vadd.xlane.f32.xlu1 %v5510_v8  ;;  %vm11784_vm13 = vmmov %vm11783_vm4 }
 0xb57   :  { %vm11785_vm2 = vmmov %vm11783_vm4 }
 0xb58   :  { %5486 = vadd.xlane.f32.xlu0 %v5485_v42  ;;  %vm11786_vm3 = vmmov %vm11785_vm2 }
 0xb59   :  { %vm11787_vm12 = vmmov %vm11785_vm2 }
 0xb5a   :  { %5496 = vadd.xlane.f32.xlu1 %v5495_v48 }
 0xb5c   :  { %5504 = vadd.xlane.f32.xlu0 %v5503_v35 }
 0xb5e   :  { %5514 = vadd.xlane.f32.xlu1 %v5513_v6 }
 0xbe1   :  { %v5502_v46 = vpop.xlane.xlu0 %5501 }
 0xbe2   :  { %v5506_v27 = vadd.f32 %v5502_v46, %v5488_v1 }
 0xbe3   :  { %v5512_v28 = vpop.xlane.xlu1 %5511 }
 0xbe4   :  { %v5519_v54 = vmul.f32 0.0125, %v5506_v27  ;;  %v5516_v60 = vadd.f32 %v5512_v28, %v5498_v39 }
 0xbe5   :  { %v5487_v36 = vpop.xlane.xlu0 %5486 }
 0xbe6   :  { %v5523_v10 = vmul.f32 %v5519_v54, %v5519_v54  ;;  %v5521_v49 = vmul.f32 0.0125, %v5516_v60  ;;  %v5489_v15 = vadd.f32 %v5487_v36, %v5471_v11 }
 0xbe7   :  { %v5497_v51 = vpop.xlane.xlu1 %5496 }
 0xbe8   :  { %v5525_v41 = vsub.f32 %v5521_v49, %v5523_v10  ;;  %v5499_v0 = vadd.f32 %v5497_v51, %v5481_v59 }
 0xbe9   :  { %v5505_v31 = vpop.xlane.xlu0 %5504 }
 0xbea   :  { %v5527_v5 = vadd.f32 1e-05, %v5525_v41  ;;  %v5507_v4 = vadd.f32 %v5505_v31, %v5489_v15 }
 0xbeb   :  { %v5515_v7 = vpop.xlane.xlu1 %5514 }
 0xbec   :  { %8329 = vrsqrt.f32 %v5527_v5  ;;  %v5520_v20 = vmul.f32 0.0125, %v5507_v4  ;;  %v5517_v34 = vadd.f32 %v5515_v7, %v5499_v0 }
 0xbee   :  { %v5524_v38 = vmul.f32 %v5520_v20, %v5520_v20  ;;  %v5522_v47 = vmul.f32 0.0125, %v5517_v34 }
 0xbf0   :  { %v5526_v44 = vsub.f32 %v5522_v47, %v5524_v38 }
 0xbf2   :  { %v5528_v62 = vadd.f32 1e-05, %v5526_v44 }
 0xbf4   :  { %8331 = vrsqrt.f32 %v5528_v62 }
 0xbf6   :  { %v8330_v24 = vpop.eup %8329 }
 0xbf7   :  { %v5533_v22 = vmul.f32 %v8330_v24, %v5531_v55 }
 0xbf9   :  { %5543 = vperm.xlu0 %8324, %v5533_v22   ;;  %v5537_v63 = vmul.f32 %v5533_v22, %v5519_v54 }
 0xbfb   :  { %v5539_v32 = vsub.f32 %v5535_v23, %v5537_v63 }
 0xbfe   :  { %v8332_v57 = vpop.eup %8331 }
 0xbff   :  { %v5534_v43 = vmul.f32 %v8332_v57, %v5532_v17 }
 0xc01   :  { %5548 = vperm.xlu1 %8325, %v5534_v43   ;;  %v5538_v14 = vmul.f32 %v5534_v43, %v5520_v20 }
 0xc03   :  { %v5540_v8 = vsub.f32 %v5536_v30, %v5538_v14 }
 0xc05   :  { %5555 = vperm.xlu1 %8325, %v5539_v32   ;;  %5560 = vperm.xlu0 %8324, %v5540_v8  }
 0xc78   :  { %v5544_v2 = vpop.permute.xlu0 %5543 }
 0xc79   :  { %v5551_v48 = vmul.f32 %v10284_v53, %v5544_v2  ;;  %v5777_v58 = vmul.f32 %v10287_v56, %v5544_v2  ;;  %v6151_v40 = vmul.f32 %v10354_v52, %v5544_v2 }
 0xc80   :  { %v5549_v42 = vpop.permute.xlu1 %5548 }
 0xc81   :  { %v5552_v29 = vmul.f32 %v10323_v26, %v5549_v42  ;;  %v5778_v16 = vmul.f32 %v10317_v50, %v5549_v42  ;;  %v5964_v26 = vmul.f32 %v10301_v13, %v5544_v2  ;;  %v5965_v9 = vmul.f32 %v10357_v45, %v5549_v42 }
 0xc82   :  { %v6152_v37 = vmul.f32 %v10363_v19, %v5549_v42 }
 0xc84   :  { %v5556_v35 = vpop.permute.xlu1 %5555  ;;  %v5561_v6 = vpop.permute.xlu0 %5560 }
 0xc85   :  { %v5563_v33 = vadd.f32 %v5556_v35, %v5551_v48  ;;  %v5564_v25 = vadd.f32 %v5561_v6, %v5552_v29  ;;  %v10396_v61 = vadd.f32 %v5777_v58, %v5556_v35  ;;  %v10398_v53 = vadd.f32 %v5778_v16, %v5561_v6 }
 0xc86   :  { %v10406_v56 = vadd.f32 %v5964_v26, %v5556_v35  ;;  %v10408_v50 = vadd.f32 %v5965_v9, %v5561_v6  ;;  %v10416_v13 = vadd.f32 %v6151_v40, %v5556_v35  ;;  %v10418_v45 = vadd.f32 %v6152_v37, %v5561_v6 }
 0xc87   :  { %5569 = vrot.lane.b32.xlu1 %v5563_v33, %s8370_s5  ;;  %5565 = vst.msk [vmem:[#allocation3] sm:$0xff] %vm11783_vm4, %v5563_v33  ;;  %5571 = vrot.lane.b32.xlu0 %v5564_v25, %s8370_s5  ;;  %vm11788_vm4 = vmmov %vm11785_vm2 }
 0xc88   :  { %5566 = vst.msk [vmem:[#allocation3 + $0x8] sm:$0xff] %vm11784_vm13, %v5564_v25  ;;  %vm11789_vm13 = vmmov %vm11785_vm2 }
 0xc8b   :  { %5785 = vrot.lane.b32.xlu1 %v10396_v61, %s8370_s5  ;;  %5787 = vrot.lane.b32.xlu0 %v10398_v53, %s8370_s5 }
 0xc8f   :  { %5972 = vrot.lane.b32.xlu1 %v10406_v56, %s8370_s5  ;;  %5974 = vrot.lane.b32.xlu0 %v10408_v50, %s8370_s5 }
 0xc93   :  { %6159 = vrot.lane.b32.xlu1 %v10416_v13, %s8370_s5  ;;  %6161 = vrot.lane.b32.xlu0 %v10418_v45, %s8370_s5 }
 0xc97   :  { %5654 = vrot.lane.b32.xlu1 %v5563_v33, %s8397_s8  ;;  %5656 = vrot.lane.b32.xlu0 %v5564_v25, %s8397_s8 }
 0xc9b   :  { %5861 = vrot.lane.b32.xlu1 %v10396_v61, %s8397_s8  ;;  %5863 = vrot.lane.b32.xlu0 %v10398_v53, %s8397_s8 }
 0xc9f   :  { %6048 = vrot.lane.b32.xlu1 %v10406_v56, %s8397_s8  ;;  %6050 = vrot.lane.b32.xlu0 %v10408_v50, %s8397_s8 }
 0xca3   :  { %6235 = vrot.lane.b32.xlu1 %v10416_v13, %s8397_s8  ;;  %6237 = vrot.lane.b32.xlu0 %v10418_v45, %s8397_s8  ;;  %s8414_s8 = smov 77  }
 0xcf9   :  { %v5570_v52 = vpop.permute.xlu1 %5569  ;;  %v5572_v19 = vpop.permute.xlu0 %5571 }
 0xcfa   :  { %v10430_v21 = vmax.f32 %v5563_v33, %v5570_v52  ;;  %v5576_v3 = vmax.f32 %v5564_v25, %v5572_v19 }
 0xcfc   :  { %5611 = vrot.lane.b32.xlu1 %v5576_v3, %s8398_s9  ;;  %5584 = vrot.lane.b32.xlu0 %v5576_v3, %s8370_s5  ;;  %5579 = vst.msk [vmem:[#allocation3 + $0x8] sm:$0xff] %vm5577_vm8, %v5576_v3  ;;  %5578 = vst.msk [vmem:[#allocation3] sm:$0xff] %vm5577_vm8, %v10430_v21 }
 0xcfd   :  { %v5788_v18 = vpop.permute.xlu0 %5787  ;;  %v5786_v28 = vpop.permute.xlu1 %5785 }
 0xcfe   :  { %v10442_v12 = vmax.f32 %v10398_v53, %v5788_v18  ;;  %v10505_v54 = vmax.f32 %v10396_v61, %v5786_v28 }
 0xd00   :  { %5629 = vrot.lane.b32.xlu1 %v5576_v3, %s8373_s1  ;;  %5593 = vrot.lane.b32.xlu0 %v5576_v3, %s8399_s21 }
 0xd01   :  { %v5975_v1 = vpop.permute.xlu0 %5974  ;;  %v5973_v60 = vpop.permute.xlu1 %5972 }
 0xd02   :  { %v10455_v46 = vmax.f32 %v10408_v50, %v5975_v1  ;;  %v10528_v36 = vmax.f32 %v10406_v56, %v5973_v60 }
 0xd04   :  { %5647 = vrot.lane.b32.xlu1 %v5576_v3, %s8400_s6  ;;  %5602 = vrot.lane.b32.xlu0 %v5576_v3, %s8401_s26 }
 0xd05   :  { %v6162_v39 = vpop.permute.xlu0 %6161  ;;  %v6160_v11 = vpop.permute.xlu1 %6159 }
 0xd06   :  { %v10470_v27 = vmax.f32 %v10418_v45, %v6162_v39  ;;  %v10561_v31 = vmax.f32 %v10416_v13, %v6160_v11 }
 0xd08   :  { %5620 = vrot.lane.b32.xlu0 %v5576_v3, %s8402_s3  ;;  %5823 = vrot.lane.b32.xlu1 %v10442_v12, %s8398_s9 }
 0xd09   :  { %v10534_v10 = vpop.permute.xlu1 %5654  ;;  %v5657_v49 = vpop.permute.xlu0 %5656 }
 0xd0c   :  { %5638 = vrot.lane.b32.xlu0 %v5576_v3, %s8403_s29  ;;  %5839 = vrot.lane.b32.xlu1 %v10442_v12, %s8373_s1 }
 0xd0d   :  { %v10544_v51 = vpop.permute.xlu1 %5861  ;;  %v10546_v59 = vpop.permute.xlu0 %5863 }
 0xd10   :  { %5855 = vrot.lane.b32.xlu1 %v10442_v12, %s8400_s6  ;;  %5799 = vrot.lane.b32.xlu0 %v10442_v12, %s8370_s5 }
 0xd11   :  { %v10552_v41 = vpop.permute.xlu1 %6048  ;;  %v10554_v15 = vpop.permute.xlu0 %6050 }
 0xd14   :  { %5807 = vrot.lane.b32.xlu0 %v10442_v12, %s8399_s21  ;;  %6010 = vrot.lane.b32.xlu1 %v10455_v46, %s8398_s9 }
 0xd15   :  { %v10567_v5 = vpop.permute.xlu1 %6235  ;;  %v10569_v0 = vpop.permute.xlu0 %6237 }
 0xd18   :  { %5815 = vrot.lane.b32.xlu0 %v10442_v12, %s8401_s26  ;;  %6026 = vrot.lane.b32.xlu1 %v10455_v46, %s8373_s1 }
 0xd1c   :  { %5831 = vrot.lane.b32.xlu0 %v10442_v12, %s8402_s3  ;;  %6042 = vrot.lane.b32.xlu1 %v10455_v46, %s8400_s6 }
 0xd20   :  { %5847 = vrot.lane.b32.xlu0 %v10442_v12, %s8403_s29  ;;  %6197 = vrot.lane.b32.xlu1 %v10470_v27, %s8398_s9 }
 0xd24   :  { %5986 = vrot.lane.b32.xlu0 %v10455_v46, %s8370_s5  ;;  %6213 = vrot.lane.b32.xlu1 %v10470_v27, %s8373_s1 }
 0xd28   :  { %5994 = vrot.lane.b32.xlu0 %v10455_v46, %s8399_s21  ;;  %6229 = vrot.lane.b32.xlu1 %v10470_v27, %s8400_s6 }
 0xd2c   :  { %6002 = vrot.lane.b32.xlu0 %v10455_v46, %s8401_s26  ;;  %5591 = vrot.lane.b32.xlu1 %v10430_v21, %s8399_s21 }
 0xd30   :  { %6018 = vrot.lane.b32.xlu0 %v10455_v46, %s8402_s3  ;;  %5600 = vrot.lane.b32.xlu1 %v10430_v21, %s8401_s26 }
 0xd34   :  { %6034 = vrot.lane.b32.xlu0 %v10455_v46, %s8403_s29  ;;  %5618 = vrot.lane.b32.xlu1 %v10430_v21, %s8402_s3 }
 0xd38   :  { %5636 = vrot.lane.b32.xlu1 %v10430_v21, %s8403_s29  ;;  %6173 = vrot.lane.b32.xlu0 %v10470_v27, %s8370_s5 }
 0xd3c   :  { %5645 = vrot.lane.b32.xlu1 %v10430_v21, %s8400_s6  ;;  %6181 = vrot.lane.b32.xlu0 %v10470_v27, %s8399_s21 }
 0xd40   :  { %5797 = vrot.lane.b32.xlu1 %v10505_v54, %s8370_s5  ;;  %6189 = vrot.lane.b32.xlu0 %v10470_v27, %s8401_s26 }
 0xd44   :  { %5813 = vrot.lane.b32.xlu1 %v10505_v54, %s8401_s26  ;;  %6205 = vrot.lane.b32.xlu0 %v10470_v27, %s8402_s3 }
 0xd48   :  { %5829 = vrot.lane.b32.xlu1 %v10505_v54, %s8402_s3  ;;  %6221 = vrot.lane.b32.xlu0 %v10470_v27, %s8403_s29 }
 0xd4c   :  { %5845 = vrot.lane.b32.xlu1 %v10505_v54, %s8403_s29  ;;  %5582 = vrot.lane.b32.xlu0 %v10430_v21, %s8370_s5 }
 0xd50   :  { %5853 = vrot.lane.b32.xlu1 %v10505_v54, %s8400_s6  ;;  %5609 = vrot.lane.b32.xlu0 %v10430_v21, %s8398_s9 }
 0xd54   :  { %5984 = vrot.lane.b32.xlu1 %v10528_v36, %s8370_s5  ;;  %5627 = vrot.lane.b32.xlu0 %v10430_v21, %s8373_s1 }
 0xd58   :  { %6000 = vrot.lane.b32.xlu1 %v10528_v36, %s8401_s26  ;;  %5805 = vrot.lane.b32.xlu0 %v10505_v54, %s8399_s21 }
 0xd5c   :  { %6016 = vrot.lane.b32.xlu1 %v10528_v36, %s8402_s3  ;;  %5821 = vrot.lane.b32.xlu0 %v10505_v54, %s8398_s9 }
 0xd60   :  { %6032 = vrot.lane.b32.xlu1 %v10528_v36, %s8403_s29  ;;  %5837 = vrot.lane.b32.xlu0 %v10505_v54, %s8373_s1 }
 0xd64   :  { %6040 = vrot.lane.b32.xlu1 %v10528_v36, %s8400_s6  ;;  %5992 = vrot.lane.b32.xlu0 %v10528_v36, %s8399_s21 }
 0xd68   :  { %6171 = vrot.lane.b32.xlu1 %v10561_v31, %s8370_s5  ;;  %6008 = vrot.lane.b32.xlu0 %v10528_v36, %s8398_s9  ;;  %s8404_s5 = smov 99  }
 0xd6c   :  { %6187 = vrot.lane.b32.xlu1 %v10561_v31, %s8401_s26  ;;  %6024 = vrot.lane.b32.xlu0 %v10528_v36, %s8373_s1 }
 0xd6e   :  { %v5612_v4 = vpop.permute.xlu1 %5611  ;;  %v5585_v7 = vpop.permute.xlu0 %5584 }
 0xd6f   :  { %5590 = vst.msk [vmem:[#allocation3 + $0x8] sm:$0xff] %vm5588_vm14, %v5585_v7 }
 0xd70   :  { %6203 = vrot.lane.b32.xlu1 %v10561_v31, %s8402_s3  ;;  %6179 = vrot.lane.b32.xlu0 %v10561_v31, %s8399_s21 }
 0xd72   :  { %v5630_v20 = vpop.permute.xlu1 %5629  ;;  %v5594_v34 = vpop.permute.xlu0 %5593 }
 0xd73   :  { %5599 = vst.msk [vmem:[#allocation3 + $0x8] sm:$0xff] %vm5597_vm15, %v5594_v34 }
 0xd74   :  { %6219 = vrot.lane.b32.xlu1 %v10561_v31, %s8403_s29  ;;  %6195 = vrot.lane.b32.xlu0 %v10561_v31, %s8398_s9 }
 0xd76   :  { %v5648_v38 = vpop.permute.xlu1 %5647  ;;  %v5603_v47 = vpop.permute.xlu0 %5602 }
 0xd77   :  { %5608 = vst.msk [vmem:[#allocation3 + $0x8] sm:$0xff] %vm5606_vm5, %v5603_v47 }
 0xd78   :  { %6227 = vrot.lane.b32.xlu1 %v10561_v31, %s8400_s6  ;;  %6211 = vrot.lane.b32.xlu0 %v10561_v31, %s8373_s1  ;;  %5617 = vst.msk [vmem:[#allocation3 + $0x8] sm:$0xff] %vm5615_vm0, %v5612_v4  ;;  %s8405_s1 = smov 4  }
 0xd7a   :  { %v5824_v44 = vpop.permute.xlu1 %5823  ;;  %v5621_v62 = vpop.permute.xlu0 %5620 }
 0xd7b   :  { %5626 = vst.msk [vmem:[#allocation3 + $0x8] sm:$0xff] %vm5624_vm9, %v5621_v62 }
 0xd7c   :  { %5635 = vst.msk [vmem:[#allocation3 + $0x8] sm:$0xff] %vm5633_vm10, %v5630_v20 }
 0xd7e   :  { %v5840_v55 = vpop.permute.xlu1 %5839  ;;  %v5639_v24 = vpop.permute.xlu0 %5638 }
 0xd7f   :  { %5644 = vst.msk [vmem:[#allocation3 + $0x8] sm:$0xff] %vm5642_vm11, %v5639_v24 }
 0xd80   :  { %5653 = vst.msk [vmem:[#allocation3 + $0x8] sm:$0xff] %vm5651_vm7, %v5648_v38 }
 0xd81   :  { %5662 = vst.msk [vmem:[#allocation3 + $0x8] sm:$0xff] %vm5660_vm6, %v5657_v49 }
 0xd82   :  { %v5856_v22 = vpop.permute.xlu1 %5855  ;;  %v5800_v17 = vpop.permute.xlu0 %5799 }
 0xd86   :  { %v6011_v57 = vpop.permute.xlu1 %6010  ;;  %v5808_v43 = vpop.permute.xlu0 %5807 }
 0xd88   :  { %v5664_v63 = vld [vmem:[#allocation3 + $0x8] sm:$0xff] }
 0xd89   :  { %v5666_v23 = vmax.f32 %v5664_v63, 0.0  ;;  %5782 = vst.msk [vmem:[#allocation3 + $0x8] sm:$0xff] %vm11785_vm2, %v10398_v53 }
 0xd8a   :  { %5794 = vst.msk [vmem:[#allocation3 + $0x8] sm:$0xff] %vm5577_vm8, %v10442_v12  ;;  %v6027_v30 = vpop.permute.xlu1 %6026  ;;  %v5816_v14 = vpop.permute.xlu0 %5815 }
 0xd8b   :  { %5804 = vst.msk [vmem:[#allocation3 + $0x8] sm:$0xff] %vm5588_vm14, %v5800_v17  ;;  %5719 = vrot.lane.b32.xlu1 %v5666_v23, %s8380_s28  ;;  %v7266_v32 = vrot.slane %v5666_v23, 11  ;;  %v7264_v8 = vrot.slane %v5666_v23, 9  ;;  %v7265_v48 = vrot.slane %v5666_v23, 10  ;;  %v10614_v6 = vcombine.high %v5666_v23, %v5666_v23 }
 0xd8c   :  { %5812 = vst.msk [vmem:[#allocation3 + $0x8] sm:$0xff] %vm5597_vm15, %v5808_v43 }
 0xd8d   :  { %5820 = vst.msk [vmem:[#allocation3 + $0x8] sm:$0xff] %vm5606_vm5, %v5816_v14  ;;  %5740 = vrot.lane.b32.xlu0 %v7266_v32, %s8403_s29 }
 0xd8e   :  { %5828 = vst.msk [vmem:[#allocation3 + $0x8] sm:$0xff] %vm5615_vm0, %v5824_v44  ;;  %v6043_v2 = vpop.permute.xlu1 %6042  ;;  %v5832_v42 = vpop.permute.xlu0 %5831 }
 0xd8f   :  { %5836 = vst.msk [vmem:[#allocation3 + $0x8] sm:$0xff] %vm5624_vm9, %v5832_v42  ;;  %5726 = vrot.lane.b32.xlu1 %v7264_v8, %s8404_s5  ;;  %v7267_v8 = vrot.slane %v10614_v6, 9 }
 0xd90   :  { %5844 = vst.msk [vmem:[#allocation3 + $0x8] sm:$0xff] %vm5633_vm10, %v5840_v55 }
 0xd92   :  { %v6198_v29 = vpop.permute.xlu1 %6197  ;;  %v5848_v35 = vpop.permute.xlu0 %5847 }
 0xd93   :  { %5852 = vst.msk [vmem:[#allocation3 + $0x8] sm:$0xff] %vm5642_vm11, %v5848_v35  ;;  %5733 = vrot.lane.b32.xlu1 %v7265_v48, %s8378_s27 }
 0xd94   :  { %5860 = vst.msk [vmem:[#allocation3 + $0x8] sm:$0xff] %vm5651_vm7, %v5856_v22 }
 0xd95   :  { %5868 = vst.msk [vmem:[#allocation3 + $0x8] sm:$0xff] %vm5660_vm6, %v10546_v59 }
 0xd96   :  { %v6214_v33 = vpop.permute.xlu1 %6213  ;;  %v5987_v25 = vpop.permute.xlu0 %5986 }
 0xd97   :  { %5751 = vrot.lane.b32.xlu1 %v10614_v6, %s8405_s1 }
 0xd9a   :  { %v6230_v58 = vpop.permute.xlu1 %6229  ;;  %v5995_v16 = vpop.permute.xlu0 %5994 }
 0xd9c   :  { %v5870_v53 = vld [vmem:[#allocation3 + $0x8] sm:$0xff] }
 0xd9d   :  { %v10618_v26 = vmax.f32 %v5870_v53, 0.0  ;;  %5969 = vst.msk [vmem:[#allocation3 + $0x8] sm:$0xff] %vm11786_vm3, %v10408_v50  ;;  %vm5729_vm3 = vcmask 893720  }
 0xd9e   :  { %5981 = vst.msk [vmem:[#allocation3 + $0x8] sm:$0xff] %vm5577_vm8, %v10455_v46  ;;  %v5592_v9 = vpop.permute.xlu1 %5591  ;;  %v6003_v40 = vpop.permute.xlu0 %6002 }
 0xd9f   :  { %5991 = vst.msk [vmem:[#allocation3 + $0x8] sm:$0xff] %vm5588_vm14, %v5987_v25  ;;  %v7278_v37 = vrot.slane %v10618_v26, 11  ;;  %v7276_v50 = vrot.slane %v10618_v26, 9  ;;  %v7277_v18 = vrot.slane %v10618_v26, 10  ;;  %v10642_v46 = vcombine.high %v10618_v26, %v10618_v26 }
 0xda0   :  { %5999 = vst.msk [vmem:[#allocation3 + $0x8] sm:$0xff] %vm5597_vm15, %v5995_v16 }
 0xda1   :  { %6007 = vst.msk [vmem:[#allocation3 + $0x8] sm:$0xff] %vm5606_vm5, %v6003_v40  ;;  %5935 = vrot.lane.b32.xlu0 %v7278_v37, %s8403_s29  ;;  %v7279_v37 = vrot.slane %v10642_v46, 9 }
 0xda2   :  { %6015 = vst.msk [vmem:[#allocation3 + $0x8] sm:$0xff] %vm5615_vm0, %v6011_v57  ;;  %v5601_v52 = vpop.permute.xlu1 %5600  ;;  %v6019_v19 = vpop.permute.xlu0 %6018 }
 0xda3   :  { %6023 = vst.msk [vmem:[#allocation3 + $0x8] sm:$0xff] %vm5624_vm9, %v6019_v19 }
 0xda4   :  { %6031 = vst.msk [vmem:[#allocation3 + $0x8] sm:$0xff] %vm5633_vm10, %v6027_v30 }
 0xda5   :  { %5923 = vrot.lane.b32.xlu0 %v7276_v50, %s8404_s5 }
 0xda6   :  { %v5619_v21 = vpop.permute.xlu1 %5618  ;;  %v6035_v3 = vpop.permute.xlu0 %6034 }
 0xda7   :  { %6039 = vst.msk [vmem:[#allocation3 + $0x8] sm:$0xff] %vm5642_vm11, %v6035_v3 }
 0xda8   :  { %6047 = vst.msk [vmem:[#allocation3 + $0x8] sm:$0xff] %vm5651_vm7, %v6043_v2 }
 0xda9   :  { %6055 = vst.msk [vmem:[#allocation3 + $0x8] sm:$0xff] %vm5660_vm6, %v10554_v15  ;;  %5929 = vrot.lane.b32.xlu0 %v7277_v18, %s8378_s27 }
 0xdaa   :  { %v5637_v12 = vpop.permute.xlu1 %5636  ;;  %v6174_v1 = vpop.permute.xlu0 %6173 }
 0xdad   :  { %5942 = vrot.lane.b32.xlu0 %v10642_v46, %s8405_s1 }
 0xdae   :  { %v5646_v39 = vpop.permute.xlu1 %5645  ;;  %v6182_v28 = vpop.permute.xlu0 %6181 }
 0xdb0   :  { %v10646_v60 = vld [vmem:[#allocation3 + $0x8] sm:$0xff] }
 0xdb1   :  { %6156 = vst.msk [vmem:[#allocation3 + $0x8] sm:$0xff] %vm11787_vm12, %v10418_v45  ;;  %vm5743_vm12 = vcmask 990208  }
 0xdb2   :  { %6168 = vst.msk [vmem:[#allocation3 + $0x8] sm:$0xff] %vm5577_vm8, %v10470_v27  ;;  %v5798_v11 = vpop.permute.xlu1 %5797  ;;  %v6190_v49 = vpop.permute.xlu0 %6189 }
 0xdb3   :  { %6178 = vst.msk [vmem:[#allocation3 + $0x8] sm:$0xff] %vm5588_vm14, %v6174_v1 }
 0xdb4   :  { %6186 = vst.msk [vmem:[#allocation3 + $0x8] sm:$0xff] %vm5597_vm15, %v6182_v28 }
 0xdb5   :  { %6194 = vst.msk [vmem:[#allocation3 + $0x8] sm:$0xff] %vm5606_vm5, %v6190_v49 }
 0xdb6   :  { %6202 = vst.msk [vmem:[#allocation3 + $0x8] sm:$0xff] %vm5615_vm0, %v6198_v29  ;;  %v5814_v59 = vpop.permute.xlu1 %5813  ;;  %v6206_v15 = vpop.permute.xlu0 %6205 }
 0xdb7   :  { %6210 = vst.msk [vmem:[#allocation3 + $0x8] sm:$0xff] %vm5624_vm9, %v6206_v15 }
 0xdb8   :  { %6218 = vst.msk [vmem:[#allocation3 + $0x8] sm:$0xff] %vm5633_vm10, %v6214_v33 }
 0xdba   :  { %v5830_v45 = vpop.permute.xlu1 %5829  ;;  %v6222_v4 = vpop.permute.xlu0 %6221 }
 0xdbb   :  { %6226 = vst.msk [vmem:[#allocation3 + $0x8] sm:$0xff] %vm5642_vm11, %v6222_v4 }
 0xdbc   :  { %6234 = vst.msk [vmem:[#allocation3 + $0x8] sm:$0xff] %vm5651_vm7, %v6230_v58 }
 0xdbd   :  { %6242 = vst.msk [vmem:[#allocation3 + $0x8] sm:$0xff] %vm5660_vm6, %v10569_v0 }
 0xdbe   :  { %v5846_v27 = vpop.permute.xlu1 %5845  ;;  %v5583_v7 = vpop.permute.xlu0 %5582 }
 0xdbf   :  { %5589 = vst.msk [vmem:[#allocation3] sm:$0xff] %vm5588_vm14, %v5583_v7 }
 0xdc0   :  { %5598 = vst.msk [vmem:[#allocation3] sm:$0xff] %vm5597_vm15, %v5592_v9 }
 0xdc1   :  { %5607 = vst.msk [vmem:[#allocation3] sm:$0xff] %vm5606_vm5, %v5601_v52 }
 0xdc2   :  { %v5854_v20 = vpop.permute.xlu1 %5853  ;;  %v5610_v34 = vpop.permute.xlu0 %5609 }
 0xdc3   :  { %5616 = vst.msk [vmem:[#allocation3] sm:$0xff] %vm5615_vm0, %v5610_v34  ;;  %v6342_v34 = vld [vmem:[%s11293_s10 + $0x18] sm:$0xff] }
 0xdc4   :  { %5625 = vst.msk [vmem:[#allocation3] sm:$0xff] %vm5624_vm9, %v5619_v21  ;;  %v6244_v1 = vld [vmem:[#allocation3 + $0x8] sm:$0xff] }
 0xdc6   :  { %v5628_v38 = vpop.permute.xlu0 %5627  ;;  %v5985_v47 = vpop.permute.xlu1 %5984 }
 0xdc7   :  { %5634 = vst.msk [vmem:[#allocation3] sm:$0xff] %vm5633_vm10, %v5628_v38 }
 0xdc8   :  { %5643 = vst.msk [vmem:[#allocation3] sm:$0xff] %vm5642_vm11, %v5637_v12 }
 0xdc9   :  { %5652 = vst.msk [vmem:[#allocation3] sm:$0xff] %vm5651_vm7, %v5646_v39 }
 0xdca   :  { %5661 = vst.msk [vmem:[#allocation3] sm:$0xff] %vm5660_vm6, %v10534_v10  ;;  %v5806_v0 = vpop.permute.xlu0 %5805  ;;  %v6001_v44 = vpop.permute.xlu1 %6000 }
 0xdce   :  { %v5822_v24 = vpop.permute.xlu0 %5821  ;;  %v6017_v22 = vpop.permute.xlu1 %6016 }
 0xdd1   :  { %v5663_v62 = vld [vmem:[#allocation3] sm:$0xff] }
 0xdd2   :  { %v5665_v55 = vmax.f32 %v5663_v62, 0.0  ;;  %5781 = vst.msk [vmem:[#allocation3] sm:$0xff] %vm11788_vm4, %v10396_v61  ;;  %v5838_v61 = vpop.permute.xlu0 %5837 }
 0xdd3   :  { %5793 = vst.msk [vmem:[#allocation3] sm:$0xff] %vm5577_vm8, %v10505_v54  ;;  %v6033_v54 = vpop.permute.xlu1 %6032 }
 0xdd4   :  { %5803 = vst.msk [vmem:[#allocation3] sm:$0xff] %vm5588_vm14, %v5798_v11  ;;  %v7258_v17 = vrot.slane %v5665_v55, 9  ;;  %v7259_v10 = vrot.slane %v5665_v55, 10  ;;  %v7260_v57 = vrot.slane %v5665_v55, 11  ;;  %v5691_v23 = vcombine.high %v5665_v55, %v5665_v55 }
 0xdd5   :  { %5668 = vst.msk [vmem:[#allocation4] sm:$0x1] %vm5667_vm1, %v5665_v55  ;;  %v10751_v11 = vmax.f32 %v6244_v1, 0.0 }
 0xdd6   :  { %5811 = vst.msk [vmem:[#allocation3] sm:$0xff] %vm5597_vm15, %v5806_v0  ;;  %5672 = vrot.lane.b32.xlu1 %v7258_v17, %s8406_s7  ;;  %v5993_v43 = vpop.permute.xlu0 %5992  ;;  %v7261_v29 = vrot.slane %v5691_v23, 9  ;;  %v7262_v25 = vrot.slane %v5691_v23, 10  ;;  %v7263_v53 = vrot.slane %v5691_v23, 11  ;;  %v6339_v0 = vld [vmem:[%s11293_s10] sm:$0xff] }
 0xdd7   :  { %5819 = vst.msk [vmem:[#allocation3] sm:$0xff] %vm5606_vm5, %v5814_v59  ;;  %v6041_v63 = vpop.permute.xlu1 %6040  ;;  %v7302_v59 = vrot.slane %v10751_v11, 11  ;;  %v10774_v38 = vcombine.high %v10751_v11, %v10751_v11 }
 0xdd8   :  { %5827 = vst.msk [vmem:[#allocation3] sm:$0xff] %vm5615_vm0, %v5822_v24  ;;  %v6344_v24 = vld [vmem:[%s11293_s10 + $0x28] sm:$0xff] }
 0xdd9   :  { %5835 = vst.msk [vmem:[#allocation3] sm:$0xff] %vm5624_vm9, %v5830_v45  ;;  %v7300_v45 = vrot.slane %v10751_v11, 9 }
 0xdda   :  { %5843 = vst.msk [vmem:[#allocation3] sm:$0xff] %vm5633_vm10, %v5838_v61  ;;  %5679 = vrot.lane.b32.xlu1 %v7259_v10, %s8407_s25  ;;  %v6009_v32 = vpop.permute.xlu0 %6008  ;;  %v6343_v10 = vld [vmem:[%s11293_s10 + $0x20] sm:$0xff] }
 0xddb   :  { %5851 = vst.msk [vmem:[#allocation3] sm:$0xff] %vm5642_vm11, %v5846_v27  ;;  %v7301_v27 = vrot.slane %v10751_v11, 10 }
 0xddc   :  { %5859 = vst.msk [vmem:[#allocation3] sm:$0xff] %vm5651_vm7, %v5854_v20  ;;  %v6340_v20 = vld [vmem:[%s11293_s10 + $0x8] sm:$0xff] }
 0xddd   :  { %5867 = vst.msk [vmem:[#allocation3] sm:$0xff] %vm5660_vm6, %v10544_v51  ;;  %v6172_v51 = vpop.permute.xlu1 %6171 }
 0xdde   :  { %5686 = vrot.lane.b32.xlu1 %v7260_v57, %s8408_s4 }
 0xde1   :  { %v6188_v48 = vpop.permute.xlu1 %6187 }
 0xde2   :  { %5692 = vrot.lane.b32.xlu1 %v5691_v23, %s8409_s30 }
 0xde4   :  { %v5869_v30 = vld [vmem:[#allocation3] sm:$0xff] }
 0xde5   :  { %v5871_v14 = vmax.f32 %v5869_v30, 0.0  ;;  %5968 = vst.msk [vmem:[#allocation3] sm:$0xff] %vm11789_vm13, %v10406_v56  ;;  %v7268_v56 = vrot.slane %v10614_v6, 10  ;;  %v6204_v58 = vpop.permute.xlu1 %6203  ;;  %v6348_v30 = vld [vmem:[%s11293_s10 + $0x48] sm:$0xff]  ;;  %vm5754_vm13 = vcmask 114720  }
 0xde6   :  { %5980 = vst.msk [vmem:[#allocation3] sm:$0xff] %vm5577_vm8, %v10528_v36  ;;  %5758 = vrot.lane.b32.xlu1 %v7267_v8, %s8410_s24  ;;  %v6025_v36 = vpop.permute.xlu0 %6024 }
 0xde7   :  { %5990 = vst.msk [vmem:[#allocation3] sm:$0xff] %vm5588_vm14, %v5985_v47  ;;  %v7270_v2 = vrot.slane %v5871_v14, 9  ;;  %v7271_v42 = vrot.slane %v5871_v14, 10  ;;  %v7272_v35 = vrot.slane %v5871_v14, 11  ;;  %v5893_v16 = vcombine.high %v5871_v14, %v5871_v14 }
 0xde8   :  { %5873 = vst.msk [vmem:[#allocation4 + $0x1] sm:$0x1] %vm5667_vm1, %v5871_v14  ;;  %v8074_v47 = vpack.c.bf16 %v6342_v34, %v6340_v20  ;;  %v6350_v14 = vld [vmem:[%s11293_s10 + $0x58] sm:$0xff]  ;;  %v6367_v34 = vld [vmem:[%s11293_s10 + $0xe0] sm:$0xff] }
 0xde9   :  { %5998 = vst.msk [vmem:[#allocation3] sm:$0xff] %vm5597_vm15, %v5993_v43  ;;  %5877 = vrot.lane.b32.xlu0 %v7270_v2, %s8406_s7  ;;  %v6220_v52 = vpop.permute.xlu1 %6219  ;;  %v7273_v21 = vrot.slane %v5893_v16, 9  ;;  %v7274_v3 = vrot.slane %v5893_v16, 10  ;;  %v7275_v12 = vrot.slane %v5893_v16, 11  ;;  %v8082_v8 = vpack.c.bf16 %v6350_v14, %v6348_v30  ;;  %v6352_v2 = vld [vmem:[%s11293_s10 + $0x68] sm:$0xff]  ;;  %v6382_v14 = vld [vmem:[%s11293_s10 + $0x158] sm:$0xff] }
 0xdea   :  { %6006 = vst.msk [vmem:[#allocation3] sm:$0xff] %vm5606_vm5, %v6001_v44  ;;  %5765 = vrot.lane.b32.xlu1 %v7268_v56, %s8411_s23  ;;  %v6180_v33 = vpop.permute.xlu0 %6179  ;;  %v6341_v44 = vld [vmem:[%s11293_s10 + $0x10] sm:$0xff]  ;;  %8075 = vmatprep.subr.bf16.mxu0 %v8074_v47  ;;  %v6354_v56 = vld [vmem:[%s11293_s10 + $0x78] sm:$0xff]  ;;  %v6372_v47 = vld [vmem:[%s11293_s10 + $0x108] sm:$0xff] }
 0xdeb   :  { %6014 = vst.msk [vmem:[#allocation3] sm:$0xff] %vm5615_vm0, %v6009_v32  ;;  %v8076_v55 = vpack.c.bf16 %v6341_v44, %v6339_v0  ;;  %v6347_v32 = vld [vmem:[%s11293_s10 + $0x40] sm:$0xff]  ;;  %v6374_v44 = vld [vmem:[%s11293_s10 + $0x118] sm:$0xff]  ;;  %v6380_v30 = vld [vmem:[%s11293_s10 + $0x148] sm:$0xff] }
 0xdec   :  { %6022 = vst.msk [vmem:[#allocation3] sm:$0xff] %vm5624_vm9, %v6017_v22  ;;  %v6346_v22 = vld [vmem:[%s11293_s10 + $0x38] sm:$0xff] }
 0xded   :  { %6030 = vst.msk [vmem:[#allocation3] sm:$0xff] %vm5633_vm10, %v6025_v36  ;;  %5883 = vrot.lane.b32.xlu0 %v7271_v42, %s8407_s25  ;;  %v6228_v50 = vpop.permute.xlu1 %6227  ;;  %8077 = vmatpush1.bf16.msra.mxu0 %v8076_v55  ;;  %v8078_v61 = vpack.c.bf16 %v6346_v22, %v6344_v24  ;;  %v6373_v55 = vld [vmem:[%s11293_s10 + $0x110] sm:$0xff]  ;;  %v8106_v24 = vpack.c.bf16 %v6374_v44, %v6372_v47  ;;  %v6376_v22 = vld [vmem:[%s11293_s10 + $0x128] sm:$0xff] }
 0xdee   :  { %6038 = vst.msk [vmem:[#allocation3] sm:$0xff] %vm5642_vm11, %v6033_v54  ;;  %5699 = vrot.lane.b32.xlu1 %v7261_v29, %s8412_s0  ;;  %v6345_v54 = vld [vmem:[%s11293_s10 + $0x30] sm:$0xff]  ;;  %v6351_v29 = vld [vmem:[%s11293_s10 + $0x60] sm:$0xff] }
 0xdef   :  { %6046 = vst.msk [vmem:[#allocation3] sm:$0xff] %vm5651_vm7, %v6041_v63  ;;  %8079 = vmatprep.subr.bf16.mxu0 %v8078_v61  ;;  %v8080_v43 = vpack.c.bf16 %v6345_v54, %v6343_v10 }
 0xdf0   :  { %6054 = vst.msk [vmem:[#allocation3] sm:$0xff] %vm5660_vm6, %v10552_v41  ;;  %v6196_v41 = vpop.permute.xlu0 %6195 }
 0xdf1   :  { %5889 = vrot.lane.b32.xlu0 %v7272_v35, %s8408_s4  ;;  %8081 = vmatpush1.bf16.msra.mxu0 %v8080_v43  ;;  %v6353_v35 = vld [vmem:[%s11293_s10 + $0x70] sm:$0xff]  ;;  %v6375_v43 = vld [vmem:[%s11293_s10 + $0x120] sm:$0xff] }
 0xdf2   :  { %5706 = vrot.lane.b32.xlu1 %v7262_v25, %s8413_s22  ;;  %8083 = vmatprep.subr.bf16.mxu0 %v8082_v8  ;;  %v8088_v25 = vpack.c.bf16 %v6353_v35, %v6351_v29 }
 0xdf4   :  { %v6212_v19 = vpop.permute.xlu0 %6211 }
 0xdf5   :  { %5894 = vrot.lane.b32.xlu0 %v5893_v16, %s8409_s30  ;;  %v6358_v16 = vld [vmem:[%s11293_s10 + $0x98] sm:$0xff] }
 0xdf6   :  { %5713 = vrot.lane.b32.xlu1 %v7263_v53, %s8414_s8 }
 0xdf7   :  { %v6056_v9 = vld [vmem:[#allocation3] sm:$0xff] }
 0xdf8   :  { %v6058_v40 = vmax.f32 %v6056_v9, 0.0  ;;  %6155 = vst.msk [vmem:[#allocation3] sm:$0xff] %vm11785_vm2, %v10416_v13  ;;  %v7280_v13 = vrot.slane %v10642_v46, 10  ;;  %vm5761_vm2 = vcmask 204920  }
 0xdf9   :  { %6167 = vst.msk [vmem:[#allocation3] sm:$0xff] %vm5577_vm8, %v10561_v31  ;;  %5948 = vrot.lane.b32.xlu0 %v7279_v37, %s8410_s24  ;;  %v6059_v31 = vmax.f32 %v10646_v60, 0.0  ;;  %vm5675_vm8 = vcmask 172120  }
 0xdfa   :  { %6177 = vst.msk [vmem:[#allocation3] sm:$0xff] %vm5588_vm14, %v6172_v51  ;;  %5917 = vrot.lane.b32.xlu1 %v10618_v26, %s8380_s28  ;;  %v7282_v49 = vrot.slane %v6058_v40, 9  ;;  %v7283_v15 = vrot.slane %v6058_v40, 10  ;;  %v7284_v4 = vrot.slane %v6058_v40, 11  ;;  %v6080_v7 = vcombine.high %v6058_v40, %v6058_v40  ;;  %v6349_v51 = vld [vmem:[%s11293_s10 + $0x50] sm:$0xff] }
 0xdfb   :  { %6060 = vst.msk [vmem:[#allocation4 + $0x2] sm:$0x1] %vm5667_vm1, %v6058_v40  ;;  %v7288_v26 = vrot.slane %v6059_v31, 9  ;;  %v7289_v18 = vrot.slane %v6059_v31, 10  ;;  %v10745_v28 = vcombine.high %v6059_v31, %v6059_v31  ;;  %v8084_v42 = vpack.c.bf16 %v6349_v51, %v6347_v32  ;;  %v6355_v40 = vld [vmem:[%s11293_s10 + $0x80] sm:$0xff] }
 0xdfc   :  { %6185 = vst.msk [vmem:[#allocation3] sm:$0xff] %vm5597_vm15, %v6180_v33  ;;  %v7285_v23 = vrot.slane %v6080_v7, 9  ;;  %v7286_v33 = vrot.slane %v6080_v7, 10  ;;  %v7287_v37 = vrot.slane %v6080_v7, 11  ;;  %v7281_v32 = vrot.slane %v10642_v46, 11 }
 0xdfd   :  { %6193 = vst.msk [vmem:[#allocation3] sm:$0xff] %vm5606_vm5, %v6188_v48  ;;  %5954 = vrot.lane.b32.xlu0 %v7280_v13, %s8411_s23  ;;  %v7291_v62 = vrot.slane %v10745_v28, 9  ;;  %v7292_v57 = vrot.slane %v10745_v28, 10  ;;  %v8086_v48 = vpack.c.bf16 %v6354_v56, %v6352_v2  ;;  %8085 = vmatpush1.bf16.msra.mxu0 %v8084_v42  ;;  %v6360_v13 = vld [vmem:[%s11293_s10 + $0xa8] sm:$0xff]  ;;  %v8114_v51 = vpack.c.bf16 %v6382_v14, %v6380_v30  ;;  %v6379_v2 = vld [vmem:[%s11293_s10 + $0x140] sm:$0xff]  ;;  %v6381_v56 = vld [vmem:[%s11293_s10 + $0x150] sm:$0xff] }
 0xdfe   :  { %6201 = vst.msk [vmem:[#allocation3] sm:$0xff] %vm5615_vm0, %v6196_v41  ;;  %6104 = vrot.lane.b32.xlu1 %v6059_v31, %s8380_s28  ;;  %v6357_v41 = vld [vmem:[%s11293_s10 + $0x90] sm:$0xff]  ;;  %v7305_v46 = vrot.slane %v10774_v38, 11  ;;  %vm5682_vm14 = vcmask 262320   ;;  %vm5689_vm15 = vcmask 352520   ;;  %vm11404_vm5 = vcmask 442720  }
 0xdff   :  { %6209 = vst.msk [vmem:[#allocation3] sm:$0xff] %vm5624_vm9, %v6204_v58  ;;  %8087 = vmatprep.subr.bf16.mxu0 %v8086_v48  ;;  %v6356_v58 = vld [vmem:[%s11293_s10 + $0x88] sm:$0xff]  ;;  %v8116_v48 = vpack.c.bf16 %v6381_v56, %v6379_v2  ;;  %vm5702_vm0 = vcmask 532920   ;;  %vm5709_vm9 = vcmask 623120  }
 0xe00   :  { %6217 = vst.msk [vmem:[#allocation3] sm:$0xff] %vm5633_vm10, %v6212_v19  ;;  %v8090_v9 = vpack.c.bf16 %v6358_v16, %v6356_v58  ;;  %v7303_v19 = vrot.slane %v10774_v38, 9  ;;  %vm5716_vm10 = vcmask 713320  }
 0xe01   :  { %6225 = vst.msk [vmem:[#allocation3] sm:$0xff] %vm5642_vm11, %v6220_v52  ;;  %5900 = vrot.lane.b32.xlu0 %v7273_v21, %s8412_s0  ;;  %8089 = vmatpush1.bf16.msra.mxu0 %v8088_v25  ;;  %v8092_v52 = vpack.c.bf16 %v6357_v41, %v6355_v40  ;;  %v6359_v21 = vld [vmem:[%s11293_s10 + $0xa0] sm:$0xff]  ;;  %vm5722_vm11 = vcmask 803520  }
 0xe02   :  { %6233 = vst.msk [vmem:[#allocation3] sm:$0xff] %vm5651_vm7, %v6228_v50  ;;  %6110 = vrot.lane.b32.xlu1 %v7288_v26, %s8404_s5  ;;  %8091 = vmatprep.subr.bf16.mxu0 %v8090_v9  ;;  %v6361_v26 = vld [vmem:[%s11293_s10 + $0xb0] sm:$0xff]  ;;  %vm5746_vm7 = vcmask 1041352  }
 0xe03   :  { %6241 = vst.msk [vmem:[#allocation3] sm:$0xff] %vm5660_vm6, %v10567_v5  ;;  %v7290_v5 = vrot.slane %v6059_v31, 11  ;;  %v6362_v31 = vld [vmem:[%s11293_s10 + $0xb8] sm:$0xff]  ;;  %vm5747_vm6 = vcmask 28676  }
 0xe04   :  { %v8094_v50 = vpack.c.bf16 %v6362_v31, %v6360_v13  ;;  %vm10974_vm4 = vmor %vm5747_vm6, %vm5746_vm7  ;;  %vm11793_vm7 = vcmask 442720  }
 0xe05   :  { %5906 = vrot.lane.b32.xlu0 %v7274_v3, %s8413_s22  ;;  %v6364_v3 = vld [vmem:[%s11293_s10 + $0xc8] sm:$0xff]  ;;  %8093 = vmatpush1.bf16.msra.mxu0 %v8092_v52  ;;  %vm11794_vm6 = vmmov %vm11793_vm7 }
 0xe06   :  { %6116 = vrot.lane.b32.xlu1 %v7289_v18, %s8378_s27  ;;  %v8096_v18 = vpack.c.bf16 %v6361_v26, %v6359_v21  ;;  %8095 = vmatprep.subr.bf16.mxu0 %v8094_v50 }
 0xe09   :  { %5912 = vrot.lane.b32.xlu0 %v7275_v12, %s8414_s8  ;;  %v6366_v12 = vld [vmem:[%s11293_s10 + $0xd8] sm:$0xff]  ;;  %8097 = vmatpush1.bf16.msra.mxu0 %v8096_v18 }
 0xe0a   :  { %v6243_v39 = vld [vmem:[#allocation3] sm:$0xff]  ;;  %6129 = vrot.lane.b32.xlu1 %v10745_v28, %s8405_s1  ;;  %v8098_v1 = vpack.c.bf16 %v6366_v12, %v6364_v3  ;;  %v6552_v3 = vld [vmem:[%s11297_s14 + $0x20] sm:$0xff] }
 0xe0b   :  { %v10747_v60 = vmax.f32 %v6243_v39, 0.0  ;;  %v10871_v39 = vpop.permute.xlu1 %5719 }
 0xe0c   :  { %8099 = vmatprep.subr.bf16.mxu0 %v8098_v1 }
 0xe0d   :  { %6247 = vst.msk [vmem:[#allocation4 + $0x3] sm:$0x1] %vm5667_vm1, %v10747_v60  ;;  %6122 = vrot.lane.b32.xlu0 %v7290_v5, %s8403_s29  ;;  %v7294_v17 = vrot.slane %v10747_v60, 9  ;;  %v7295_v63 = vrot.slane %v10747_v60, 10  ;;  %v7296_v36 = vrot.slane %v10747_v60, 11  ;;  %v10840_v53 = vcombine.high %v10747_v60, %v10747_v60 }
 0xe0e   :  { %6064 = vrot.lane.b32.xlu1 %v7282_v49, %s8406_s7  ;;  %v7304_v60 = vrot.slane %v10774_v38, 10  ;;  %v7269_v5 = vrot.slane %v10614_v6, 11  ;;  %v7293_v6 = vrot.slane %v10745_v28, 11  ;;  %v6369_v28 = vld [vmem:[%s11293_s10 + $0xf0] sm:$0xff]  ;;  %vm5736_vm1 = vcmask 983920  }
 0xe0f   :  { %v7297_v49 = vrot.slane %v10840_v53, 9  ;;  %v7298_v20 = vrot.slane %v10840_v53, 10  ;;  %v8104_v0 = vpack.c.bf16 %v6369_v28, %v6367_v34  ;;  %v7299_v10 = vrot.slane %v10840_v53, 11 }
 0xe11   :  { %6309 = vrot.lane.b32.xlu0 %v7302_v59, %s8403_s29  ;;  %v6363_v59 = vld [vmem:[%s11293_s10 + $0xc0] sm:$0xff] }
 0xe12   :  { %6070 = vrot.lane.b32.xlu1 %v7283_v15, %s8407_s25  ;;  %v10886_v15 = vpop.permute.xlu1 %5726 }
 0xe15   :  { %6297 = vrot.lane.b32.xlu0 %v7300_v45, %s8404_s5 }
 0xe16   :  { %6076 = vrot.lane.b32.xlu1 %v7284_v4, %s8408_s4  ;;  %v6368_v4 = vld [vmem:[%s11293_s10 + $0xe8] sm:$0xff]  ;;  %v10923_v61 = vpop.permute.xlu1 %5733 }
 0xe19   :  { %6303 = vrot.lane.b32.xlu0 %v7301_v27, %s8378_s27  ;;  %v6370_v27 = vld [vmem:[%s11293_s10 + $0xf8] sm:$0xff] }
 0xe1a   :  { %6081 = vrot.lane.b32.xlu1 %v6080_v7, %s8409_s30  ;;  %v8102_v7 = vpack.c.bf16 %v6370_v27, %v6368_v4 }
 0xe1d   :  { %6316 = vrot.lane.b32.xlu0 %v10774_v38, %s8405_s1 }
 0xe1e   :  { %6135 = vrot.lane.b32.xlu1 %v7291_v62, %s8410_s24  ;;  %v6371_v62 = vld [vmem:[%s11293_s10 + $0x100] sm:$0xff] }
 0xe1f   :  { %v8108_v54 = vpack.c.bf16 %v6373_v55, %v6371_v62 }
 0xe21   :  { %6251 = vrot.lane.b32.xlu0 %v7294_v17, %s8406_s7  ;;  %v6378_v17 = vld [vmem:[%s11293_s10 + $0x138] sm:$0xff] }
 0xe22   :  { %6141 = vrot.lane.b32.xlu1 %v7292_v57, %s8411_s23  ;;  %v8110_v57 = vpack.c.bf16 %v6378_v17, %v6376_v22 }
 0xe25   :  { %6257 = vrot.lane.b32.xlu0 %v7295_v63, %s8407_s25  ;;  %v6377_v63 = vld [vmem:[%s11293_s10 + $0x130] sm:$0xff] }
 0xe26   :  { %6087 = vrot.lane.b32.xlu1 %v7285_v23, %s8412_s0  ;;  %v10932_v23 = vpop.permute.xlu0 %5740  ;;  %v8112_v8 = vpack.c.bf16 %v6377_v63, %v6375_v43 }
 0xe27   :  { %v5742_v50 = vrot.slane %v10932_v23, 4 }
 0xe29   :  { %6263 = vrot.lane.b32.xlu0 %v7296_v36, %s8408_s4  ;;  %v10948_v36 = vpop.permute.xlu1 %5751  ;;  %v5744_v18 = vsel %vm5743_vm12, %v5742_v50, %v10932_v23  ;;  %v6569_v50 = vld [vmem:[%s11297_s14 + $0xa8] sm:$0xff] }
 0xe2a   :  { %6093 = vrot.lane.b32.xlu1 %v7286_v33, %s8413_s22  ;;  %v10950_v42 = vpop.permute.xlu0 %5935  ;;  %v11790_v33 = vmov 0.0|0.0  }
 0xe2d   :  { %6268 = vrot.lane.b32.xlu0 %v10840_v53, %s8409_s30 }
 0xe2e   :  { %6099 = vrot.lane.b32.xlu1 %v7287_v37, %s8414_s8  ;;  %v10956_v35 = vpop.permute.xlu0 %5923 }
 0xe31   :  { %6322 = vrot.lane.b32.xlu0 %v7303_v19, %s8410_s24 }
 0xe32   :  { %6291 = vrot.lane.b32.xlu1 %v10751_v11, %s8380_s28  ;;  %v6365_v11 = vld [vmem:[%s11293_s10 + $0xd0] sm:$0xff]  ;;  %v10960_v58 = vpop.permute.xlu0 %5929 }
 0xe33   :  { %v8100_v45 = vpack.c.bf16 %v6365_v11, %v6363_v59  ;;  %v5937_v11 = vrot.slane %v10950_v42, 4 }
 0xe35   :  { %6328 = vrot.lane.b32.xlu0 %v7304_v60, %s8411_s23  ;;  %8101 = vmatpush1.bf16.msra.mxu0 %v8100_v45  ;;  %v5938_v45 = vsel %vm5743_vm12, %v5937_v11, %v10950_v42  ;;  %v6573_v11 = vld [vmem:[%s11297_s14 + $0xc8] sm:$0xff] }
 0xe36   :  { %5772 = vrot.lane.b32.xlu1 %v7269_v5, %s8393_s2  ;;  %8103 = vmatprep.subr.bf16.mxu0 %v8102_v7  ;;  %v5943_v53 = vpop.permute.xlu0 %5942 }
 0xe39   :  { %6274 = vrot.lane.b32.xlu0 %v7297_v49, %s8412_s0  ;;  %8105 = vmatpush1.bf16.msra.mxu0 %v8104_v0 }
 0xe3a   :  { %6147 = vrot.lane.b32.xlu1 %v7293_v6, %s8393_s2  ;;  %8107 = vmatprep.subr.bf16.mxu0 %v8106_v24 }
 0xe3d   :  { %6280 = vrot.lane.b32.xlu0 %v7298_v20, %s8413_s22  ;;  %8109 = vmatpush1.bf16.msra.mxu0 %v8108_v54 }
 0xe3e   :  { %8111 = vmatprep.subr.bf16.mxu0 %v8110_v57 }
 0xe41   :  { %6286 = vrot.lane.b32.xlu0 %v7299_v10, %s8414_s8  ;;  %8113 = vmatpush1.bf16.msra.mxu0 %v8112_v8 }
 0xe42   :  { %8115 = vmatprep.subr.bf16.mxu0 %v8114_v51 }
 0xe45   :  { %5960 = vrot.lane.b32.xlu0 %v7281_v32, %s8393_s2  ;;  %8117 = vmatpush1.bf16.msra.mxu0 %v8116_v48 }
 0xe46   :  { %8171 = vmatprep.subr.bf16.mxu0 %v11790_v33 }
 0xe48   :  { %v5673_v29 = vpop.permute.xlu1 %5672 }
 0xe49   :  { %6334 = vrot.lane.b32.xlu0 %v7305_v46, %s8393_s2  ;;  %5676 = vst.msk [vmem:[#allocation4] sm:$0x1] %vm5675_vm8, %v5673_v29 }
 0xe4c   :  { %v5680_v25 = vpop.permute.xlu1 %5679 }
 0xe4d   :  { %5683 = vst.msk [vmem:[#allocation4] sm:$0x1] %vm5682_vm14, %v5680_v25  ;;  %v11795_v25 = vmov 0.0  }
 0xe50   :  { %v5687_v38 = vpop.permute.xlu1 %5686 }
 0xe51   :  { %5690 = vst.msk [vmem:[#allocation4] sm:$0x1] %vm5689_vm15, %v5687_v38  ;;  %v6565_v38 = vld [vmem:[%s11297_s14 + $0x88] sm:$0xff] }
 0xe54   :  { %v5693_v16 = vpop.permute.xlu1 %5692 }
 0xe55   :  { %5696 = vst.msk [vmem:[#allocation4] sm:$0x1] %vm11404_vm5, %v5693_v16  ;;  %v6548_v16 = vld [vmem:[%s11297_s14] sm:$0xff] }
 0xe58   :  { %v5759_v9 = vpop.permute.xlu1 %5758 }
 0xe5b   :  { %v5878_v40 = vpop.permute.xlu0 %5877 }
 0xe5c   :  { %5880 = vst.msk [vmem:[#allocation4 + $0x1] sm:$0x1] %vm5675_vm8, %v5878_v40  ;;  %v5766_v41 = vpop.permute.xlu1 %5765  ;;  %v6566_v40 = vld [vmem:[%s11297_s14 + $0x90] sm:$0xff] }
 0xe5f   :  { %v5884_v37 = vpop.permute.xlu0 %5883 }
 0xe60   :  { %5886 = vst.msk [vmem:[#allocation4 + $0x1] sm:$0x1] %vm5682_vm14, %v5884_v37  ;;  %v5700_v52 = vpop.permute.xlu1 %5699 }
 0xe61   :  { %5703 = vst.msk [vmem:[#allocation4] sm:$0x1] %vm5702_vm0, %v5700_v52 }
 0xe63   :  { %v5890_v13 = vpop.permute.xlu0 %5889 }
 0xe64   :  { %5892 = vst.msk [vmem:[#allocation4 + $0x1] sm:$0x1] %vm5689_vm15, %v5890_v13  ;;  %v5707_v31 = vpop.permute.xlu1 %5706  ;;  %v6550_v13 = vld [vmem:[%s11297_s14 + $0x10] sm:$0xff] }
 0xe65   :  { %5710 = vst.msk [vmem:[#allocation4] sm:$0x1] %vm5709_vm9, %v5707_v31  ;;  %v6551_v31 = vld [vmem:[%s11297_s14 + $0x18] sm:$0xff] }
 0xe67   :  { %v5895_v19 = vpop.permute.xlu0 %5894 }
 0xe68   :  { %5897 = vst.msk [vmem:[#allocation4 + $0x1] sm:$0x1] %vm11404_vm5, %v5895_v19  ;;  %v5714_v21 = vpop.permute.xlu1 %5713  ;;  %vm5768_vm5 = vcmask 295120   ;;  %v6568_v19 = vld [vmem:[%s11297_s14 + $0xa0] sm:$0xff] }
 0xe69   :  { %5717 = vst.msk [vmem:[#allocation4] sm:$0x1] %vm5716_vm10, %v5714_v21  ;;  %v8124_v21 = vpack.c.bf16 %v6551_v31, %v6550_v13 }
 0xe6a   :  { %5723 = vst.msk [vmem:[#allocation4] sm:$0x1] %vm5722_vm11, %v10871_v39 }
 0xe6b   :  { %v5949_v26 = vpop.permute.xlu0 %5948  ;;  %5730 = vst.msk [vmem:[#allocation4] sm:$0x1] %vm5729_vm3, %v10886_v15 }
 0xe6c   :  { %5737 = vst.msk [vmem:[#allocation4] sm:$0x1] %vm5736_vm1, %v10923_v61  ;;  %v5918_v12 = vpop.permute.xlu1 %5917 }
 0xe6d   :  { %5749 = vst.msk [vmem:[#allocation4] sm:$0x11] %vm10974_vm4, %v5744_v18  ;;  %v6553_v18 = vld [vmem:[%s11297_s14 + $0x28] sm:$0xff] }
 0xe6e   :  { %5755 = vst.msk [vmem:[#allocation4 + $0x4] sm:$0x1] %vm5754_vm13, %v10948_v36 }
 0xe6f   :  { %v5955_v1 = vpop.permute.xlu0 %5954  ;;  %5762 = vst.msk [vmem:[#allocation4 + $0x4] sm:$0x1] %vm5761_vm2, %v5759_v9  ;;  %v6549_v9 = vld [vmem:[%s11297_s14 + $0x8] sm:$0xff] }
 0xe70   :  { %v6105_v39 = vpop.permute.xlu1 %6104  ;;  %5769 = vst.msk [vmem:[#allocation4 + $0x4] sm:$0x1] %vm5768_vm5, %v5766_v41  ;;  %v6567_v41 = vld [vmem:[%s11297_s14 + $0x98] sm:$0xff]  ;;  %v8120_v37 = vpack.c.bf16 %v6549_v9, %v6548_v16 }
 0xe71   :  { %v8122_v52 = vpack.c.bf16 %v6567_v41, %v6566_v40 }
 0xe73   :  { %v5901_v60 = vpop.permute.xlu0 %5900 }
 0xe74   :  { %5903 = vst.msk [vmem:[#allocation4 + $0x1] sm:$0x1] %vm5702_vm0, %v5901_v60  ;;  %v6111_v5 = vpop.permute.xlu1 %6110 }
 0xe77   :  { %v5907_v49 = vpop.permute.xlu0 %5906 }
 0xe78   :  { %5909 = vst.msk [vmem:[#allocation4 + $0x1] sm:$0x1] %vm5709_vm9, %v5907_v49  ;;  %v6117_v59 = vpop.permute.xlu1 %6116  ;;  %v6555_v49 = vld [vmem:[%s11297_s14 + $0x38] sm:$0xff] }
 0xe7b   :  { %v5913_v15 = vpop.permute.xlu0 %5912 }
 0xe7c   :  { %5915 = vst.msk [vmem:[#allocation4 + $0x1] sm:$0x1] %vm5716_vm10, %v5913_v15  ;;  %v6130_v6 = vpop.permute.xlu1 %6129 }
 0xe7d   :  { %5920 = vst.msk [vmem:[#allocation4 + $0x1] sm:$0x1] %vm5722_vm11, %v5918_v12  ;;  %v6570_v12 = vld [vmem:[%s11297_s14 + $0xb0] sm:$0xff] }
 0xe7e   :  { %5926 = vst.msk [vmem:[#allocation4 + $0x1] sm:$0x1] %vm5729_vm3, %v10956_v35 }
 0xe7f   :  { %5932 = vst.msk [vmem:[#allocation4 + $0x1] sm:$0x1] %vm5736_vm1, %v10960_v58  ;;  %v6123_v4 = vpop.permute.xlu0 %6122  ;;  %v6564_v58 = vld [vmem:[%s11297_s14 + $0x80] sm:$0xff] }
 0xe80   :  { %5940 = vst.msk [vmem:[#allocation4 + $0x1] sm:$0x11] %vm10974_vm4, %v5938_v45  ;;  %v6065_v27 = vpop.permute.xlu1 %6064  ;;  %v6124_v57 = vrot.slane %v6123_v4, 4  ;;  %v6556_v45 = vld [vmem:[%s11297_s14 + $0x40] sm:$0xff] }
 0xe81   :  { %5945 = vst.msk [vmem:[#allocation4 + $0x5] sm:$0x1] %vm5754_vm13, %v5943_v53  ;;  %v8118_v53 = vpack.c.bf16 %v6565_v38, %v6564_v58 }
 0xe82   :  { %6067 = vst.msk [vmem:[#allocation4 + $0x2] sm:$0x1] %vm5675_vm8, %v6065_v27  ;;  %v6125_v23 = vsel %vm5743_vm12, %v6124_v57, %v6123_v4  ;;  %v6557_v4 = vld [vmem:[%s11297_s14 + $0x48] sm:$0xff]  ;;  %v6574_v27 = vld [vmem:[%s11297_s14 + $0xd0] sm:$0xff] }
 0xe83   :  { %5951 = vst.msk [vmem:[#allocation4 + $0x5] sm:$0x1] %vm5761_vm2, %v5949_v26  ;;  %v6310_v7 = vpop.permute.xlu0 %6309  ;;  %8119 = vmatprep.subr.bf16.mxu1 %v8118_v53  ;;  %v8126_v26 = vpack.c.bf16 %v6569_v50, %v6568_v19  ;;  %v6562_v57 = vld [vmem:[%s11297_s14 + $0x70] sm:$0xff] }
 0xe84   :  { %5957 = vst.msk [vmem:[#allocation4 + $0x5] sm:$0x1] %vm5768_vm5, %v5955_v1  ;;  %v6071_v20 = vpop.permute.xlu1 %6070  ;;  %v6311_v56 = vrot.slane %v6310_v7, 4  ;;  %8121 = vmatpush3.bf16.msra.mxu1 %v8120_v37  ;;  %v6571_v1 = vld [vmem:[%s11297_s14 + $0xb8] sm:$0xff] }
 0xe85   :  { %6073 = vst.msk [vmem:[#allocation4 + $0x2] sm:$0x1] %vm5682_vm14, %v6071_v20  ;;  %8123 = vmatprep.subr.bf16.mxu1 %v8122_v52  ;;  %v8130_v60 = vpack.c.bf16 %v6571_v1, %v6570_v12  ;;  %v8136_v20 = vpack.c.bf16 %v6557_v4, %v6556_v45 }
 0xe86   :  { %v6312_v42 = vsel %vm5743_vm12, %v6311_v56, %v6310_v7  ;;  %v6575_v7 = vld [vmem:[%s11297_s14 + $0xd8] sm:$0xff]  ;;  %vm6772_vm12 = vcmask 687104  }
 0xe87   :  { %v6298_v34 = vpop.permute.xlu0 %6297 }
 0xe88   :  { %v6077_v28 = vpop.permute.xlu1 %6076  ;;  %8125 = vmatpush3.bf16.msra.mxu1 %v8124_v21 }
 0xe89   :  { %6079 = vst.msk [vmem:[#allocation4 + $0x2] sm:$0x1] %vm5689_vm15, %v6077_v28  ;;  %8127 = vmatprep.subr.bf16.mxu1 %v8126_v26  ;;  %v6558_v28 = vld [vmem:[%s11297_s14 + $0x50] sm:$0xff] }
 0xe8b   :  { %v6304_v47 = vpop.permute.xlu0 %6303 }
 0xe8c   :  { %v6082_v0 = vpop.permute.xlu1 %6081 }
 0xe8d   :  { %6084 = vst.msk [vmem:[#allocation4 + $0x2] sm:$0x1] %vm11793_vm7, %v6082_v0  ;;  %v6576_v0 = vld [vmem:[%s11297_s14 + $0xe0] sm:$0xff] }
 0xe8f   :  { %v6317_v44 = vpop.permute.xlu0 %6316 }
 0xe90   :  { %v6136_v62 = vpop.permute.xlu1 %6135 }
 0xe93   :  { %v6252_v55 = vpop.permute.xlu0 %6251 }
 0xe94   :  { %6254 = vst.msk [vmem:[#allocation4 + $0x3] sm:$0x1] %vm5675_vm8, %v6252_v55  ;;  %v6142_v24 = vpop.permute.xlu1 %6141  ;;  %vm5775_vm8 = vcmask 385320  }
 0xe97   :  { %v6258_v22 = vpop.permute.xlu0 %6257 }
 0xe98   :  { %6260 = vst.msk [vmem:[#allocation4 + $0x3] sm:$0x1] %vm5682_vm14, %v6258_v22  ;;  %v6088_v17 = vpop.permute.xlu1 %6087  ;;  %vm6397_vm14 = vcmask 392192   ;;  %v6561_v22 = vld [vmem:[%s11297_s14 + $0x68] sm:$0xff] }
 0xe99   :  { %6090 = vst.msk [vmem:[#allocation4 + $0x2] sm:$0x1] %vm5702_vm0, %v6088_v17  ;;  %v6578_v17 = vld [vmem:[%s11297_s14 + $0xf0] sm:$0xff] }
 0xe9b   :  { %v6264_v61 = vpop.permute.xlu0 %6263 }
 0xe9c   :  { %6266 = vst.msk [vmem:[#allocation4 + $0x3] sm:$0x1] %vm5689_vm15, %v6264_v61  ;;  %v6094_v10 = vpop.permute.xlu1 %6093  ;;  %vm11796_vm15 = vmmov 0   ;;  %v6579_v61 = vld [vmem:[%s11297_s14 + $0xf8] sm:$0xff] }
 0xe9d   :  { %6096 = vst.msk [vmem:[#allocation4 + $0x2] sm:$0x1] %vm5709_vm9, %v6094_v10 }
 0xe9f   :  { %v6269_v54 = vpop.permute.xlu0 %6268 }
 0xea0   :  { %6271 = vst.msk [vmem:[#allocation4 + $0x3] sm:$0x1] %vm11794_vm6, %v6269_v54  ;;  %v6100_v43 = vpop.permute.xlu1 %6099  ;;  %v8146_v54 = vpack.c.bf16 %v6579_v61, %v6578_v17 }
 0xea1   :  { %6102 = vst.msk [vmem:[#allocation4 + $0x2] sm:$0x1] %vm5716_vm10, %v6100_v43  ;;  %v6563_v43 = vld [vmem:[%s11297_s14 + $0x78] sm:$0xff] }
 0xea2   :  { %6107 = vst.msk [vmem:[#allocation4 + $0x2] sm:$0x1] %vm5722_vm11, %v6105_v39  ;;  %v8128_v39 = vpack.c.bf16 %v6553_v18, %v6552_v3 }
 0xea3   :  { %v6323_v63 = vpop.permute.xlu0 %6322  ;;  %6113 = vst.msk [vmem:[#allocation4 + $0x2] sm:$0x1] %vm5729_vm3, %v6111_v5  ;;  %v6554_v5 = vld [vmem:[%s11297_s14 + $0x30] sm:$0xff] }
 0xea4   :  { %6119 = vst.msk [vmem:[#allocation4 + $0x2] sm:$0x1] %vm5736_vm1, %v6117_v59  ;;  %v6292_v30 = vpop.permute.xlu1 %6291  ;;  %v6572_v59 = vld [vmem:[%s11297_s14 + $0xc0] sm:$0xff]  ;;  %8129 = vmatpush3.bf16.msra.mxu1 %v8128_v39  ;;  %v8132_v15 = vpack.c.bf16 %v6555_v49, %v6554_v5 }
 0xea5   :  { %6127 = vst.msk [vmem:[#allocation4 + $0x2] sm:$0x11] %vm10974_vm4, %v6125_v23  ;;  %8131 = vmatprep.subr.bf16.mxu1 %v8130_v60  ;;  %v11797_v23 = vld [vmem:[#allocation10_spill] sm:$0xff] }
 0xea6   :  { %6132 = vst.msk [vmem:[#allocation4 + $0x6] sm:$0x1] %vm5754_vm13, %v6130_v6  ;;  %v8134_v6 = vpack.c.bf16 %v6573_v11, %v6572_v59 }
 0xea7   :  { %v6329_v14 = vpop.permute.xlu0 %6328  ;;  %6138 = vst.msk [vmem:[#allocation4 + $0x6] sm:$0x1] %vm5761_vm2, %v6136_v62 }
 0xea8   :  { %v5773_v32 = vpop.permute.xlu1 %5772  ;;  %6144 = vst.msk [vmem:[#allocation4 + $0x6] sm:$0x1] %vm5768_vm5, %v6142_v24  ;;  %8133 = vmatpush3.bf16.msra.mxu1 %v8132_v15  ;;  %v6560_v24 = vld [vmem:[%s11297_s14 + $0x60] sm:$0xff] }
 0xea9   :  { %5776 = vst.msk [vmem:[#allocation4 + $0x4] sm:$0x1] %vm5775_vm8, %v5773_v32  ;;  %8135 = vmatprep.subr.bf16.mxu1 %v8134_v6  ;;  %v8144_v10 = vpack.c.bf16 %v6561_v22, %v6560_v24  ;;  %v11148_v32 = vsub.s32 1, %v11797_v23 }
 0xeab   :  { %v6275_v8 = vpop.permute.xlu0 %6274 }
 0xeac   :  { %6277 = vst.msk [vmem:[#allocation4 + $0x3] sm:$0x1] %vm5702_vm0, %v6275_v8  ;;  %v6148_v51 = vpop.permute.xlu1 %6147  ;;  %8137 = vmatpush3.bf16.msra.mxu1 %v8136_v20 }
 0xead   :  { %6150 = vst.msk [vmem:[#allocation4 + $0x6] sm:$0x1] %vm5775_vm8, %v6148_v51 }
 0xeaf   :  { %v6281_v2 = vpop.permute.xlu0 %6280 }
 0xeb0   :  { %6283 = vst.msk [vmem:[#allocation4 + $0x3] sm:$0x1] %vm5709_vm9, %v6281_v2 }
 0xeb3   :  { %v6287_v36 = vpop.permute.xlu0 %6286 }
 0xeb4   :  { %6289 = vst.msk [vmem:[#allocation4 + $0x3] sm:$0x1] %vm5716_vm10, %v6287_v36 }
 0xeb5   :  { %6294 = vst.msk [vmem:[#allocation4 + $0x3] sm:$0x1] %vm5722_vm11, %v6292_v30  ;;  %v11142_v30 = vsub.s32 0, %v11797_v23  ;;  %vm6680_vm11 = vcmask 982016  }
 0xeb6   :  { %6300 = vst.msk [vmem:[#allocation4 + $0x3] sm:$0x1] %vm5729_vm3, %v6298_v34  ;;  %v8138_v34 = vpack.c.bf16 %v6575_v7, %v6574_v27 }
 0xeb7   :  { %6306 = vst.msk [vmem:[#allocation4 + $0x3] sm:$0x1] %vm5736_vm1, %v6304_v47  ;;  %v5961_v46 = vpop.permute.xlu0 %5960  ;;  %v6559_v47 = vld [vmem:[%s11297_s14 + $0x58] sm:$0xff]  ;;  %vm6849_vm1 = vcmask 35840  }
 0xeb8   :  { %6314 = vst.msk [vmem:[#allocation4 + $0x3] sm:$0x11] %vm10974_vm4, %v6312_v42  ;;  %v8140_v62 = vpack.c.bf16 %v6559_v47, %v6558_v28  ;;  %8139 = vmatprep.subr.bf16.mxu1 %v8138_v34 }
 0xeb9   :  { %5963 = vst.msk [vmem:[#allocation4 + $0x5] sm:$0x1] %vm5775_vm8, %v5961_v46 }
 0xeba   :  { %6319 = vst.msk [vmem:[#allocation4 + $0x7] sm:$0x1] %vm5754_vm13, %v6317_v44  ;;  %v6577_v44 = vld [vmem:[%s11297_s14 + $0xe8] sm:$0xff]  ;;  %8141 = vmatpush3.bf16.msra.mxu1 %v8140_v62  ;;  %v6532_v62 = vld [vmem:[%s11296_s13] sm:$0x3] }
 0xebb   :  { %6325 = vst.msk [vmem:[#allocation4 + $0x7] sm:$0x1] %vm5761_vm2, %v6323_v63  ;;  %v6335_v48 = vpop.permute.xlu0 %6334  ;;  %v8142_v55 = vpack.c.bf16 %v6577_v44, %v6576_v0  ;;  %v8148_v63 = vpack.c.bf16 %v6563_v43, %v6562_v57  ;;  %v6518_v44 = vld [vmem:[%s11295_s12] sm:$0x3]  ;;  %v6537_v57 = vrot.slane %v6532_v62, %v11142_v30 }
 0xebc   :  { %6331 = vst.msk [vmem:[#allocation4 + $0x7] sm:$0x1] %vm5768_vm5, %v6329_v14  ;;  %v6383_v14 = vld [vmem:[%s11294_s11] sm:$0x3]  ;;  %vm11798_vm5 = vcmask 1043456   ;;  %v6523_v24 = vrot.slane %v6518_v44, %v11142_v30  ;;  %v6527_v61 = vrot.slane %v6518_v44, %v11148_v32 }
 0xebd   :  { %6337 = vst.msk [vmem:[#allocation4 + $0x7] sm:$0x1] %vm5775_vm8, %v6335_v48  ;;  %8143 = vmatprep.subr.bf16.mxu1 %v8142_v55  ;;  %v6388_v8 = vrot.slane %v6383_v14, %v11142_v30  ;;  %v6392_v51 = vrot.slane %v6383_v14, %v11148_v32  ;;  %vm11799_vm0 = vmmov %vm11798_vm5  ;;  %v6660_v30 = vld [vmem:[%s11299_s16 + $0x10] sm:$0xff] }
 0xebe   :  { %8145 = vmatpush3.bf16.msra.mxu1 %v8144_v10  ;;  %vm11800_vm9 = vmmov %vm11799_vm0 }
 0xebf   :  { %8147 = vmatprep.subr.bf16.mxu1 %v8146_v54  ;;  %vm11801_vm10 = vmmov %vm11799_vm0 }
 0xec0   :  { %vm11802_vm3 = vmmov %vm11799_vm0 }
 0xec2   :  { %8149 = vmatpush3.bf16.msra.mxu1 %v8148_v63  ;;  %v6541_v63 = vrot.slane %v6532_v62, %v11148_v32  ;;  %v6661_v32 = vld [vmem:[%s11299_s16 + $0x18] sm:$0xff] }
 0xec3   :  { %8150 = vmatprep.subr.bf16.mxu1 %v11790_v33 }
 0xec4   :  { %v6338_v29 = vld [vmem:[#allocation4] sm:$0xff] }
 0xec5   :  { %v6396_v35 = vcombine.high %v6338_v29, %v6338_v29 }
 0xec7   :  { %7306 = vmatprep.mubr.msk.f32.mxu0 %vm6397_vm14, %v6396_v35 }
 0xec8   :  { %6465 = vmatmul.mubr.f32.vlgmr.msra.gmra.mrb[16].mxu0 %v6338_v29 }
 0xec9   :  { %7809 = vmatprep.mubr.msk.f32.mxu0 %vm11796_vm15, %v11795_v25 }
 0xf9b   :  { %v6466_v2 = vpop.f32.mrb[16].mxu0 }
 0xf9c   :  { %v6467_v56 = vadd.f32 %v6466_v2, %v6388_v8  ;;  %v6468_v36 = vpop.f32.mrb[17].mxu0  ;;  %v6659_v2 = vld [vmem:[%s11299_s16 + $0x8] sm:$0xff] }
 0xf9d   :  { %v6469_v42 = vadd.f32 %v6468_v36, %v6392_v51  ;;  %v6658_v51 = vld [vmem:[%s11299_s16] sm:$0xff] }
 0xf9e   :  { %v6471_v46 = vsel %vm11798_vm5, %v6467_v56, 0.0  ;;  %v6488_v48 = vmul.f32 %v6467_v56, %v6467_v56 }
 0xf9f   :  { %v6472_v29 = vrot.slane %v6471_v46, 4  ;;  %v6478_v35 = vsel %vm11799_vm0, %v6469_v42, 0.0  ;;  %v6489_v58 = vmul.f32 %v6469_v42, %v6469_v42 }
 0xfa0   :  { %v6490_v38 = vsel %vm11800_vm9, %v6488_v48, 0.0  ;;  %v6479_v16 = vrot.slane %v6478_v35, 4  ;;  %v8154_v48 = vpack.c.bf16 %v6661_v32, %v6660_v30 }
 0xfa1   :  { %v6473_v53 = vadd.f32 %v6472_v29, %v6471_v46  ;;  %v6491_v9 = vrot.slane %v6490_v38, 4  ;;  %v6497_v40 = vsel %vm11801_vm10, %v6489_v58, 0.0  ;;  %v6662_v29 = vld [vmem:[%s11299_s16 + $0x20] sm:$0xff] }
 0xfa2   :  { %v6480_v41 = vadd.f32 %v6479_v16, %v6478_v35  ;;  %v6498_v37 = vrot.slane %v6497_v40, 4  ;;  %v6663_v35 = vld [vmem:[%s11299_s16 + $0x28] sm:$0xff]  ;;  %v6665_v16 = vld [vmem:[%s11299_s16 + $0x38] sm:$0xff] }
 0xfa3   :  { %v6474_v52 = vrot.slane %v6473_v53, 2  ;;  %v6492_v13 = vadd.f32 %v6491_v9, %v6490_v38  ;;  %v8157_v58 = vpack.c.bf16 %v6663_v35, %v6662_v29  ;;  %v6664_v38 = vld [vmem:[%s11299_s16 + $0x30] sm:$0xff]  ;;  %v6666_v9 = vld [vmem:[%s11299_s16 + $0x40] sm:$0xff] }
 0xfa4   :  { %v6481_v31 = vrot.slane %v6480_v41, 2  ;;  %v6499_v19 = vadd.f32 %v6498_v37, %v6497_v40  ;;  %v6667_v40 = vld [vmem:[%s11299_s16 + $0x48] sm:$0xff]  ;;  %v6668_v37 = vld [vmem:[%s11299_s16 + $0x50] sm:$0xff] }
 0xfa5   :  { %v6475_v50 = vadd.f32 %v6474_v52, %v6473_v53  ;;  %v6493_v21 = vrot.slane %v6492_v13, 2  ;;  %v8160_v53 = vpack.c.bf16 %v6665_v16, %v6664_v38  ;;  %v6669_v52 = vld [vmem:[%s11299_s16 + $0x58] sm:$0xff] }
 0xfa6   :  { %v6482_v26 = vadd.f32 %v6481_v31, %v6480_v41  ;;  %v6500_v3 = vrot.slane %v6499_v19, 2  ;;  %v8163_v41 = vpack.c.bf16 %v6667_v40, %v6666_v9  ;;  %v6670_v31 = vld [vmem:[%s11299_s16 + $0x60] sm:$0xff] }
 0xfa7   :  { %v6476_v18 = vrot.slane %v6475_v50, 1  ;;  %v6494_v12 = vadd.f32 %v6493_v21, %v6492_v13  ;;  %v8166_v13 = vpack.c.bf16 %v6669_v52, %v6668_v37  ;;  %v6754_v21 = vld [vmem:[%s11301_s18] sm:$0xff] }
 0xfa8   :  { %v6483_v1 = vrot.slane %v6482_v26, 1  ;;  %v6501_v39 = vadd.f32 %v6500_v3, %v6499_v19  ;;  %v6671_v19 = vld [vmem:[%s11299_s16 + $0x68] sm:$0xff]  ;;  %v6756_v3 = vld [vmem:[%s11301_s18 + $0x10] sm:$0xff] }
 0xfa9   :  { %v6477_v60 = vadd.f32 %v6476_v18, %v6475_v50  ;;  %v6495_v5 = vrot.slane %v6494_v12, 1  ;;  %v8169_v50 = vpack.c.bf16 %v6671_v19, %v6670_v31 }
 0xfaa   :  { %v6484_v49 = vadd.f32 %v6483_v1, %v6482_v26  ;;  %v6502_v59 = vrot.slane %v6501_v39, 1  ;;  %v6755_v26 = vld [vmem:[%s11301_s18 + $0x8] sm:$0xff]  ;;  %v6672_v1 = vld [vmem:[%s11299_s16 + $0x70] sm:$0xff] }
 0xfab   :  { %v6486_v11 = vmul.f32 0.25, %v6477_v60  ;;  %v6496_v15 = vadd.f32 %v6495_v5, %v6494_v12  ;;  %v8172_v18 = vpack.c.bf16 %v6755_v26, %v6754_v21  ;;  %v6757_v12 = vld [vmem:[%s11301_s18 + $0x18] sm:$0xff]  ;;  %v6758_v60 = vld [vmem:[%s11301_s18 + $0x20] sm:$0xff]  ;;  %v6759_v5 = vld [vmem:[%s11301_s18 + $0x28] sm:$0xff] }
 0xfac   :  { %v6487_v6 = vmul.f32 0.25, %v6484_v49  ;;  %v6503_v45 = vadd.f32 %v6502_v59, %v6501_v39  ;;  %v8175_v39 = vpack.c.bf16 %v6757_v12, %v6756_v3  ;;  %v8178_v49 = vpack.c.bf16 %v6759_v5, %v6758_v60  ;;  %v6760_v59 = vld [vmem:[%s11301_s18 + $0x30] sm:$0xff] }
 0xfad   :  { %v6504_v4 = vmul.f32 0.25, %v6496_v15  ;;  %v6506_v27 = vmul.f32 %v6486_v11, %v6486_v11  ;;  %v6510_v55 = vsub.f32 %v6467_v56, %v6486_v11  ;;  %8173 = vmatpush3.bf16.msra.mxu0 %v8172_v18  ;;  %v6761_v11 = vld [vmem:[%s11301_s18 + $0x38] sm:$0xff] }
 0xfae   :  { %v6505_v7 = vmul.f32 0.25, %v6503_v45  ;;  %v6507_v20 = vmul.f32 %v6487_v6, %v6487_v6  ;;  %v6511_v17 = vsub.f32 %v6469_v42, %v6487_v6  ;;  %v8151_v42 = vpack.c.bf16 %v6659_v2, %v6658_v51  ;;  %8174 = vmatprep.subr.bf16.mxu0 %v11790_v33  ;;  %v6762_v6 = vld [vmem:[%s11301_s18 + $0x40] sm:$0xff]  ;;  %v6763_v45 = vld [vmem:[%s11301_s18 + $0x48] sm:$0xff] }
 0xfaf   :  { %v6508_v34 = vsub.f32 %v6504_v4, %v6506_v27  ;;  %v8181_v15 = vpack.c.bf16 %v6761_v11, %v6760_v59  ;;  %v8184_v4 = vpack.c.bf16 %v6763_v45, %v6762_v6 }
 0xfb0   :  { %v6509_v28 = vsub.f32 %v6505_v7, %v6507_v20  ;;  %v7307_v7 = vld [vmem:[%s11298_s15] ss:$0 sm:$0xff] }
 0xfb1   :  { %v6512_v47 = vadd.f32 1e-05, %v6508_v34  ;;  %8176 = vmatpush3.bf16.msra.mxu0 %v8175_v39 }
 0xfb2   :  { %v6513_v0 = vadd.f32 1e-05, %v6509_v28  ;;  %8177 = vmatprep.subr.bf16.mxu0 %v11790_v33 }
 0xfb3   :  { %8333 = vrsqrt.f32 %v6512_v47 }
 0xfb4   :  { %8335 = vrsqrt.f32 %v6513_v0  ;;  %v6764_v0 = vld [vmem:[%s11301_s18 + $0x50] sm:$0xf] }
 0xfb5   :  { %8179 = vmatpush3.bf16.msra.mxu0 %v8178_v49 }
 0xfb6   :  { %8180 = vmatprep.subr.bf16.mxu0 %v11790_v33 }
 0xfb9   :  { %8182 = vmatpush3.bf16.msra.mxu0 %v8181_v15 }
 0xfba   :  { %8183 = vmatprep.subr.bf16.mxu0 %v11790_v33 }
 0xfbd   :  { %v8334_v22 = vpop.eup %8333  ;;  %8185 = vmatpush3.bf16.msra.mxu0 %v8184_v4 }
 0xfbe   :  { %v8336_v10 = vpop.eup %8335  ;;  %v6516_v54 = vmul.f32 %v8334_v22, %v6510_v55  ;;  %7807 = vmatprep.subr.mxu0 %v11795_v25  ;;  %v7310_v55 = vld [vmem:[%s11302_s19] ss:$0 sm:$0xff] }
 0xfbf   :  { %v6517_v43 = vmul.f32 %v8336_v10, %v6511_v17 }
 0xfc0   :  { %v6530_v23 = vmul.f32 %v6523_v24, %v6516_v54 }
 0xfc1   :  { %v6531_v14 = vmul.f32 %v6527_v61, %v6517_v43  ;;  %7808 = vmatpush3.msk.msra.mxu0 %vm11802_vm3, %v6764_v0 }
 0xfc2   :  { %v6544_v8 = vadd.f32 %v6537_v57, %v6530_v23 }
 0xfc3   :  { %v6545_v56 = vadd.f32 %v6541_v63, %v6531_v14 }
 0xfc4   :  { %v6546_v46 = vmax.f32 %v6544_v8, 0.0 }
 0xfc5   :  { %v6547_v36 = vmax.f32 %v6545_v56, 0.0 }
 0xfc7   :  { %6651 = vmatprep.mubr.f32.mxu1 %v6547_v36 }
 0xfc8   :  { %6652 = vmatmul.mubr.f32.vlgmr.msra.gmra.mrb[16].mxu1 %v6546_v46 }
 0xfc9   :  { %8152 = vmatpush3.bf16.msra.mxu1 %v8151_v42  ;;  %7784 = vmatprep.mubr.msk.f32.mxu1 %vm11796_vm15, %v11795_v25 }
 0xfca   :  { %8153 = vmatprep.subr.bf16.mxu1 %v11790_v33 }
 0xfcd   :  { %8155 = vmatpush3.bf16.msra.mxu1 %v8154_v48 }
 0xfce   :  { %8156 = vmatprep.subr.bf16.mxu1 %v11790_v33 }
 0xfd1   :  { %8158 = vmatpush3.bf16.msra.mxu1 %v8157_v58 }
 0xfd2   :  { %8159 = vmatprep.subr.bf16.mxu1 %v11790_v33 }
 0xfd5   :  { %8161 = vmatpush3.bf16.msra.mxu1 %v8160_v53 }
 0xfd6   :  { %8162 = vmatprep.subr.bf16.mxu1 %v11790_v33 }
 0xfd9   :  { %8164 = vmatpush3.bf16.msra.mxu1 %v8163_v41 }
 0xfda   :  { %8165 = vmatprep.subr.bf16.mxu1 %v11790_v33 }
 0xfdd   :  { %8167 = vmatpush3.bf16.msra.mxu1 %v8166_v13 }
 0xfde   :  { %8168 = vmatprep.subr.bf16.mxu1 %v11790_v33  ;;  %v7308_v33 = vld [vmem:[%s11300_s17] ss:$0 sm:$0xff]  ;;  %s8415_s17 = smov [#allocation5]  }
 0xfdf   :  { %s6868_s18 = sshll.u32 %s8415_s17, 4  ;;  %s6869_s18 = int_to_ptr.vmem [resolvable:$true] %s6868_s18 }
 0xfe0   :  { %s8342_s19 = scalar_lea.vmem %s6869_s18, 64  ;;  %p8347_p1 = scmp.lt.s32.totalorder %s6869_s18, %s6869_s18 }
 0xfe1   :  { %8170 = vmatpush3.bf16.msra.mxu1 %v8169_v50  ;;  %p8343_p0 = scmp.ne.s32.totalorder %s6869_s18, %s8342_s19  ;;  %p8348_p2 = scmp.lt.s32.totalorder %s8342_s19, %s8342_s19 }
 0xfe2   :  { %7782 = vmatprep.subr.mxu1 %v11795_v25 }
 0xfe3   :  { %p8349_p3 = por %p8348_p2, %p8347_p1 }
 0xfe5   :  { %7783 = vmatpush3.msra.mxu1 %v6672_v1  ;;  %p8350_p4 = pnand %p8349_p3, %p8343_p0 }
0x109b   :  { %v7485_v27 = vpop.f32.mrb[16].mxu1 }
0x109c   :  { %v7486_v20 = vpop.f32.mrb[17].mxu1 }
0x109d   :  { %v7487_v34 = vadd.f32 %v7486_v20, %v7485_v27 }
0x109f   :  { %v6654_v28 = vadd.f32 %v7487_v34, %v7307_v7 }
0x10a1   :  { %v6657_v47 = vmax.f32 %v6654_v28, 0.0 }
0x10a3   :  { %7785 = vmatmul.mubr.msk.f32.vlgmr.msra.gmra.mrb[18].mxu1 %vm6680_vm11, %v6657_v47 }
0x1176   :  { %v6750_v25 = vpop.f32.mrb[18].mxu1 }
0x1177   :  { %v6751_v44 = vadd.f32 %v7308_v33, %v6750_v25  ;;  %v7786_v62 = vpop.f32.mrb[19].mxu1 }
0x1179   :  { %7810 = vmatmul.mubr.msk.f32.vlgmr.msra.gmra.mrb[18].mxu0 %vm6772_vm12, %v6751_v44 }
0x124c   :  { %v6845_v24 = vpop.f32.mrb[18].mxu0 }
0x124d   :  { %v6846_v22 = vadd.f32 %v7310_v55, %v6845_v24  ;;  %v7811_v17 = vpop.f32.mrb[19].mxu0 }
0x124f   :  { %v6850_v61 = vsel %vm6849_vm1, %v6846_v22, -inf }
0x1250   :  { %6851 = vmax.xlane.f32.xlu1 %v6850_v61 }
0x12dd   :  { %v6852_v10 = vpop.xlane.xlu1 %6851 }
0x12de   :  { %v6853_v54 = vsub.f32 %v6846_v22, %v6852_v10 }
0x12e0   :  { %v6854_v57 = vmul.f32 1.442695, %v6853_v54 }
0x12e2   :  { %8337 = vpow2.f32 %v6854_v57 }
0x12ec   :  { %v8338_v43 = vpop.eup %8337 }
0x12ed   :  { %v6856_v63 = vsel %vm6849_vm1, %v8338_v43, 0.0 }
0x12ee   :  { %6857 = vadd.xlane.f32.xlu0 %v6856_v63 }
0x137b   :  { %v6858_v23 = vpop.xlane.xlu0 %6857 }
0x137c   :  { %8339 = vrcp.f32 %v6858_v23 }
0x1386   :  { %v8340_v14 = vpop.eup %8339 }
0x1387   :  { %v6860_v8 = vmul.f32 %v8340_v14, %v8338_v43 }
0x1389   :  { %6861 = vst.msk [vmem:[#allocation5] sm:$0xf] %vm6849_vm1, %v6860_v8 }
0x138a   :  { %8353 = shalt.err (!%p8350_p4)
}
0x138b   :  { %s8354_s22 = scalar_lea.hbm %s11303_s20, 64 }
0x138c   :  { %p8355_p5 = scmp.ne.s32.totalorder %s11303_s20, %s8354_s22  ;;  %p8358_p6 = scmp.lt.u32.totalorder %s8354_s22, %s11303_s20 }
0x138e   :  { %p8360_p7 = pnand %p8358_p6, %p8355_p5 }
0x1390   :  { %8363 = shalt.err (!%p8360_p7)
}
0x1391   :  { %6871 = dma.vmem_to_hbm [thread:$0]  %s6869_s18, 64, %s11303_s20, [#allocation6]  }
0x1392   :  { %8364 = dma.done.wait [#allocation6], 64  }
0x1393   :  { %8365 = vsyncadd [#allocation6], 4294967232 }
0x1394   :  { %6875 = vsyncpa [#allocation6], 1 }

</bundles_post_ra>
